<compile_context>
chip_gen: v6e
topology: v6e:2x2x1
jax: 0.10.0
libtpu: 0.0.40
codegen_flags: <defaults>
</compile_context>

<pallas_src>
import functools
import math

import jax
import jax.numpy as jnp
from jax import lax
from jax.experimental import pallas as pl
from jax.experimental.pallas import tpu as pltpu


def _round_up(x, m):
    return (x + m - 1) // m * m


def _row_tile(M, target=512):
    """Pick a row tile (multiple of 8) and the padded row count it divides."""
    Mp8 = _round_up(max(M, 1), 8)
    if Mp8 <= target:
        return Mp8, Mp8
    return target, _round_up(M, target)


# ----------------------------- Pallas kernels -------------------------------

def _matmul_acc_kernel(a_ref, b_ref, o_ref):
    # Output block is resident across the K axis (out index_map -> (i, 0)):
    # accumulate directly into o_ref in f32; operands are bf16 for the MXU.
    @pl.when(pl.program_id(1) == 0)
    def _():
        o_ref[...] = jnp.zeros_like(o_ref)

    o_ref[...] += jnp.dot(a_ref[...], b_ref[...],
                          preferred_element_type=jnp.float32)


def _matmul_single_kernel(a_ref, b_ref, o_ref):
    # Single full-K block: write the result directly (no zero-init / readback).
    o_ref[...] = jnp.dot(a_ref[...], b_ref[...],
                         preferred_element_type=jnp.float32)


def pallas_matmul(a, b, tm_target=512):
    """(M, K) @ (K, N) -> (M, N) f32.  bf16 MXU operands, f32 accumulation.

    Rows are tiled ("parallel"); K is tiled ("arbitrary") only when large.
    """
    M, K = a.shape
    K2, N = b.shape
    assert K == K2
    Np = _round_up(N, 128)
    tm, Mp = _row_tile(M, tm_target)
    if K > 2048:                       # e.g. conv0: K = 7*7*200 = 9800
        tk = 256
        Kp = _round_up(K, tk)
    else:                              # single full-K block needs no alignment
        tk = Kp = K

    a_p = a.astype(jnp.bfloat16)
    if (Mp, Kp) != (M, K):
        a_p = jnp.pad(a_p, ((0, Mp - M), (0, Kp - K)))
    b_p = b.astype(jnp.bfloat16)
    if (Kp, Np) != (K, N):
        b_p = jnp.pad(b_p, ((0, Kp - K), (0, Np - N)))

    nk = Kp // tk
    if nk > 1:
        out = pl.pallas_call(
            _matmul_acc_kernel,
            out_shape=jax.ShapeDtypeStruct((Mp, Np), jnp.float32),
            grid_spec=pltpu.PrefetchScalarGridSpec(
                num_scalar_prefetch=0,
                grid=(Mp // tm, nk),
                in_specs=[pl.BlockSpec((tm, tk), lambda i, k: (i, k)),
                          pl.BlockSpec((tk, Np), lambda i, k: (k, 0))],
                out_specs=pl.BlockSpec((tm, Np), lambda i, k: (i, 0))),
            compiler_params=pltpu.CompilerParams(
                dimension_semantics=("parallel", "arbitrary")),
        )(a_p, b_p)
    else:
        out = pl.pallas_call(
            _matmul_single_kernel,
            out_shape=jax.ShapeDtypeStruct((Mp, Np), jnp.float32),
            grid_spec=pltpu.PrefetchScalarGridSpec(
                num_scalar_prefetch=0,
                grid=(Mp // tm,),
                in_specs=[pl.BlockSpec((tm, Kp), lambda i: (i, 0)),
                          pl.BlockSpec((Kp, Np), lambda i: (0, 0))],
                out_specs=pl.BlockSpec((tm, Np), lambda i: (i, 0))),
            compiler_params=pltpu.CompilerParams(
                dimension_semantics=("parallel",)),
        )(a_p, b_p)
    return out[:M, :N]


def _matmul_bnrelu_kernel(a_ref, s_ref, t_ref, b_ref, o_ref):
    # y = relu(x * scale + shift) @ W : BN-affine + ReLU fused as MXU prologue.
    a = jnp.maximum(a_ref[...] * s_ref[...] + t_ref[...], 0.0)
    o_ref[...] = jnp.dot(a.astype(jnp.bfloat16), b_ref[...],
                         preferred_element_type=jnp.float32)


def pallas_conv1x1_bn_relu(x2d, scale, shift, w, tm_target=512):
    """relu(x*scale + shift) @ w  for a 1x1 conv.  x2d is (M, Cin) float32."""
    M, K = x2d.shape
    Kw, N = w.shape
    assert K == Kw
    Np = _round_up(N, 128)
    tm, Mp = _row_tile(M, tm_target)
    x_p = x2d if Mp == M else jnp.pad(x2d, ((0, Mp - M), (0, 0)))
    w_p = w.astype(jnp.bfloat16)
    if Np != N:
        w_p = jnp.pad(w_p, ((0, 0), (0, Np - N)))
    s2 = scale.reshape(1, K).astype(jnp.float32)
    t2 = shift.reshape(1, K).astype(jnp.float32)
    out = pl.pallas_call(
        _matmul_bnrelu_kernel,
        out_shape=jax.ShapeDtypeStruct((Mp, Np), jnp.float32),
        grid_spec=pltpu.PrefetchScalarGridSpec(
            num_scalar_prefetch=0,
            grid=(Mp // tm,),
            in_specs=[pl.BlockSpec((tm, K), lambda i: (i, 0)),
                      pl.BlockSpec((1, K), lambda i: (0, 0)),
                      pl.BlockSpec((1, K), lambda i: (0, 0)),
                      pl.BlockSpec((K, Np), lambda i: (0, 0))],
            out_specs=pl.BlockSpec((tm, Np), lambda i: (i, 0))),
        compiler_params=pltpu.CompilerParams(
            dimension_semantics=("parallel",)),
    )(x_p, s2, t2, w_p)
    return out[:M, :N]


def _bn_stats_kernel(x_ref, sum_ref, ssq_ref):
    @pl.when(pl.program_id(0) == 0)
    def _():
        sum_ref[...] = jnp.zeros_like(sum_ref)
        ssq_ref[...] = jnp.zeros_like(ssq_ref)

    x = x_ref[...].astype(jnp.float32)
    sum_ref[...] += jnp.sum(x, axis=0, keepdims=True)
    ssq_ref[...] += jnp.sum(x * x, axis=0, keepdims=True)


def bn_batch_scale_shift(x2d, gamma, beta, eps=1e-5, tm_target=1024):
    """Training-mode BatchNorm batch stats -> per-channel (scale, shift) with
    y = x*scale + shift == gamma*(x-mean)*rsqrt(var+eps) + beta."""
    M, C = x2d.shape
    tm, Mp = _row_tile(M, tm_target)
    x_p = x2d if Mp == M else jnp.pad(x2d, ((0, Mp - M), (0, 0)))
    s, ss = pl.pallas_call(
        _bn_stats_kernel,
        out_shape=(jax.ShapeDtypeStruct((1, C), jnp.float32),
                   jax.ShapeDtypeStruct((1, C), jnp.float32)),
        grid_spec=pltpu.PrefetchScalarGridSpec(
            num_scalar_prefetch=0,
            grid=(Mp // tm,),
            in_specs=[pl.BlockSpec((tm, C), lambda i: (i, 0))],
            out_specs=(pl.BlockSpec((1, C), lambda i: (0, 0)),
                       pl.BlockSpec((1, C), lambda i: (0, 0)))),
        compiler_params=pltpu.CompilerParams(
            dimension_semantics=("arbitrary",)),
    )(x_p)
    inv_m = 1.0 / float(M)           # padded rows are zeros -> divide by true M
    mean = s[0] * inv_m
    var = jnp.maximum(ss[0] * inv_m - mean * mean, 0.0)  # clamp: never negative
    scale = gamma.astype(jnp.float32) * lax.rsqrt(var + eps)
    shift = beta.astype(jnp.float32) - mean * scale
    return scale, shift


def _affine_relu_kernel(x_ref, s_ref, t_ref, o_ref):
    y = jnp.maximum(x_ref[...].astype(jnp.float32) * s_ref[...] + t_ref[...], 0.0)
    o_ref[...] = y.astype(o_ref.dtype)


def pallas_affine_relu(x2d, scale, shift, out_dtype=jnp.float32, tm_target=1024):
    """Per-channel affine + ReLU (BN apply) on (M, C), row-tiled."""
    M, C = x2d.shape
    tm, Mp = _row_tile(M, tm_target)
    x_p = x2d if Mp == M else jnp.pad(x2d, ((0, Mp - M), (0, 0)))
    out = pl.pallas_call(
        _affine_relu_kernel,
        out_shape=jax.ShapeDtypeStruct((Mp, C), out_dtype),
        grid_spec=pltpu.PrefetchScalarGridSpec(
            num_scalar_prefetch=0,
            grid=(Mp // tm,),
            in_specs=[pl.BlockSpec((tm, C), lambda i: (i, 0)),
                      pl.BlockSpec((1, C), lambda i: (0, 0)),
                      pl.BlockSpec((1, C), lambda i: (0, 0))],
            out_specs=pl.BlockSpec((tm, C), lambda i: (i, 0))),
        compiler_params=pltpu.CompilerParams(
            dimension_semantics=("parallel",)),
    )(x_p, scale.reshape(1, C).astype(jnp.float32),
      shift.reshape(1, C).astype(jnp.float32))
    return out[:M]


def _affine_relu_avgpool_kernel(x_ref, s_ref, t_ref, o_ref):
    # x_ref: (Kwin, tm, C) raw windows; apply BN-affine + ReLU, then mean over
    # the window axis -> (tm, C).  BN+ReLU are per-element so fusing them here
    # avoids materializing the activated tensor at full resolution.
    x = x_ref[...].astype(jnp.float32)
    y = jnp.maximum(x * s_ref[...] + t_ref[...], 0.0)
    o_ref[...] = jnp.mean(y, axis=0).astype(o_ref.dtype)


def pallas_affine_relu_avgpool(stacked, scale, shift, out_dtype=jnp.bfloat16,
                               tm_target=1024):
    """mean_over_window(relu(x*scale+shift)) on stacked windows (Kwin, M, C)."""
    Kw, M, C = stacked.shape
    tm, Mp = _row_tile(M, tm_target)
    x_p = stacked if Mp == M else jnp.pad(stacked, ((0, 0), (0, Mp - M), (0, 0)))
    out = pl.pallas_call(
        _affine_relu_avgpool_kernel,
        out_shape=jax.ShapeDtypeStruct((Mp, C), out_dtype),
        grid_spec=pltpu.PrefetchScalarGridSpec(
            num_scalar_prefetch=0,
            grid=(Mp // tm,),
            in_specs=[pl.BlockSpec((Kw, tm, C), lambda i: (0, i, 0)),
                      pl.BlockSpec((1, C), lambda i: (0, 0)),
                      pl.BlockSpec((1, C), lambda i: (0, 0))],
            out_specs=pl.BlockSpec((tm, C), lambda i: (i, 0))),
        compiler_params=pltpu.CompilerParams(
            dimension_semantics=("parallel",)),
    )(x_p, scale.reshape(1, C).astype(jnp.float32),
      shift.reshape(1, C).astype(jnp.float32))
    return out[:M]


def _pool_reduce_kernel(x_ref, o_ref, *, op):
    x = x_ref[...].astype(jnp.float32)
    if op == "max":
        o_ref[...] = jnp.max(x, axis=0)
    else:
        o_ref[...] = jnp.mean(x, axis=0)


def pallas_pool_reduce(stacked, op, tm_target=1024):
    """Reduce (Kwin, M, C) -> (M, C) with max/mean over the window axis."""
    Kw, M, C = stacked.shape
    tm, Mp = _row_tile(M, tm_target)
    x_p = stacked if Mp == M else jnp.pad(stacked, ((0, 0), (0, Mp - M), (0, 0)))
    out = pl.pallas_call(
        functools.partial(_pool_reduce_kernel, op=op),
        out_shape=jax.ShapeDtypeStruct((Mp, C), jnp.float32),
        grid_spec=pltpu.PrefetchScalarGridSpec(
            num_scalar_prefetch=0,
            grid=(Mp // tm,),
            in_specs=[pl.BlockSpec((Kw, tm, C), lambda i: (0, i, 0))],
            out_specs=pl.BlockSpec((tm, C), lambda i: (i, 0))),
        compiler_params=pltpu.CompilerParams(
            dimension_semantics=("parallel",)),
    )(x_p)
    return out[:M]


# ------------------------------ NN building blocks --------------------------

def conv2d_nhwc(x, w, stride=1, padding=0):
    """nn.Conv2d(bias=False) on NHWC input; w is (kh, kw, Cin, Cout), f32 out."""
    N, H, W, Cin = x.shape
    kh, kw, _, Cout = w.shape
    if padding:
        x = jnp.pad(x, ((0, 0), (padding, padding), (padding, padding), (0, 0)))
    Hp, Wp = H + 2 * padding, W + 2 * padding
    Ho = (Hp - kh) // stride + 1
    Wo = (Wp - kw) // stride + 1
    if kh == 1 and kw == 1 and stride == 1:
        a = x.reshape(N * Ho * Wo, Cin)
    else:
        # TODO(synk): make im2col virtual via pl.Element index_maps (grid over
        # the kh*kw window offsets) instead of materializing the kh*kw-wide A.
        cols = []
        for dy in range(kh):
            for dx in range(kw):
                cols.append(x[:, dy:dy + stride * (Ho - 1) + 1:stride,
                              dx:dx + stride * (Wo - 1) + 1:stride, :])
        a = jnp.stack(cols, axis=3).reshape(N * Ho * Wo, kh * kw * Cin)
    y = pallas_matmul(a, w.reshape(kh * kw * Cin, Cout))
    return y.reshape(N, Ho, Wo, Cout)


def maxpool_3x3_s2_p1(x):
    N, H, W, C = x.shape
    xp = jnp.pad(x, ((0, 0), (1, 1), (1, 1), (0, 0)), constant_values=-jnp.inf)
    Ho, Wo = (H + 2 - 3) // 2 + 1, (W + 2 - 3) // 2 + 1
    cols = [xp[:, dy:dy + 2 * (Ho - 1) + 1:2, dx:dx + 2 * (Wo - 1) + 1:2, :]
            for dy in range(3) for dx in range(3)]
    stacked = jnp.stack(cols, axis=0).reshape(9, N * Ho * Wo, C)
    return pallas_pool_reduce(stacked, "max").reshape(N, Ho, Wo, C)


# ------------------------------ Parameters -----------------------------------

def init_densenet_params(key, growth_rate=32, block_config=(6, 12, 24, 16),
                         num_init_features=64, bn_size=4, num_classes=9,
                         in_channels=200):
    keys = iter(jax.random.split(key, 4096))

    def conv_w(kh, kw, cin, cout):
        std = math.sqrt(2.0 / (kh * kw * cin))   # kaiming_normal_, fan_in
        return std * jax.random.normal(next(keys), (kh, kw, cin, cout), jnp.float32)

    def bn(c):
        return {"gamma": jnp.ones((c,), jnp.float32),
                "beta": jnp.zeros((c,), jnp.float32)}

    params = {"conv0": conv_w(7, 7, in_channels, num_init_features),
              "norm0": bn(num_init_features)}
    num_features = num_init_features
    blocks = []
    for i, num_layers in enumerate(block_config):
        layers = []
        for j in range(num_layers):
            cin = num_features + j * growth_rate
            layers.append({
                "norm1": bn(cin),
                "conv1": conv_w(1, 1, cin, bn_size * growth_rate),
                "norm2": bn(bn_size * growth_rate),
                "conv2": conv_w(3, 3, bn_size * growth_rate, growth_rate),
            })
        block = {"layers": layers}
        num_features = num_features + num_layers * growth_rate
        if i != len(block_config) - 1:
            block["transition"] = {
                "norm": bn(num_features),
                "conv": conv_w(1, 1, num_features, num_features // 2),
            }
            num_features = num_features // 2
        blocks.append(block)
    params["blocks"] = blocks
    params["norm5"] = bn(num_features)
    std = 1.0 / math.sqrt(num_features)
    params["classifier"] = {
        "weight": std * jax.random.normal(next(keys), (num_features, num_classes),
                                          jnp.float32),
        "bias": jnp.zeros((num_classes,), jnp.float32),   # init.constant_(bias, 0)
    }
    return params


# ------------------------------ Forward --------------------------------------

def densenet_forward(params, x_nchw):
    """DenseNet.forward: interpolate(32,32) -> features -> relu -> GAP -> linear."""
    N, C, H, W = x_nchw.shape
    # F.interpolate(x, size=(32,32)), mode='nearest': src = floor(dst * H / 32)
    hy = (jnp.arange(32) * H) // 32
    wx = (jnp.arange(32) * W) // 32
    x = x_nchw[:, :, hy][:, :, :, wx]
    x = jnp.transpose(x, (0, 2, 3, 1)).astype(jnp.float32)   # NCHW -> NHWC

    # conv0 (7x7 s2 p3) -> norm0 -> relu0 -> pool0
    x = conv2d_nhwc(x.astype(jnp.bfloat16), params["conv0"], stride=2, padding=3)
    n0, h0, w0, c0 = x.shape
    x2 = x.reshape(n0 * h0 * w0, c0)
    sc, sh = bn_batch_scale_shift(x2, params["norm0"]["gamma"], params["norm0"]["beta"])
    x = pallas_affine_relu(x2, sc, sh).reshape(n0, h0, w0, c0)
    x = maxpool_3x3_s2_p1(x)

    # dense blocks + transitions
    for block in params["blocks"]:
        feats = [x]
        for lp in block["layers"]:
            hcat = jnp.concatenate(feats, axis=-1)            # torch.cat(inputs, 1)
            nb, hb, wb, cin = hcat.shape
            h2 = hcat.reshape(nb * hb * wb, cin)
            # norm1 + relu1 fused into the 1x1 bottleneck conv (MXU prologue)
            sc1, sh1 = bn_batch_scale_shift(h2, lp["norm1"]["gamma"],
                                            lp["norm1"]["beta"])
            cbn = lp["conv1"].shape[-1]
            bott = pallas_conv1x1_bn_relu(h2, sc1, sh1,
                                          lp["conv1"].reshape(cin, cbn))
            # norm2 + relu2 materialized (bf16) since the 3x3 conv zero-pads the
            # *activated* tensor; then im2col + MXU matmul.
            sc2, sh2 = bn_batch_scale_shift(bott, lp["norm2"]["gamma"],
                                            lp["norm2"]["beta"])
            act = pallas_affine_relu(bott, sc2, sh2, out_dtype=jnp.bfloat16)
            act = act.reshape(nb, hb, wb, cbn)
            new = conv2d_nhwc(act, lp["conv2"], stride=1, padding=1)
            # drop_rate == 0 -> F.dropout is the identity
            feats.append(new)
        x = jnp.concatenate(feats, axis=-1)
        if "transition" in block:
            tp = block["transition"]
            nb, hb, wb, cin = x.shape
            x2 = x.reshape(nb * hb * wb, cin)
            sc, sh = bn_batch_scale_shift(x2, tp["norm"]["gamma"], tp["norm"]["beta"])
            # AvgPool2x2 commutes with the per-pixel-linear 1x1 conv, so fuse
            # BN-affine + ReLU + AvgPool into one kernel and run the conv on
            # the pooled tensor: 4x fewer MXU FLOPs, smaller matmul output.
            Ho, Wo = hb // 2, wb // 2
            cols = [x[:, dy:2 * Ho:2, dx:2 * Wo:2, :]
                    for dy in range(2) for dx in range(2)]
            stacked = jnp.stack(cols, axis=0).reshape(4, nb * Ho * Wo, cin)
            pooled = pallas_affine_relu_avgpool(stacked, sc, sh,
                                                out_dtype=jnp.bfloat16)
            cout = tp["conv"].shape[-1]
            y = pallas_matmul(pooled, tp["conv"].reshape(cin, cout))
            x = y.reshape(nb, Ho, Wo, cout)

    # norm5 + F.relu (affine+ReLU apply kernel)
    nb, hb, wb, cfin = x.shape
    x2 = x.reshape(nb * hb * wb, cfin)
    sc, sh = bn_batch_scale_shift(x2, params["norm5"]["gamma"], params["norm5"]["beta"])
    x2 = pallas_affine_relu(x2, sc, sh)
    # adaptive_avg_pool2d((1,1)) + flatten (spatial is 1x1 at this point)
    x = x2.reshape(nb, hb, wb, cfin).mean(axis=(1, 2))
    # classifier: tiny GEMV, keep in plain XLA (an MXU tile would be >90% padding)
    logits = x @ params["classifier"]["weight"] + params["classifier"]["bias"]
    return logits


# ------------------------------ Main ------------------------------------------

if __name__ == "__main__":
    key = jax.random.PRNGKey(0)
    kp, kx = jax.random.split(key)

    # Small DenseNet configuration (constructor args of the PyTorch module);
    # the 200 input channels and the 32x32 interpolation are hard-coded.
    params = init_densenet_params(kp,
                                  growth_rate=16,
                                  block_config=(2, 2, 2, 2),
                                  num_init_features=32,
                                  bn_size=4,
                                  num_classes=9,
                                  in_channels=200)

    x = jax.random.normal(kx, (2, 200, 16, 16), jnp.float32)

    fwd = jax.jit(densenet_forward)
    out = fwd(params, x)
    jax.block_until_ready(out)
    assert out.shape == (2, 9) and out.dtype == jnp.float32
    print("KERNEL_OK")
</pallas_src>

<mosaic_0001>
module attributes {stable_mosaic.version = 11 : i64} {
  func.func @_bn_stats_kernel(%arg0: i32, %arg1: memref<512x32xf32, #tpu.memory_space<vmem>>, %arg2: memref<1x32xf32, #tpu.memory_space<vmem>>, %arg3: memref<1x32xf32, #tpu.memory_space<vmem>>) attributes {dimension_semantics = [#tpu.dimension_semantics<arbitrary>], iteration_bounds = array<i64: 1>, scalar_prefetch = 0 : i64, scratch_operands = 0 : i64, tpu.core_type = #tpu.core_type<tc>, window_params = [{transform_indices = @transform_0, window_bounds = array<i64: 512, 32>}, {pipeline_mode = #tpu.pipeline_mode<synchronous>, transform_indices = @transform_1, window_bounds = array<i64: 1, 32>}, {pipeline_mode = #tpu.pipeline_mode<synchronous>, transform_indices = @transform_2, window_bounds = array<i64: 1, 32>}]} {
    %c0_i32 = arith.constant 0 : i32
    %0 = arith.cmpi eq, %arg0, %c0_i32 : i32
    %1 = arith.extui %0 : i1 to i32
    %c0_i32_0 = arith.constant 0 : i32
    %2 = arith.cmpi ne, %1, %c0_i32_0 : i32
    scf.if %2 {
      %cst_11 = arith.constant 0.000000e+00 : f32
      %15 = vector.broadcast %cst_11 : f32 to vector<1x32xf32>
      %c0_12 = arith.constant 0 : index
      %c0_13 = arith.constant 0 : index
      %16 = vector.load %arg2[%c0_12, %c0_13] : memref<1x32xf32, #tpu.memory_space<vmem>>, vector<1x32xf32>
      tpu.vector_store %arg2[%c0_12, %c0_13], %15 {strides = array<i32>} : memref<1x32xf32, #tpu.memory_space<vmem>>, vector<1x32xf32>,
      %cst_14 = arith.constant 0.000000e+00 : f32
      %17 = vector.broadcast %cst_14 : f32 to vector<1x32xf32>
      %c0_15 = arith.constant 0 : index
      %c0_16 = arith.constant 0 : index
      %18 = vector.load %arg3[%c0_15, %c0_16] : memref<1x32xf32, #tpu.memory_space<vmem>>, vector<1x32xf32>
      tpu.vector_store %arg3[%c0_15, %c0_16], %17 {strides = array<i32>} : memref<1x32xf32, #tpu.memory_space<vmem>>, vector<1x32xf32>,
    } else {
    }
    %c0 = arith.constant 0 : index
    %c0_1 = arith.constant 0 : index
    %3 = vector.load %arg1[%c0, %c0_1] : memref<512x32xf32, #tpu.memory_space<vmem>>, vector<512x32xf32>
    %c0_2 = arith.constant 0 : index
    %c0_3 = arith.constant 0 : index
    %4 = vector.load %arg2[%c0_2, %c0_3] : memref<1x32xf32, #tpu.memory_space<vmem>>, vector<1x32xf32>
    %cst = arith.constant dense<0.000000e+00> : vector<32xf32>
    %5 = vector.multi_reduction <add>, %3, %cst [0] : vector<512x32xf32> to vector<32xf32>
    %6 = vector.shape_cast %5 : vector<32xf32> to vector<1x32xf32>
    %7 = arith.addf %4, %6 : vector<1x32xf32>
    %c0_4 = arith.constant 0 : index
    %c0_5 = arith.constant 0 : index
    %8 = vector.load %arg2[%c0_4, %c0_5] : memref<1x32xf32, #tpu.memory_space<vmem>>, vector<1x32xf32>
    tpu.vector_store %arg2[%c0_4, %c0_5], %7 {strides = array<i32>} : memref<1x32xf32, #tpu.memory_space<vmem>>, vector<1x32xf32>,
    %c0_6 = arith.constant 0 : index
    %c0_7 = arith.constant 0 : index
    %9 = vector.load %arg3[%c0_6, %c0_7] : memref<1x32xf32, #tpu.memory_space<vmem>>, vector<1x32xf32>
    %10 = arith.mulf %3, %3 : vector<512x32xf32>
    %cst_8 = arith.constant dense<0.000000e+00> : vector<32xf32>
    %11 = vector.multi_reduction <add>, %10, %cst_8 [0] : vector<512x32xf32> to vector<32xf32>
    %12 = vector.shape_cast %11 : vector<32xf32> to vector<1x32xf32>
    %13 = arith.addf %9, %12 : vector<1x32xf32>
    %c0_9 = arith.constant 0 : index
    %c0_10 = arith.constant 0 : index
    %14 = vector.load %arg3[%c0_9, %c0_10] : memref<1x32xf32, #tpu.memory_space<vmem>>, vector<1x32xf32>
    tpu.vector_store %arg3[%c0_9, %c0_10], %13 {strides = array<i32>} : memref<1x32xf32, #tpu.memory_space<vmem>>, vector<1x32xf32>,
    return
  }
  func.func @transform_0(%arg0: i32) -> (i32, i32) {
    %c0_i32 = arith.constant 0 : i32
    %c0_i32_0 = arith.constant 0 : i32
    return %arg0, %c0_i32 : i32, i32
  }
  func.func @transform_1(%arg0: i32) -> (i32, i32) {
    %c0_i32 = arith.constant 0 : i32
    %c0_i32_0 = arith.constant 0 : i32
    %c0_i32_1 = arith.constant 0 : i32
    return %c0_i32, %c0_i32_0 : i32, i32
  }
  func.func @transform_2(%arg0: i32) -> (i32, i32) {
    %c0_i32 = arith.constant 0 : i32
    %c0_i32_0 = arith.constant 0 : i32
    %c0_i32_1 = arith.constant 0 : i32
    return %c0_i32, %c0_i32_0 : i32, i32
  }
}

module attributes {stable_mosaic.version = 11 : i64} {
  func.func @_matmul_acc_kernel(%arg0: i32, %arg1: i32, %arg2: memref<512x256xbf16, #tpu.memory_space<vmem>>, %arg3: memref<256x128xbf16, #tpu.memory_space<vmem>>, %arg4: memref<512x128xf32, #tpu.memory_space<vmem>>) attributes {dimension_semantics = [#tpu.dimension_semantics<parallel>, #tpu.dimension_semantics<arbitrary>], iteration_bounds = array<i64: 1, 39>, scalar_prefetch = 0 : i64, scratch_operands = 0 : i64, tpu.core_type = #tpu.core_type<tc>, window_params = [{transform_indices = @transform_0, window_bounds = array<i64: 512, 256>}, {transform_indices = @transform_1, window_bounds = array<i64: 256, 128>}, {transform_indices = @transform_2, window_bounds = array<i64: 512, 128>}]} {
    %c0_i32 = arith.constant 0 : i32
    %0 = arith.cmpi eq, %arg1, %c0_i32 : i32
    %1 = arith.extui %0 : i1 to i32
    %c0_i32_0 = arith.constant 0 : i32
    %2 = arith.cmpi ne, %1, %c0_i32_0 : i32
    scf.if %2 {
      %cst_8 = arith.constant 0.000000e+00 : f32
      %9 = vector.broadcast %cst_8 : f32 to vector<512x128xf32>
      %c0_9 = arith.constant 0 : index
      %c0_10 = arith.constant 0 : index
      %10 = vector.load %arg4[%c0_9, %c0_10] : memref<512x128xf32, #tpu.memory_space<vmem>>, vector<512x128xf32>
      tpu.vector_store %arg4[%c0_9, %c0_10], %9 {strides = array<i32>} : memref<512x128xf32, #tpu.memory_space<vmem>>, vector<512x128xf32>,
    } else {
    }
    %c0 = arith.constant 0 : index
    %c0_1 = arith.constant 0 : index
    %3 = vector.load %arg4[%c0, %c0_1] : memref<512x128xf32, #tpu.memory_space<vmem>>, vector<512x128xf32>
    %c0_2 = arith.constant 0 : index
    %c0_3 = arith.constant 0 : index
    %4 = vector.load %arg2[%c0_2, %c0_3] : memref<512x256xbf16, #tpu.memory_space<vmem>>, vector<512x256xbf16>
    %c0_4 = arith.constant 0 : index
    %c0_5 = arith.constant 0 : index
    %5 = vector.load %arg3[%c0_4, %c0_5] : memref<256x128xbf16, #tpu.memory_space<vmem>>, vector<256x128xbf16>
    %cst = arith.constant dense<0.000000e+00> : vector<512x128xf32>
    %6 = tpu.matmul %4, %5, %cst {dimension_numbers = #tpu.dot_dimension_numbers<[1], [0], [0], [1], [0, 0, 1, 1], [], []>} : vector<512x256xbf16>, vector<256x128xbf16>, vector<512x128xf32> -> vector<512x128xf32>
    %7 = arith.addf %3, %6 : vector<512x128xf32>
    %c0_6 = arith.constant 0 : index
    %c0_7 = arith.constant 0 : index
    %8 = vector.load %arg4[%c0_6, %c0_7] : memref<512x128xf32, #tpu.memory_space<vmem>>, vector<512x128xf32>
    tpu.vector_store %arg4[%c0_6, %c0_7], %7 {strides = array<i32>} : memref<512x128xf32, #tpu.memory_space<vmem>>, vector<512x128xf32>,
    return
  }
  func.func @transform_0(%arg0: i32, %arg1: i32) -> (i32, i32) {
    %c0_i32 = arith.constant 0 : i32
    return %arg0, %arg1 : i32, i32
  }
  func.func @transform_1(%arg0: i32, %arg1: i32) -> (i32, i32) {
    %c0_i32 = arith.constant 0 : i32
    %c0_i32_0 = arith.constant 0 : i32
    return %arg1, %c0_i32 : i32, i32
  }
  func.func @transform_2(%arg0: i32, %arg1: i32) -> (i32, i32) {
    %c0_i32 = arith.constant 0 : i32
    %c0_i32_0 = arith.constant 0 : i32
    return %arg0, %c0_i32 : i32, i32
  }
}

module attributes {stable_mosaic.version = 11 : i64} {
  func.func @_affine_relu_kernel(%arg0: i32, %arg1: memref<512x32xf32, #tpu.memory_space<vmem>>, %arg2: memref<1x32xf32, #tpu.memory_space<vmem>>, %arg3: memref<1x32xf32, #tpu.memory_space<vmem>>, %arg4: memref<512x32xf32, #tpu.memory_space<vmem>>) attributes {dimension_semantics = [#tpu.dimension_semantics<parallel>], iteration_bounds = array<i64: 1>, scalar_prefetch = 0 : i64, scratch_operands = 0 : i64, tpu.core_type = #tpu.core_type<tc>, window_params = [{transform_indices = @transform_0, window_bounds = array<i64: 512, 32>}, {pipeline_mode = #tpu.pipeline_mode<synchronous>, transform_indices = @transform_1, window_bounds = array<i64: 1, 32>}, {pipeline_mode = #tpu.pipeline_mode<synchronous>, transform_indices = @transform_2, window_bounds = array<i64: 1, 32>}, {transform_indices = @transform_3, window_bounds = array<i64: 512, 32>}]} {
    %c0 = arith.constant 0 : index
    %c0_0 = arith.constant 0 : index
    %0 = vector.load %arg1[%c0, %c0_0] : memref<512x32xf32, #tpu.memory_space<vmem>>, vector<512x32xf32>
    %c0_1 = arith.constant 0 : index
    %c0_2 = arith.constant 0 : index
    %1 = vector.load %arg2[%c0_1, %c0_2] : memref<1x32xf32, #tpu.memory_space<vmem>>, vector<1x32xf32>
    %2 = vector.broadcast %1 : vector<1x32xf32> to vector<512x32xf32>
    %3 = arith.mulf %0, %2 : vector<512x32xf32>
    %c0_3 = arith.constant 0 : index
    %c0_4 = arith.constant 0 : index
    %4 = vector.load %arg3[%c0_3, %c0_4] : memref<1x32xf32, #tpu.memory_space<vmem>>, vector<1x32xf32>
    %5 = vector.broadcast %4 : vector<1x32xf32> to vector<512x32xf32>
    %6 = arith.addf %3, %5 : vector<512x32xf32>
    %cst = arith.constant 0.000000e+00 : f32
    %7 = vector.broadcast %cst : f32 to vector<512x32xf32>
    %8 = arith.maximumf %6, %7 : vector<512x32xf32>
    %c0_5 = arith.constant 0 : index
    %c0_6 = arith.constant 0 : index
    %9 = vector.load %arg4[%c0_5, %c0_6] : memref<512x32xf32, #tpu.memory_space<vmem>>, vector<512x32xf32>
    tpu.vector_store %arg4[%c0_5, %c0_6], %8 {strides = array<i32>} : memref<512x32xf32, #tpu.memory_space<vmem>>, vector<512x32xf32>,
    return
  }
  func.func @transform_0(%arg0: i32) -> (i32, i32) {
    %c0_i32 = arith.constant 0 : i32
    %c0_i32_0 = arith.constant 0 : i32
    return %arg0, %c0_i32 : i32, i32
  }
  func.func @transform_1(%arg0: i32) -> (i32, i32) {
    %c0_i32 = arith.constant 0 : i32
    %c0_i32_0 = arith.constant 0 : i32
    %c0_i32_1 = arith.constant 0 : i32
    return %c0_i32, %c0_i32_0 : i32, i32
  }
  func.func @transform_2(%arg0: i32) -> (i32, i32) {
    %c0_i32 = arith.constant 0 : i32
    %c0_i32_0 = arith.constant 0 : i32
    %c0_i32_1 = arith.constant 0 : i32
    return %c0_i32, %c0_i32_0 : i32, i32
  }
  func.func @transform_3(%arg0: i32) -> (i32, i32) {
    %c0_i32 = arith.constant 0 : i32
    %c0_i32_0 = arith.constant 0 : i32
    return %arg0, %c0_i32 : i32, i32
  }
}

module attributes {stable_mosaic.version = 11 : i64} {
  func.func @_pool_reduce_kernel(%arg0: i32, %arg1: memref<9x128x32xf32, #tpu.memory_space<vmem>>, %arg2: memref<128x32xf32, #tpu.memory_space<vmem>>) attributes {dimension_semantics = [#tpu.dimension_semantics<parallel>], iteration_bounds = array<i64: 1>, scalar_prefetch = 0 : i64, scratch_operands = 0 : i64, tpu.core_type = #tpu.core_type<tc>, window_params = [{transform_indices = @transform_0, window_bounds = array<i64: 9, 128, 32>}, {transform_indices = @transform_1, window_bounds = array<i64: 128, 32>}]} {
    %c0 = arith.constant 0 : index
    %c0_0 = arith.constant 0 : index
    %c0_1 = arith.constant 0 : index
    %0 = vector.load %arg1[%c0, %c0_0, %c0_1] : memref<9x128x32xf32, #tpu.memory_space<vmem>>, vector<9x128x32xf32>
    %cst = arith.constant dense<0xFF800000> : vector<128x32xf32>
    %1 = vector.multi_reduction <maximumf>, %0, %cst [0] : vector<9x128x32xf32> to vector<128x32xf32>
    %c0_2 = arith.constant 0 : index
    %c0_3 = arith.constant 0 : index
    %2 = vector.load %arg2[%c0_2, %c0_3] : memref<128x32xf32, #tpu.memory_space<vmem>>, vector<128x32xf32>
    tpu.vector_store %arg2[%c0_2, %c0_3], %1 {strides = array<i32>} : memref<128x32xf32, #tpu.memory_space<vmem>>, vector<128x32xf32>,
    return
  }
  func.func @transform_0(%arg0: i32) -> (i32, i32, i32) {
    %c0_i32 = arith.constant 0 : i32
    %c0_i32_0 = arith.constant 0 : i32
    %c0_i32_1 = arith.constant 0 : i32
    return %c0_i32, %arg0, %c0_i32_0 : i32, i32, i32
  }
  func.func @transform_1(%arg0: i32) -> (i32, i32) {
    %c0_i32 = arith.constant 0 : i32
    %c0_i32_0 = arith.constant 0 : i32
    return %arg0, %c0_i32 : i32, i32
  }
}

module attributes {stable_mosaic.version = 11 : i64} {
  func.func @_bn_stats_kernel(%arg0: i32, %arg1: memref<128x32xf32, #tpu.memory_space<vmem>>, %arg2: memref<1x32xf32, #tpu.memory_space<vmem>>, %arg3: memref<1x32xf32, #tpu.memory_space<vmem>>) attributes {dimension_semantics = [#tpu.dimension_semantics<arbitrary>], iteration_bounds = array<i64: 1>, scalar_prefetch = 0 : i64, scratch_operands = 0 : i64, tpu.core_type = #tpu.core_type<tc>, window_params = [{transform_indices = @transform_0, window_bounds = array<i64: 128, 32>}, {pipeline_mode = #tpu.pipeline_mode<synchronous>, transform_indices = @transform_1, window_bounds = array<i64: 1, 32>}, {pipeline_mode = #tpu.pipeline_mode<synchronous>, transform_indices = @transform_2, window_bounds = array<i64: 1, 32>}]} {
    %c0_i32 = arith.constant 0 : i32
    %0 = arith.cmpi eq, %arg0, %c0_i32 : i32
    %1 = arith.extui %0 : i1 to i32
    %c0_i32_0 = arith.constant 0 : i32
    %2 = arith.cmpi ne, %1, %c0_i32_0 : i32
    scf.if %2 {
      %cst_11 = arith.constant 0.000000e+00 : f32
      %15 = vector.broadcast %cst_11 : f32 to vector<1x32xf32>
      %c0_12 = arith.constant 0 : index
      %c0_13 = arith.constant 0 : index
      %16 = vector.load %arg2[%c0_12, %c0_13] : memref<1x32xf32, #tpu.memory_space<vmem>>, vector<1x32xf32>
      tpu.vector_store %arg2[%c0_12, %c0_13], %15 {strides = array<i32>} : memref<1x32xf32, #tpu.memory_space<vmem>>, vector<1x32xf32>,
      %cst_14 = arith.constant 0.000000e+00 : f32
      %17 = vector.broadcast %cst_14 : f32 to vector<1x32xf32>
      %c0_15 = arith.constant 0 : index
      %c0_16 = arith.constant 0 : index
      %18 = vector.load %arg3[%c0_15, %c0_16] : memref<1x32xf32, #tpu.memory_space<vmem>>, vector<1x32xf32>
      tpu.vector_store %arg3[%c0_15, %c0_16], %17 {strides = array<i32>} : memref<1x32xf32, #tpu.memory_space<vmem>>, vector<1x32xf32>,
    } else {
    }
    %c0 = arith.constant 0 : index
    %c0_1 = arith.constant 0 : index
    %3 = vector.load %arg1[%c0, %c0_1] : memref<128x32xf32, #tpu.memory_space<vmem>>, vector<128x32xf32>
    %c0_2 = arith.constant 0 : index
    %c0_3 = arith.constant 0 : index
    %4 = vector.load %arg2[%c0_2, %c0_3] : memref<1x32xf32, #tpu.memory_space<vmem>>, vector<1x32xf32>
    %cst = arith.constant dense<0.000000e+00> : vector<32xf32>
    %5 = vector.multi_reduction <add>, %3, %cst [0] : vector<128x32xf32> to vector<32xf32>
    %6 = vector.shape_cast %5 : vector<32xf32> to vector<1x32xf32>
    %7 = arith.addf %4, %6 : vector<1x32xf32>
    %c0_4 = arith.constant 0 : index
    %c0_5 = arith.constant 0 : index
    %8 = vector.load %arg2[%c0_4, %c0_5] : memref<1x32xf32, #tpu.memory_space<vmem>>, vector<1x32xf32>
    tpu.vector_store %arg2[%c0_4, %c0_5], %7 {strides = array<i32>} : memref<1x32xf32, #tpu.memory_space<vmem>>, vector<1x32xf32>,
    %c0_6 = arith.constant 0 : index
    %c0_7 = arith.constant 0 : index
    %9 = vector.load %arg3[%c0_6, %c0_7] : memref<1x32xf32, #tpu.memory_space<vmem>>, vector<1x32xf32>
    %10 = arith.mulf %3, %3 : vector<128x32xf32>
    %cst_8 = arith.constant dense<0.000000e+00> : vector<32xf32>
    %11 = vector.multi_reduction <add>, %10, %cst_8 [0] : vector<128x32xf32> to vector<32xf32>
    %12 = vector.shape_cast %11 : vector<32xf32> to vector<1x32xf32>
    %13 = arith.addf %9, %12 : vector<1x32xf32>
    %c0_9 = arith.constant 0 : index
    %c0_10 = arith.constant 0 : index
    %14 = vector.load %arg3[%c0_9, %c0_10] : memref<1x32xf32, #tpu.memory_space<vmem>>, vector<1x32xf32>
    tpu.vector_store %arg3[%c0_9, %c0_10], %13 {strides = array<i32>} : memref<1x32xf32, #tpu.memory_space<vmem>>, vector<1x32xf32>,
    return
  }
  func.func @transform_0(%arg0: i32) -> (i32, i32) {
    %c0_i32 = arith.constant 0 : i32
    %c0_i32_0 = arith.constant 0 : i32
    return %arg0, %c0_i32 : i32, i32
  }
  func.func @transform_1(%arg0: i32) -> (i32, i32) {
    %c0_i32 = arith.constant 0 : i32
    %c0_i32_0 = arith.constant 0 : i32
    %c0_i32_1 = arith.constant 0 : i32
    return %c0_i32, %c0_i32_0 : i32, i32
  }
  func.func @transform_2(%arg0: i32) -> (i32, i32) {
    %c0_i32 = arith.constant 0 : i32
    %c0_i32_0 = arith.constant 0 : i32
    %c0_i32_1 = arith.constant 0 : i32
    return %c0_i32, %c0_i32_0 : i32, i32
  }
}

module attributes {stable_mosaic.version = 11 : i64} {
  func.func @_matmul_bnrelu_kernel(%arg0: i32, %arg1: memref<128x32xf32, #tpu.memory_space<vmem>>, %arg2: memref<1x32xf32, #tpu.memory_space<vmem>>, %arg3: memref<1x32xf32, #tpu.memory_space<vmem>>, %arg4: memref<32x128xbf16, #tpu.memory_space<vmem>>, %arg5: memref<128x128xf32, #tpu.memory_space<vmem>>) attributes {dimension_semantics = [#tpu.dimension_semantics<parallel>], iteration_bounds = array<i64: 1>, scalar_prefetch = 0 : i64, scratch_operands = 0 : i64, tpu.core_type = #tpu.core_type<tc>, window_params = [{transform_indices = @transform_0, window_bounds = array<i64: 128, 32>}, {pipeline_mode = #tpu.pipeline_mode<synchronous>, transform_indices = @transform_1, window_bounds = array<i64: 1, 32>}, {pipeline_mode = #tpu.pipeline_mode<synchronous>, transform_indices = @transform_2, window_bounds = array<i64: 1, 32>}, {pipeline_mode = #tpu.pipeline_mode<synchronous>, transform_indices = @transform_3, window_bounds = array<i64: 32, 128>}, {transform_indices = @transform_4, window_bounds = array<i64: 128, 128>}]} {
    %c0 = arith.constant 0 : index
    %c0_0 = arith.constant 0 : index
    %0 = vector.load %arg1[%c0, %c0_0] : memref<128x32xf32, #tpu.memory_space<vmem>>, vector<128x32xf32>
    %c0_1 = arith.constant 0 : index
    %c0_2 = arith.constant 0 : index
    %1 = vector.load %arg2[%c0_1, %c0_2] : memref<1x32xf32, #tpu.memory_space<vmem>>, vector<1x32xf32>
    %2 = vector.broadcast %1 : vector<1x32xf32> to vector<128x32xf32>
    %3 = arith.mulf %0, %2 : vector<128x32xf32>
    %c0_3 = arith.constant 0 : index
    %c0_4 = arith.constant 0 : index
    %4 = vector.load %arg3[%c0_3, %c0_4] : memref<1x32xf32, #tpu.memory_space<vmem>>, vector<1x32xf32>
    %5 = vector.broadcast %4 : vector<1x32xf32> to vector<128x32xf32>
    %6 = arith.addf %3, %5 : vector<128x32xf32>
    %cst = arith.constant 0.000000e+00 : f32
    %7 = vector.broadcast %cst : f32 to vector<128x32xf32>
    %8 = arith.maximumf %6, %7 : vector<128x32xf32>
    %9 = arith.truncf %8 : vector<128x32xf32> to vector<128x32xbf16>
    %c0_5 = arith.constant 0 : index
    %c0_6 = arith.constant 0 : index
    %10 = vector.load %arg4[%c0_5, %c0_6] : memref<32x128xbf16, #tpu.memory_space<vmem>>, vector<32x128xbf16>
    %cst_7 = arith.constant dense<0.000000e+00> : vector<128x128xf32>
    %11 = tpu.matmul %9, %10, %cst_7 {dimension_numbers = #tpu.dot_dimension_numbers<[1], [0], [0], [1], [0, 0, 1, 1], [], []>} : vector<128x32xbf16>, vector<32x128xbf16>, vector<128x128xf32> -> vector<128x128xf32>
    %c0_8 = arith.constant 0 : index
    %c0_9 = arith.constant 0 : index
    %12 = vector.load %arg5[%c0_8, %c0_9] : memref<128x128xf32, #tpu.memory_space<vmem>>, vector<128x128xf32>
    tpu.vector_store %arg5[%c0_8, %c0_9], %11 {strides = array<i32>} : memref<128x128xf32, #tpu.memory_space<vmem>>, vector<128x128xf32>,
    return
  }
  func.func @transform_0(%arg0: i32) -> (i32, i32) {
    %c0_i32 = arith.constant 0 : i32
    %c0_i32_0 = arith.constant 0 : i32
    return %arg0, %c0_i32 : i32, i32
  }
  func.func @transform_1(%arg0: i32) -> (i32, i32) {
    %c0_i32 = arith.constant 0 : i32
    %c0_i32_0 = arith.constant 0 : i32
    %c0_i32_1 = arith.constant 0 : i32
    return %c0_i32, %c0_i32_0 : i32, i32
  }
  func.func @transform_2(%arg0: i32) -> (i32, i32) {
    %c0_i32 = arith.constant 0 : i32
    %c0_i32_0 = arith.constant 0 : i32
    %c0_i32_1 = arith.constant 0 : i32
    return %c0_i32, %c0_i32_0 : i32, i32
  }
  func.func @transform_3(%arg0: i32) -> (i32, i32) {
    %c0_i32 = arith.constant 0 : i32
    %c0_i32_0 = arith.constant 0 : i32
    %c0_i32_1 = arith.constant 0 : i32
    return %c0_i32, %c0_i32_0 : i32, i32
  }
  func.func @transform_4(%arg0: i32) -> (i32, i32) {
    %c0_i32 = arith.constant 0 : i32
    %c0_i32_0 = arith.constant 0 : i32
    return %arg0, %c0_i32 : i32, i32
  }
}

module attributes {stable_mosaic.version = 11 : i64} {
  func.func @_bn_stats_kernel(%arg0: i32, %arg1: memref<128x64xf32, #tpu.memory_space<vmem>>, %arg2: memref<1x64xf32, #tpu.memory_space<vmem>>, %arg3: memref<1x64xf32, #tpu.memory_space<vmem>>) attributes {dimension_semantics = [#tpu.dimension_semantics<arbitrary>], iteration_bounds = array<i64: 1>, scalar_prefetch = 0 : i64, scratch_operands = 0 : i64, tpu.core_type = #tpu.core_type<tc>, window_params = [{transform_indices = @transform_0, window_bounds = array<i64: 128, 64>}, {pipeline_mode = #tpu.pipeline_mode<synchronous>, transform_indices = @transform_1, window_bounds = array<i64: 1, 64>}, {pipeline_mode = #tpu.pipeline_mode<synchronous>, transform_indices = @transform_2, window_bounds = array<i64: 1, 64>}]} {
    %c0_i32 = arith.constant 0 : i32
    %0 = arith.cmpi eq, %arg0, %c0_i32 : i32
    %1 = arith.extui %0 : i1 to i32
    %c0_i32_0 = arith.constant 0 : i32
    %2 = arith.cmpi ne, %1, %c0_i32_0 : i32
    scf.if %2 {
      %cst_11 = arith.constant 0.000000e+00 : f32
      %15 = vector.broadcast %cst_11 : f32 to vector<1x64xf32>
      %c0_12 = arith.constant 0 : index
      %c0_13 = arith.constant 0 : index
      %16 = vector.load %arg2[%c0_12, %c0_13] : memref<1x64xf32, #tpu.memory_space<vmem>>, vector<1x64xf32>
      tpu.vector_store %arg2[%c0_12, %c0_13], %15 {strides = array<i32>} : memref<1x64xf32, #tpu.memory_space<vmem>>, vector<1x64xf32>,
      %cst_14 = arith.constant 0.000000e+00 : f32
      %17 = vector.broadcast %cst_14 : f32 to vector<1x64xf32>
      %c0_15 = arith.constant 0 : index
      %c0_16 = arith.constant 0 : index
      %18 = vector.load %arg3[%c0_15, %c0_16] : memref<1x64xf32, #tpu.memory_space<vmem>>, vector<1x64xf32>
      tpu.vector_store %arg3[%c0_15, %c0_16], %17 {strides = array<i32>} : memref<1x64xf32, #tpu.memory_space<vmem>>, vector<1x64xf32>,
    } else {
    }
    %c0 = arith.constant 0 : index
    %c0_1 = arith.constant 0 : index
    %3 = vector.load %arg1[%c0, %c0_1] : memref<128x64xf32, #tpu.memory_space<vmem>>, vector<128x64xf32>
    %c0_2 = arith.constant 0 : index
    %c0_3 = arith.constant 0 : index
    %4 = vector.load %arg2[%c0_2, %c0_3] : memref<1x64xf32, #tpu.memory_space<vmem>>, vector<1x64xf32>
    %cst = arith.constant dense<0.000000e+00> : vector<64xf32>
    %5 = vector.multi_reduction <add>, %3, %cst [0] : vector<128x64xf32> to vector<64xf32>
    %6 = vector.shape_cast %5 : vector<64xf32> to vector<1x64xf32>
    %7 = arith.addf %4, %6 : vector<1x64xf32>
    %c0_4 = arith.constant 0 : index
    %c0_5 = arith.constant 0 : index
    %8 = vector.load %arg2[%c0_4, %c0_5] : memref<1x64xf32, #tpu.memory_space<vmem>>, vector<1x64xf32>
    tpu.vector_store %arg2[%c0_4, %c0_5], %7 {strides = array<i32>} : memref<1x64xf32, #tpu.memory_space<vmem>>, vector<1x64xf32>,
    %c0_6 = arith.constant 0 : index
    %c0_7 = arith.constant 0 : index
    %9 = vector.load %arg3[%c0_6, %c0_7] : memref<1x64xf32, #tpu.memory_space<vmem>>, vector<1x64xf32>
    %10 = arith.mulf %3, %3 : vector<128x64xf32>
    %cst_8 = arith.constant dense<0.000000e+00> : vector<64xf32>
    %11 = vector.multi_reduction <add>, %10, %cst_8 [0] : vector<128x64xf32> to vector<64xf32>
    %12 = vector.shape_cast %11 : vector<64xf32> to vector<1x64xf32>
    %13 = arith.addf %9, %12 : vector<1x64xf32>
    %c0_9 = arith.constant 0 : index
    %c0_10 = arith.constant 0 : index
    %14 = vector.load %arg3[%c0_9, %c0_10] : memref<1x64xf32, #tpu.memory_space<vmem>>, vector<1x64xf32>
    tpu.vector_store %arg3[%c0_9, %c0_10], %13 {strides = array<i32>} : memref<1x64xf32, #tpu.memory_space<vmem>>, vector<1x64xf32>,
    return
  }
  func.func @transform_0(%arg0: i32) -> (i32, i32) {
    %c0_i32 = arith.constant 0 : i32
    %c0_i32_0 = arith.constant 0 : i32
    return %arg0, %c0_i32 : i32, i32
  }
  func.func @transform_1(%arg0: i32) -> (i32, i32) {
    %c0_i32 = arith.constant 0 : i32
    %c0_i32_0 = arith.constant 0 : i32
    %c0_i32_1 = arith.constant 0 : i32
    return %c0_i32, %c0_i32_0 : i32, i32
  }
  func.func @transform_2(%arg0: i32) -> (i32, i32) {
    %c0_i32 = arith.constant 0 : i32
    %c0_i32_0 = arith.constant 0 : i32
    %c0_i32_1 = arith.constant 0 : i32
    return %c0_i32, %c0_i32_0 : i32, i32
  }
}

module attributes {stable_mosaic.version = 11 : i64} {
  func.func @_affine_relu_kernel(%arg0: i32, %arg1: memref<128x64xf32, #tpu.memory_space<vmem>>, %arg2: memref<1x64xf32, #tpu.memory_space<vmem>>, %arg3: memref<1x64xf32, #tpu.memory_space<vmem>>, %arg4: memref<128x64xbf16, #tpu.memory_space<vmem>>) attributes {dimension_semantics = [#tpu.dimension_semantics<parallel>], iteration_bounds = array<i64: 1>, scalar_prefetch = 0 : i64, scratch_operands = 0 : i64, tpu.core_type = #tpu.core_type<tc>, window_params = [{transform_indices = @transform_0, window_bounds = array<i64: 128, 64>}, {pipeline_mode = #tpu.pipeline_mode<synchronous>, transform_indices = @transform_1, window_bounds = array<i64: 1, 64>}, {pipeline_mode = #tpu.pipeline_mode<synchronous>, transform_indices = @transform_2, window_bounds = array<i64: 1, 64>}, {transform_indices = @transform_3, window_bounds = array<i64: 128, 64>}]} {
    %c0 = arith.constant 0 : index
    %c0_0 = arith.constant 0 : index
    %0 = vector.load %arg1[%c0, %c0_0] : memref<128x64xf32, #tpu.memory_space<vmem>>, vector<128x64xf32>
    %c0_1 = arith.constant 0 : index
    %c0_2 = arith.constant 0 : index
    %1 = vector.load %arg2[%c0_1, %c0_2] : memref<1x64xf32, #tpu.memory_space<vmem>>, vector<1x64xf32>
    %2 = vector.broadcast %1 : vector<1x64xf32> to vector<128x64xf32>
    %3 = arith.mulf %0, %2 : vector<128x64xf32>
    %c0_3 = arith.constant 0 : index
    %c0_4 = arith.constant 0 : index
    %4 = vector.load %arg3[%c0_3, %c0_4] : memref<1x64xf32, #tpu.memory_space<vmem>>, vector<1x64xf32>
    %5 = vector.broadcast %4 : vector<1x64xf32> to vector<128x64xf32>
    %6 = arith.addf %3, %5 : vector<128x64xf32>
    %cst = arith.constant 0.000000e+00 : f32
    %7 = vector.broadcast %cst : f32 to vector<128x64xf32>
    %8 = arith.maximumf %6, %7 : vector<128x64xf32>
    %9 = arith.truncf %8 : vector<128x64xf32> to vector<128x64xbf16>
    %c0_5 = arith.constant 0 : index
    %c0_6 = arith.constant 0 : index
    %10 = vector.load %arg4[%c0_5, %c0_6] : memref<128x64xbf16, #tpu.memory_space<vmem>>, vector<128x64xbf16>
    tpu.vector_store %arg4[%c0_5, %c0_6], %9 {strides = array<i32>} : memref<128x64xbf16, #tpu.memory_space<vmem>>, vector<128x64xbf16>,
    return
  }
  func.func @transform_0(%arg0: i32) -> (i32, i32) {
    %c0_i32 = arith.constant 0 : i32
    %c0_i32_0 = arith.constant 0 : i32
    return %arg0, %c0_i32 : i32, i32
  }
  func.func @transform_1(%arg0: i32) -> (i32, i32) {
    %c0_i32 = arith.constant 0 : i32
    %c0_i32_0 = arith.constant 0 : i32
    %c0_i32_1 = arith.constant 0 : i32
    return %c0_i32, %c0_i32_0 : i32, i32
  }
  func.func @transform_2(%arg0: i32) -> (i32, i32) {
    %c0_i32 = arith.constant 0 : i32
    %c0_i32_0 = arith.constant 0 : i32
    %c0_i32_1 = arith.constant 0 : i32
    return %c0_i32, %c0_i32_0 : i32, i32
  }
  func.func @transform_3(%arg0: i32) -> (i32, i32) {
    %c0_i32 = arith.constant 0 : i32
    %c0_i32_0 = arith.constant 0 : i32
    return %arg0, %c0_i32 : i32, i32
  }
}

module attributes {stable_mosaic.version = 11 : i64} {
  func.func @_matmul_single_kernel(%arg0: i32, %arg1: memref<128x576xbf16, #tpu.memory_space<vmem>>, %arg2: memref<576x128xbf16, #tpu.memory_space<vmem>>, %arg3: memref<128x128xf32, #tpu.memory_space<vmem>>) attributes {dimension_semantics = [#tpu.dimension_semantics<parallel>], iteration_bounds = array<i64: 1>, scalar_prefetch = 0 : i64, scratch_operands = 0 : i64, tpu.core_type = #tpu.core_type<tc>, window_params = [{transform_indices = @transform_0, window_bounds = array<i64: 128, 576>}, {pipeline_mode = #tpu.pipeline_mode<synchronous>, transform_indices = @transform_1, window_bounds = array<i64: 576, 128>}, {transform_indices = @transform_2, window_bounds = array<i64: 128, 128>}]} {
    %c0 = arith.constant 0 : index
    %c0_0 = arith.constant 0 : index
    %0 = vector.load %arg1[%c0, %c0_0] : memref<128x576xbf16, #tpu.memory_space<vmem>>, vector<128x576xbf16>
    %c0_1 = arith.constant 0 : index
    %c0_2 = arith.constant 0 : index
    %1 = vector.load %arg2[%c0_1, %c0_2] : memref<576x128xbf16, #tpu.memory_space<vmem>>, vector<576x128xbf16>
    %cst = arith.constant dense<0.000000e+00> : vector<128x128xf32>
    %2 = tpu.matmul %0, %1, %cst {dimension_numbers = #tpu.dot_dimension_numbers<[1], [0], [0], [1], [0, 0, 1, 1], [], []>} : vector<128x576xbf16>, vector<576x128xbf16>, vector<128x128xf32> -> vector<128x128xf32>
    %c0_3 = arith.constant 0 : index
    %c0_4 = arith.constant 0 : index
    %3 = vector.load %arg3[%c0_3, %c0_4] : memref<128x128xf32, #tpu.memory_space<vmem>>, vector<128x128xf32>
    tpu.vector_store %arg3[%c0_3, %c0_4], %2 {strides = array<i32>} : memref<128x128xf32, #tpu.memory_space<vmem>>, vector<128x128xf32>,
    return
  }
  func.func @transform_0(%arg0: i32) -> (i32, i32) {
    %c0_i32 = arith.constant 0 : i32
    %c0_i32_0 = arith.constant 0 : i32
    return %arg0, %c0_i32 : i32, i32
  }
  func.func @transform_1(%arg0: i32) -> (i32, i32) {
    %c0_i32 = arith.constant 0 : i32
    %c0_i32_0 = arith.constant 0 : i32
    %c0_i32_1 = arith.constant 0 : i32
    return %c0_i32, %c0_i32_0 : i32, i32
  }
  func.func @transform_2(%arg0: i32) -> (i32, i32) {
    %c0_i32 = arith.constant 0 : i32
    %c0_i32_0 = arith.constant 0 : i32
    return %arg0, %c0_i32 : i32, i32
  }
}

module attributes {stable_mosaic.version = 11 : i64} {
  func.func @_bn_stats_kernel(%arg0: i32, %arg1: memref<128x48xf32, #tpu.memory_space<vmem>>, %arg2: memref<1x48xf32, #tpu.memory_space<vmem>>, %arg3: memref<1x48xf32, #tpu.memory_space<vmem>>) attributes {dimension_semantics = [#tpu.dimension_semantics<arbitrary>], iteration_bounds = array<i64: 1>, scalar_prefetch = 0 : i64, scratch_operands = 0 : i64, tpu.core_type = #tpu.core_type<tc>, window_params = [{transform_indices = @transform_0, window_bounds = array<i64: 128, 48>}, {pipeline_mode = #tpu.pipeline_mode<synchronous>, transform_indices = @transform_1, window_bounds = array<i64: 1, 48>}, {pipeline_mode = #tpu.pipeline_mode<synchronous>, transform_indices = @transform_2, window_bounds = array<i64: 1, 48>}]} {
    %c0_i32 = arith.constant 0 : i32
    %0 = arith.cmpi eq, %arg0, %c0_i32 : i32
    %1 = arith.extui %0 : i1 to i32
    %c0_i32_0 = arith.constant 0 : i32
    %2 = arith.cmpi ne, %1, %c0_i32_0 : i32
    scf.if %2 {
      %cst_11 = arith.constant 0.000000e+00 : f32
      %15 = vector.broadcast %cst_11 : f32 to vector<1x48xf32>
      %c0_12 = arith.constant 0 : index
      %c0_13 = arith.constant 0 : index
      %16 = vector.load %arg2[%c0_12, %c0_13] : memref<1x48xf32, #tpu.memory_space<vmem>>, vector<1x48xf32>
      tpu.vector_store %arg2[%c0_12, %c0_13], %15 {strides = array<i32>} : memref<1x48xf32, #tpu.memory_space<vmem>>, vector<1x48xf32>,
      %cst_14 = arith.constant 0.000000e+00 : f32
      %17 = vector.broadcast %cst_14 : f32 to vector<1x48xf32>
      %c0_15 = arith.constant 0 : index
      %c0_16 = arith.constant 0 : index
      %18 = vector.load %arg3[%c0_15, %c0_16] : memref<1x48xf32, #tpu.memory_space<vmem>>, vector<1x48xf32>
      tpu.vector_store %arg3[%c0_15, %c0_16], %17 {strides = array<i32>} : memref<1x48xf32, #tpu.memory_space<vmem>>, vector<1x48xf32>,
    } else {
    }
    %c0 = arith.constant 0 : index
    %c0_1 = arith.constant 0 : index
    %3 = vector.load %arg1[%c0, %c0_1] : memref<128x48xf32, #tpu.memory_space<vmem>>, vector<128x48xf32>
    %c0_2 = arith.constant 0 : index
    %c0_3 = arith.constant 0 : index
    %4 = vector.load %arg2[%c0_2, %c0_3] : memref<1x48xf32, #tpu.memory_space<vmem>>, vector<1x48xf32>
    %cst = arith.constant dense<0.000000e+00> : vector<48xf32>
    %5 = vector.multi_reduction <add>, %3, %cst [0] : vector<128x48xf32> to vector<48xf32>
    %6 = vector.shape_cast %5 : vector<48xf32> to vector<1x48xf32>
    %7 = arith.addf %4, %6 : vector<1x48xf32>
    %c0_4 = arith.constant 0 : index
    %c0_5 = arith.constant 0 : index
    %8 = vector.load %arg2[%c0_4, %c0_5] : memref<1x48xf32, #tpu.memory_space<vmem>>, vector<1x48xf32>
    tpu.vector_store %arg2[%c0_4, %c0_5], %7 {strides = array<i32>} : memref<1x48xf32, #tpu.memory_space<vmem>>, vector<1x48xf32>,
    %c0_6 = arith.constant 0 : index
    %c0_7 = arith.constant 0 : index
    %9 = vector.load %arg3[%c0_6, %c0_7] : memref<1x48xf32, #tpu.memory_space<vmem>>, vector<1x48xf32>
    %10 = arith.mulf %3, %3 : vector<128x48xf32>
    %cst_8 = arith.constant dense<0.000000e+00> : vector<48xf32>
    %11 = vector.multi_reduction <add>, %10, %cst_8 [0] : vector<128x48xf32> to vector<48xf32>
    %12 = vector.shape_cast %11 : vector<48xf32> to vector<1x48xf32>
    %13 = arith.addf %9, %12 : vector<1x48xf32>
    %c0_9 = arith.constant 0 : index
    %c0_10 = arith.constant 0 : index
    %14 = vector.load %arg3[%c0_9, %c0_10] : memref<1x48xf32, #tpu.memory_space<vmem>>, vector<1x48xf32>
    tpu.vector_store %arg3[%c0_9, %c0_10], %13 {strides = array<i32>} : memref<1x48xf32, #tpu.memory_space<vmem>>, vector<1x48xf32>,
    return
  }
  func.func @transform_0(%arg0: i32) -> (i32, i32) {
    %c0_i32 = arith.constant 0 : i32
    %c0_i32_0 = arith.constant 0 : i32
    return %arg0, %c0_i32 : i32, i32
  }
  func.func @transform_1(%arg0: i32) -> (i32, i32) {
    %c0_i32 = arith.constant 0 : i32
    %c0_i32_0 = arith.constant 0 : i32
    %c0_i32_1 = arith.constant 0 : i32
    return %c0_i32, %c0_i32_0 : i32, i32
  }
  func.func @transform_2(%arg0: i32) -> (i32, i32) {
    %c0_i32 = arith.constant 0 : i32
    %c0_i32_0 = arith.constant 0 : i32
    %c0_i32_1 = arith.constant 0 : i32
    return %c0_i32, %c0_i32_0 : i32, i32
  }
}

module attributes {stable_mosaic.version = 11 : i64} {
  func.func @_matmul_bnrelu_kernel(%arg0: i32, %arg1: memref<128x48xf32, #tpu.memory_space<vmem>>, %arg2: memref<1x48xf32, #tpu.memory_space<vmem>>, %arg3: memref<1x48xf32, #tpu.memory_space<vmem>>, %arg4: memref<48x128xbf16, #tpu.memory_space<vmem>>, %arg5: memref<128x128xf32, #tpu.memory_space<vmem>>) attributes {dimension_semantics = [#tpu.dimension_semantics<parallel>], iteration_bounds = array<i64: 1>, scalar_prefetch = 0 : i64, scratch_operands = 0 : i64, tpu.core_type = #tpu.core_type<tc>, window_params = [{transform_indices = @transform_0, window_bounds = array<i64: 128, 48>}, {pipeline_mode = #tpu.pipeline_mode<synchronous>, transform_indices = @transform_1, window_bounds = array<i64: 1, 48>}, {pipeline_mode = #tpu.pipeline_mode<synchronous>, transform_indices = @transform_2, window_bounds = array<i64: 1, 48>}, {pipeline_mode = #tpu.pipeline_mode<synchronous>, transform_indices = @transform_3, window_bounds = array<i64: 48, 128>}, {transform_indices = @transform_4, window_bounds = array<i64: 128, 128>}]} {
    %c0 = arith.constant 0 : index
    %c0_0 = arith.constant 0 : index
    %0 = vector.load %arg1[%c0, %c0_0] : memref<128x48xf32, #tpu.memory_space<vmem>>, vector<128x48xf32>
    %c0_1 = arith.constant 0 : index
    %c0_2 = arith.constant 0 : index
    %1 = vector.load %arg2[%c0_1, %c0_2] : memref<1x48xf32, #tpu.memory_space<vmem>>, vector<1x48xf32>
    %2 = vector.broadcast %1 : vector<1x48xf32> to vector<128x48xf32>
    %3 = arith.mulf %0, %2 : vector<128x48xf32>
    %c0_3 = arith.constant 0 : index
    %c0_4 = arith.constant 0 : index
    %4 = vector.load %arg3[%c0_3, %c0_4] : memref<1x48xf32, #tpu.memory_space<vmem>>, vector<1x48xf32>
    %5 = vector.broadcast %4 : vector<1x48xf32> to vector<128x48xf32>
    %6 = arith.addf %3, %5 : vector<128x48xf32>
    %cst = arith.constant 0.000000e+00 : f32
    %7 = vector.broadcast %cst : f32 to vector<128x48xf32>
    %8 = arith.maximumf %6, %7 : vector<128x48xf32>
    %9 = arith.truncf %8 : vector<128x48xf32> to vector<128x48xbf16>
    %c0_5 = arith.constant 0 : index
    %c0_6 = arith.constant 0 : index
    %10 = vector.load %arg4[%c0_5, %c0_6] : memref<48x128xbf16, #tpu.memory_space<vmem>>, vector<48x128xbf16>
    %cst_7 = arith.constant dense<0.000000e+00> : vector<128x128xf32>
    %11 = tpu.matmul %9, %10, %cst_7 {dimension_numbers = #tpu.dot_dimension_numbers<[1], [0], [0], [1], [0, 0, 1, 1], [], []>} : vector<128x48xbf16>, vector<48x128xbf16>, vector<128x128xf32> -> vector<128x128xf32>
    %c0_8 = arith.constant 0 : index
    %c0_9 = arith.constant 0 : index
    %12 = vector.load %arg5[%c0_8, %c0_9] : memref<128x128xf32, #tpu.memory_space<vmem>>, vector<128x128xf32>
    tpu.vector_store %arg5[%c0_8, %c0_9], %11 {strides = array<i32>} : memref<128x128xf32, #tpu.memory_space<vmem>>, vector<128x128xf32>,
    return
  }
  func.func @transform_0(%arg0: i32) -> (i32, i32) {
    %c0_i32 = arith.constant 0 : i32
    %c0_i32_0 = arith.constant 0 : i32
    return %arg0, %c0_i32 : i32, i32
  }
  func.func @transform_1(%arg0: i32) -> (i32, i32) {
    %c0_i32 = arith.constant 0 : i32
    %c0_i32_0 = arith.constant 0 : i32
    %c0_i32_1 = arith.constant 0 : i32
    return %c0_i32, %c0_i32_0 : i32, i32
  }
  func.func @transform_2(%arg0: i32) -> (i32, i32) {
    %c0_i32 = arith.constant 0 : i32
    %c0_i32_0 = arith.constant 0 : i32
    %c0_i32_1 = arith.constant 0 : i32
    return %c0_i32, %c0_i32_0 : i32, i32
  }
  func.func @transform_3(%arg0: i32) -> (i32, i32) {
    %c0_i32 = arith.constant 0 : i32
    %c0_i32_0 = arith.constant 0 : i32
    %c0_i32_1 = arith.constant 0 : i32
    return %c0_i32, %c0_i32_0 : i32, i32
  }
  func.func @transform_4(%arg0: i32) -> (i32, i32) {
    %c0_i32 = arith.constant 0 : i32
    %c0_i32_0 = arith.constant 0 : i32
    return %arg0, %c0_i32 : i32, i32
  }
}

module attributes {stable_mosaic.version = 11 : i64} {
  func.func @_affine_relu_avgpool_kernel(%arg0: i32, %arg1: memref<4x32x64xf32, #tpu.memory_space<vmem>>, %arg2: memref<1x64xf32, #tpu.memory_space<vmem>>, %arg3: memref<1x64xf32, #tpu.memory_space<vmem>>, %arg4: memref<32x64xbf16, #tpu.memory_space<vmem>>) attributes {dimension_semantics = [#tpu.dimension_semantics<parallel>], iteration_bounds = array<i64: 1>, scalar_prefetch = 0 : i64, scratch_operands = 0 : i64, tpu.core_type = #tpu.core_type<tc>, window_params = [{transform_indices = @transform_0, window_bounds = array<i64: 4, 32, 64>}, {pipeline_mode = #tpu.pipeline_mode<synchronous>, transform_indices = @transform_1, window_bounds = array<i64: 1, 64>}, {pipeline_mode = #tpu.pipeline_mode<synchronous>, transform_indices = @transform_2, window_bounds = array<i64: 1, 64>}, {transform_indices = @transform_3, window_bounds = array<i64: 32, 64>}]} {
    %c0 = arith.constant 0 : index
    %c0_0 = arith.constant 0 : index
    %c0_1 = arith.constant 0 : index
    %0 = vector.load %arg1[%c0, %c0_0, %c0_1] : memref<4x32x64xf32, #tpu.memory_space<vmem>>, vector<4x32x64xf32>
    %c0_2 = arith.constant 0 : index
    %c0_3 = arith.constant 0 : index
    %1 = vector.load %arg2[%c0_2, %c0_3] : memref<1x64xf32, #tpu.memory_space<vmem>>, vector<1x64xf32>
    %2 = vector.shape_cast %1 : vector<1x64xf32> to vector<1x1x64xf32>
    %3 = vector.broadcast %2 : vector<1x1x64xf32> to vector<4x32x64xf32>
    %4 = arith.mulf %0, %3 : vector<4x32x64xf32>
    %c0_4 = arith.constant 0 : index
    %c0_5 = arith.constant 0 : index
    %5 = vector.load %arg3[%c0_4, %c0_5] : memref<1x64xf32, #tpu.memory_space<vmem>>, vector<1x64xf32>
    %6 = vector.shape_cast %5 : vector<1x64xf32> to vector<1x1x64xf32>
    %7 = vector.broadcast %6 : vector<1x1x64xf32> to vector<4x32x64xf32>
    %8 = arith.addf %4, %7 : vector<4x32x64xf32>
    %cst = arith.constant 0.000000e+00 : f32
    %9 = vector.broadcast %cst : f32 to vector<4x32x64xf32>
    %10 = arith.maximumf %8, %9 : vector<4x32x64xf32>
    %cst_6 = arith.constant dense<0.000000e+00> : vector<32x64xf32>
    %11 = vector.multi_reduction <add>, %10, %cst_6 [0] : vector<4x32x64xf32> to vector<32x64xf32>
    %cst_7 = arith.constant 4.000000e+00 : f32
    %12 = vector.broadcast %cst_7 : f32 to vector<32x64xf32>
    %13 = arith.divf %11, %12 : vector<32x64xf32>
    %14 = arith.truncf %13 : vector<32x64xf32> to vector<32x64xbf16>
    %c0_8 = arith.constant 0 : index
    %c0_9 = arith.constant 0 : index
    %15 = vector.load %arg4[%c0_8, %c0_9] : memref<32x64xbf16, #tpu.memory_space<vmem>>, vector<32x64xbf16>
    tpu.vector_store %arg4[%c0_8, %c0_9], %14 {strides = array<i32>} : memref<32x64xbf16, #tpu.memory_space<vmem>>, vector<32x64xbf16>,
    return
  }
  func.func @transform_0(%arg0: i32) -> (i32, i32, i32) {
    %c0_i32 = arith.constant 0 : i32
    %c0_i32_0 = arith.constant 0 : i32
    %c0_i32_1 = arith.constant 0 : i32
    return %c0_i32, %arg0, %c0_i32_0 : i32, i32, i32
  }
  func.func @transform_1(%arg0: i32) -> (i32, i32) {
    %c0_i32 = arith.constant 0 : i32
    %c0_i32_0 = arith.constant 0 : i32
    %c0_i32_1 = arith.constant 0 : i32
    return %c0_i32, %c0_i32_0 : i32, i32
  }
  func.func @transform_2(%arg0: i32) -> (i32, i32) {
    %c0_i32 = arith.constant 0 : i32
    %c0_i32_0 = arith.constant 0 : i32
    %c0_i32_1 = arith.constant 0 : i32
    return %c0_i32, %c0_i32_0 : i32, i32
  }
  func.func @transform_3(%arg0: i32) -> (i32, i32) {
    %c0_i32 = arith.constant 0 : i32
    %c0_i32_0 = arith.constant 0 : i32
    return %arg0, %c0_i32 : i32, i32
  }
}

module attributes {stable_mosaic.version = 11 : i64} {
  func.func @_matmul_single_kernel(%arg0: i32, %arg1: memref<32x64xbf16, #tpu.memory_space<vmem>>, %arg2: memref<64x128xbf16, #tpu.memory_space<vmem>>, %arg3: memref<32x128xf32, #tpu.memory_space<vmem>>) attributes {dimension_semantics = [#tpu.dimension_semantics<parallel>], iteration_bounds = array<i64: 1>, scalar_prefetch = 0 : i64, scratch_operands = 0 : i64, tpu.core_type = #tpu.core_type<tc>, window_params = [{transform_indices = @transform_0, window_bounds = array<i64: 32, 64>}, {pipeline_mode = #tpu.pipeline_mode<synchronous>, transform_indices = @transform_1, window_bounds = array<i64: 64, 128>}, {transform_indices = @transform_2, window_bounds = array<i64: 32, 128>}]} {
    %c0 = arith.constant 0 : index
    %c0_0 = arith.constant 0 : index
    %0 = vector.load %arg1[%c0, %c0_0] : memref<32x64xbf16, #tpu.memory_space<vmem>>, vector<32x64xbf16>
    %c0_1 = arith.constant 0 : index
    %c0_2 = arith.constant 0 : index
    %1 = vector.load %arg2[%c0_1, %c0_2] : memref<64x128xbf16, #tpu.memory_space<vmem>>, vector<64x128xbf16>
    %cst = arith.constant dense<0.000000e+00> : vector<32x128xf32>
    %2 = tpu.matmul %0, %1, %cst {dimension_numbers = #tpu.dot_dimension_numbers<[1], [0], [0], [1], [0, 0, 1, 1], [], []>} : vector<32x64xbf16>, vector<64x128xbf16>, vector<32x128xf32> -> vector<32x128xf32>
    %c0_3 = arith.constant 0 : index
    %c0_4 = arith.constant 0 : index
    %3 = vector.load %arg3[%c0_3, %c0_4] : memref<32x128xf32, #tpu.memory_space<vmem>>, vector<32x128xf32>
    tpu.vector_store %arg3[%c0_3, %c0_4], %2 {strides = array<i32>} : memref<32x128xf32, #tpu.memory_space<vmem>>, vector<32x128xf32>,
    return
  }
  func.func @transform_0(%arg0: i32) -> (i32, i32) {
    %c0_i32 = arith.constant 0 : i32
    %c0_i32_0 = arith.constant 0 : i32
    return %arg0, %c0_i32 : i32, i32
  }
  func.func @transform_1(%arg0: i32) -> (i32, i32) {
    %c0_i32 = arith.constant 0 : i32
    %c0_i32_0 = arith.constant 0 : i32
    %c0_i32_1 = arith.constant 0 : i32
    return %c0_i32, %c0_i32_0 : i32, i32
  }
  func.func @transform_2(%arg0: i32) -> (i32, i32) {
    %c0_i32 = arith.constant 0 : i32
    %c0_i32_0 = arith.constant 0 : i32
    return %arg0, %c0_i32 : i32, i32
  }
}

module attributes {stable_mosaic.version = 11 : i64} {
  func.func @_bn_stats_kernel(%arg0: i32, %arg1: memref<32x32xf32, #tpu.memory_space<vmem>>, %arg2: memref<1x32xf32, #tpu.memory_space<vmem>>, %arg3: memref<1x32xf32, #tpu.memory_space<vmem>>) attributes {dimension_semantics = [#tpu.dimension_semantics<arbitrary>], iteration_bounds = array<i64: 1>, scalar_prefetch = 0 : i64, scratch_operands = 0 : i64, tpu.core_type = #tpu.core_type<tc>, window_params = [{transform_indices = @transform_0, window_bounds = array<i64: 32, 32>}, {pipeline_mode = #tpu.pipeline_mode<synchronous>, transform_indices = @transform_1, window_bounds = array<i64: 1, 32>}, {pipeline_mode = #tpu.pipeline_mode<synchronous>, transform_indices = @transform_2, window_bounds = array<i64: 1, 32>}]} {
    %c0_i32 = arith.constant 0 : i32
    %0 = arith.cmpi eq, %arg0, %c0_i32 : i32
    %1 = arith.extui %0 : i1 to i32
    %c0_i32_0 = arith.constant 0 : i32
    %2 = arith.cmpi ne, %1, %c0_i32_0 : i32
    scf.if %2 {
      %cst_11 = arith.constant 0.000000e+00 : f32
      %15 = vector.broadcast %cst_11 : f32 to vector<1x32xf32>
      %c0_12 = arith.constant 0 : index
      %c0_13 = arith.constant 0 : index
      %16 = vector.load %arg2[%c0_12, %c0_13] : memref<1x32xf32, #tpu.memory_space<vmem>>, vector<1x32xf32>
      tpu.vector_store %arg2[%c0_12, %c0_13], %15 {strides = array<i32>} : memref<1x32xf32, #tpu.memory_space<vmem>>, vector<1x32xf32>,
      %cst_14 = arith.constant 0.000000e+00 : f32
      %17 = vector.broadcast %cst_14 : f32 to vector<1x32xf32>
      %c0_15 = arith.constant 0 : index
      %c0_16 = arith.constant 0 : index
      %18 = vector.load %arg3[%c0_15, %c0_16] : memref<1x32xf32, #tpu.memory_space<vmem>>, vector<1x32xf32>
      tpu.vector_store %arg3[%c0_15, %c0_16], %17 {strides = array<i32>} : memref<1x32xf32, #tpu.memory_space<vmem>>, vector<1x32xf32>,
    } else {
    }
    %c0 = arith.constant 0 : index
    %c0_1 = arith.constant 0 : index
    %3 = vector.load %arg1[%c0, %c0_1] : memref<32x32xf32, #tpu.memory_space<vmem>>, vector<32x32xf32>
    %c0_2 = arith.constant 0 : index
    %c0_3 = arith.constant 0 : index
    %4 = vector.load %arg2[%c0_2, %c0_3] : memref<1x32xf32, #tpu.memory_space<vmem>>, vector<1x32xf32>
    %cst = arith.constant dense<0.000000e+00> : vector<32xf32>
    %5 = vector.multi_reduction <add>, %3, %cst [0] : vector<32x32xf32> to vector<32xf32>
    %6 = vector.shape_cast %5 : vector<32xf32> to vector<1x32xf32>
    %7 = arith.addf %4, %6 : vector<1x32xf32>
    %c0_4 = arith.constant 0 : index
    %c0_5 = arith.constant 0 : index
    %8 = vector.load %arg2[%c0_4, %c0_5] : memref<1x32xf32, #tpu.memory_space<vmem>>, vector<1x32xf32>
    tpu.vector_store %arg2[%c0_4, %c0_5], %7 {strides = array<i32>} : memref<1x32xf32, #tpu.memory_space<vmem>>, vector<1x32xf32>,
    %c0_6 = arith.constant 0 : index
    %c0_7 = arith.constant 0 : index
    %9 = vector.load %arg3[%c0_6, %c0_7] : memref<1x32xf32, #tpu.memory_space<vmem>>, vector<1x32xf32>
    %10 = arith.mulf %3, %3 : vector<32x32xf32>
    %cst_8 = arith.constant dense<0.000000e+00> : vector<32xf32>
    %11 = vector.multi_reduction <add>, %10, %cst_8 [0] : vector<32x32xf32> to vector<32xf32>
    %12 = vector.shape_cast %11 : vector<32xf32> to vector<1x32xf32>
    %13 = arith.addf %9, %12 : vector<1x32xf32>
    %c0_9 = arith.constant 0 : index
    %c0_10 = arith.constant 0 : index
    %14 = vector.load %arg3[%c0_9, %c0_10] : memref<1x32xf32, #tpu.memory_space<vmem>>, vector<1x32xf32>
    tpu.vector_store %arg3[%c0_9, %c0_10], %13 {strides = array<i32>} : memref<1x32xf32, #tpu.memory_space<vmem>>, vector<1x32xf32>,
    return
  }
  func.func @transform_0(%arg0: i32) -> (i32, i32) {
    %c0_i32 = arith.constant 0 : i32
    %c0_i32_0 = arith.constant 0 : i32
    return %arg0, %c0_i32 : i32, i32
  }
  func.func @transform_1(%arg0: i32) -> (i32, i32) {
    %c0_i32 = arith.constant 0 : i32
    %c0_i32_0 = arith.constant 0 : i32
    %c0_i32_1 = arith.constant 0 : i32
    return %c0_i32, %c0_i32_0 : i32, i32
  }
  func.func @transform_2(%arg0: i32) -> (i32, i32) {
    %c0_i32 = arith.constant 0 : i32
    %c0_i32_0 = arith.constant 0 : i32
    %c0_i32_1 = arith.constant 0 : i32
    return %c0_i32, %c0_i32_0 : i32, i32
  }
}

module attributes {stable_mosaic.version = 11 : i64} {
  func.func @_matmul_bnrelu_kernel(%arg0: i32, %arg1: memref<32x32xf32, #tpu.memory_space<vmem>>, %arg2: memref<1x32xf32, #tpu.memory_space<vmem>>, %arg3: memref<1x32xf32, #tpu.memory_space<vmem>>, %arg4: memref<32x128xbf16, #tpu.memory_space<vmem>>, %arg5: memref<32x128xf32, #tpu.memory_space<vmem>>) attributes {dimension_semantics = [#tpu.dimension_semantics<parallel>], iteration_bounds = array<i64: 1>, scalar_prefetch = 0 : i64, scratch_operands = 0 : i64, tpu.core_type = #tpu.core_type<tc>, window_params = [{transform_indices = @transform_0, window_bounds = array<i64: 32, 32>}, {pipeline_mode = #tpu.pipeline_mode<synchronous>, transform_indices = @transform_1, window_bounds = array<i64: 1, 32>}, {pipeline_mode = #tpu.pipeline_mode<synchronous>, transform_indices = @transform_2, window_bounds = array<i64: 1, 32>}, {pipeline_mode = #tpu.pipeline_mode<synchronous>, transform_indices = @transform_3, window_bounds = array<i64: 32, 128>}, {transform_indices = @transform_4, window_bounds = array<i64: 32, 128>}]} {
    %c0 = arith.constant 0 : index
    %c0_0 = arith.constant 0 : index
    %0 = vector.load %arg1[%c0, %c0_0] : memref<32x32xf32, #tpu.memory_space<vmem>>, vector<32x32xf32>
    %c0_1 = arith.constant 0 : index
    %c0_2 = arith.constant 0 : index
    %1 = vector.load %arg2[%c0_1, %c0_2] : memref<1x32xf32, #tpu.memory_space<vmem>>, vector<1x32xf32>
    %2 = vector.broadcast %1 : vector<1x32xf32> to vector<32x32xf32>
    %3 = arith.mulf %0, %2 : vector<32x32xf32>
    %c0_3 = arith.constant 0 : index
    %c0_4 = arith.constant 0 : index
    %4 = vector.load %arg3[%c0_3, %c0_4] : memref<1x32xf32, #tpu.memory_space<vmem>>, vector<1x32xf32>
    %5 = vector.broadcast %4 : vector<1x32xf32> to vector<32x32xf32>
    %6 = arith.addf %3, %5 : vector<32x32xf32>
    %cst = arith.constant 0.000000e+00 : f32
    %7 = vector.broadcast %cst : f32 to vector<32x32xf32>
    %8 = arith.maximumf %6, %7 : vector<32x32xf32>
    %9 = arith.truncf %8 : vector<32x32xf32> to vector<32x32xbf16>
    %c0_5 = arith.constant 0 : index
    %c0_6 = arith.constant 0 : index
    %10 = vector.load %arg4[%c0_5, %c0_6] : memref<32x128xbf16, #tpu.memory_space<vmem>>, vector<32x128xbf16>
    %cst_7 = arith.constant dense<0.000000e+00> : vector<32x128xf32>
    %11 = tpu.matmul %9, %10, %cst_7 {dimension_numbers = #tpu.dot_dimension_numbers<[1], [0], [0], [1], [0, 0, 1, 1], [], []>} : vector<32x32xbf16>, vector<32x128xbf16>, vector<32x128xf32> -> vector<32x128xf32>
    %c0_8 = arith.constant 0 : index
    %c0_9 = arith.constant 0 : index
    %12 = vector.load %arg5[%c0_8, %c0_9] : memref<32x128xf32, #tpu.memory_space<vmem>>, vector<32x128xf32>
    tpu.vector_store %arg5[%c0_8, %c0_9], %11 {strides = array<i32>} : memref<32x128xf32, #tpu.memory_space<vmem>>, vector<32x128xf32>,
    return
  }
  func.func @transform_0(%arg0: i32) -> (i32, i32) {
    %c0_i32 = arith.constant 0 : i32
    %c0_i32_0 = arith.constant 0 : i32
    return %arg0, %c0_i32 : i32, i32
  }
  func.func @transform_1(%arg0: i32) -> (i32, i32) {
    %c0_i32 = arith.constant 0 : i32
    %c0_i32_0 = arith.constant 0 : i32
    %c0_i32_1 = arith.constant 0 : i32
    return %c0_i32, %c0_i32_0 : i32, i32
  }
  func.func @transform_2(%arg0: i32) -> (i32, i32) {
    %c0_i32 = arith.constant 0 : i32
    %c0_i32_0 = arith.constant 0 : i32
    %c0_i32_1 = arith.constant 0 : i32
    return %c0_i32, %c0_i32_0 : i32, i32
  }
  func.func @transform_3(%arg0: i32) -> (i32, i32) {
    %c0_i32 = arith.constant 0 : i32
    %c0_i32_0 = arith.constant 0 : i32
    %c0_i32_1 = arith.constant 0 : i32
    return %c0_i32, %c0_i32_0 : i32, i32
  }
  func.func @transform_4(%arg0: i32) -> (i32, i32) {
    %c0_i32 = arith.constant 0 : i32
    %c0_i32_0 = arith.constant 0 : i32
    return %arg0, %c0_i32 : i32, i32
  }
}

module attributes {stable_mosaic.version = 11 : i64} {
  func.func @_bn_stats_kernel(%arg0: i32, %arg1: memref<32x64xf32, #tpu.memory_space<vmem>>, %arg2: memref<1x64xf32, #tpu.memory_space<vmem>>, %arg3: memref<1x64xf32, #tpu.memory_space<vmem>>) attributes {dimension_semantics = [#tpu.dimension_semantics<arbitrary>], iteration_bounds = array<i64: 1>, scalar_prefetch = 0 : i64, scratch_operands = 0 : i64, tpu.core_type = #tpu.core_type<tc>, window_params = [{transform_indices = @transform_0, window_bounds = array<i64: 32, 64>}, {pipeline_mode = #tpu.pipeline_mode<synchronous>, transform_indices = @transform_1, window_bounds = array<i64: 1, 64>}, {pipeline_mode = #tpu.pipeline_mode<synchronous>, transform_indices = @transform_2, window_bounds = array<i64: 1, 64>}]} {
    %c0_i32 = arith.constant 0 : i32
    %0 = arith.cmpi eq, %arg0, %c0_i32 : i32
    %1 = arith.extui %0 : i1 to i32
    %c0_i32_0 = arith.constant 0 : i32
    %2 = arith.cmpi ne, %1, %c0_i32_0 : i32
    scf.if %2 {
      %cst_11 = arith.constant 0.000000e+00 : f32
      %15 = vector.broadcast %cst_11 : f32 to vector<1x64xf32>
      %c0_12 = arith.constant 0 : index
      %c0_13 = arith.constant 0 : index
      %16 = vector.load %arg2[%c0_12, %c0_13] : memref<1x64xf32, #tpu.memory_space<vmem>>, vector<1x64xf32>
      tpu.vector_store %arg2[%c0_12, %c0_13], %15 {strides = array<i32>} : memref<1x64xf32, #tpu.memory_space<vmem>>, vector<1x64xf32>,
      %cst_14 = arith.constant 0.000000e+00 : f32
      %17 = vector.broadcast %cst_14 : f32 to vector<1x64xf32>
      %c0_15 = arith.constant 0 : index
      %c0_16 = arith.constant 0 : index
      %18 = vector.load %arg3[%c0_15, %c0_16] : memref<1x64xf32, #tpu.memory_space<vmem>>, vector<1x64xf32>
      tpu.vector_store %arg3[%c0_15, %c0_16], %17 {strides = array<i32>} : memref<1x64xf32, #tpu.memory_space<vmem>>, vector<1x64xf32>,
    } else {
    }
    %c0 = arith.constant 0 : index
    %c0_1 = arith.constant 0 : index
    %3 = vector.load %arg1[%c0, %c0_1] : memref<32x64xf32, #tpu.memory_space<vmem>>, vector<32x64xf32>
    %c0_2 = arith.constant 0 : index
    %c0_3 = arith.constant 0 : index
    %4 = vector.load %arg2[%c0_2, %c0_3] : memref<1x64xf32, #tpu.memory_space<vmem>>, vector<1x64xf32>
    %cst = arith.constant dense<0.000000e+00> : vector<64xf32>
    %5 = vector.multi_reduction <add>, %3, %cst [0] : vector<32x64xf32> to vector<64xf32>
    %6 = vector.shape_cast %5 : vector<64xf32> to vector<1x64xf32>
    %7 = arith.addf %4, %6 : vector<1x64xf32>
    %c0_4 = arith.constant 0 : index
    %c0_5 = arith.constant 0 : index
    %8 = vector.load %arg2[%c0_4, %c0_5] : memref<1x64xf32, #tpu.memory_space<vmem>>, vector<1x64xf32>
    tpu.vector_store %arg2[%c0_4, %c0_5], %7 {strides = array<i32>} : memref<1x64xf32, #tpu.memory_space<vmem>>, vector<1x64xf32>,
    %c0_6 = arith.constant 0 : index
    %c0_7 = arith.constant 0 : index
    %9 = vector.load %arg3[%c0_6, %c0_7] : memref<1x64xf32, #tpu.memory_space<vmem>>, vector<1x64xf32>
    %10 = arith.mulf %3, %3 : vector<32x64xf32>
    %cst_8 = arith.constant dense<0.000000e+00> : vector<64xf32>
    %11 = vector.multi_reduction <add>, %10, %cst_8 [0] : vector<32x64xf32> to vector<64xf32>
    %12 = vector.shape_cast %11 : vector<64xf32> to vector<1x64xf32>
    %13 = arith.addf %9, %12 : vector<1x64xf32>
    %c0_9 = arith.constant 0 : index
    %c0_10 = arith.constant 0 : index
    %14 = vector.load %arg3[%c0_9, %c0_10] : memref<1x64xf32, #tpu.memory_space<vmem>>, vector<1x64xf32>
    tpu.vector_store %arg3[%c0_9, %c0_10], %13 {strides = array<i32>} : memref<1x64xf32, #tpu.memory_space<vmem>>, vector<1x64xf32>,
    return
  }
  func.func @transform_0(%arg0: i32) -> (i32, i32) {
    %c0_i32 = arith.constant 0 : i32
    %c0_i32_0 = arith.constant 0 : i32
    return %arg0, %c0_i32 : i32, i32
  }
  func.func @transform_1(%arg0: i32) -> (i32, i32) {
    %c0_i32 = arith.constant 0 : i32
    %c0_i32_0 = arith.constant 0 : i32
    %c0_i32_1 = arith.constant 0 : i32
    return %c0_i32, %c0_i32_0 : i32, i32
  }
  func.func @transform_2(%arg0: i32) -> (i32, i32) {
    %c0_i32 = arith.constant 0 : i32
    %c0_i32_0 = arith.constant 0 : i32
    %c0_i32_1 = arith.constant 0 : i32
    return %c0_i32, %c0_i32_0 : i32, i32
  }
}

module attributes {stable_mosaic.version = 11 : i64} {
  func.func @_affine_relu_kernel(%arg0: i32, %arg1: memref<32x64xf32, #tpu.memory_space<vmem>>, %arg2: memref<1x64xf32, #tpu.memory_space<vmem>>, %arg3: memref<1x64xf32, #tpu.memory_space<vmem>>, %arg4: memref<32x64xbf16, #tpu.memory_space<vmem>>) attributes {dimension_semantics = [#tpu.dimension_semantics<parallel>], iteration_bounds = array<i64: 1>, scalar_prefetch = 0 : i64, scratch_operands = 0 : i64, tpu.core_type = #tpu.core_type<tc>, window_params = [{transform_indices = @transform_0, window_bounds = array<i64: 32, 64>}, {pipeline_mode = #tpu.pipeline_mode<synchronous>, transform_indices = @transform_1, window_bounds = array<i64: 1, 64>}, {pipeline_mode = #tpu.pipeline_mode<synchronous>, transform_indices = @transform_2, window_bounds = array<i64: 1, 64>}, {transform_indices = @transform_3, window_bounds = array<i64: 32, 64>}]} {
    %c0 = arith.constant 0 : index
    %c0_0 = arith.constant 0 : index
    %0 = vector.load %arg1[%c0, %c0_0] : memref<32x64xf32, #tpu.memory_space<vmem>>, vector<32x64xf32>
    %c0_1 = arith.constant 0 : index
    %c0_2 = arith.constant 0 : index
    %1 = vector.load %arg2[%c0_1, %c0_2] : memref<1x64xf32, #tpu.memory_space<vmem>>, vector<1x64xf32>
    %2 = vector.broadcast %1 : vector<1x64xf32> to vector<32x64xf32>
    %3 = arith.mulf %0, %2 : vector<32x64xf32>
    %c0_3 = arith.constant 0 : index
    %c0_4 = arith.constant 0 : index
    %4 = vector.load %arg3[%c0_3, %c0_4] : memref<1x64xf32, #tpu.memory_space<vmem>>, vector<1x64xf32>
    %5 = vector.broadcast %4 : vector<1x64xf32> to vector<32x64xf32>
    %6 = arith.addf %3, %5 : vector<32x64xf32>
    %cst = arith.constant 0.000000e+00 : f32
    %7 = vector.broadcast %cst : f32 to vector<32x64xf32>
    %8 = arith.maximumf %6, %7 : vector<32x64xf32>
    %9 = arith.truncf %8 : vector<32x64xf32> to vector<32x64xbf16>
    %c0_5 = arith.constant 0 : index
    %c0_6 = arith.constant 0 : index
    %10 = vector.load %arg4[%c0_5, %c0_6] : memref<32x64xbf16, #tpu.memory_space<vmem>>, vector<32x64xbf16>
    tpu.vector_store %arg4[%c0_5, %c0_6], %9 {strides = array<i32>} : memref<32x64xbf16, #tpu.memory_space<vmem>>, vector<32x64xbf16>,
    return
  }
  func.func @transform_0(%arg0: i32) -> (i32, i32) {
    %c0_i32 = arith.constant 0 : i32
    %c0_i32_0 = arith.constant 0 : i32
    return %arg0, %c0_i32 : i32, i32
  }
  func.func @transform_1(%arg0: i32) -> (i32, i32) {
    %c0_i32 = arith.constant 0 : i32
    %c0_i32_0 = arith.constant 0 : i32
    %c0_i32_1 = arith.constant 0 : i32
    return %c0_i32, %c0_i32_0 : i32, i32
  }
  func.func @transform_2(%arg0: i32) -> (i32, i32) {
    %c0_i32 = arith.constant 0 : i32
    %c0_i32_0 = arith.constant 0 : i32
    %c0_i32_1 = arith.constant 0 : i32
    return %c0_i32, %c0_i32_0 : i32, i32
  }
  func.func @transform_3(%arg0: i32) -> (i32, i32) {
    %c0_i32 = arith.constant 0 : i32
    %c0_i32_0 = arith.constant 0 : i32
    return %arg0, %c0_i32 : i32, i32
  }
}

module attributes {stable_mosaic.version = 11 : i64} {
  func.func @_matmul_single_kernel(%arg0: i32, %arg1: memref<32x576xbf16, #tpu.memory_space<vmem>>, %arg2: memref<576x128xbf16, #tpu.memory_space<vmem>>, %arg3: memref<32x128xf32, #tpu.memory_space<vmem>>) attributes {dimension_semantics = [#tpu.dimension_semantics<parallel>], iteration_bounds = array<i64: 1>, scalar_prefetch = 0 : i64, scratch_operands = 0 : i64, tpu.core_type = #tpu.core_type<tc>, window_params = [{transform_indices = @transform_0, window_bounds = array<i64: 32, 576>}, {pipeline_mode = #tpu.pipeline_mode<synchronous>, transform_indices = @transform_1, window_bounds = array<i64: 576, 128>}, {transform_indices = @transform_2, window_bounds = array<i64: 32, 128>}]} {
    %c0 = arith.constant 0 : index
    %c0_0 = arith.constant 0 : index
    %0 = vector.load %arg1[%c0, %c0_0] : memref<32x576xbf16, #tpu.memory_space<vmem>>, vector<32x576xbf16>
    %c0_1 = arith.constant 0 : index
    %c0_2 = arith.constant 0 : index
    %1 = vector.load %arg2[%c0_1, %c0_2] : memref<576x128xbf16, #tpu.memory_space<vmem>>, vector<576x128xbf16>
    %cst = arith.constant dense<0.000000e+00> : vector<32x128xf32>
    %2 = tpu.matmul %0, %1, %cst {dimension_numbers = #tpu.dot_dimension_numbers<[1], [0], [0], [1], [0, 0, 1, 1], [], []>} : vector<32x576xbf16>, vector<576x128xbf16>, vector<32x128xf32> -> vector<32x128xf32>
    %c0_3 = arith.constant 0 : index
    %c0_4 = arith.constant 0 : index
    %3 = vector.load %arg3[%c0_3, %c0_4] : memref<32x128xf32, #tpu.memory_space<vmem>>, vector<32x128xf32>
    tpu.vector_store %arg3[%c0_3, %c0_4], %2 {strides = array<i32>} : memref<32x128xf32, #tpu.memory_space<vmem>>, vector<32x128xf32>,
    return
  }
  func.func @transform_0(%arg0: i32) -> (i32, i32) {
    %c0_i32 = arith.constant 0 : i32
    %c0_i32_0 = arith.constant 0 : i32
    return %arg0, %c0_i32 : i32, i32
  }
  func.func @transform_1(%arg0: i32) -> (i32, i32) {
    %c0_i32 = arith.constant 0 : i32
    %c0_i32_0 = arith.constant 0 : i32
    %c0_i32_1 = arith.constant 0 : i32
    return %c0_i32, %c0_i32_0 : i32, i32
  }
  func.func @transform_2(%arg0: i32) -> (i32, i32) {
    %c0_i32 = arith.constant 0 : i32
    %c0_i32_0 = arith.constant 0 : i32
    return %arg0, %c0_i32 : i32, i32
  }
}

module attributes {stable_mosaic.version = 11 : i64} {
  func.func @_bn_stats_kernel(%arg0: i32, %arg1: memref<32x48xf32, #tpu.memory_space<vmem>>, %arg2: memref<1x48xf32, #tpu.memory_space<vmem>>, %arg3: memref<1x48xf32, #tpu.memory_space<vmem>>) attributes {dimension_semantics = [#tpu.dimension_semantics<arbitrary>], iteration_bounds = array<i64: 1>, scalar_prefetch = 0 : i64, scratch_operands = 0 : i64, tpu.core_type = #tpu.core_type<tc>, window_params = [{transform_indices = @transform_0, window_bounds = array<i64: 32, 48>}, {pipeline_mode = #tpu.pipeline_mode<synchronous>, transform_indices = @transform_1, window_bounds = array<i64: 1, 48>}, {pipeline_mode = #tpu.pipeline_mode<synchronous>, transform_indices = @transform_2, window_bounds = array<i64: 1, 48>}]} {
    %c0_i32 = arith.constant 0 : i32
    %0 = arith.cmpi eq, %arg0, %c0_i32 : i32
    %1 = arith.extui %0 : i1 to i32
    %c0_i32_0 = arith.constant 0 : i32
    %2 = arith.cmpi ne, %1, %c0_i32_0 : i32
    scf.if %2 {
      %cst_11 = arith.constant 0.000000e+00 : f32
      %15 = vector.broadcast %cst_11 : f32 to vector<1x48xf32>
      %c0_12 = arith.constant 0 : index
      %c0_13 = arith.constant 0 : index
      %16 = vector.load %arg2[%c0_12, %c0_13] : memref<1x48xf32, #tpu.memory_space<vmem>>, vector<1x48xf32>
      tpu.vector_store %arg2[%c0_12, %c0_13], %15 {strides = array<i32>} : memref<1x48xf32, #tpu.memory_space<vmem>>, vector<1x48xf32>,
      %cst_14 = arith.constant 0.000000e+00 : f32
      %17 = vector.broadcast %cst_14 : f32 to vector<1x48xf32>
      %c0_15 = arith.constant 0 : index
      %c0_16 = arith.constant 0 : index
      %18 = vector.load %arg3[%c0_15, %c0_16] : memref<1x48xf32, #tpu.memory_space<vmem>>, vector<1x48xf32>
      tpu.vector_store %arg3[%c0_15, %c0_16], %17 {strides = array<i32>} : memref<1x48xf32, #tpu.memory_space<vmem>>, vector<1x48xf32>,
    } else {
    }
    %c0 = arith.constant 0 : index
    %c0_1 = arith.constant 0 : index
    %3 = vector.load %arg1[%c0, %c0_1] : memref<32x48xf32, #tpu.memory_space<vmem>>, vector<32x48xf32>
    %c0_2 = arith.constant 0 : index
    %c0_3 = arith.constant 0 : index
    %4 = vector.load %arg2[%c0_2, %c0_3] : memref<1x48xf32, #tpu.memory_space<vmem>>, vector<1x48xf32>
    %cst = arith.constant dense<0.000000e+00> : vector<48xf32>
    %5 = vector.multi_reduction <add>, %3, %cst [0] : vector<32x48xf32> to vector<48xf32>
    %6 = vector.shape_cast %5 : vector<48xf32> to vector<1x48xf32>
    %7 = arith.addf %4, %6 : vector<1x48xf32>
    %c0_4 = arith.constant 0 : index
    %c0_5 = arith.constant 0 : index
    %8 = vector.load %arg2[%c0_4, %c0_5] : memref<1x48xf32, #tpu.memory_space<vmem>>, vector<1x48xf32>
    tpu.vector_store %arg2[%c0_4, %c0_5], %7 {strides = array<i32>} : memref<1x48xf32, #tpu.memory_space<vmem>>, vector<1x48xf32>,
    %c0_6 = arith.constant 0 : index
    %c0_7 = arith.constant 0 : index
    %9 = vector.load %arg3[%c0_6, %c0_7] : memref<1x48xf32, #tpu.memory_space<vmem>>, vector<1x48xf32>
    %10 = arith.mulf %3, %3 : vector<32x48xf32>
    %cst_8 = arith.constant dense<0.000000e+00> : vector<48xf32>
    %11 = vector.multi_reduction <add>, %10, %cst_8 [0] : vector<32x48xf32> to vector<48xf32>
    %12 = vector.shape_cast %11 : vector<48xf32> to vector<1x48xf32>
    %13 = arith.addf %9, %12 : vector<1x48xf32>
    %c0_9 = arith.constant 0 : index
    %c0_10 = arith.constant 0 : index
    %14 = vector.load %arg3[%c0_9, %c0_10] : memref<1x48xf32, #tpu.memory_space<vmem>>, vector<1x48xf32>
    tpu.vector_store %arg3[%c0_9, %c0_10], %13 {strides = array<i32>} : memref<1x48xf32, #tpu.memory_space<vmem>>, vector<1x48xf32>,
    return
  }
  func.func @transform_0(%arg0: i32) -> (i32, i32) {
    %c0_i32 = arith.constant 0 : i32
    %c0_i32_0 = arith.constant 0 : i32
    return %arg0, %c0_i32 : i32, i32
  }
  func.func @transform_1(%arg0: i32) -> (i32, i32) {
    %c0_i32 = arith.constant 0 : i32
    %c0_i32_0 = arith.constant 0 : i32
    %c0_i32_1 = arith.constant 0 : i32
    return %c0_i32, %c0_i32_0 : i32, i32
  }
  func.func @transform_2(%arg0: i32) -> (i32, i32) {
    %c0_i32 = arith.constant 0 : i32
    %c0_i32_0 = arith.constant 0 : i32
    %c0_i32_1 = arith.constant 0 : i32
    return %c0_i32, %c0_i32_0 : i32, i32
  }
}

module attributes {stable_mosaic.version = 11 : i64} {
  func.func @_matmul_bnrelu_kernel(%arg0: i32, %arg1: memref<32x48xf32, #tpu.memory_space<vmem>>, %arg2: memref<1x48xf32, #tpu.memory_space<vmem>>, %arg3: memref<1x48xf32, #tpu.memory_space<vmem>>, %arg4: memref<48x128xbf16, #tpu.memory_space<vmem>>, %arg5: memref<32x128xf32, #tpu.memory_space<vmem>>) attributes {dimension_semantics = [#tpu.dimension_semantics<parallel>], iteration_bounds = array<i64: 1>, scalar_prefetch = 0 : i64, scratch_operands = 0 : i64, tpu.core_type = #tpu.core_type<tc>, window_params = [{transform_indices = @transform_0, window_bounds = array<i64: 32, 48>}, {pipeline_mode = #tpu.pipeline_mode<synchronous>, transform_indices = @transform_1, window_bounds = array<i64: 1, 48>}, {pipeline_mode = #tpu.pipeline_mode<synchronous>, transform_indices = @transform_2, window_bounds = array<i64: 1, 48>}, {pipeline_mode = #tpu.pipeline_mode<synchronous>, transform_indices = @transform_3, window_bounds = array<i64: 48, 128>}, {transform_indices = @transform_4, window_bounds = array<i64: 32, 128>}]} {
    %c0 = arith.constant 0 : index
    %c0_0 = arith.constant 0 : index
    %0 = vector.load %arg1[%c0, %c0_0] : memref<32x48xf32, #tpu.memory_space<vmem>>, vector<32x48xf32>
    %c0_1 = arith.constant 0 : index
    %c0_2 = arith.constant 0 : index
    %1 = vector.load %arg2[%c0_1, %c0_2] : memref<1x48xf32, #tpu.memory_space<vmem>>, vector<1x48xf32>
    %2 = vector.broadcast %1 : vector<1x48xf32> to vector<32x48xf32>
    %3 = arith.mulf %0, %2 : vector<32x48xf32>
    %c0_3 = arith.constant 0 : index
    %c0_4 = arith.constant 0 : index
    %4 = vector.load %arg3[%c0_3, %c0_4] : memref<1x48xf32, #tpu.memory_space<vmem>>, vector<1x48xf32>
    %5 = vector.broadcast %4 : vector<1x48xf32> to vector<32x48xf32>
    %6 = arith.addf %3, %5 : vector<32x48xf32>
    %cst = arith.constant 0.000000e+00 : f32
    %7 = vector.broadcast %cst : f32 to vector<32x48xf32>
    %8 = arith.maximumf %6, %7 : vector<32x48xf32>
    %9 = arith.truncf %8 : vector<32x48xf32> to vector<32x48xbf16>
    %c0_5 = arith.constant 0 : index
    %c0_6 = arith.constant 0 : index
    %10 = vector.load %arg4[%c0_5, %c0_6] : memref<48x128xbf16, #tpu.memory_space<vmem>>, vector<48x128xbf16>
    %cst_7 = arith.constant dense<0.000000e+00> : vector<32x128xf32>
    %11 = tpu.matmul %9, %10, %cst_7 {dimension_numbers = #tpu.dot_dimension_numbers<[1], [0], [0], [1], [0, 0, 1, 1], [], []>} : vector<32x48xbf16>, vector<48x128xbf16>, vector<32x128xf32> -> vector<32x128xf32>
    %c0_8 = arith.constant 0 : index
    %c0_9 = arith.constant 0 : index
    %12 = vector.load %arg5[%c0_8, %c0_9] : memref<32x128xf32, #tpu.memory_space<vmem>>, vector<32x128xf32>
    tpu.vector_store %arg5[%c0_8, %c0_9], %11 {strides = array<i32>} : memref<32x128xf32, #tpu.memory_space<vmem>>, vector<32x128xf32>,
    return
  }
  func.func @transform_0(%arg0: i32) -> (i32, i32) {
    %c0_i32 = arith.constant 0 : i32
    %c0_i32_0 = arith.constant 0 : i32
    return %arg0, %c0_i32 : i32, i32
  }
  func.func @transform_1(%arg0: i32) -> (i32, i32) {
    %c0_i32 = arith.constant 0 : i32
    %c0_i32_0 = arith.constant 0 : i32
    %c0_i32_1 = arith.constant 0 : i32
    return %c0_i32, %c0_i32_0 : i32, i32
  }
  func.func @transform_2(%arg0: i32) -> (i32, i32) {
    %c0_i32 = arith.constant 0 : i32
    %c0_i32_0 = arith.constant 0 : i32
    %c0_i32_1 = arith.constant 0 : i32
    return %c0_i32, %c0_i32_0 : i32, i32
  }
  func.func @transform_3(%arg0: i32) -> (i32, i32) {
    %c0_i32 = arith.constant 0 : i32
    %c0_i32_0 = arith.constant 0 : i32
    %c0_i32_1 = arith.constant 0 : i32
    return %c0_i32, %c0_i32_0 : i32, i32
  }
  func.func @transform_4(%arg0: i32) -> (i32, i32) {
    %c0_i32 = arith.constant 0 : i32
    %c0_i32_0 = arith.constant 0 : i32
    return %arg0, %c0_i32 : i32, i32
  }
}

module attributes {stable_mosaic.version = 11 : i64} {
  func.func @_affine_relu_avgpool_kernel(%arg0: i32, %arg1: memref<4x8x64xf32, #tpu.memory_space<vmem>>, %arg2: memref<1x64xf32, #tpu.memory_space<vmem>>, %arg3: memref<1x64xf32, #tpu.memory_space<vmem>>, %arg4: memref<8x64xbf16, #tpu.memory_space<vmem>>) attributes {dimension_semantics = [#tpu.dimension_semantics<parallel>], iteration_bounds = array<i64: 1>, scalar_prefetch = 0 : i64, scratch_operands = 0 : i64, tpu.core_type = #tpu.core_type<tc>, window_params = [{transform_indices = @transform_0, window_bounds = array<i64: 4, 8, 64>}, {pipeline_mode = #tpu.pipeline_mode<synchronous>, transform_indices = @transform_1, window_bounds = array<i64: 1, 64>}, {pipeline_mode = #tpu.pipeline_mode<synchronous>, transform_indices = @transform_2, window_bounds = array<i64: 1, 64>}, {transform_indices = @transform_3, window_bounds = array<i64: 8, 64>}]} {
    %c0 = arith.constant 0 : index
    %c0_0 = arith.constant 0 : index
    %c0_1 = arith.constant 0 : index
    %0 = vector.load %arg1[%c0, %c0_0, %c0_1] : memref<4x8x64xf32, #tpu.memory_space<vmem>>, vector<4x8x64xf32>
    %c0_2 = arith.constant 0 : index
    %c0_3 = arith.constant 0 : index
    %1 = vector.load %arg2[%c0_2, %c0_3] : memref<1x64xf32, #tpu.memory_space<vmem>>, vector<1x64xf32>
    %2 = vector.shape_cast %1 : vector<1x64xf32> to vector<1x1x64xf32>
    %3 = vector.broadcast %2 : vector<1x1x64xf32> to vector<4x8x64xf32>
    %4 = arith.mulf %0, %3 : vector<4x8x64xf32>
    %c0_4 = arith.constant 0 : index
    %c0_5 = arith.constant 0 : index
    %5 = vector.load %arg3[%c0_4, %c0_5] : memref<1x64xf32, #tpu.memory_space<vmem>>, vector<1x64xf32>
    %6 = vector.shape_cast %5 : vector<1x64xf32> to vector<1x1x64xf32>
    %7 = vector.broadcast %6 : vector<1x1x64xf32> to vector<4x8x64xf32>
    %8 = arith.addf %4, %7 : vector<4x8x64xf32>
    %cst = arith.constant 0.000000e+00 : f32
    %9 = vector.broadcast %cst : f32 to vector<4x8x64xf32>
    %10 = arith.maximumf %8, %9 : vector<4x8x64xf32>
    %cst_6 = arith.constant dense<0.000000e+00> : vector<8x64xf32>
    %11 = vector.multi_reduction <add>, %10, %cst_6 [0] : vector<4x8x64xf32> to vector<8x64xf32>
    %cst_7 = arith.constant 4.000000e+00 : f32
    %12 = vector.broadcast %cst_7 : f32 to vector<8x64xf32>
    %13 = arith.divf %11, %12 : vector<8x64xf32>
    %14 = arith.truncf %13 : vector<8x64xf32> to vector<8x64xbf16>
    %c0_8 = arith.constant 0 : index
    %c0_9 = arith.constant 0 : index
    %15 = vector.load %arg4[%c0_8, %c0_9] : memref<8x64xbf16, #tpu.memory_space<vmem>>, vector<8x64xbf16>
    tpu.vector_store %arg4[%c0_8, %c0_9], %14 {strides = array<i32>} : memref<8x64xbf16, #tpu.memory_space<vmem>>, vector<8x64xbf16>,
    return
  }
  func.func @transform_0(%arg0: i32) -> (i32, i32, i32) {
    %c0_i32 = arith.constant 0 : i32
    %c0_i32_0 = arith.constant 0 : i32
    %c0_i32_1 = arith.constant 0 : i32
    return %c0_i32, %arg0, %c0_i32_0 : i32, i32, i32
  }
  func.func @transform_1(%arg0: i32) -> (i32, i32) {
    %c0_i32 = arith.constant 0 : i32
    %c0_i32_0 = arith.constant 0 : i32
    %c0_i32_1 = arith.constant 0 : i32
    return %c0_i32, %c0_i32_0 : i32, i32
  }
  func.func @transform_2(%arg0: i32) -> (i32, i32) {
    %c0_i32 = arith.constant 0 : i32
    %c0_i32_0 = arith.constant 0 : i32
    %c0_i32_1 = arith.constant 0 : i32
    return %c0_i32, %c0_i32_0 : i32, i32
  }
  func.func @transform_3(%arg0: i32) -> (i32, i32) {
    %c0_i32 = arith.constant 0 : i32
    %c0_i32_0 = arith.constant 0 : i32
    return %arg0, %c0_i32 : i32, i32
  }
}

module attributes {stable_mosaic.version = 11 : i64} {
  func.func @_bn_stats_kernel(%arg0: i32, %arg1: memref<8x32xf32, #tpu.memory_space<vmem>>, %arg2: memref<1x32xf32, #tpu.memory_space<vmem>>, %arg3: memref<1x32xf32, #tpu.memory_space<vmem>>) attributes {dimension_semantics = [#tpu.dimension_semantics<arbitrary>], iteration_bounds = array<i64: 1>, scalar_prefetch = 0 : i64, scratch_operands = 0 : i64, tpu.core_type = #tpu.core_type<tc>, window_params = [{transform_indices = @transform_0, window_bounds = array<i64: 8, 32>}, {pipeline_mode = #tpu.pipeline_mode<synchronous>, transform_indices = @transform_1, window_bounds = array<i64: 1, 32>}, {pipeline_mode = #tpu.pipeline_mode<synchronous>, transform_indices = @transform_2, window_bounds = array<i64: 1, 32>}]} {
    %c0_i32 = arith.constant 0 : i32
    %0 = arith.cmpi eq, %arg0, %c0_i32 : i32
    %1 = arith.extui %0 : i1 to i32
    %c0_i32_0 = arith.constant 0 : i32
    %2 = arith.cmpi ne, %1, %c0_i32_0 : i32
    scf.if %2 {
      %cst_11 = arith.constant 0.000000e+00 : f32
      %15 = vector.broadcast %cst_11 : f32 to vector<1x32xf32>
      %c0_12 = arith.constant 0 : index
      %c0_13 = arith.constant 0 : index
      %16 = vector.load %arg2[%c0_12, %c0_13] : memref<1x32xf32, #tpu.memory_space<vmem>>, vector<1x32xf32>
      tpu.vector_store %arg2[%c0_12, %c0_13], %15 {strides = array<i32>} : memref<1x32xf32, #tpu.memory_space<vmem>>, vector<1x32xf32>,
      %cst_14 = arith.constant 0.000000e+00 : f32
      %17 = vector.broadcast %cst_14 : f32 to vector<1x32xf32>
      %c0_15 = arith.constant 0 : index
      %c0_16 = arith.constant 0 : index
      %18 = vector.load %arg3[%c0_15, %c0_16] : memref<1x32xf32, #tpu.memory_space<vmem>>, vector<1x32xf32>
      tpu.vector_store %arg3[%c0_15, %c0_16], %17 {strides = array<i32>} : memref<1x32xf32, #tpu.memory_space<vmem>>, vector<1x32xf32>,
    } else {
    }
    %c0 = arith.constant 0 : index
    %c0_1 = arith.constant 0 : index
    %3 = vector.load %arg1[%c0, %c0_1] : memref<8x32xf32, #tpu.memory_space<vmem>>, vector<8x32xf32>
    %c0_2 = arith.constant 0 : index
    %c0_3 = arith.constant 0 : index
    %4 = vector.load %arg2[%c0_2, %c0_3] : memref<1x32xf32, #tpu.memory_space<vmem>>, vector<1x32xf32>
    %cst = arith.constant dense<0.000000e+00> : vector<32xf32>
    %5 = vector.multi_reduction <add>, %3, %cst [0] : vector<8x32xf32> to vector<32xf32>
    %6 = vector.shape_cast %5 : vector<32xf32> to vector<1x32xf32>
    %7 = arith.addf %4, %6 : vector<1x32xf32>
    %c0_4 = arith.constant 0 : index
    %c0_5 = arith.constant 0 : index
    %8 = vector.load %arg2[%c0_4, %c0_5] : memref<1x32xf32, #tpu.memory_space<vmem>>, vector<1x32xf32>
    tpu.vector_store %arg2[%c0_4, %c0_5], %7 {strides = array<i32>} : memref<1x32xf32, #tpu.memory_space<vmem>>, vector<1x32xf32>,
    %c0_6 = arith.constant 0 : index
    %c0_7 = arith.constant 0 : index
    %9 = vector.load %arg3[%c0_6, %c0_7] : memref<1x32xf32, #tpu.memory_space<vmem>>, vector<1x32xf32>
    %10 = arith.mulf %3, %3 : vector<8x32xf32>
    %cst_8 = arith.constant dense<0.000000e+00> : vector<32xf32>
    %11 = vector.multi_reduction <add>, %10, %cst_8 [0] : vector<8x32xf32> to vector<32xf32>
    %12 = vector.shape_cast %11 : vector<32xf32> to vector<1x32xf32>
    %13 = arith.addf %9, %12 : vector<1x32xf32>
    %c0_9 = arith.constant 0 : index
    %c0_10 = arith.constant 0 : index
    %14 = vector.load %arg3[%c0_9, %c0_10] : memref<1x32xf32, #tpu.memory_space<vmem>>, vector<1x32xf32>
    tpu.vector_store %arg3[%c0_9, %c0_10], %13 {strides = array<i32>} : memref<1x32xf32, #tpu.memory_space<vmem>>, vector<1x32xf32>,
    return
  }
  func.func @transform_0(%arg0: i32) -> (i32, i32) {
    %c0_i32 = arith.constant 0 : i32
    %c0_i32_0 = arith.constant 0 : i32
    return %arg0, %c0_i32 : i32, i32
  }
  func.func @transform_1(%arg0: i32) -> (i32, i32) {
    %c0_i32 = arith.constant 0 : i32
    %c0_i32_0 = arith.constant 0 : i32
    %c0_i32_1 = arith.constant 0 : i32
    return %c0_i32, %c0_i32_0 : i32, i32
  }
  func.func @transform_2(%arg0: i32) -> (i32, i32) {
    %c0_i32 = arith.constant 0 : i32
    %c0_i32_0 = arith.constant 0 : i32
    %c0_i32_1 = arith.constant 0 : i32
    return %c0_i32, %c0_i32_0 : i32, i32
  }
}

module attributes {stable_mosaic.version = 11 : i64} {
  func.func @_matmul_single_kernel(%arg0: i32, %arg1: memref<8x64xbf16, #tpu.memory_space<vmem>>, %arg2: memref<64x128xbf16, #tpu.memory_space<vmem>>, %arg3: memref<8x128xf32, #tpu.memory_space<vmem>>) attributes {dimension_semantics = [#tpu.dimension_semantics<parallel>], iteration_bounds = array<i64: 1>, scalar_prefetch = 0 : i64, scratch_operands = 0 : i64, tpu.core_type = #tpu.core_type<tc>, window_params = [{transform_indices = @transform_0, window_bounds = array<i64: 8, 64>}, {pipeline_mode = #tpu.pipeline_mode<synchronous>, transform_indices = @transform_1, window_bounds = array<i64: 64, 128>}, {transform_indices = @transform_2, window_bounds = array<i64: 8, 128>}]} {
    %c0 = arith.constant 0 : index
    %c0_0 = arith.constant 0 : index
    %0 = vector.load %arg1[%c0, %c0_0] : memref<8x64xbf16, #tpu.memory_space<vmem>>, vector<8x64xbf16>
    %c0_1 = arith.constant 0 : index
    %c0_2 = arith.constant 0 : index
    %1 = vector.load %arg2[%c0_1, %c0_2] : memref<64x128xbf16, #tpu.memory_space<vmem>>, vector<64x128xbf16>
    %cst = arith.constant dense<0.000000e+00> : vector<8x128xf32>
    %2 = tpu.matmul %0, %1, %cst {dimension_numbers = #tpu.dot_dimension_numbers<[1], [0], [0], [1], [0, 0, 1, 1], [], []>} : vector<8x64xbf16>, vector<64x128xbf16>, vector<8x128xf32> -> vector<8x128xf32>
    %c0_3 = arith.constant 0 : index
    %c0_4 = arith.constant 0 : index
    %3 = vector.load %arg3[%c0_3, %c0_4] : memref<8x128xf32, #tpu.memory_space<vmem>>, vector<8x128xf32>
    tpu.vector_store %arg3[%c0_3, %c0_4], %2 {strides = array<i32>} : memref<8x128xf32, #tpu.memory_space<vmem>>, vector<8x128xf32>,
    return
  }
  func.func @transform_0(%arg0: i32) -> (i32, i32) {
    %c0_i32 = arith.constant 0 : i32
    %c0_i32_0 = arith.constant 0 : i32
    return %arg0, %c0_i32 : i32, i32
  }
  func.func @transform_1(%arg0: i32) -> (i32, i32) {
    %c0_i32 = arith.constant 0 : i32
    %c0_i32_0 = arith.constant 0 : i32
    %c0_i32_1 = arith.constant 0 : i32
    return %c0_i32, %c0_i32_0 : i32, i32
  }
  func.func @transform_2(%arg0: i32) -> (i32, i32) {
    %c0_i32 = arith.constant 0 : i32
    %c0_i32_0 = arith.constant 0 : i32
    return %arg0, %c0_i32 : i32, i32
  }
}

module attributes {stable_mosaic.version = 11 : i64} {
  func.func @_matmul_bnrelu_kernel(%arg0: i32, %arg1: memref<8x32xf32, #tpu.memory_space<vmem>>, %arg2: memref<1x32xf32, #tpu.memory_space<vmem>>, %arg3: memref<1x32xf32, #tpu.memory_space<vmem>>, %arg4: memref<32x128xbf16, #tpu.memory_space<vmem>>, %arg5: memref<8x128xf32, #tpu.memory_space<vmem>>) attributes {dimension_semantics = [#tpu.dimension_semantics<parallel>], iteration_bounds = array<i64: 1>, scalar_prefetch = 0 : i64, scratch_operands = 0 : i64, tpu.core_type = #tpu.core_type<tc>, window_params = [{transform_indices = @transform_0, window_bounds = array<i64: 8, 32>}, {pipeline_mode = #tpu.pipeline_mode<synchronous>, transform_indices = @transform_1, window_bounds = array<i64: 1, 32>}, {pipeline_mode = #tpu.pipeline_mode<synchronous>, transform_indices = @transform_2, window_bounds = array<i64: 1, 32>}, {pipeline_mode = #tpu.pipeline_mode<synchronous>, transform_indices = @transform_3, window_bounds = array<i64: 32, 128>}, {transform_indices = @transform_4, window_bounds = array<i64: 8, 128>}]} {
    %c0 = arith.constant 0 : index
    %c0_0 = arith.constant 0 : index
    %0 = vector.load %arg1[%c0, %c0_0] : memref<8x32xf32, #tpu.memory_space<vmem>>, vector<8x32xf32>
    %c0_1 = arith.constant 0 : index
    %c0_2 = arith.constant 0 : index
    %1 = vector.load %arg2[%c0_1, %c0_2] : memref<1x32xf32, #tpu.memory_space<vmem>>, vector<1x32xf32>
    %2 = vector.broadcast %1 : vector<1x32xf32> to vector<8x32xf32>
    %3 = arith.mulf %0, %2 : vector<8x32xf32>
    %c0_3 = arith.constant 0 : index
    %c0_4 = arith.constant 0 : index
    %4 = vector.load %arg3[%c0_3, %c0_4] : memref<1x32xf32, #tpu.memory_space<vmem>>, vector<1x32xf32>
    %5 = vector.broadcast %4 : vector<1x32xf32> to vector<8x32xf32>
    %6 = arith.addf %3, %5 : vector<8x32xf32>
    %cst = arith.constant 0.000000e+00 : f32
    %7 = vector.broadcast %cst : f32 to vector<8x32xf32>
    %8 = arith.maximumf %6, %7 : vector<8x32xf32>
    %9 = arith.truncf %8 : vector<8x32xf32> to vector<8x32xbf16>
    %c0_5 = arith.constant 0 : index
    %c0_6 = arith.constant 0 : index
    %10 = vector.load %arg4[%c0_5, %c0_6] : memref<32x128xbf16, #tpu.memory_space<vmem>>, vector<32x128xbf16>
    %cst_7 = arith.constant dense<0.000000e+00> : vector<8x128xf32>
    %11 = tpu.matmul %9, %10, %cst_7 {dimension_numbers = #tpu.dot_dimension_numbers<[1], [0], [0], [1], [0, 0, 1, 1], [], []>} : vector<8x32xbf16>, vector<32x128xbf16>, vector<8x128xf32> -> vector<8x128xf32>
    %c0_8 = arith.constant 0 : index
    %c0_9 = arith.constant 0 : index
    %12 = vector.load %arg5[%c0_8, %c0_9] : memref<8x128xf32, #tpu.memory_space<vmem>>, vector<8x128xf32>
    tpu.vector_store %arg5[%c0_8, %c0_9], %11 {strides = array<i32>} : memref<8x128xf32, #tpu.memory_space<vmem>>, vector<8x128xf32>,
    return
  }
  func.func @transform_0(%arg0: i32) -> (i32, i32) {
    %c0_i32 = arith.constant 0 : i32
    %c0_i32_0 = arith.constant 0 : i32
    return %arg0, %c0_i32 : i32, i32
  }
  func.func @transform_1(%arg0: i32) -> (i32, i32) {
    %c0_i32 = arith.constant 0 : i32
    %c0_i32_0 = arith.constant 0 : i32
    %c0_i32_1 = arith.constant 0 : i32
    return %c0_i32, %c0_i32_0 : i32, i32
  }
  func.func @transform_2(%arg0: i32) -> (i32, i32) {
    %c0_i32 = arith.constant 0 : i32
    %c0_i32_0 = arith.constant 0 : i32
    %c0_i32_1 = arith.constant 0 : i32
    return %c0_i32, %c0_i32_0 : i32, i32
  }
  func.func @transform_3(%arg0: i32) -> (i32, i32) {
    %c0_i32 = arith.constant 0 : i32
    %c0_i32_0 = arith.constant 0 : i32
    %c0_i32_1 = arith.constant 0 : i32
    return %c0_i32, %c0_i32_0 : i32, i32
  }
  func.func @transform_4(%arg0: i32) -> (i32, i32) {
    %c0_i32 = arith.constant 0 : i32
    %c0_i32_0 = arith.constant 0 : i32
    return %arg0, %c0_i32 : i32, i32
  }
}

module attributes {stable_mosaic.version = 11 : i64} {
  func.func @_affine_relu_kernel(%arg0: i32, %arg1: memref<8x64xf32, #tpu.memory_space<vmem>>, %arg2: memref<1x64xf32, #tpu.memory_space<vmem>>, %arg3: memref<1x64xf32, #tpu.memory_space<vmem>>, %arg4: memref<8x64xbf16, #tpu.memory_space<vmem>>) attributes {dimension_semantics = [#tpu.dimension_semantics<parallel>], iteration_bounds = array<i64: 1>, scalar_prefetch = 0 : i64, scratch_operands = 0 : i64, tpu.core_type = #tpu.core_type<tc>, window_params = [{transform_indices = @transform_0, window_bounds = array<i64: 8, 64>}, {pipeline_mode = #tpu.pipeline_mode<synchronous>, transform_indices = @transform_1, window_bounds = array<i64: 1, 64>}, {pipeline_mode = #tpu.pipeline_mode<synchronous>, transform_indices = @transform_2, window_bounds = array<i64: 1, 64>}, {transform_indices = @transform_3, window_bounds = array<i64: 8, 64>}]} {
    %c0 = arith.constant 0 : index
    %c0_0 = arith.constant 0 : index
    %0 = vector.load %arg1[%c0, %c0_0] : memref<8x64xf32, #tpu.memory_space<vmem>>, vector<8x64xf32>
    %c0_1 = arith.constant 0 : index
    %c0_2 = arith.constant 0 : index
    %1 = vector.load %arg2[%c0_1, %c0_2] : memref<1x64xf32, #tpu.memory_space<vmem>>, vector<1x64xf32>
    %2 = vector.broadcast %1 : vector<1x64xf32> to vector<8x64xf32>
    %3 = arith.mulf %0, %2 : vector<8x64xf32>
    %c0_3 = arith.constant 0 : index
    %c0_4 = arith.constant 0 : index
    %4 = vector.load %arg3[%c0_3, %c0_4] : memref<1x64xf32, #tpu.memory_space<vmem>>, vector<1x64xf32>
    %5 = vector.broadcast %4 : vector<1x64xf32> to vector<8x64xf32>
    %6 = arith.addf %3, %5 : vector<8x64xf32>
    %cst = arith.constant 0.000000e+00 : f32
    %7 = vector.broadcast %cst : f32 to vector<8x64xf32>
    %8 = arith.maximumf %6, %7 : vector<8x64xf32>
    %9 = arith.truncf %8 : vector<8x64xf32> to vector<8x64xbf16>
    %c0_5 = arith.constant 0 : index
    %c0_6 = arith.constant 0 : index
    %10 = vector.load %arg4[%c0_5, %c0_6] : memref<8x64xbf16, #tpu.memory_space<vmem>>, vector<8x64xbf16>
    tpu.vector_store %arg4[%c0_5, %c0_6], %9 {strides = array<i32>} : memref<8x64xbf16, #tpu.memory_space<vmem>>, vector<8x64xbf16>,
    return
  }
  func.func @transform_0(%arg0: i32) -> (i32, i32) {
    %c0_i32 = arith.constant 0 : i32
    %c0_i32_0 = arith.constant 0 : i32
    return %arg0, %c0_i32 : i32, i32
  }
  func.func @transform_1(%arg0: i32) -> (i32, i32) {
    %c0_i32 = arith.constant 0 : i32
    %c0_i32_0 = arith.constant 0 : i32
    %c0_i32_1 = arith.constant 0 : i32
    return %c0_i32, %c0_i32_0 : i32, i32
  }
  func.func @transform_2(%arg0: i32) -> (i32, i32) {
    %c0_i32 = arith.constant 0 : i32
    %c0_i32_0 = arith.constant 0 : i32
    %c0_i32_1 = arith.constant 0 : i32
    return %c0_i32, %c0_i32_0 : i32, i32
  }
  func.func @transform_3(%arg0: i32) -> (i32, i32) {
    %c0_i32 = arith.constant 0 : i32
    %c0_i32_0 = arith.constant 0 : i32
    return %arg0, %c0_i32 : i32, i32
  }
}

module attributes {stable_mosaic.version = 11 : i64} {
  func.func @_bn_stats_kernel(%arg0: i32, %arg1: memref<8x64xf32, #tpu.memory_space<vmem>>, %arg2: memref<1x64xf32, #tpu.memory_space<vmem>>, %arg3: memref<1x64xf32, #tpu.memory_space<vmem>>) attributes {dimension_semantics = [#tpu.dimension_semantics<arbitrary>], iteration_bounds = array<i64: 1>, scalar_prefetch = 0 : i64, scratch_operands = 0 : i64, tpu.core_type = #tpu.core_type<tc>, window_params = [{transform_indices = @transform_0, window_bounds = array<i64: 8, 64>}, {pipeline_mode = #tpu.pipeline_mode<synchronous>, transform_indices = @transform_1, window_bounds = array<i64: 1, 64>}, {pipeline_mode = #tpu.pipeline_mode<synchronous>, transform_indices = @transform_2, window_bounds = array<i64: 1, 64>}]} {
    %c0_i32 = arith.constant 0 : i32
    %0 = arith.cmpi eq, %arg0, %c0_i32 : i32
    %1 = arith.extui %0 : i1 to i32
    %c0_i32_0 = arith.constant 0 : i32
    %2 = arith.cmpi ne, %1, %c0_i32_0 : i32
    scf.if %2 {
      %cst_11 = arith.constant 0.000000e+00 : f32
      %15 = vector.broadcast %cst_11 : f32 to vector<1x64xf32>
      %c0_12 = arith.constant 0 : index
      %c0_13 = arith.constant 0 : index
      %16 = vector.load %arg2[%c0_12, %c0_13] : memref<1x64xf32, #tpu.memory_space<vmem>>, vector<1x64xf32>
      tpu.vector_store %arg2[%c0_12, %c0_13], %15 {strides = array<i32>} : memref<1x64xf32, #tpu.memory_space<vmem>>, vector<1x64xf32>,
      %cst_14 = arith.constant 0.000000e+00 : f32
      %17 = vector.broadcast %cst_14 : f32 to vector<1x64xf32>
      %c0_15 = arith.constant 0 : index
      %c0_16 = arith.constant 0 : index
      %18 = vector.load %arg3[%c0_15, %c0_16] : memref<1x64xf32, #tpu.memory_space<vmem>>, vector<1x64xf32>
      tpu.vector_store %arg3[%c0_15, %c0_16], %17 {strides = array<i32>} : memref<1x64xf32, #tpu.memory_space<vmem>>, vector<1x64xf32>,
    } else {
    }
    %c0 = arith.constant 0 : index
    %c0_1 = arith.constant 0 : index
    %3 = vector.load %arg1[%c0, %c0_1] : memref<8x64xf32, #tpu.memory_space<vmem>>, vector<8x64xf32>
    %c0_2 = arith.constant 0 : index
    %c0_3 = arith.constant 0 : index
    %4 = vector.load %arg2[%c0_2, %c0_3] : memref<1x64xf32, #tpu.memory_space<vmem>>, vector<1x64xf32>
    %cst = arith.constant dense<0.000000e+00> : vector<64xf32>
    %5 = vector.multi_reduction <add>, %3, %cst [0] : vector<8x64xf32> to vector<64xf32>
    %6 = vector.shape_cast %5 : vector<64xf32> to vector<1x64xf32>
    %7 = arith.addf %4, %6 : vector<1x64xf32>
    %c0_4 = arith.constant 0 : index
    %c0_5 = arith.constant 0 : index
    %8 = vector.load %arg2[%c0_4, %c0_5] : memref<1x64xf32, #tpu.memory_space<vmem>>, vector<1x64xf32>
    tpu.vector_store %arg2[%c0_4, %c0_5], %7 {strides = array<i32>} : memref<1x64xf32, #tpu.memory_space<vmem>>, vector<1x64xf32>,
    %c0_6 = arith.constant 0 : index
    %c0_7 = arith.constant 0 : index
    %9 = vector.load %arg3[%c0_6, %c0_7] : memref<1x64xf32, #tpu.memory_space<vmem>>, vector<1x64xf32>
    %10 = arith.mulf %3, %3 : vector<8x64xf32>
    %cst_8 = arith.constant dense<0.000000e+00> : vector<64xf32>
    %11 = vector.multi_reduction <add>, %10, %cst_8 [0] : vector<8x64xf32> to vector<64xf32>
    %12 = vector.shape_cast %11 : vector<64xf32> to vector<1x64xf32>
    %13 = arith.addf %9, %12 : vector<1x64xf32>
    %c0_9 = arith.constant 0 : index
    %c0_10 = arith.constant 0 : index
    %14 = vector.load %arg3[%c0_9, %c0_10] : memref<1x64xf32, #tpu.memory_space<vmem>>, vector<1x64xf32>
    tpu.vector_store %arg3[%c0_9, %c0_10], %13 {strides = array<i32>} : memref<1x64xf32, #tpu.memory_space<vmem>>, vector<1x64xf32>,
    return
  }
  func.func @transform_0(%arg0: i32) -> (i32, i32) {
    %c0_i32 = arith.constant 0 : i32
    %c0_i32_0 = arith.constant 0 : i32
    return %arg0, %c0_i32 : i32, i32
  }
  func.func @transform_1(%arg0: i32) -> (i32, i32) {
    %c0_i32 = arith.constant 0 : i32
    %c0_i32_0 = arith.constant 0 : i32
    %c0_i32_1 = arith.constant 0 : i32
    return %c0_i32, %c0_i32_0 : i32, i32
  }
  func.func @transform_2(%arg0: i32) -> (i32, i32) {
    %c0_i32 = arith.constant 0 : i32
    %c0_i32_0 = arith.constant 0 : i32
    %c0_i32_1 = arith.constant 0 : i32
    return %c0_i32, %c0_i32_0 : i32, i32
  }
}

module attributes {stable_mosaic.version = 11 : i64} {
  func.func @_bn_stats_kernel(%arg0: i32, %arg1: memref<8x48xf32, #tpu.memory_space<vmem>>, %arg2: memref<1x48xf32, #tpu.memory_space<vmem>>, %arg3: memref<1x48xf32, #tpu.memory_space<vmem>>) attributes {dimension_semantics = [#tpu.dimension_semantics<arbitrary>], iteration_bounds = array<i64: 1>, scalar_prefetch = 0 : i64, scratch_operands = 0 : i64, tpu.core_type = #tpu.core_type<tc>, window_params = [{transform_indices = @transform_0, window_bounds = array<i64: 8, 48>}, {pipeline_mode = #tpu.pipeline_mode<synchronous>, transform_indices = @transform_1, window_bounds = array<i64: 1, 48>}, {pipeline_mode = #tpu.pipeline_mode<synchronous>, transform_indices = @transform_2, window_bounds = array<i64: 1, 48>}]} {
    %c0_i32 = arith.constant 0 : i32
    %0 = arith.cmpi eq, %arg0, %c0_i32 : i32
    %1 = arith.extui %0 : i1 to i32
    %c0_i32_0 = arith.constant 0 : i32
    %2 = arith.cmpi ne, %1, %c0_i32_0 : i32
    scf.if %2 {
      %cst_11 = arith.constant 0.000000e+00 : f32
      %15 = vector.broadcast %cst_11 : f32 to vector<1x48xf32>
      %c0_12 = arith.constant 0 : index
      %c0_13 = arith.constant 0 : index
      %16 = vector.load %arg2[%c0_12, %c0_13] : memref<1x48xf32, #tpu.memory_space<vmem>>, vector<1x48xf32>
      tpu.vector_store %arg2[%c0_12, %c0_13], %15 {strides = array<i32>} : memref<1x48xf32, #tpu.memory_space<vmem>>, vector<1x48xf32>,
      %cst_14 = arith.constant 0.000000e+00 : f32
      %17 = vector.broadcast %cst_14 : f32 to vector<1x48xf32>
      %c0_15 = arith.constant 0 : index
      %c0_16 = arith.constant 0 : index
      %18 = vector.load %arg3[%c0_15, %c0_16] : memref<1x48xf32, #tpu.memory_space<vmem>>, vector<1x48xf32>
      tpu.vector_store %arg3[%c0_15, %c0_16], %17 {strides = array<i32>} : memref<1x48xf32, #tpu.memory_space<vmem>>, vector<1x48xf32>,
    } else {
    }
    %c0 = arith.constant 0 : index
    %c0_1 = arith.constant 0 : index
    %3 = vector.load %arg1[%c0, %c0_1] : memref<8x48xf32, #tpu.memory_space<vmem>>, vector<8x48xf32>
    %c0_2 = arith.constant 0 : index
    %c0_3 = arith.constant 0 : index
    %4 = vector.load %arg2[%c0_2, %c0_3] : memref<1x48xf32, #tpu.memory_space<vmem>>, vector<1x48xf32>
    %cst = arith.constant dense<0.000000e+00> : vector<48xf32>
    %5 = vector.multi_reduction <add>, %3, %cst [0] : vector<8x48xf32> to vector<48xf32>
    %6 = vector.shape_cast %5 : vector<48xf32> to vector<1x48xf32>
    %7 = arith.addf %4, %6 : vector<1x48xf32>
    %c0_4 = arith.constant 0 : index
    %c0_5 = arith.constant 0 : index
    %8 = vector.load %arg2[%c0_4, %c0_5] : memref<1x48xf32, #tpu.memory_space<vmem>>, vector<1x48xf32>
    tpu.vector_store %arg2[%c0_4, %c0_5], %7 {strides = array<i32>} : memref<1x48xf32, #tpu.memory_space<vmem>>, vector<1x48xf32>,
    %c0_6 = arith.constant 0 : index
    %c0_7 = arith.constant 0 : index
    %9 = vector.load %arg3[%c0_6, %c0_7] : memref<1x48xf32, #tpu.memory_space<vmem>>, vector<1x48xf32>
    %10 = arith.mulf %3, %3 : vector<8x48xf32>
    %cst_8 = arith.constant dense<0.000000e+00> : vector<48xf32>
    %11 = vector.multi_reduction <add>, %10, %cst_8 [0] : vector<8x48xf32> to vector<48xf32>
    %12 = vector.shape_cast %11 : vector<48xf32> to vector<1x48xf32>
    %13 = arith.addf %9, %12 : vector<1x48xf32>
    %c0_9 = arith.constant 0 : index
    %c0_10 = arith.constant 0 : index
    %14 = vector.load %arg3[%c0_9, %c0_10] : memref<1x48xf32, #tpu.memory_space<vmem>>, vector<1x48xf32>
    tpu.vector_store %arg3[%c0_9, %c0_10], %13 {strides = array<i32>} : memref<1x48xf32, #tpu.memory_space<vmem>>, vector<1x48xf32>,
    return
  }
  func.func @transform_0(%arg0: i32) -> (i32, i32) {
    %c0_i32 = arith.constant 0 : i32
    %c0_i32_0 = arith.constant 0 : i32
    return %arg0, %c0_i32 : i32, i32
  }
  func.func @transform_1(%arg0: i32) -> (i32, i32) {
    %c0_i32 = arith.constant 0 : i32
    %c0_i32_0 = arith.constant 0 : i32
    %c0_i32_1 = arith.constant 0 : i32
    return %c0_i32, %c0_i32_0 : i32, i32
  }
  func.func @transform_2(%arg0: i32) -> (i32, i32) {
    %c0_i32 = arith.constant 0 : i32
    %c0_i32_0 = arith.constant 0 : i32
    %c0_i32_1 = arith.constant 0 : i32
    return %c0_i32, %c0_i32_0 : i32, i32
  }
}

module attributes {stable_mosaic.version = 11 : i64} {
  func.func @_matmul_single_kernel(%arg0: i32, %arg1: memref<8x576xbf16, #tpu.memory_space<vmem>>, %arg2: memref<576x128xbf16, #tpu.memory_space<vmem>>, %arg3: memref<8x128xf32, #tpu.memory_space<vmem>>) attributes {dimension_semantics = [#tpu.dimension_semantics<parallel>], iteration_bounds = array<i64: 1>, scalar_prefetch = 0 : i64, scratch_operands = 0 : i64, tpu.core_type = #tpu.core_type<tc>, window_params = [{transform_indices = @transform_0, window_bounds = array<i64: 8, 576>}, {pipeline_mode = #tpu.pipeline_mode<synchronous>, transform_indices = @transform_1, window_bounds = array<i64: 576, 128>}, {transform_indices = @transform_2, window_bounds = array<i64: 8, 128>}]} {
    %c0 = arith.constant 0 : index
    %c0_0 = arith.constant 0 : index
    %0 = vector.load %arg1[%c0, %c0_0] : memref<8x576xbf16, #tpu.memory_space<vmem>>, vector<8x576xbf16>
    %c0_1 = arith.constant 0 : index
    %c0_2 = arith.constant 0 : index
    %1 = vector.load %arg2[%c0_1, %c0_2] : memref<576x128xbf16, #tpu.memory_space<vmem>>, vector<576x128xbf16>
    %cst = arith.constant dense<0.000000e+00> : vector<8x128xf32>
    %2 = tpu.matmul %0, %1, %cst {dimension_numbers = #tpu.dot_dimension_numbers<[1], [0], [0], [1], [0, 0, 1, 1], [], []>} : vector<8x576xbf16>, vector<576x128xbf16>, vector<8x128xf32> -> vector<8x128xf32>
    %c0_3 = arith.constant 0 : index
    %c0_4 = arith.constant 0 : index
    %3 = vector.load %arg3[%c0_3, %c0_4] : memref<8x128xf32, #tpu.memory_space<vmem>>, vector<8x128xf32>
    tpu.vector_store %arg3[%c0_3, %c0_4], %2 {strides = array<i32>} : memref<8x128xf32, #tpu.memory_space<vmem>>, vector<8x128xf32>,
    return
  }
  func.func @transform_0(%arg0: i32) -> (i32, i32) {
    %c0_i32 = arith.constant 0 : i32
    %c0_i32_0 = arith.constant 0 : i32
    return %arg0, %c0_i32 : i32, i32
  }
  func.func @transform_1(%arg0: i32) -> (i32, i32) {
    %c0_i32 = arith.constant 0 : i32
    %c0_i32_0 = arith.constant 0 : i32
    %c0_i32_1 = arith.constant 0 : i32
    return %c0_i32, %c0_i32_0 : i32, i32
  }
  func.func @transform_2(%arg0: i32) -> (i32, i32) {
    %c0_i32 = arith.constant 0 : i32
    %c0_i32_0 = arith.constant 0 : i32
    return %arg0, %c0_i32 : i32, i32
  }
}

module attributes {stable_mosaic.version = 11 : i64} {
  func.func @_matmul_bnrelu_kernel(%arg0: i32, %arg1: memref<8x48xf32, #tpu.memory_space<vmem>>, %arg2: memref<1x48xf32, #tpu.memory_space<vmem>>, %arg3: memref<1x48xf32, #tpu.memory_space<vmem>>, %arg4: memref<48x128xbf16, #tpu.memory_space<vmem>>, %arg5: memref<8x128xf32, #tpu.memory_space<vmem>>) attributes {dimension_semantics = [#tpu.dimension_semantics<parallel>], iteration_bounds = array<i64: 1>, scalar_prefetch = 0 : i64, scratch_operands = 0 : i64, tpu.core_type = #tpu.core_type<tc>, window_params = [{transform_indices = @transform_0, window_bounds = array<i64: 8, 48>}, {pipeline_mode = #tpu.pipeline_mode<synchronous>, transform_indices = @transform_1, window_bounds = array<i64: 1, 48>}, {pipeline_mode = #tpu.pipeline_mode<synchronous>, transform_indices = @transform_2, window_bounds = array<i64: 1, 48>}, {pipeline_mode = #tpu.pipeline_mode<synchronous>, transform_indices = @transform_3, window_bounds = array<i64: 48, 128>}, {transform_indices = @transform_4, window_bounds = array<i64: 8, 128>}]} {
    %c0 = arith.constant 0 : index
    %c0_0 = arith.constant 0 : index
    %0 = vector.load %arg1[%c0, %c0_0] : memref<8x48xf32, #tpu.memory_space<vmem>>, vector<8x48xf32>
    %c0_1 = arith.constant 0 : index
    %c0_2 = arith.constant 0 : index
    %1 = vector.load %arg2[%c0_1, %c0_2] : memref<1x48xf32, #tpu.memory_space<vmem>>, vector<1x48xf32>
    %2 = vector.broadcast %1 : vector<1x48xf32> to vector<8x48xf32>
    %3 = arith.mulf %0, %2 : vector<8x48xf32>
    %c0_3 = arith.constant 0 : index
    %c0_4 = arith.constant 0 : index
    %4 = vector.load %arg3[%c0_3, %c0_4] : memref<1x48xf32, #tpu.memory_space<vmem>>, vector<1x48xf32>
    %5 = vector.broadcast %4 : vector<1x48xf32> to vector<8x48xf32>
    %6 = arith.addf %3, %5 : vector<8x48xf32>
    %cst = arith.constant 0.000000e+00 : f32
    %7 = vector.broadcast %cst : f32 to vector<8x48xf32>
    %8 = arith.maximumf %6, %7 : vector<8x48xf32>
    %9 = arith.truncf %8 : vector<8x48xf32> to vector<8x48xbf16>
    %c0_5 = arith.constant 0 : index
    %c0_6 = arith.constant 0 : index
    %10 = vector.load %arg4[%c0_5, %c0_6] : memref<48x128xbf16, #tpu.memory_space<vmem>>, vector<48x128xbf16>
    %cst_7 = arith.constant dense<0.000000e+00> : vector<8x128xf32>
    %11 = tpu.matmul %9, %10, %cst_7 {dimension_numbers = #tpu.dot_dimension_numbers<[1], [0], [0], [1], [0, 0, 1, 1], [], []>} : vector<8x48xbf16>, vector<48x128xbf16>, vector<8x128xf32> -> vector<8x128xf32>
    %c0_8 = arith.constant 0 : index
    %c0_9 = arith.constant 0 : index
    %12 = vector.load %arg5[%c0_8, %c0_9] : memref<8x128xf32, #tpu.memory_space<vmem>>, vector<8x128xf32>
    tpu.vector_store %arg5[%c0_8, %c0_9], %11 {strides = array<i32>} : memref<8x128xf32, #tpu.memory_space<vmem>>, vector<8x128xf32>,
    return
  }
  func.func @transform_0(%arg0: i32) -> (i32, i32) {
    %c0_i32 = arith.constant 0 : i32
    %c0_i32_0 = arith.constant 0 : i32
    return %arg0, %c0_i32 : i32, i32
  }
  func.func @transform_1(%arg0: i32) -> (i32, i32) {
    %c0_i32 = arith.constant 0 : i32
    %c0_i32_0 = arith.constant 0 : i32
    %c0_i32_1 = arith.constant 0 : i32
    return %c0_i32, %c0_i32_0 : i32, i32
  }
  func.func @transform_2(%arg0: i32) -> (i32, i32) {
    %c0_i32 = arith.constant 0 : i32
    %c0_i32_0 = arith.constant 0 : i32
    %c0_i32_1 = arith.constant 0 : i32
    return %c0_i32, %c0_i32_0 : i32, i32
  }
  func.func @transform_3(%arg0: i32) -> (i32, i32) {
    %c0_i32 = arith.constant 0 : i32
    %c0_i32_0 = arith.constant 0 : i32
    %c0_i32_1 = arith.constant 0 : i32
    return %c0_i32, %c0_i32_0 : i32, i32
  }
  func.func @transform_4(%arg0: i32) -> (i32, i32) {
    %c0_i32 = arith.constant 0 : i32
    %c0_i32_0 = arith.constant 0 : i32
    return %arg0, %c0_i32 : i32, i32
  }
}

module attributes {stable_mosaic.version = 11 : i64} {
  func.func @_affine_relu_kernel(%arg0: i32, %arg1: memref<8x64xf32, #tpu.memory_space<vmem>>, %arg2: memref<1x64xf32, #tpu.memory_space<vmem>>, %arg3: memref<1x64xf32, #tpu.memory_space<vmem>>, %arg4: memref<8x64xf32, #tpu.memory_space<vmem>>) attributes {dimension_semantics = [#tpu.dimension_semantics<parallel>], iteration_bounds = array<i64: 1>, scalar_prefetch = 0 : i64, scratch_operands = 0 : i64, tpu.core_type = #tpu.core_type<tc>, window_params = [{transform_indices = @transform_0, window_bounds = array<i64: 8, 64>}, {pipeline_mode = #tpu.pipeline_mode<synchronous>, transform_indices = @transform_1, window_bounds = array<i64: 1, 64>}, {pipeline_mode = #tpu.pipeline_mode<synchronous>, transform_indices = @transform_2, window_bounds = array<i64: 1, 64>}, {transform_indices = @transform_3, window_bounds = array<i64: 8, 64>}]} {
    %c0 = arith.constant 0 : index
    %c0_0 = arith.constant 0 : index
    %0 = vector.load %arg1[%c0, %c0_0] : memref<8x64xf32, #tpu.memory_space<vmem>>, vector<8x64xf32>
    %c0_1 = arith.constant 0 : index
    %c0_2 = arith.constant 0 : index
    %1 = vector.load %arg2[%c0_1, %c0_2] : memref<1x64xf32, #tpu.memory_space<vmem>>, vector<1x64xf32>
    %2 = vector.broadcast %1 : vector<1x64xf32> to vector<8x64xf32>
    %3 = arith.mulf %0, %2 : vector<8x64xf32>
    %c0_3 = arith.constant 0 : index
    %c0_4 = arith.constant 0 : index
    %4 = vector.load %arg3[%c0_3, %c0_4] : memref<1x64xf32, #tpu.memory_space<vmem>>, vector<1x64xf32>
    %5 = vector.broadcast %4 : vector<1x64xf32> to vector<8x64xf32>
    %6 = arith.addf %3, %5 : vector<8x64xf32>
    %cst = arith.constant 0.000000e+00 : f32
    %7 = vector.broadcast %cst : f32 to vector<8x64xf32>
    %8 = arith.maximumf %6, %7 : vector<8x64xf32>
    %c0_5 = arith.constant 0 : index
    %c0_6 = arith.constant 0 : index
    %9 = vector.load %arg4[%c0_5, %c0_6] : memref<8x64xf32, #tpu.memory_space<vmem>>, vector<8x64xf32>
    tpu.vector_store %arg4[%c0_5, %c0_6], %8 {strides = array<i32>} : memref<8x64xf32, #tpu.memory_space<vmem>>, vector<8x64xf32>,
    return
  }
  func.func @transform_0(%arg0: i32) -> (i32, i32) {
    %c0_i32 = arith.constant 0 : i32
    %c0_i32_0 = arith.constant 0 : i32
    return %arg0, %c0_i32 : i32, i32
  }
  func.func @transform_1(%arg0: i32) -> (i32, i32) {
    %c0_i32 = arith.constant 0 : i32
    %c0_i32_0 = arith.constant 0 : i32
    %c0_i32_1 = arith.constant 0 : i32
    return %c0_i32, %c0_i32_0 : i32, i32
  }
  func.func @transform_2(%arg0: i32) -> (i32, i32) {
    %c0_i32 = arith.constant 0 : i32
    %c0_i32_0 = arith.constant 0 : i32
    %c0_i32_1 = arith.constant 0 : i32
    return %c0_i32, %c0_i32_0 : i32, i32
  }
  func.func @transform_3(%arg0: i32) -> (i32, i32) {
    %c0_i32 = arith.constant 0 : i32
    %c0_i32_0 = arith.constant 0 : i32
    return %arg0, %c0_i32 : i32, i32
  }
}

</mosaic_0001>

<bundles_post_ra>
// kernel: densenet_forward.56
= control target key start
LH: loop header
LB: loop body
LE: loop exit
PB: predicated region body
PF: predicated region fallthrough
CT: control target
= control target key end

     0   :  { %vm14_vm0 = vcmask 253952   ;;  %vm82_vm1 = vcmask 261120   ;;  %v428_v0 = vmov 0.0   ;;  %s1318_s0 = inlined_call_operand.vmem [shape: f32[512,32], index: 0, kind: input, shape index: {}]   ;;  %s1319_s1 = inlined_call_operand.vmem [shape: f32[1,32], index: 1, kind: output, shape index: {0}]   ;;  %s1320_s2 = inlined_call_operand.vmem [shape: f32[1,32], index: 2, kind: output, shape index: {1}]  }
   0x1   :  { %15 = vst.msk [vmem:[%s1319_s1] sm:$0x1] %vm14_vm0, %v428_v0  ;;  %16 = vst.msk [vmem:[%s1320_s2] sm:$0x1] %vm14_vm0, %v428_v0  ;;  %v455_v1 = vld [vmem:[%s1318_s0] sm:$0xff]  ;;  %v460_v2 = vld [vmem:[%s1318_s0 + $0x8] sm:$0xff] }
   0x2   :  { %v465_v3 = vld [vmem:[%s1318_s0 + $0x10] sm:$0xff]  ;;  %v83_v4 = vsel %vm82_vm1, %v455_v1, 0.0  ;;  %v84_v5 = vsel %vm82_vm1, %v460_v2, 0.0  ;;  %v476_v7 = vld [vmem:[%s1318_s0 + $0x18] sm:$0xff]  ;;  %v483_v10 = vld [vmem:[%s1318_s0 + $0x20] sm:$0xff] }
   0x3   :  { %v86_v6 = vsel %vm82_vm1, %v465_v3, 0.0  ;;  %v85_v8 = vadd.f32 %v84_v5, %v83_v4  ;;  %v88_v9 = vsel %vm82_vm1, %v476_v7, 0.0  ;;  %v90_v12 = vsel %vm82_vm1, %v483_v10, 0.0  ;;  %v490_v13 = vld [vmem:[%s1318_s0 + $0x28] sm:$0xff]  ;;  %v497_v16 = vld [vmem:[%s1318_s0 + $0x30] sm:$0xff]  ;;  %v502_v18 = vld [vmem:[%s1318_s0 + $0x38] sm:$0xff] }
   0x4   :  { %v92_v15 = vsel %vm82_vm1, %v490_v13, 0.0  ;;  %v507_v19 = vld [vmem:[%s1318_s0 + $0x40] sm:$0xff]  ;;  %v94_v20 = vsel %vm82_vm1, %v497_v16, 0.0  ;;  %v514_v21 = vld [vmem:[%s1318_s0 + $0x48] sm:$0xff]  ;;  %v519_v22 = vld [vmem:[%s1318_s0 + $0x50] sm:$0xff]  ;;  %v96_v25 = vsel %vm82_vm1, %v502_v18, 0.0 }
   0x5   :  { %v87_v11 = vadd.f32 %v86_v6, %v85_v8  ;;  %v524_v23 = vld [vmem:[%s1318_s0 + $0x58] sm:$0xff]  ;;  %v98_v26 = vsel %vm82_vm1, %v507_v19, 0.0  ;;  %v533_v27 = vld [vmem:[%s1318_s0 + $0x108] sm:$0xff]  ;;  %v538_v28 = vld [vmem:[%s1318_s0 + $0x110] sm:$0xff]  ;;  %v100_v30 = vsel %vm82_vm1, %v514_v21, 0.0  ;;  %v102_v31 = vsel %vm82_vm1, %v519_v22, 0.0 }
   0x6   :  { %v543_v29 = vld [vmem:[%s1318_s0 + $0x118] sm:$0xff]  ;;  %v551_v32 = vsel %vm82_vm1, %v524_v23, 0.0  ;;  %v556_v33 = vld [vmem:[%s1318_s0 + $0x120] sm:$0xff]  ;;  %v561_v34 = vld [vmem:[%s1318_s0 + $0x128] sm:$0xff]  ;;  %v570_v37 = vsel %vm82_vm1, %v533_v27, 0.0  ;;  %v574_v38 = vsel %vm82_vm1, %v538_v28, 0.0 }
   0x7   :  { %v89_v14 = vadd.f32 %v88_v9, %v87_v11  ;;  %v566_v35 = vld [vmem:[%s1318_s0 + $0x130] sm:$0xff]  ;;  %1339 = vst [vmem:[#allocation2_spill] sm:$0xff] %v570_v37  ;;  %1340 = vst [vmem:[#allocation3_spill] sm:$0xff] %v574_v38  ;;  %v578_v39 = vsel %vm82_vm1, %v543_v29, 0.0  ;;  %v583_v40 = vld [vmem:[%s1318_s0 + $0x138] sm:$0xff]  ;;  %v597_v43 = vsel %vm82_vm1, %v556_v33, 0.0  ;;  %v222_v37 = vmul.f32 %v465_v3, %v465_v3 }
   0x8   :  { %1341 = vst [vmem:[#allocation4_spill] sm:$0xff] %v578_v39  ;;  %v588_v41 = vld [vmem:[%s1318_s0 + $0x140] sm:$0xff]  ;;  %v593_v42 = vld [vmem:[%s1318_s0 + $0x148] sm:$0xff]  ;;  %1342 = vst [vmem:[#allocation5_spill] sm:$0xff] %v597_v43  ;;  %v601_v44 = vsel %vm82_vm1, %v561_v34, 0.0  ;;  %v605_v45 = vsel %vm82_vm1, %v566_v35, 0.0 }
   0x9   :  { %v91_v17 = vadd.f32 %v90_v12, %v89_v14  ;;  %1343 = vst [vmem:[#allocation6_spill] sm:$0xff] %v601_v44  ;;  %1344 = vst [vmem:[#allocation7_spill] sm:$0xff] %v605_v45  ;;  %v610_v46 = vld [vmem:[%s1318_s0 + $0x150] sm:$0xff]  ;;  %v615_v47 = vld [vmem:[%s1318_s0 + $0x158] sm:$0xff]  ;;  %v624_v50 = vsel %vm82_vm1, %v583_v40, 0.0  ;;  %v628_v51 = vsel %vm82_vm1, %v588_v41, 0.0 }
   0xa   :  { %v620_v48 = vld [vmem:[%s1318_s0 + $0x160] sm:$0xff]  ;;  %1345 = vst [vmem:[#allocation8_spill] sm:$0xff] %v624_v50  ;;  %1346 = vst [vmem:[#allocation9_spill] sm:$0xff] %v628_v51  ;;  %v632_v52 = vsel %vm82_vm1, %v593_v42, 0.0  ;;  %v637_v53 = vld [vmem:[%s1318_s0 + $0x168] sm:$0xff]  ;;  %v651_v56 = vsel %vm82_vm1, %v610_v46, 0.0 }
   0xb   :  { %v93_v24 = vadd.f32 %v92_v15, %v91_v17  ;;  %1347 = vst [vmem:[#allocation10_spill] sm:$0xff] %v632_v52  ;;  %v642_v54 = vld [vmem:[%s1318_s0 + $0x170] sm:$0xff]  ;;  %v647_v55 = vld [vmem:[%s1318_s0 + $0x178] sm:$0xff]  ;;  %1348 = vst [vmem:[#allocation11_spill] sm:$0xff] %v651_v56  ;;  %v655_v57 = vsel %vm82_vm1, %v615_v47, 0.0  ;;  %v659_v58 = vsel %vm82_vm1, %v620_v48, 0.0 }
   0xc   :  { %1349 = vst [vmem:[#allocation12_spill] sm:$0xff] %v655_v57  ;;  %1350 = vst [vmem:[#allocation13_spill] sm:$0xff] %v659_v58  ;;  %v664_v59 = vld [vmem:[%s1318_s0 + $0x180] sm:$0xff]  ;;  %v669_v60 = vld [vmem:[%s1318_s0 + $0x188] sm:$0xff]  ;;  %v678_v63 = vsel %vm82_vm1, %v637_v53, 0.0  ;;  %v682_v0 = vsel %vm82_vm1, %v642_v54, 0.0 }
   0xd   :  { %v95_v36 = vadd.f32 %v94_v20, %v93_v24  ;;  %v674_v61 = vld [vmem:[%s1318_s0 + $0x190] sm:$0xff]  ;;  %1351 = vst [vmem:[#allocation14_spill] sm:$0xff] %v678_v63  ;;  %1352 = vst [vmem:[#allocation15_spill] sm:$0xff] %v682_v0  ;;  %v686_v4 = vsel %vm82_vm1, %v647_v55, 0.0  ;;  %v691_v5 = vld [vmem:[%s1318_s0 + $0x198] sm:$0xff]  ;;  %v705_v9 = vsel %vm82_vm1, %v664_v59, 0.0 }
   0xe   :  { %1353 = vst [vmem:[#allocation16_spill] sm:$0xff] %v686_v4  ;;  %v696_v6 = vld [vmem:[%s1318_s0 + $0x1a0] sm:$0xff]  ;;  %v701_v8 = vld [vmem:[%s1318_s0 + $0x1a8] sm:$0xff]  ;;  %1354 = vst [vmem:[#allocation17_spill] sm:$0xff] %v705_v9  ;;  %v709_v11 = vsel %vm82_vm1, %v669_v60, 0.0  ;;  %v713_v12 = vsel %vm82_vm1, %v674_v61, 0.0 }
   0xf   :  { %v97_v49 = vadd.f32 %v96_v25, %v95_v36  ;;  %1355 = vst [vmem:[#allocation18_spill] sm:$0xff] %v709_v11  ;;  %1356 = vst [vmem:[#allocation19_spill] sm:$0xff] %v713_v12  ;;  %v718_v14 = vld [vmem:[%s1318_s0 + $0x60] sm:$0xff]  ;;  %v723_v15 = vld [vmem:[%s1318_s0 + $0x1b0] sm:$0xff]  ;;  %v737_v25 = vsel %vm82_vm1, %v691_v5, 0.0  ;;  %v745_v36 = vsel %vm82_vm1, %v701_v8, 0.0 }
  0x10   :  { %v728_v17 = vld [vmem:[%s1318_s0 + $0x1b8] sm:$0xff]  ;;  %v733_v20 = vld [vmem:[%s1318_s0 + $0x1c0] sm:$0xff]  ;;  %1357 = vst [vmem:[#allocation20_spill] sm:$0xff] %v737_v25  ;;  %1359 = vst [vmem:[#allocation22_spill] sm:$0xff] %v745_v36 }
  0x11   :  { %v99_v62 = vadd.f32 %v98_v26, %v97_v49  ;;  %v741_v26 = vsel %vm82_vm1, %v696_v6, 0.0  ;;  %v750_v49 = vld [vmem:[%s1318_s0 + $0x1c8] sm:$0xff]  ;;  %v768_v36 = vsel %vm82_vm1, %v728_v17, 0.0  ;;  %v772_v25 = vsel %vm82_vm1, %v733_v20, 0.0  ;;  %v777_v12 = vld [vmem:[%s1318_s0 + $0x1e0] sm:$0xff]  ;;  %v804_v0 = vld [vmem:[%s1318_s0 + $0x1f8] sm:$0xff] }
  0x12   :  { %1358 = vst [vmem:[#allocation21_spill] sm:$0xff] %v741_v26  ;;  %v764_v26 = vsel %vm82_vm1, %v723_v15, 0.0  ;;  %1361 = vst [vmem:[#allocation24_spill] sm:$0xff] %v768_v36  ;;  %v782_v11 = vld [vmem:[%s1318_s0 + $0x1e8] sm:$0xff]  ;;  %v791_v9 = vsel %vm82_vm1, %v750_v49, 0.0  ;;  %v826_v58 = vsel %vm82_vm1, %v804_v0, 0.0 }
  0x13   :  { %v101_v24 = vadd.f32 %v100_v30, %v99_v62  ;;  %v755_v30 = vld [vmem:[%s1318_s0 + $0x1d0] sm:$0xff]  ;;  %v760_v62 = vld [vmem:[%s1318_s0 + $0x1d8] sm:$0xff]  ;;  %1360 = vst [vmem:[#allocation23_spill] sm:$0xff] %v764_v26  ;;  %1362 = vst [vmem:[#allocation25_spill] sm:$0xff] %v772_v25 }
  0x14   :  { %v787_v26 = vld [vmem:[%s1318_s0 + $0x1f0] sm:$0xff]  ;;  %1364 = vst [vmem:[#allocation27_spill] sm:$0xff] %v791_v9  ;;  %v795_v25 = vsel %vm82_vm1, %v755_v30, 0.0  ;;  %v799_v4 = vsel %vm82_vm1, %v760_v62, 0.0  ;;  %1367 = vst [vmem:[#allocation30_spill] sm:$0xff] %v804_v0  ;;  %v814_v9 = vsel %vm82_vm1, %v782_v11, 0.0 }
  0x15   :  { %1363 = vst [vmem:[#allocation26_spill] sm:$0xff] %v787_v26  ;;  %v103_v36 = vadd.f32 %v102_v31, %v101_v24  ;;  %1365 = vst [vmem:[#allocation28_spill] sm:$0xff] %v795_v25  ;;  %v106_v31 = vsel %vm82_vm1, %v718_v14, 0.0  ;;  %v810_v24 = vsel %vm82_vm1, %v777_v12, 0.0  ;;  %v818_v25 = vsel %vm82_vm1, %v787_v26, 0.0  ;;  %v855_v56 = vld [vmem:[%s1318_s0 + $0x90] sm:$0xff] }
  0x16   :  { %1366 = vst [vmem:[#allocation29_spill] sm:$0xff] %v799_v4  ;;  %1368 = vst [vmem:[#allocation31_spill] sm:$0xff] %v810_v24  ;;  %v30_v4 = vld [vmem:[%s1318_s0 + $0x68] sm:$0xff]  ;;  %v860_v52 = vld [vmem:[%s1318_s0 + $0x98] sm:$0xff] }
  0x17   :  { %1369 = vst [vmem:[#allocation32_spill] sm:$0xff] %v814_v9  ;;  %1370 = vst [vmem:[#allocation33_spill] sm:$0xff] %v818_v25  ;;  %v105_v63 = vadd.f32 %v551_v32, %v103_v36  ;;  %v108_v24 = vsel %vm82_vm1, %v30_v4, 0.0  ;;  %v31_v9 = vld [vmem:[%s1318_s0 + $0x70] sm:$0xff]  ;;  %v835_v25 = vld [vmem:[%s1318_s0 + $0x78] sm:$0xff]  ;;  %v120_v39 = vsel %vm82_vm1, %v860_v52, 0.0 }
  0x18   :  { %1371 = vst [vmem:[#allocation34_spill] sm:$0xff] %v826_v58  ;;  %1372 = vst [vmem:[#allocation35_spill] sm:$0xff] %v835_v25  ;;  %v840_v32 = vld [vmem:[%s1318_s0 + $0x80] sm:$0xff]  ;;  %v845_v36 = vld [vmem:[%s1318_s0 + $0x88] sm:$0xff]  ;;  %v110_v58 = vsel %vm82_vm1, %v31_v9, 0.0 }
  0x19   :  { %v107_v57 = vadd.f32 %v106_v31, %v105_v63  ;;  %1373 = vst [vmem:[#allocation36_spill] sm:$0xff] %v840_v32  ;;  %1374 = vst [vmem:[#allocation37_spill] sm:$0xff] %v845_v36  ;;  %v220_v63 = vmul.f32 %v455_v1, %v455_v1  ;;  %v221_v31 = vmul.f32 %v460_v2, %v460_v2  ;;  %v865_v51 = vld [vmem:[%s1318_s0 + $0xa0] sm:$0xff]  ;;  %v112_v1 = vsel %vm82_vm1, %v835_v25, 0.0  ;;  %v876_v44 = vld [vmem:[%s1318_s0 + $0xa8] sm:$0xff] }
  0x1a   :  { %1375 = vst [vmem:[#allocation38_spill] sm:$0xff] %v855_v56  ;;  %1376 = vst [vmem:[#allocation39_spill] sm:$0xff] %v860_v52  ;;  %v114_v2 = vsel %vm82_vm1, %v840_v32, 0.0  ;;  %v116_v45 = vsel %vm82_vm1, %v845_v36, 0.0  ;;  %v881_v43 = vld [vmem:[%s1318_s0 + $0xb0] sm:$0xff]  ;;  %v122_v38 = vsel %vm82_vm1, %v865_v51, 0.0  ;;  %v223_v25 = vmul.f32 %v476_v7, %v476_v7 }
  0x1b   :  { %1377 = vst [vmem:[#allocation40_spill] sm:$0xff] %v865_v51  ;;  %v109_v50 = vadd.f32 %v108_v24, %v107_v57  ;;  %1378 = vst [vmem:[#allocation41_spill] sm:$0xff] %v876_v44  ;;  %v886_v57 = vld [vmem:[%s1318_s0 + $0xb8] sm:$0xff]  ;;  %v118_v24 = vsel %vm82_vm1, %v855_v56, 0.0  ;;  %v899_v36 = vld [vmem:[%s1318_s0 + $0xc0] sm:$0xff]  ;;  %v124_v51 = vsel %vm82_vm1, %v876_v44, 0.0 }
  0x1c   :  { %1379 = vst [vmem:[#allocation42_spill] sm:$0xff] %v881_v43  ;;  %1380 = vst [vmem:[#allocation43_spill] sm:$0xff] %v886_v57  ;;  %v904_v32 = vld [vmem:[%s1318_s0 + $0xc8] sm:$0xff]  ;;  %v909_v52 = vld [vmem:[%s1318_s0 + $0xd0] sm:$0xff]  ;;  %v915_v3 = vsel %vm82_vm1, %v881_v43, 0.0 }
  0x1d   :  { %1381 = vst [vmem:[#allocation44_spill] sm:$0xff] %v899_v36  ;;  %1382 = vst [vmem:[#allocation45_spill] sm:$0xff] %v904_v32  ;;  %v111_v56 = vadd.f32 %v110_v58, %v109_v50  ;;  %v922_v0 = vld [vmem:[%s1318_s0 + $0xd8] sm:$0xff]  ;;  %v927_v26 = vld [vmem:[%s1318_s0 + $0xe0] sm:$0xff]  ;;  %v931_v50 = vsel %vm82_vm1, %v886_v57, 0.0  ;;  %v935_v58 = vsel %vm82_vm1, %v899_v36, 0.0 }
  0x1e   :  { %1383 = vst [vmem:[#allocation46_spill] sm:$0xff] %v909_v52  ;;  %1384 = vst [vmem:[#allocation47_spill] sm:$0xff] %v922_v0  ;;  %v939_v7 = vsel %vm82_vm1, %v904_v32, 0.0  ;;  %v943_v43 = vsel %vm82_vm1, %v909_v52, 0.0  ;;  %v948_v44 = vld [vmem:[%s1318_s0 + $0xe8] sm:$0xff]  ;;  %v953_v57 = vld [vmem:[%s1318_s0 + $0xf0] sm:$0xff]  ;;  %v224_v52 = vmul.f32 %v483_v10, %v483_v10  ;;  %v228_v10 = vmul.f32 %v507_v19, %v507_v19 }
  0x1f   :  { %1385 = vst [vmem:[#allocation48_spill] sm:$0xff] %v927_v26  ;;  %1386 = vst [vmem:[#allocation49_spill] sm:$0xff] %v935_v58  ;;  %v113_v36 = vadd.f32 %v112_v1, %v111_v56  ;;  %v957_v58 = vsel %vm82_vm1, %v922_v0, 0.0  ;;  %v961_v32 = vsel %vm82_vm1, %v927_v26, 0.0  ;;  %v225_v56 = vmul.f32 %v490_v13, %v490_v13 }
  0x20   :  { %1387 = vst [vmem:[#allocation50_spill] sm:$0xff] %v939_v7  ;;  %1388 = vst [vmem:[#allocation51_spill] sm:$0xff] %v943_v43  ;;  %v967_v43 = vsel %vm82_vm1, %v948_v44, 0.0  ;;  %v971_v7 = vsel %vm82_vm1, %v953_v57, 0.0  ;;  %v226_v1 = vmul.f32 %v497_v16, %v497_v16  ;;  %v227_v26 = vmul.f32 %v502_v18, %v502_v18 }
  0x21   :  { %1389 = vst [vmem:[#allocation52_spill] sm:$0xff] %v948_v44  ;;  %1390 = vst [vmem:[#allocation53_spill] sm:$0xff] %v953_v57  ;;  %v115_v0 = vadd.f32 %v114_v2, %v113_v36  ;;  %v229_v44 = vmul.f32 %v514_v21, %v514_v21  ;;  %v230_v57 = vmul.f32 %v519_v22, %v519_v22 }
  0x22   :  { %1391 = vst [vmem:[#allocation54_spill] sm:$0xff] %v971_v7  ;;  %v231_v7 = vmul.f32 %v524_v23, %v524_v23  ;;  %v232_v13 = vmul.f32 %v718_v14, %v718_v14  ;;  %v989_v16 = vmul.f32 %v30_v4, %v30_v4  ;;  %v991_v2 = vmul.f32 %v31_v9, %v31_v9 }
  0x23   :  { %v117_v36 = vadd.f32 %v116_v45, %v115_v0  ;;  %v253_v18 = vmul.f32 %v533_v27, %v533_v27  ;;  %v254_v19 = vmul.f32 %v538_v28, %v538_v28  ;;  %v255_v21 = vmul.f32 %v543_v29, %v543_v29 }
  0x24   :  { %v256_v22 = vmul.f32 %v556_v33, %v556_v33  ;;  %v257_v23 = vmul.f32 %v561_v34, %v561_v34  ;;  %v258_v45 = vmul.f32 %v566_v35, %v566_v35  ;;  %v259_v4 = vmul.f32 %v583_v40, %v583_v40 }
  0x25   :  { %v119_v0 = vadd.f32 %v118_v24, %v117_v36  ;;  %v260_v27 = vmul.f32 %v588_v41, %v588_v41  ;;  %v261_v28 = vmul.f32 %v593_v42, %v593_v42  ;;  %v262_v29 = vmul.f32 %v610_v46, %v610_v46 }
  0x26   :  { %v263_v33 = vmul.f32 %v615_v47, %v615_v47  ;;  %v284_v34 = vsel %vm82_vm1, %v220_v63, 0.0  ;;  %v285_v35 = vsel %vm82_vm1, %v221_v31, 0.0  ;;  %v264_v40 = vmul.f32 %v620_v48, %v620_v48 }
  0x27   :  { %v121_v9 = vadd.f32 %v120_v39, %v119_v0  ;;  %v286_v14 = vadd.f32 %v285_v35, %v284_v34  ;;  %v287_v41 = vsel %vm82_vm1, %v222_v37, 0.0  ;;  %v265_v42 = vmul.f32 %v637_v53, %v637_v53  ;;  %v1392_v0 = vld [vmem:[#allocation26_spill] sm:$0xff] }
  0x28   :  { %v266_v46 = vmul.f32 %v642_v54, %v642_v54  ;;  %v267_v47 = vmul.f32 %v647_v55, %v647_v55  ;;  %v289_v63 = vsel %vm82_vm1, %v223_v25, 0.0  ;;  %v268_v39 = vmul.f32 %v664_v59, %v664_v59  ;;  %v1393_v34 = vld [vmem:[#allocation30_spill] sm:$0xff] }
  0x29   :  { %v123_v24 = vadd.f32 %v122_v38, %v121_v9  ;;  %v269_v48 = vmul.f32 %v669_v60, %v669_v60  ;;  %v288_v31 = vadd.f32 %v287_v41, %v286_v14  ;;  %v270_v37 = vmul.f32 %v674_v61, %v674_v61  ;;  %v1394_v41 = vld [vmem:[#allocation49_spill] sm:$0xff] }
  0x2a   :  { %v271_v53 = vmul.f32 %v691_v5, %v691_v5  ;;  %v272_v54 = vmul.f32 %v696_v6, %v696_v6  ;;  %v291_v55 = vsel %vm82_vm1, %v224_v52, 0.0  ;;  %v273_v38 = vmul.f32 %v701_v8, %v701_v8 }
  0x2b   :  { %v125_v25 = vadd.f32 %v124_v51, %v123_v24  ;;  %v274_v59 = vmul.f32 %v723_v15, %v723_v15  ;;  %v290_v60 = vadd.f32 %v289_v63, %v288_v31  ;;  %v275_v36 = vmul.f32 %v728_v17, %v728_v17 }
  0x2c   :  { %v276_v61 = vmul.f32 %v733_v20, %v733_v20  ;;  %v277_v5 = vmul.f32 %v750_v49, %v750_v49  ;;  %v293_v6 = vsel %vm82_vm1, %v225_v56, 0.0  ;;  %v278_v52 = vmul.f32 %v755_v30, %v755_v30 }
  0x2d   :  { %v127_v51 = vadd.f32 %v915_v3, %v125_v25  ;;  %v279_v8 = vmul.f32 %v760_v62, %v760_v62  ;;  %v292_v15 = vadd.f32 %v291_v55, %v290_v60  ;;  %v280_v17 = vmul.f32 %v777_v12, %v777_v12  ;;  %v1396_v25 = vld [vmem:[#allocation51_spill] sm:$0xff] }
  0x2e   :  { %v281_v20 = vmul.f32 %v782_v11, %v782_v11  ;;  %v282_v49 = vmul.f32 %v1392_v0, %v1392_v0  ;;  %v295_v56 = vsel %vm82_vm1, %v226_v1, 0.0  ;;  %v283_v30 = vmul.f32 %v1393_v34, %v1393_v34  ;;  %v1398_v34 = vld [vmem:[#allocation54_spill] sm:$0xff] }
  0x2f   :  { %v129_v3 = vadd.f32 %v931_v50, %v127_v51  ;;  %v294_v35 = vadd.f32 %v293_v6, %v292_v15  ;;  %v297_v62 = vsel %vm82_vm1, %v227_v26, 0.0  ;;  %v299_v9 = vsel %vm82_vm1, %v228_v10, 0.0 }
  0x30   :  { %v301_v12 = vsel %vm82_vm1, %v229_v44, 0.0  ;;  %v303_v14 = vsel %vm82_vm1, %v230_v57, 0.0  ;;  %v305_v11 = vsel %vm82_vm1, %v231_v7, 0.0  ;;  %v307_v1 = vsel %vm82_vm1, %v232_v13, 0.0  ;;  %v1395_v7 = vld [vmem:[#allocation50_spill] sm:$0xff] }
  0x31   :  { %v131_v63 = vadd.f32 %v1394_v41, %v129_v3  ;;  %v296_v24 = vadd.f32 %v295_v56, %v294_v35  ;;  %v1072_v50 = vsel %vm82_vm1, %v253_v18, 0.0  ;;  %v1075_v31 = vsel %vm82_vm1, %v254_v19, 0.0  ;;  %v1397_v56 = vld [vmem:[#allocation35_spill] sm:$0xff] }
  0x32   :  { %v1078_v26 = vsel %vm82_vm1, %v255_v21, 0.0  ;;  %v1081_v44 = vsel %vm82_vm1, %v256_v22, 0.0  ;;  %v1084_v57 = vsel %vm82_vm1, %v257_v23, 0.0  ;;  %v1088_v13 = vsel %vm82_vm1, %v258_v45, 0.0 }
  0x33   :  { %v133_v10 = vadd.f32 %v1395_v7, %v131_v63  ;;  %v298_v55 = vadd.f32 %v297_v62, %v296_v24  ;;  %v1091_v18 = vsel %vm82_vm1, %v259_v4, 0.0  ;;  %v1094_v19 = vsel %vm82_vm1, %v260_v27, 0.0  ;;  %v1399_v62 = vld [vmem:[#allocation36_spill] sm:$0xff] }
  0x34   :  { %v1097_v21 = vsel %vm82_vm1, %v261_v28, 0.0  ;;  %v1100_v22 = vsel %vm82_vm1, %v262_v29, 0.0  ;;  %v1103_v23 = vsel %vm82_vm1, %v263_v33, 0.0  ;;  %v1107_v45 = vsel %vm82_vm1, %v264_v40, 0.0 }
  0x35   :  { %v135_v60 = vadd.f32 %v1396_v25, %v133_v10  ;;  %v300_v6 = vadd.f32 %v299_v9, %v298_v55  ;;  %v1110_v4 = vsel %vm82_vm1, %v265_v42, 0.0  ;;  %v1113_v27 = vsel %vm82_vm1, %v266_v46, 0.0  ;;  %v1401_v10 = vld [vmem:[#allocation38_spill] sm:$0xff] }
  0x36   :  { %v1116_v28 = vsel %vm82_vm1, %v267_v47, 0.0  ;;  %v1119_v29 = vsel %vm82_vm1, %v268_v39, 0.0  ;;  %v1122_v33 = vsel %vm82_vm1, %v269_v48, 0.0  ;;  %v1126_v40 = vsel %vm82_vm1, %v270_v37, 0.0  ;;  %v1402_v25 = vld [vmem:[#allocation2_spill] sm:$0xff] }
  0x37   :  { %v137_v51 = vadd.f32 %v957_v58, %v135_v60  ;;  %v302_v15 = vadd.f32 %v301_v12, %v300_v6  ;;  %v1129_v42 = vsel %vm82_vm1, %v271_v53, 0.0  ;;  %v1132_v46 = vsel %vm82_vm1, %v272_v54, 0.0 }
  0x38   :  { %v1135_v47 = vsel %vm82_vm1, %v273_v38, 0.0  ;;  %v1138_v39 = vsel %vm82_vm1, %v274_v59, 0.0  ;;  %v1141_v48 = vsel %vm82_vm1, %v275_v36, 0.0  ;;  %v1145_v37 = vsel %vm82_vm1, %v276_v61, 0.0 }
  0x39   :  { %v139_v58 = vadd.f32 %v961_v32, %v137_v51  ;;  %v304_v0 = vadd.f32 %v303_v14, %v302_v15  ;;  %v1148_v53 = vsel %vm82_vm1, %v277_v5, 0.0  ;;  %v1151_v54 = vsel %vm82_vm1, %v278_v52, 0.0  ;;  %v1165_v32 = vld [vmem:[%s1318_s0 + $0xf8] sm:$0xff]  ;;  %v1403_v51 = vld [vmem:[#allocation39_spill] sm:$0xff] }
  0x3a   :  { %v1154_v38 = vsel %vm82_vm1, %v279_v8, 0.0  ;;  %v1157_v59 = vsel %vm82_vm1, %v280_v17, 0.0  ;;  %v1160_v36 = vsel %vm82_vm1, %v281_v20, 0.0  ;;  %v1169_v52 = vsel %vm82_vm1, %v282_v49, 0.0 }
  0x3b   :  { %v141_v61 = vadd.f32 %v967_v43, %v139_v58  ;;  %v306_v5 = vadd.f32 %v305_v11, %v304_v0  ;;  %v1172_v8 = vsel %vm82_vm1, %v283_v30, 0.0  ;;  %v144_v17 = vsel %vm82_vm1, %v1165_v32, 0.0  ;;  %v1183_v43 = vld [vmem:[%s1318_s0 + $0x100] sm:$0xff]  ;;  %v1404_v58 = vld [vmem:[#allocation3_spill] sm:$0xff] }
  0x3c   :  { %v235_v20 = vmul.f32 %v1397_v56, %v1397_v56  ;;  %v309_v3 = vsel %vm82_vm1, %v989_v16, 0.0  ;;  %v146_v30 = vsel %vm82_vm1, %v1183_v43, 0.0  ;;  %v236_v9 = vmul.f32 %v1399_v62, %v1399_v62  ;;  %v1400_v16 = vld [vmem:[#allocation37_spill] sm:$0xff] }
  0x3d   :  { %v143_v49 = vadd.f32 %v1398_v34, %v141_v61  ;;  %v308_v35 = vadd.f32 %v307_v1, %v306_v5  ;;  %v311_v12 = vsel %vm82_vm1, %v991_v2, 0.0  ;;  %v237_v41 = vmul.f32 %v1400_v16, %v1400_v16  ;;  %v1405_v5 = vld [vmem:[#allocation40_spill] sm:$0xff]  ;;  %v1408_v62 = vld [vmem:[#allocation5_spill] sm:$0xff] }
  0x3e   :  { %v313_v63 = vsel %vm82_vm1, %v235_v20, 0.0  ;;  %v238_v1 = vmul.f32 %v1401_v10, %v1401_v10  ;;  %v315_v55 = vsel %vm82_vm1, %v236_v9, 0.0  ;;  %v239_v2 = vmul.f32 %v1403_v51, %v1403_v51  ;;  %v1406_v20 = vld [vmem:[#allocation4_spill] sm:$0xff] }
  0x3f   :  { %v145_v14 = vadd.f32 %v144_v17, %v143_v49  ;;  %v310_v11 = vadd.f32 %v309_v3, %v308_v35  ;;  %v317_v15 = vsel %vm82_vm1, %v237_v41, 0.0  ;;  %v240_v17 = vmul.f32 %v1405_v5, %v1405_v5  ;;  %v1407_v49 = vld [vmem:[#allocation41_spill] sm:$0xff]  ;;  %v1410_v41 = vld [vmem:[#allocation6_spill] sm:$0xff] }
  0x40   :  { %v319_v56 = vsel %vm82_vm1, %v238_v1, 0.0  ;;  %v241_v35 = vmul.f32 %v1407_v49, %v1407_v49 }
  0x41   :  { %v147_v24 = vadd.f32 %v146_v30, %v145_v14  ;;  %v312_v7 = vadd.f32 %v311_v12, %v310_v11  ;;  %v321_v30 = vsel %vm82_vm1, %v239_v2, 0.0  ;;  %v1409_v14 = vld [vmem:[#allocation42_spill] sm:$0xff]  ;;  %v323_v16 = vsel %vm82_vm1, %v240_v17, 0.0 }
  0x42   :  { %v242_v11 = vmul.f32 %v1409_v14, %v1409_v14  ;;  %v325_v1 = vsel %vm82_vm1, %v241_v35, 0.0 }
  0x43   :  { %v149_v60 = vadd.f32 %v1402_v25, %v147_v24  ;;  %v314_v6 = vadd.f32 %v313_v63, %v312_v7  ;;  %v1411_v7 = vld [vmem:[#allocation43_spill] sm:$0xff] }
  0x44   :  { %v243_v10 = vmul.f32 %v1411_v7, %v1411_v7  ;;  %v327_v2 = vsel %vm82_vm1, %v242_v11, 0.0 }
  0x45   :  { %v151_v0 = vadd.f32 %v1404_v58, %v149_v60  ;;  %v316_v61 = vadd.f32 %v315_v55, %v314_v6  ;;  %v1412_v55 = vld [vmem:[#allocation7_spill] sm:$0xff]  ;;  %v1413_v6 = vld [vmem:[#allocation44_spill] sm:$0xff] }
  0x46   :  { %v244_v51 = vmul.f32 %v1413_v6, %v1413_v6  ;;  %v329_v17 = vsel %vm82_vm1, %v243_v10, 0.0 }
  0x47   :  { %v153_v3 = vadd.f32 %v1406_v20, %v151_v0  ;;  %v318_v34 = vadd.f32 %v317_v15, %v316_v61  ;;  %v1414_v15 = vld [vmem:[#allocation8_spill] sm:$0xff]  ;;  %v1415_v61 = vld [vmem:[#allocation45_spill] sm:$0xff] }
  0x48   :  { %v245_v5 = vmul.f32 %v1415_v61, %v1415_v61  ;;  %v331_v35 = vsel %vm82_vm1, %v244_v51, 0.0 }
  0x49   :  { %v155_v9 = vadd.f32 %v1408_v62, %v153_v3  ;;  %v320_v12 = vadd.f32 %v319_v56, %v318_v34  ;;  %v1416_v56 = vld [vmem:[#allocation9_spill] sm:$0xff]  ;;  %v1417_v34 = vld [vmem:[#allocation46_spill] sm:$0xff] }
  0x4a   :  { %v246_v49 = vmul.f32 %v1417_v34, %v1417_v34  ;;  %v333_v11 = vsel %vm82_vm1, %v245_v5, 0.0 }
  0x4b   :  { %v157_v63 = vadd.f32 %v1410_v41, %v155_v9  ;;  %v322_v24 = vadd.f32 %v321_v30, %v320_v12  ;;  %v1418_v30 = vld [vmem:[#allocation10_spill] sm:$0xff]  ;;  %v1419_v12 = vld [vmem:[#allocation47_spill] sm:$0xff] }
  0x4c   :  { %v247_v14 = vmul.f32 %v1419_v12, %v1419_v12  ;;  %v335_v10 = vsel %vm82_vm1, %v246_v49, 0.0  ;;  %v1427_v49 = vld [vmem:[#allocation15_spill] sm:$0xff]  ;;  %v1428_v12 = vld [vmem:[#allocation16_spill] sm:$0xff] }
  0x4d   :  { %v159_v25 = vadd.f32 %v1412_v55, %v157_v63  ;;  %v324_v60 = vadd.f32 %v323_v16, %v322_v24  ;;  %v1420_v16 = vld [vmem:[#allocation11_spill] sm:$0xff]  ;;  %v1421_v24 = vld [vmem:[#allocation48_spill] sm:$0xff] }
  0x4e   :  { %v248_v7 = vmul.f32 %v1421_v24, %v1421_v24  ;;  %v337_v51 = vsel %vm82_vm1, %v247_v14, 0.0 }
  0x4f   :  { %v161_v58 = vadd.f32 %v1414_v15, %v159_v25  ;;  %v326_v0 = vadd.f32 %v325_v1, %v324_v60  ;;  %v1422_v1 = vld [vmem:[#allocation12_spill] sm:$0xff] }
  0x50   :  { %v1423_v60 = vld [vmem:[#allocation52_spill] sm:$0xff]  ;;  %v339_v5 = vsel %vm82_vm1, %v248_v7, 0.0  ;;  %v1430_v7 = vld [vmem:[#allocation18_spill] sm:$0xff] }
  0x51   :  { %v163_v20 = vadd.f32 %v1416_v56, %v161_v58  ;;  %v328_v3 = vadd.f32 %v327_v2, %v326_v0  ;;  %v249_v6 = vmul.f32 %v1423_v60, %v1423_v60  ;;  %v1424_v2 = vld [vmem:[#allocation13_spill] sm:$0xff] }
  0x52   :  { %v1425_v0 = vld [vmem:[#allocation53_spill] sm:$0xff] }
  0x53   :  { %v165_v62 = vadd.f32 %v1418_v30, %v163_v20  ;;  %v330_v9 = vadd.f32 %v329_v17, %v328_v3  ;;  %v250_v61 = vmul.f32 %v1425_v0, %v1425_v0  ;;  %v1426_v17 = vld [vmem:[#allocation14_spill] sm:$0xff]  ;;  %v251_v3 = vmul.f32 %v1165_v32, %v1165_v32 }
  0x54   :  { %v341_v34 = vsel %vm82_vm1, %v249_v6, 0.0  ;;  %v1432_v6 = vld [vmem:[#allocation20_spill] sm:$0xff]  ;;  %v1434_v0 = vld [vmem:[#allocation22_spill] sm:$0xff] }
  0x55   :  { %v167_v41 = vadd.f32 %v1420_v16, %v165_v62  ;;  %v332_v63 = vadd.f32 %v331_v35, %v330_v9  ;;  %v252_v62 = vmul.f32 %v1183_v43, %v1183_v43  ;;  %v343_v9 = vsel %vm82_vm1, %v250_v61, 0.0 }
  0x56   :  { %v345_v16 = vsel %vm82_vm1, %v251_v3, 0.0  ;;  %v1436_v3 = vld [vmem:[#allocation24_spill] sm:$0xff] }
  0x57   :  { %v169_v55 = vadd.f32 %v1422_v1, %v167_v41  ;;  %v334_v25 = vadd.f32 %v333_v11, %v332_v63  ;;  %v1429_v41 = vld [vmem:[#allocation17_spill] sm:$0xff]  ;;  %v347_v32 = vsel %vm82_vm1, %v252_v62, 0.0  ;;  %v1438_v62 = vld [vmem:[#allocation27_spill] sm:$0xff] }
  0x59   :  { %v171_v15 = vadd.f32 %v1424_v2, %v169_v55  ;;  %v336_v58 = vadd.f32 %v335_v10, %v334_v25  ;;  %v1431_v55 = vld [vmem:[#allocation19_spill] sm:$0xff]  ;;  %v1433_v2 = vld [vmem:[#allocation21_spill] sm:$0xff] }
  0x5b   :  { %v173_v56 = vadd.f32 %v1426_v17, %v171_v15  ;;  %v338_v20 = vadd.f32 %v337_v51, %v336_v58  ;;  %v1435_v17 = vld [vmem:[#allocation23_spill] sm:$0xff] }
  0x5d   :  { %v175_v35 = vadd.f32 %v1427_v49, %v173_v56  ;;  %v340_v30 = vadd.f32 %v339_v5, %v338_v20 }
  0x5f   :  { %v177_v14 = vadd.f32 %v1428_v12, %v175_v35  ;;  %v342_v11 = vadd.f32 %v341_v34, %v340_v30  ;;  %v1437_v35 = vld [vmem:[#allocation25_spill] sm:$0xff]  ;;  %v1439_v12 = vld [vmem:[#allocation28_spill] sm:$0xff] }
  0x61   :  { %v179_v63 = vadd.f32 %v1429_v41, %v177_v14  ;;  %v344_v24 = vadd.f32 %v343_v9, %v342_v11  ;;  %v1440_v11 = vld [vmem:[#allocation29_spill] sm:$0xff]  ;;  %v1441_v41 = vld [vmem:[#allocation31_spill] sm:$0xff] }
  0x63   :  { %v181_v10 = vadd.f32 %v1430_v7, %v179_v63  ;;  %v346_v1 = vadd.f32 %v345_v16, %v344_v24  ;;  %v1442_v24 = vld [vmem:[#allocation32_spill] sm:$0xff]  ;;  %v1443_v7 = vld [vmem:[#allocation33_spill] sm:$0xff] }
  0x65   :  { %v183_v25 = vadd.f32 %v1431_v55, %v181_v10  ;;  %v348_v60 = vadd.f32 %v347_v32, %v346_v1  ;;  %v1444_v1 = vld [vmem:[#allocation34_spill] sm:$0xff] }
  0x67   :  { %v185_v43 = vadd.f32 %v1432_v6, %v183_v25  ;;  %v350_v51 = vadd.f32 %v1072_v50, %v348_v60 }
  0x69   :  { %v187_v15 = vadd.f32 %v1433_v2, %v185_v43  ;;  %v352_v58 = vadd.f32 %v1075_v31, %v350_v51 }
  0x6b   :  { %v189_v61 = vadd.f32 %v1434_v0, %v187_v15  ;;  %v354_v5 = vadd.f32 %v1078_v26, %v352_v58 }
  0x6d   :  { %v191_v56 = vadd.f32 %v1435_v17, %v189_v61  ;;  %v356_v20 = vadd.f32 %v1081_v44, %v354_v5 }
  0x6f   :  { %v193_v34 = vadd.f32 %v1436_v3, %v191_v56  ;;  %v358_v49 = vadd.f32 %v1084_v57, %v356_v20 }
  0x71   :  { %v195_v30 = vadd.f32 %v1437_v35, %v193_v34  ;;  %v360_v50 = vadd.f32 %v1088_v13, %v358_v49 }
  0x73   :  { %v197_v9 = vadd.f32 %v1438_v62, %v195_v30  ;;  %v362_v31 = vadd.f32 %v1091_v18, %v360_v50 }
  0x75   :  { %v199_v14 = vadd.f32 %v1439_v12, %v197_v9  ;;  %v364_v26 = vadd.f32 %v1094_v19, %v362_v31 }
  0x77   :  { %v201_v16 = vadd.f32 %v1440_v11, %v199_v14  ;;  %v366_v44 = vadd.f32 %v1097_v21, %v364_v26 }
  0x79   :  { %v203_v63 = vadd.f32 %v1441_v41, %v201_v16  ;;  %v368_v57 = vadd.f32 %v1100_v22, %v366_v44 }
  0x7b   :  { %v205_v32 = vadd.f32 %v1442_v24, %v203_v63  ;;  %v370_v13 = vadd.f32 %v1103_v23, %v368_v57 }
  0x7d   :  { %v207_v10 = vadd.f32 %v1443_v7, %v205_v32  ;;  %v372_v18 = vadd.f32 %v1107_v45, %v370_v13  ;;  %v81_v45 = vld [vmem:[%s1319_s1] sm:$0x1] }
  0x7f   :  { %v209_v55 = vadd.f32 %v1444_v1, %v207_v10  ;;  %v374_v19 = vadd.f32 %v1110_v4, %v372_v18 }
  0x81   :  { %v210_v25 = vrot.slane %v209_v55, 4  ;;  %v376_v60 = vadd.f32 %v1113_v27, %v374_v19 }
  0x83   :  { %v211_v21 = vadd.f32 %v210_v25, %v209_v55  ;;  %v378_v6 = vadd.f32 %v1116_v28, %v376_v60 }
  0x85   :  { %v212_v43 = vrot.slane %v211_v21, 2  ;;  %v380_v22 = vadd.f32 %v1119_v29, %v378_v6 }
  0x87   :  { %v213_v51 = vadd.f32 %v212_v43, %v211_v21  ;;  %v382_v23 = vadd.f32 %v1122_v33, %v380_v22 }
  0x89   :  { %v214_v2 = vrot.slane %v213_v51, 1  ;;  %v384_v15 = vadd.f32 %v1126_v40, %v382_v23 }
  0x8b   :  { %v215_v4 = vadd.f32 %v214_v2, %v213_v51  ;;  %v386_v58 = vadd.f32 %v1129_v42, %v384_v15 }
  0x8d   :  { %v216_v27 = vadd.f32 %v215_v4, %v81_v45  ;;  %v388_v0 = vadd.f32 %v1132_v46, %v386_v58 }
  0x8f   :  { %218 = vst.msk [vmem:[%s1319_s1] sm:$0x1] %vm14_vm0, %v216_v27  ;;  %v390_v28 = vadd.f32 %v1135_v47, %v388_v0 }
  0x91   :  { %v392_v29 = vadd.f32 %v1138_v39, %v390_v28 }
  0x93   :  { %v394_v33 = vadd.f32 %v1141_v48, %v392_v29 }
  0x95   :  { %v396_v40 = vadd.f32 %v1145_v37, %v394_v33  ;;  %v219_v37 = vld [vmem:[%s1320_s2] sm:$0x1] }
  0x97   :  { %v398_v61 = vadd.f32 %v1148_v53, %v396_v40 }
  0x99   :  { %v400_v42 = vadd.f32 %v1151_v54, %v398_v61 }
  0x9b   :  { %v402_v5 = vadd.f32 %v1154_v38, %v400_v42 }
  0x9d   :  { %v404_v46 = vadd.f32 %v1157_v59, %v402_v5 }
  0x9f   :  { %v406_v17 = vadd.f32 %v1160_v36, %v404_v46 }
  0xa1   :  { %v408_v56 = vadd.f32 %v1169_v52, %v406_v17 }
  0xa3   :  { %v410_v47 = vadd.f32 %v1172_v8, %v408_v56 }
  0xa5   :  { %v411_v20 = vrot.slane %v410_v47, 4 }
  0xa7   :  { %v412_v39 = vadd.f32 %v411_v20, %v410_v47 }
  0xa9   :  { %v413_v3 = vrot.slane %v412_v39, 2 }
  0xab   :  { %v414_v48 = vadd.f32 %v413_v3, %v412_v39 }
  0xad   :  { %v415_v34 = vrot.slane %v414_v48, 1 }
  0xaf   :  { %v416_v53 = vadd.f32 %v415_v34, %v414_v48 }
  0xb1   :  { %v417_v54 = vadd.f32 %v416_v53, %v219_v37 }
  0xb3   :  { %418 = vst.msk [vmem:[%s1320_s2] sm:$0x1] %vm14_vm0, %v417_v54 }

// kernel: densenet_forward.55
= control target key start
LH: loop header
LB: loop body
LE: loop exit
PB: predicated region body
PF: predicated region fallthrough
CT: control target
= control target key end

     0   :  { %s1958_s9 = smov 0   ;;  %s1960_s10 = smov 0   ;;  %s2912_s0 = inlined_call_operand.vmem [shape: bf16[512,9984], index: 0, kind: input, shape index: {}]   ;;  %s2913_s1 = inlined_call_operand.vmem [shape: bf16[9984,128], index: 1, kind: input, shape index: {}]   ;;  %s2914_s2 = inlined_call_operand.vmem [shape: f32[512,128], index: 2, kind: output, shape index: {}]  }
   0x1   :  { %s1962_s11 = smov 0   ;;  %s1964_s12 = smov 0  }
   0x2   :  { %s1966_s13 = smov 0  }
   0x3 LB: > { %s21_s14 = sadd.s32 1, %s1935_s12  ;;  %p40_p1 = scmp.ne.s32.totalorder %s1927_s10, %s1923_s9  ;;  %s1939_s13 = sphi %s1966_s13, %s12_s13   ;;  %s1935_s12 = sphi %s1964_s12, %s2918_s12   ;;  %s1931_s11 = sphi %s1962_s11, %s2917_s11   ;;  %s1927_s10 = sphi %s1960_s10, %s2916_s10   ;;  %s1923_s9 = sphi %s1958_s9, %s2915_s9  }
   0x4   : > { %p22_p0 = scmp.ge.s32.totalorder %s21_s14, 39  ;;  %p41_p2 = scmp.eq.s32.totalorder %s1939_s13, 0 }
   0x5   : > { %s33_s16 = sadd.s32 1, %s1927_s10  ;;  %p1621_p5 = scmp.ge.s32.totalorder %s1939_s13, 39 }
   0x6   : > { %s2920_s14 = smov (%p22_p0, %s21_s14), 0  ;;  %p42_p3 = por %p41_p2, %p40_p1 }
   0x7   : > { %s29_s15 = ssub.s32 %s1935_s12, %s2920_s14  ;;  %118 = sbr.rel (%p1621_p5) target bundleno = 48 (0x30), region = 16 }
   0x8   : > { %p31_p4 = scmp.eq.s32.totalorder %s29_s15, 0 }
   0xa   : > { %s1993_s17 = scalar_select %p31_p4, %s1927_s10, %s33_s16  }
   0xc   : > { %121 = sbr.rel (!%p42_p3) target bundleno = 48 (0x30), region = 20  ;;  %s123_s18 = sand.u32 (%p42_p3), 1, %s1927_s10  }
   0xd   : > { %s1714_s19 = sshll.u32 (%p42_p3), %s1935_s12, 3  ;;  %s1622_s20 = sshll.u32 (%p42_p3), %s123_s18, 9 }
   0xe   : > { %s2001_s23 = scalar_lea.vmem (%p42_p3), %s2912_s0, %s1714_s19  ;;  %s2006_s24 = scalar_lea.vmem (%p42_p3), [#allocation2], %s1622_s20 }
   0xf   : > { %v286_v0 = vld [vmem:[%s2001_s23] sm:$0xff] (%p42_p3)  ;;  %v288_v1 = vld [vmem:[%s2001_s23 + $0x138] sm:$0xff] (%p42_p3)  ;;  %v290_v2 = vld [vmem:[%s2001_s23 + $0x270] sm:$0xff] (%p42_p3) }
  0x10   : > { %287 = vst [vmem:[%s2006_s24] sm:$0xff] (%p42_p3), %v286_v0  ;;  %289 = vst [vmem:[%s2006_s24 + $0x8] sm:$0xff] (%p42_p3), %v288_v1  ;;  %v292_v3 = vld [vmem:[%s2001_s23 + $0x3a8] sm:$0xff] (%p42_p3)  ;;  %v294_v4 = vld [vmem:[%s2001_s23 + $0x4e0] sm:$0xff] (%p42_p3) }
  0x11   : > { %291 = vst [vmem:[%s2006_s24 + $0x10] sm:$0xff] %v290_v2  ;;  %v296_v5 = vld [vmem:[%s2001_s23 + $0x618] sm:$0xff]  ;;  %293 = vst [vmem:[%s2006_s24 + $0x18] sm:$0xff] %v292_v3  ;;  %v298_v6 = vld [vmem:[%s2001_s23 + $0x750] sm:$0xff] }
  0x12   : > { %295 = vst [vmem:[%s2006_s24 + $0x20] sm:$0xff] %v294_v4  ;;  %297 = vst [vmem:[%s2006_s24 + $0x28] sm:$0xff] %v296_v5  ;;  %v300_v7 = vld [vmem:[%s2001_s23 + $0x888] sm:$0xff]  ;;  %v302_v8 = vld [vmem:[%s2001_s23 + $0x9c0] sm:$0xff] }
  0x13   : > { %299 = vst [vmem:[%s2006_s24 + $0x30] sm:$0xff] %v298_v6  ;;  %301 = vst [vmem:[%s2006_s24 + $0x38] sm:$0xff] %v300_v7  ;;  %v304_v9 = vld [vmem:[%s2001_s23 + $0xaf8] sm:$0xff]  ;;  %v306_v10 = vld [vmem:[%s2001_s23 + $0xc30] sm:$0xff] }
  0x14   : > { %303 = vst [vmem:[%s2006_s24 + $0x40] sm:$0xff] %v302_v8  ;;  %v308_v11 = vld [vmem:[%s2001_s23 + $0xd68] sm:$0xff]  ;;  %305 = vst [vmem:[%s2006_s24 + $0x48] sm:$0xff] %v304_v9  ;;  %v310_v12 = vld [vmem:[%s2001_s23 + $0xea0] sm:$0xff] }
  0x15   : > { %307 = vst [vmem:[%s2006_s24 + $0x50] sm:$0xff] %v306_v10  ;;  %309 = vst [vmem:[%s2006_s24 + $0x58] sm:$0xff] %v308_v11  ;;  %v312_v13 = vld [vmem:[%s2001_s23 + $0xfd8] sm:$0xff]  ;;  %v314_v14 = vld [vmem:[%s2001_s23 + $0x1110] sm:$0xff] }
  0x16   : > { %311 = vst [vmem:[%s2006_s24 + $0x60] sm:$0xff] %v310_v12  ;;  %313 = vst [vmem:[%s2006_s24 + $0x68] sm:$0xff] %v312_v13  ;;  %v316_v15 = vld [vmem:[%s2001_s23 + $0x1248] sm:$0xff]  ;;  %v318_v16 = vld [vmem:[%s2001_s23 + $0x1380] sm:$0xff] }
  0x17   : > { %315 = vst [vmem:[%s2006_s24 + $0x70] sm:$0xff] %v314_v14  ;;  %v320_v17 = vld [vmem:[%s2001_s23 + $0x14b8] sm:$0xff]  ;;  %317 = vst [vmem:[%s2006_s24 + $0x78] sm:$0xff] %v316_v15  ;;  %v322_v18 = vld [vmem:[%s2001_s23 + $0x15f0] sm:$0xff] }
  0x18   : > { %319 = vst [vmem:[%s2006_s24 + $0x80] sm:$0xff] %v318_v16  ;;  %321 = vst [vmem:[%s2006_s24 + $0x88] sm:$0xff] %v320_v17  ;;  %v324_v19 = vld [vmem:[%s2001_s23 + $0x1728] sm:$0xff]  ;;  %v326_v20 = vld [vmem:[%s2001_s23 + $0x1860] sm:$0xff] }
  0x19   : > { %323 = vst [vmem:[%s2006_s24 + $0x90] sm:$0xff] %v322_v18  ;;  %325 = vst [vmem:[%s2006_s24 + $0x98] sm:$0xff] %v324_v19  ;;  %v328_v21 = vld [vmem:[%s2001_s23 + $0x1998] sm:$0xff]  ;;  %v330_v22 = vld [vmem:[%s2001_s23 + $0x1ad0] sm:$0xff] }
  0x1a   : > { %327 = vst [vmem:[%s2006_s24 + $0xa0] sm:$0xff] %v326_v20  ;;  %v332_v23 = vld [vmem:[%s2001_s23 + $0x1c08] sm:$0xff]  ;;  %329 = vst [vmem:[%s2006_s24 + $0xa8] sm:$0xff] %v328_v21  ;;  %v334_v24 = vld [vmem:[%s2001_s23 + $0x1d40] sm:$0xff] }
  0x1b   : > { %331 = vst [vmem:[%s2006_s24 + $0xb0] sm:$0xff] %v330_v22  ;;  %333 = vst [vmem:[%s2006_s24 + $0xb8] sm:$0xff] %v332_v23  ;;  %v336_v25 = vld [vmem:[%s2001_s23 + $0x1e78] sm:$0xff]  ;;  %v338_v26 = vld [vmem:[%s2001_s23 + $0x1fb0] sm:$0xff] }
  0x1c   : > { %335 = vst [vmem:[%s2006_s24 + $0xc0] sm:$0xff] %v334_v24  ;;  %337 = vst [vmem:[%s2006_s24 + $0xc8] sm:$0xff] %v336_v25  ;;  %v340_v27 = vld [vmem:[%s2001_s23 + $0x20e8] sm:$0xff]  ;;  %v342_v28 = vld [vmem:[%s2001_s23 + $0x2220] sm:$0xff] }
  0x1d   : > { %339 = vst [vmem:[%s2006_s24 + $0xd0] sm:$0xff] %v338_v26  ;;  %v344_v29 = vld [vmem:[%s2001_s23 + $0x2358] sm:$0xff]  ;;  %341 = vst [vmem:[%s2006_s24 + $0xd8] sm:$0xff] %v340_v27  ;;  %v346_v30 = vld [vmem:[%s2001_s23 + $0x2490] sm:$0xff] }
  0x1e   : > { %343 = vst [vmem:[%s2006_s24 + $0xe0] sm:$0xff] %v342_v28  ;;  %345 = vst [vmem:[%s2006_s24 + $0xe8] sm:$0xff] %v344_v29  ;;  %v348_v31 = vld [vmem:[%s2001_s23 + $0x25c8] sm:$0xff]  ;;  %v350_v32 = vld [vmem:[%s2001_s23 + $0x2700] sm:$0xff] }
  0x1f   : > { %347 = vst [vmem:[%s2006_s24 + $0xf0] sm:$0xff] %v346_v30  ;;  %349 = vst [vmem:[%s2006_s24 + $0xf8] sm:$0xff] %v348_v31  ;;  %v352_v33 = vld [vmem:[%s2001_s23 + $0x2838] sm:$0xff]  ;;  %v354_v34 = vld [vmem:[%s2001_s23 + $0x2970] sm:$0xff] }
  0x20   : > { %351 = vst [vmem:[%s2006_s24 + $0x100] sm:$0xff] %v350_v32  ;;  %v356_v35 = vld [vmem:[%s2001_s23 + $0x2aa8] sm:$0xff]  ;;  %353 = vst [vmem:[%s2006_s24 + $0x108] sm:$0xff] %v352_v33  ;;  %v358_v36 = vld [vmem:[%s2001_s23 + $0x2be0] sm:$0xff] }
  0x21   : > { %355 = vst [vmem:[%s2006_s24 + $0x110] sm:$0xff] %v354_v34  ;;  %357 = vst [vmem:[%s2006_s24 + $0x118] sm:$0xff] %v356_v35  ;;  %v360_v37 = vld [vmem:[%s2001_s23 + $0x2d18] sm:$0xff]  ;;  %v362_v38 = vld [vmem:[%s2001_s23 + $0x2e50] sm:$0xff] }
  0x22   : > { %359 = vst [vmem:[%s2006_s24 + $0x120] sm:$0xff] %v358_v36  ;;  %361 = vst [vmem:[%s2006_s24 + $0x128] sm:$0xff] %v360_v37  ;;  %v364_v39 = vld [vmem:[%s2001_s23 + $0x2f88] sm:$0xff]  ;;  %v366_v40 = vld [vmem:[%s2001_s23 + $0x30c0] sm:$0xff] }
  0x23   : > { %363 = vst [vmem:[%s2006_s24 + $0x130] sm:$0xff] %v362_v38  ;;  %v368_v41 = vld [vmem:[%s2001_s23 + $0x31f8] sm:$0xff]  ;;  %365 = vst [vmem:[%s2006_s24 + $0x138] sm:$0xff] %v364_v39  ;;  %v370_v42 = vld [vmem:[%s2001_s23 + $0x3330] sm:$0xff] }
  0x24   : > { %367 = vst [vmem:[%s2006_s24 + $0x140] sm:$0xff] %v366_v40  ;;  %369 = vst [vmem:[%s2006_s24 + $0x148] sm:$0xff] %v368_v41  ;;  %v372_v43 = vld [vmem:[%s2001_s23 + $0x3468] sm:$0xff]  ;;  %v374_v44 = vld [vmem:[%s2001_s23 + $0x35a0] sm:$0xff] }
  0x25   : > { %371 = vst [vmem:[%s2006_s24 + $0x150] sm:$0xff] %v370_v42  ;;  %373 = vst [vmem:[%s2006_s24 + $0x158] sm:$0xff] %v372_v43  ;;  %v376_v45 = vld [vmem:[%s2001_s23 + $0x36d8] sm:$0xff]  ;;  %v378_v46 = vld [vmem:[%s2001_s23 + $0x3810] sm:$0xff] }
  0x26   : > { %375 = vst [vmem:[%s2006_s24 + $0x160] sm:$0xff] %v374_v44  ;;  %v380_v47 = vld [vmem:[%s2001_s23 + $0x3948] sm:$0xff]  ;;  %377 = vst [vmem:[%s2006_s24 + $0x168] sm:$0xff] %v376_v45  ;;  %v382_v48 = vld [vmem:[%s2001_s23 + $0x3a80] sm:$0xff] }
  0x27   : > { %379 = vst [vmem:[%s2006_s24 + $0x170] sm:$0xff] %v378_v46  ;;  %381 = vst [vmem:[%s2006_s24 + $0x178] sm:$0xff] %v380_v47  ;;  %v384_v49 = vld [vmem:[%s2001_s23 + $0x3bb8] sm:$0xff]  ;;  %v386_v50 = vld [vmem:[%s2001_s23 + $0x3cf0] sm:$0xff] }
  0x28   : > { %383 = vst [vmem:[%s2006_s24 + $0x180] sm:$0xff] %v382_v48  ;;  %385 = vst [vmem:[%s2006_s24 + $0x188] sm:$0xff] %v384_v49  ;;  %v388_v51 = vld [vmem:[%s2001_s23 + $0x3e28] sm:$0xff]  ;;  %v390_v52 = vld [vmem:[%s2001_s23 + $0x3f60] sm:$0xff] }
  0x29   : > { %387 = vst [vmem:[%s2006_s24 + $0x190] sm:$0xff] %v386_v50  ;;  %v392_v53 = vld [vmem:[%s2001_s23 + $0x4098] sm:$0xff]  ;;  %389 = vst [vmem:[%s2006_s24 + $0x198] sm:$0xff] %v388_v51  ;;  %v394_v54 = vld [vmem:[%s2001_s23 + $0x41d0] sm:$0xff] }
  0x2a   : > { %391 = vst [vmem:[%s2006_s24 + $0x1a0] sm:$0xff] %v390_v52  ;;  %393 = vst [vmem:[%s2006_s24 + $0x1a8] sm:$0xff] %v392_v53  ;;  %v396_v55 = vld [vmem:[%s2001_s23 + $0x4308] sm:$0xff]  ;;  %v398_v56 = vld [vmem:[%s2001_s23 + $0x4440] sm:$0xff] }
  0x2b   : > { %395 = vst [vmem:[%s2006_s24 + $0x1b0] sm:$0xff] %v394_v54  ;;  %397 = vst [vmem:[%s2006_s24 + $0x1b8] sm:$0xff] %v396_v55  ;;  %v400_v57 = vld [vmem:[%s2001_s23 + $0x4578] sm:$0xff]  ;;  %v402_v58 = vld [vmem:[%s2001_s23 + $0x46b0] sm:$0xff] }
  0x2c   : > { %399 = vst [vmem:[%s2006_s24 + $0x1c0] sm:$0xff] %v398_v56  ;;  %v404_v59 = vld [vmem:[%s2001_s23 + $0x47e8] sm:$0xff]  ;;  %401 = vst [vmem:[%s2006_s24 + $0x1c8] sm:$0xff] %v400_v57  ;;  %v406_v60 = vld [vmem:[%s2001_s23 + $0x4920] sm:$0xff] }
  0x2d   : > { %403 = vst [vmem:[%s2006_s24 + $0x1d0] sm:$0xff] %v402_v58  ;;  %405 = vst [vmem:[%s2006_s24 + $0x1d8] sm:$0xff] %v404_v59  ;;  %v408_v61 = vld [vmem:[%s2001_s23 + $0x4a58] sm:$0xff]  ;;  %v410_v62 = vld [vmem:[%s2001_s23 + $0x4b90] sm:$0xff] }
  0x2e   : > { %407 = vst [vmem:[%s2006_s24 + $0x1e0] sm:$0xff] %v406_v60  ;;  %409 = vst [vmem:[%s2006_s24 + $0x1e8] sm:$0xff] %v408_v61  ;;  %v412_v63 = vld [vmem:[%s2001_s23 + $0x4cc8] sm:$0xff] }
  0x2f   : > { %411 = vst [vmem:[%s2006_s24 + $0x1f0] sm:$0xff] %v410_v62  ;;  %413 = vst [vmem:[%s2006_s24 + $0x1f8] sm:$0xff] %v412_v63 }
  0x30 PF: > { %p1625_p6 = scmp.ge.s32.totalorder %s1939_s13, 1  ;;  %p427_p7 = scmp.lt.s32.totalorder %s1939_s13, 40 }
  0x32   : > { %p428_p8 = pnand %p1625_p6, %p427_p7 }
  0x33   : > { %s434_s25 = sand.u32 (!%p428_p8), 1, %s1923_s9   ;;  %s1627_s26 = sshll.u32 (!%p428_p8), %s1931_s11, 5 }
  0x34   : > { %431 = sbr.rel (%p428_p8) target bundleno = 480 (0x1e0), region = 62  ;;  %s1626_s27 = sshll.u32 (!%p428_p8), %s434_s25, 9 }
  0x35   : > { %p463_p9 = scmp.lt.s32.totalorder (!%p428_p8), %s1627_s26, 1247  ;;  %s2142_s4 = scalar_lea.vmem (!%p428_p8), [#allocation2], %s1626_s27 }
  0x36   : > { %p1629_p10 = scmp.ne.s32.totalorder (!%p428_p8), %s1931_s11, 0 }
  0x39   : > { %s2922_s26 = smov (!%p463_p9, %s1627_s26), 1247  ;;  %478 = sbr.rel (%p1629_p10) target bundleno = 95 (0x5f), region = 70 }
  0x3a   : > { %s1628_s28 = sshll.u32 %s2922_s26, 2 }
  0x3b   : > { %s2140_s3 = scalar_lea.vmem %s2913_s1, %s1628_s28 }
  0x3e   : > { %v1941_v0 = vmov 0.0  }
  0x3f   : > { %479 = vst [vmem:[%s2914_s2] sm:$0xff] %v1941_v0  ;;  %480 = vst [vmem:[%s2914_s2 + $0x8] sm:$0xff] %v1941_v0 }
  0x40   : > { %481 = vst [vmem:[%s2914_s2 + $0x10] sm:$0xff] %v1941_v0  ;;  %482 = vst [vmem:[%s2914_s2 + $0x18] sm:$0xff] %v1941_v0 }
  0x41   : > { %483 = vst [vmem:[%s2914_s2 + $0x20] sm:$0xff] %v1941_v0  ;;  %484 = vst [vmem:[%s2914_s2 + $0x28] sm:$0xff] %v1941_v0 }
  0x42   : > { %485 = vst [vmem:[%s2914_s2 + $0x30] sm:$0xff] %v1941_v0  ;;  %486 = vst [vmem:[%s2914_s2 + $0x38] sm:$0xff] %v1941_v0 }
  0x43   : > { %487 = vst [vmem:[%s2914_s2 + $0x40] sm:$0xff] %v1941_v0  ;;  %488 = vst [vmem:[%s2914_s2 + $0x48] sm:$0xff] %v1941_v0 }
  0x44   : > { %489 = vst [vmem:[%s2914_s2 + $0x50] sm:$0xff] %v1941_v0  ;;  %490 = vst [vmem:[%s2914_s2 + $0x58] sm:$0xff] %v1941_v0 }
  0x45   : > { %491 = vst [vmem:[%s2914_s2 + $0x60] sm:$0xff] %v1941_v0  ;;  %492 = vst [vmem:[%s2914_s2 + $0x68] sm:$0xff] %v1941_v0 }
  0x46   : > { %493 = vst [vmem:[%s2914_s2 + $0x70] sm:$0xff] %v1941_v0  ;;  %494 = vst [vmem:[%s2914_s2 + $0x78] sm:$0xff] %v1941_v0 }
  0x47   : > { %495 = vst [vmem:[%s2914_s2 + $0x80] sm:$0xff] %v1941_v0  ;;  %496 = vst [vmem:[%s2914_s2 + $0x88] sm:$0xff] %v1941_v0 }
  0x48   : > { %497 = vst [vmem:[%s2914_s2 + $0x90] sm:$0xff] %v1941_v0  ;;  %498 = vst [vmem:[%s2914_s2 + $0x98] sm:$0xff] %v1941_v0 }
  0x49   : > { %499 = vst [vmem:[%s2914_s2 + $0xa0] sm:$0xff] %v1941_v0  ;;  %500 = vst [vmem:[%s2914_s2 + $0xa8] sm:$0xff] %v1941_v0 }
  0x4a   : > { %501 = vst [vmem:[%s2914_s2 + $0xb0] sm:$0xff] %v1941_v0  ;;  %502 = vst [vmem:[%s2914_s2 + $0xb8] sm:$0xff] %v1941_v0 }
  0x4b   : > { %503 = vst [vmem:[%s2914_s2 + $0xc0] sm:$0xff] %v1941_v0  ;;  %504 = vst [vmem:[%s2914_s2 + $0xc8] sm:$0xff] %v1941_v0 }
  0x4c   : > { %505 = vst [vmem:[%s2914_s2 + $0xd0] sm:$0xff] %v1941_v0  ;;  %506 = vst [vmem:[%s2914_s2 + $0xd8] sm:$0xff] %v1941_v0 }
  0x4d   : > { %507 = vst [vmem:[%s2914_s2 + $0xe0] sm:$0xff] %v1941_v0  ;;  %508 = vst [vmem:[%s2914_s2 + $0xe8] sm:$0xff] %v1941_v0 }
  0x4e   : > { %509 = vst [vmem:[%s2914_s2 + $0xf0] sm:$0xff] %v1941_v0  ;;  %510 = vst [vmem:[%s2914_s2 + $0xf8] sm:$0xff] %v1941_v0 }
  0x4f   : > { %511 = vst [vmem:[%s2914_s2 + $0x100] sm:$0xff] %v1941_v0  ;;  %512 = vst [vmem:[%s2914_s2 + $0x108] sm:$0xff] %v1941_v0 }
  0x50   : > { %513 = vst [vmem:[%s2914_s2 + $0x110] sm:$0xff] %v1941_v0  ;;  %514 = vst [vmem:[%s2914_s2 + $0x118] sm:$0xff] %v1941_v0 }
  0x51   : > { %515 = vst [vmem:[%s2914_s2 + $0x120] sm:$0xff] %v1941_v0  ;;  %516 = vst [vmem:[%s2914_s2 + $0x128] sm:$0xff] %v1941_v0 }
  0x52   : > { %517 = vst [vmem:[%s2914_s2 + $0x130] sm:$0xff] %v1941_v0  ;;  %518 = vst [vmem:[%s2914_s2 + $0x138] sm:$0xff] %v1941_v0 }
  0x53   : > { %519 = vst [vmem:[%s2914_s2 + $0x140] sm:$0xff] %v1941_v0  ;;  %520 = vst [vmem:[%s2914_s2 + $0x148] sm:$0xff] %v1941_v0 }
  0x54   : > { %521 = vst [vmem:[%s2914_s2 + $0x150] sm:$0xff] %v1941_v0  ;;  %522 = vst [vmem:[%s2914_s2 + $0x158] sm:$0xff] %v1941_v0 }
  0x55   : > { %523 = vst [vmem:[%s2914_s2 + $0x160] sm:$0xff] %v1941_v0  ;;  %524 = vst [vmem:[%s2914_s2 + $0x168] sm:$0xff] %v1941_v0 }
  0x56   : > { %525 = vst [vmem:[%s2914_s2 + $0x170] sm:$0xff] %v1941_v0  ;;  %526 = vst [vmem:[%s2914_s2 + $0x178] sm:$0xff] %v1941_v0 }
  0x57   : > { %527 = vst [vmem:[%s2914_s2 + $0x180] sm:$0xff] %v1941_v0  ;;  %528 = vst [vmem:[%s2914_s2 + $0x188] sm:$0xff] %v1941_v0 }
  0x58   : > { %529 = vst [vmem:[%s2914_s2 + $0x190] sm:$0xff] %v1941_v0  ;;  %530 = vst [vmem:[%s2914_s2 + $0x198] sm:$0xff] %v1941_v0 }
  0x59   : > { %531 = vst [vmem:[%s2914_s2 + $0x1a0] sm:$0xff] %v1941_v0  ;;  %532 = vst [vmem:[%s2914_s2 + $0x1a8] sm:$0xff] %v1941_v0 }
  0x5a   : > { %533 = vst [vmem:[%s2914_s2 + $0x1b0] sm:$0xff] %v1941_v0  ;;  %534 = vst [vmem:[%s2914_s2 + $0x1b8] sm:$0xff] %v1941_v0 }
  0x5b   : > { %535 = vst [vmem:[%s2914_s2 + $0x1c0] sm:$0xff] %v1941_v0  ;;  %536 = vst [vmem:[%s2914_s2 + $0x1c8] sm:$0xff] %v1941_v0 }
  0x5c   : > { %537 = vst [vmem:[%s2914_s2 + $0x1d0] sm:$0xff] %v1941_v0  ;;  %538 = vst [vmem:[%s2914_s2 + $0x1d8] sm:$0xff] %v1941_v0 }
  0x5d   : > { %539 = vst [vmem:[%s2914_s2 + $0x1e0] sm:$0xff] %v1941_v0  ;;  %540 = vst [vmem:[%s2914_s2 + $0x1e8] sm:$0xff] %v1941_v0 }
  0x5e   : > { %541 = vst [vmem:[%s2914_s2 + $0x1f0] sm:$0xff] %v1941_v0  ;;  %542 = vst [vmem:[%s2914_s2 + $0x1f8] sm:$0xff] %v1941_v0 }
  0x5f PF: > { %v1789_v1 = vld [vmem:[%s2140_s3 + $0x38] sm:$0xff]   ;;  %v1942_v2 = vmov 0   ;;  %v1790_v3 = vld [vmem:[%s2140_s3 + $0x30] sm:$0xff]   ;;  %v1791_v4 = vld [vmem:[%s2140_s3 + $0x28] sm:$0xff]  }
  0x60   : > { %1119 = vmatprep.subr.bf16.mxu0 %v1942_v2  ;;  %1715 = vmatprep.subr.bf16.mxu1 %v1942_v2  ;;  %v1792_v5 = vld [vmem:[%s2140_s3 + $0x20] sm:$0xff]   ;;  %v1793_v6 = vld [vmem:[%s2140_s3 + $0x18] sm:$0xff]   ;;  %v1794_v8 = vld [vmem:[%s2140_s3 + $0x10] sm:$0xff]  }
  0x61   : > { %1120 = vmatpush1.bf16.msra.mxu0 %v1789_v1  ;;  %1731 = vmatpush1.bf16.msra.mxu1 %v1789_v1  ;;  %v1807_v7 = vld [vmem:[%s2142_s4 + $0x4] ss:$8 sps:$4 sm:$0xff]   ;;  %v1797_v12 = vld [vmem:[%s2140_s3 + $0x78] sm:$0xff]   ;;  %v1798_v13 = vld [vmem:[%s2140_s3 + $0x70] sm:$0xff]  }
  0x62   : > { %1121 = vmatprep.subr.bf16.mxu0 %v1942_v2  ;;  %1716 = vmatprep.subr.bf16.mxu1 %v1942_v2  ;;  %v1810_v9 = vld [vmem:[%s2142_s4 + $0x104] ss:$8 sps:$4 sm:$0xff]   ;;  %v1801_v16 = vld [vmem:[%s2140_s3 + $0x58] sm:$0xff]   ;;  %v1802_v17 = vld [vmem:[%s2140_s3 + $0x50] sm:$0xff]  }
  0x63   : > { %1151 = vmatprep.mubr.bf16.mxu0 %v1807_v7  ;;  %1279 = vmatprep.mubr.bf16.mxu1 %v1810_v9  ;;  %v1795_v10 = vld [vmem:[%s2140_s3 + $0x8] sm:$0xff]   ;;  %v1796_v11 = vld [vmem:[%s2140_s3] sm:$0xff]   ;;  %v1811_v22 = vld [vmem:[%s2142_s4 + $0x14] ss:$8 sps:$4 sm:$0xff]  }
  0x64   : > { %v1799_v14 = vld [vmem:[%s2140_s3 + $0x68] sm:$0xff]   ;;  %v1800_v15 = vld [vmem:[%s2140_s3 + $0x60] sm:$0xff]   ;;  %v1813_v23 = vld [vmem:[%s2142_s4 + $0x114] ss:$8 sps:$4 sm:$0xff]  }
  0x65   : > { %1122 = vmatpush1.bf16.msra.mxu0 %v1790_v3  ;;  %1732 = vmatpush1.bf16.msra.mxu1 %v1790_v3  ;;  %v1803_v18 = vld [vmem:[%s2140_s3 + $0x48] sm:$0xff]   ;;  %v1804_v19 = vld [vmem:[%s2140_s3 + $0x40] sm:$0xff]   ;;  %v1815_v24 = vld [vmem:[%s2142_s4 + $0x10] ss:$8 sps:$4 sm:$0xff]  }
  0x66   : > { %1123 = vmatprep.subr.bf16.mxu0 %v1942_v2  ;;  %1717 = vmatprep.subr.bf16.mxu1 %v1942_v2  ;;  %v1805_v20 = vld [vmem:[%s2142_s4] ss:$8 sps:$4 sm:$0xff]   ;;  %v1816_v25 = vld [vmem:[%s2142_s4 + $0x110] ss:$8 sps:$4 sm:$0xff]   ;;  %v1817_v26 = vld [vmem:[%s2142_s4 + $0x24] ss:$8 sps:$4 sm:$0xff]  }
  0x67   : > { %v1808_v21 = vld [vmem:[%s2142_s4 + $0x100] ss:$8 sps:$4 sm:$0xff]   ;;  %v1819_v27 = vld [vmem:[%s2142_s4 + $0x124] ss:$8 sps:$4 sm:$0xff]   ;;  %v1823_v30 = vld [vmem:[%s2142_s4 + $0x34] ss:$8 sps:$4 sm:$0xff]  }
  0x68   : > { %v1821_v28 = vld [vmem:[%s2142_s4 + $0x20] ss:$8 sps:$4 sm:$0xff]   ;;  %v1825_v31 = vld [vmem:[%s2142_s4 + $0x134] ss:$8 sps:$4 sm:$0xff]   ;;  %v1827_v32 = vld [vmem:[%s2142_s4 + $0x30] ss:$8 sps:$4 sm:$0xff]  }
  0x69   : > { %1124 = vmatpush1.bf16.msra.mxu0 %v1791_v4  ;;  %1733 = vmatpush1.bf16.msra.mxu1 %v1791_v4  ;;  %v1822_v29 = vld [vmem:[%s2142_s4 + $0x120] ss:$8 sps:$4 sm:$0xff]   ;;  %v1828_v33 = vld [vmem:[%s2142_s4 + $0x130] ss:$8 sps:$4 sm:$0xff]   ;;  %v1829_v34 = vld [vmem:[%s2142_s4 + $0x44] ss:$8 sps:$4 sm:$0xff]  }
  0x6a   : > { %1125 = vmatprep.subr.bf16.mxu0 %v1942_v2  ;;  %1718 = vmatprep.subr.bf16.mxu1 %v1942_v2  ;;  %v1831_v35 = vld [vmem:[%s2142_s4 + $0x144] ss:$8 sps:$4 sm:$0xff]   ;;  %v1833_v36 = vld [vmem:[%s2142_s4 + $0x40] ss:$8 sps:$4 sm:$0xff]   ;;  %v1835_v38 = vld [vmem:[%s2142_s4 + $0x54] ss:$8 sps:$4 sm:$0xff]  }
  0x6b   : > { %v1834_v37 = vld [vmem:[%s2142_s4 + $0x140] ss:$8 sps:$4 sm:$0xff]   ;;  %v1837_v39 = vld [vmem:[%s2142_s4 + $0x154] ss:$8 sps:$4 sm:$0xff]   ;;  %v1839_v40 = vld [vmem:[%s2142_s4 + $0x50] ss:$8 sps:$4 sm:$0xff]  }
  0x6c   : > { %v1840_v41 = vld [vmem:[%s2142_s4 + $0x150] ss:$8 sps:$4 sm:$0xff]   ;;  %v1841_v42 = vld [vmem:[%s2142_s4 + $0x64] ss:$8 sps:$4 sm:$0xff]   ;;  %v1845_v44 = vld [vmem:[%s2142_s4 + $0x60] ss:$8 sps:$4 sm:$0xff]  }
  0x6d   : > { %1126 = vmatpush1.bf16.msra.mxu0 %v1792_v5  ;;  %1734 = vmatpush1.bf16.msra.mxu1 %v1792_v5  ;;  %v1843_v43 = vld [vmem:[%s2142_s4 + $0x164] ss:$8 sps:$4 sm:$0xff]   ;;  %v1846_v45 = vld [vmem:[%s2142_s4 + $0x160] ss:$8 sps:$4 sm:$0xff]   ;;  %v1847_v46 = vld [vmem:[%s2142_s4 + $0x74] ss:$8 sps:$4 sm:$0xff]  }
  0x6e   : > { %1127 = vmatprep.subr.bf16.mxu0 %v1942_v2  ;;  %1719 = vmatprep.subr.bf16.mxu1 %v1942_v2  ;;  %v1849_v47 = vld [vmem:[%s2142_s4 + $0x174] ss:$8 sps:$4 sm:$0xff]   ;;  %v1851_v48 = vld [vmem:[%s2142_s4 + $0x70] ss:$8 sps:$4 sm:$0xff]   ;;  %v1853_v50 = vld [vmem:[%s2142_s4 + $0x84] ss:$8 sps:$4 sm:$0xff]  }
  0x6f   : > { %v1852_v49 = vld [vmem:[%s2142_s4 + $0x170] ss:$8 sps:$4 sm:$0xff]   ;;  %v1855_v51 = vld [vmem:[%s2142_s4 + $0x184] ss:$8 sps:$4 sm:$0xff]   ;;  %v1857_v52 = vld [vmem:[%s2142_s4 + $0x80] ss:$8 sps:$4 sm:$0xff]  }
  0x70   : > { %v1858_v53 = vld [vmem:[%s2142_s4 + $0x180] ss:$8 sps:$4 sm:$0xff]   ;;  %v1859_v54 = vld [vmem:[%s2142_s4 + $0x94] ss:$8 sps:$4 sm:$0xff]   ;;  %v1863_v56 = vld [vmem:[%s2142_s4 + $0x90] ss:$8 sps:$4 sm:$0xff]  }
  0x71   : > { %1128 = vmatpush1.bf16.msra.mxu0 %v1793_v6  ;;  %1735 = vmatpush1.bf16.msra.mxu1 %v1793_v6  ;;  %v1861_v55 = vld [vmem:[%s2142_s4 + $0x194] ss:$8 sps:$4 sm:$0xff]   ;;  %v1864_v57 = vld [vmem:[%s2142_s4 + $0x190] ss:$8 sps:$4 sm:$0xff]   ;;  %v1865_v58 = vld [vmem:[%s2142_s4 + $0xa4] ss:$8 sps:$4 sm:$0xff]  }
  0x72   : > { %1129 = vmatprep.subr.bf16.mxu0 %v1942_v2  ;;  %1720 = vmatprep.subr.bf16.mxu1 %v1942_v2  ;;  %v1867_v59 = vld [vmem:[%s2142_s4 + $0x1a4] ss:$8 sps:$4 sm:$0xff]   ;;  %v1869_v60 = vld [vmem:[%s2142_s4 + $0xa0] ss:$8 sps:$4 sm:$0xff]   ;;  %v1871_v62 = vld [vmem:[%s2142_s4 + $0xb4] ss:$8 sps:$4 sm:$0xff]  }
  0x73   : > { %v1870_v61 = vld [vmem:[%s2142_s4 + $0x1a0] ss:$8 sps:$4 sm:$0xff]   ;;  %v1873_v63 = vld [vmem:[%s2142_s4 + $0x1b4] ss:$8 sps:$4 sm:$0xff]   ;;  %v1875_v0 = vld [vmem:[%s2142_s4 + $0xb0] ss:$8 sps:$4 sm:$0xff]  }
  0x74   : > { %v1876_v1 = vld [vmem:[%s2142_s4 + $0x1b0] ss:$8 sps:$4 sm:$0xff]   ;;  %v1879_v3 = vld [vmem:[%s2142_s4 + $0x1c4] ss:$8 sps:$4 sm:$0xff]   ;;  %v1881_v4 = vld [vmem:[%s2142_s4 + $0xc0] ss:$8 sps:$4 sm:$0xff]  }
  0x75   : > { %1130 = vmatpush1.bf16.msra.mxu0 %v1794_v8  ;;  %1736 = vmatpush1.bf16.msra.mxu1 %v1794_v8  ;;  %v1882_v5 = vld [vmem:[%s2142_s4 + $0x1c0] ss:$8 sps:$4 sm:$0xff]   ;;  %v1883_v6 = vld [vmem:[%s2142_s4 + $0xd4] ss:$8 sps:$4 sm:$0xff]   ;;  %v1887_v8 = vld [vmem:[%s2142_s4 + $0xd0] ss:$8 sps:$4 sm:$0xff]  }
  0x76   : > { %1131 = vmatprep.subr.bf16.mxu0 %v1942_v2  ;;  %1721 = vmatprep.subr.bf16.mxu1 %v1942_v2  ;;  %v1885_v7 = vld [vmem:[%s2142_s4 + $0x1d4] ss:$8 sps:$4 sm:$0xff]   ;;  %v1888_v9 = vld [vmem:[%s2142_s4 + $0x1d0] ss:$8 sps:$4 sm:$0xff]  }
  0x79   : > { %1132 = vmatpush1.bf16.msra.mxu0 %v1795_v10  ;;  %1737 = vmatpush1.bf16.msra.mxu1 %v1795_v10  ;;  %v1889_v10 = vld [vmem:[%s2142_s4 + $0xe4] ss:$8 sps:$4 sm:$0xff]  }
  0x7a   : > { %1133 = vmatprep.subr.bf16.mxu0 %v1942_v2  ;;  %1722 = vmatprep.subr.bf16.mxu1 %v1942_v2 }
  0x7d   : > { %1134 = vmatpush1.bf16.msra.mxu0 %v1796_v11  ;;  %1738 = vmatpush1.bf16.msra.mxu1 %v1796_v11  ;;  %v1891_v11 = vld [vmem:[%s2142_s4 + $0x1e4] ss:$8 sps:$4 sm:$0xff]  }
  0x7e   : > { %1135 = vmatprep.subr.bf16.mxu0 %v1942_v2  ;;  %1723 = vmatprep.subr.bf16.mxu1 %v1942_v2 }
  0x81   : > { %1136 = vmatpush2.bf16.msra.mxu0 %v1797_v12  ;;  %1739 = vmatpush2.bf16.msra.mxu1 %v1797_v12  ;;  %v1893_v12 = vld [vmem:[%s2142_s4 + $0xe0] ss:$8 sps:$4 sm:$0xff]  }
  0x82   : > { %1137 = vmatprep.subr.bf16.mxu0 %v1942_v2  ;;  %1724 = vmatprep.subr.bf16.mxu1 %v1942_v2 }
  0x85   : > { %1138 = vmatpush2.bf16.msra.mxu0 %v1798_v13  ;;  %1740 = vmatpush2.bf16.msra.mxu1 %v1798_v13  ;;  %v1894_v13 = vld [vmem:[%s2142_s4 + $0x1e0] ss:$8 sps:$4 sm:$0xff]  }
  0x86   : > { %1139 = vmatprep.subr.bf16.mxu0 %v1942_v2  ;;  %1725 = vmatprep.subr.bf16.mxu1 %v1942_v2 }
  0x89   : > { %1140 = vmatpush2.bf16.msra.mxu0 %v1799_v14  ;;  %1741 = vmatpush2.bf16.msra.mxu1 %v1799_v14  ;;  %v1895_v14 = vld [vmem:[%s2142_s4 + $0xf4] ss:$8 sps:$4 sm:$0xff]  }
  0x8a   : > { %1141 = vmatprep.subr.bf16.mxu0 %v1942_v2  ;;  %1726 = vmatprep.subr.bf16.mxu1 %v1942_v2 }
  0x8d   : > { %1142 = vmatpush2.bf16.msra.mxu0 %v1800_v15  ;;  %1742 = vmatpush2.bf16.msra.mxu1 %v1800_v15  ;;  %v1897_v15 = vld [vmem:[%s2142_s4 + $0x1f4] ss:$8 sps:$4 sm:$0xff]  }
  0x8e   : > { %1143 = vmatprep.subr.bf16.mxu0 %v1942_v2  ;;  %1727 = vmatprep.subr.bf16.mxu1 %v1942_v2 }
  0x91   : > { %1144 = vmatpush2.bf16.msra.mxu0 %v1801_v16  ;;  %1743 = vmatpush2.bf16.msra.mxu1 %v1801_v16  ;;  %v1899_v16 = vld [vmem:[%s2142_s4 + $0xf0] ss:$8 sps:$4 sm:$0xff]  }
  0x92   : > { %1145 = vmatprep.subr.bf16.mxu0 %v1942_v2  ;;  %1728 = vmatprep.subr.bf16.mxu1 %v1942_v2 }
  0x95   : > { %1146 = vmatpush2.bf16.msra.mxu0 %v1802_v17  ;;  %1744 = vmatpush2.bf16.msra.mxu1 %v1802_v17  ;;  %v1900_v17 = vld [vmem:[%s2142_s4 + $0x1f0] ss:$8 sps:$4 sm:$0xff]  }
  0x96   : > { %1147 = vmatprep.subr.bf16.mxu0 %v1942_v2  ;;  %1729 = vmatprep.subr.bf16.mxu1 %v1942_v2 }
  0x99   : > { %1148 = vmatpush2.bf16.msra.mxu0 %v1803_v18  ;;  %1745 = vmatpush2.bf16.msra.mxu1 %v1803_v18  ;;  %v543_v18 = vld [vmem:[%s2914_s2] sm:$0xff] }
  0x9a   : > { %1149 = vmatprep.subr.bf16.mxu0 %v1942_v2  ;;  %1730 = vmatprep.subr.bf16.mxu1 %v1942_v2  ;;  %v1877_v2 = vld [vmem:[%s2142_s4 + $0xc4] ss:$8 sps:$4 sm:$0xff]  }
  0x9d   : > { %1150 = vmatpush2.bf16.msra.mxu0 %v1804_v19  ;;  %1746 = vmatpush2.bf16.msra.mxu1 %v1804_v19  ;;  %v575_v19 = vld [vmem:[%s2914_s2 + $0x100] sm:$0xff] }
  0xa0   : > { %1152 = vmatmul.mubr.bf16.vlgmr.msra.gmra.mxu0 %v1805_v20  ;;  %1280 = vmatmul.mubr.bf16.vlgmr.msra.gmra.mxu1 %v1808_v21 }
  0xa1   : > { %1159 = vmatprep.mubr.bf16.mxu0 %v1811_v22  ;;  %1287 = vmatprep.mubr.bf16.mxu1 %v1813_v23 }
  0xa8   : > { %1160 = vmatmul.mubr.bf16.gmra.mxu0 %v1815_v24  ;;  %1288 = vmatmul.mubr.bf16.gmra.mxu1 %v1816_v25 }
  0xa9   : > { %1167 = vmatprep.mubr.bf16.mxu0 %v1817_v26  ;;  %1295 = vmatprep.mubr.bf16.mxu1 %v1819_v27  ;;  %v544_v26 = vld [vmem:[%s2914_s2 + $0x8] sm:$0xff] }
  0xaa   : > { %v576_v27 = vld [vmem:[%s2914_s2 + $0x108] sm:$0xff] }
  0xb0   : > { %1168 = vmatmul.mubr.bf16.gmra.mxu0 %v1821_v28  ;;  %1296 = vmatmul.mubr.bf16.gmra.mxu1 %v1822_v29 }
  0xb1   : > { %1175 = vmatprep.mubr.bf16.mxu0 %v1823_v30  ;;  %1303 = vmatprep.mubr.bf16.mxu1 %v1825_v31 }
  0xb8   : > { %1176 = vmatmul.mubr.bf16.gmra.mxu0 %v1827_v32  ;;  %1304 = vmatmul.mubr.bf16.gmra.mxu1 %v1828_v33 }
  0xb9   : > { %1183 = vmatprep.mubr.bf16.mxu0 %v1829_v34  ;;  %1311 = vmatprep.mubr.bf16.mxu1 %v1831_v35  ;;  %v545_v34 = vld [vmem:[%s2914_s2 + $0x10] sm:$0xff] }
  0xba   : > { %v577_v35 = vld [vmem:[%s2914_s2 + $0x110] sm:$0xff] }
  0xc0   : > { %1184 = vmatmul.mubr.bf16.gmra.mxu0 %v1833_v36  ;;  %1312 = vmatmul.mubr.bf16.gmra.mxu1 %v1834_v37 }
  0xc1   : > { %1191 = vmatprep.mubr.bf16.mxu0 %v1835_v38  ;;  %1319 = vmatprep.mubr.bf16.mxu1 %v1837_v39 }
  0xc8   : > { %1192 = vmatmul.mubr.bf16.gmra.mxu0 %v1839_v40  ;;  %1320 = vmatmul.mubr.bf16.gmra.mxu1 %v1840_v41 }
  0xc9   : > { %1199 = vmatprep.mubr.bf16.mxu0 %v1841_v42  ;;  %1327 = vmatprep.mubr.bf16.mxu1 %v1843_v43  ;;  %v546_v42 = vld [vmem:[%s2914_s2 + $0x18] sm:$0xff] }
  0xca   : > { %v578_v43 = vld [vmem:[%s2914_s2 + $0x118] sm:$0xff] }
  0xd0   : > { %1200 = vmatmul.mubr.bf16.gmra.mxu0 %v1845_v44  ;;  %1328 = vmatmul.mubr.bf16.gmra.mxu1 %v1846_v45 }
  0xd1   : > { %1207 = vmatprep.mubr.bf16.mxu0 %v1847_v46  ;;  %1335 = vmatprep.mubr.bf16.mxu1 %v1849_v47 }
  0xd8   : > { %1208 = vmatmul.mubr.bf16.gmra.mxu0 %v1851_v48  ;;  %1336 = vmatmul.mubr.bf16.gmra.mxu1 %v1852_v49 }
  0xd9   : > { %1215 = vmatprep.mubr.bf16.mxu0 %v1853_v50  ;;  %1343 = vmatprep.mubr.bf16.mxu1 %v1855_v51  ;;  %v547_v50 = vld [vmem:[%s2914_s2 + $0x20] sm:$0xff] }
  0xda   : > { %v579_v51 = vld [vmem:[%s2914_s2 + $0x120] sm:$0xff] }
  0xe0   : > { %1216 = vmatmul.mubr.bf16.gmra.mxu0 %v1857_v52  ;;  %1344 = vmatmul.mubr.bf16.gmra.mxu1 %v1858_v53 }
  0xe1   : > { %1223 = vmatprep.mubr.bf16.mxu0 %v1859_v54  ;;  %1351 = vmatprep.mubr.bf16.mxu1 %v1861_v55 }
  0xe8   : > { %1224 = vmatmul.mubr.bf16.gmra.mxu0 %v1863_v56  ;;  %1352 = vmatmul.mubr.bf16.gmra.mxu1 %v1864_v57 }
  0xe9   : > { %1231 = vmatprep.mubr.bf16.mxu0 %v1865_v58  ;;  %1359 = vmatprep.mubr.bf16.mxu1 %v1867_v59  ;;  %v548_v58 = vld [vmem:[%s2914_s2 + $0x28] sm:$0xff] }
  0xea   : > { %v580_v59 = vld [vmem:[%s2914_s2 + $0x128] sm:$0xff] }
  0xf0   : > { %1232 = vmatmul.mubr.bf16.gmra.mxu0 %v1869_v60  ;;  %1360 = vmatmul.mubr.bf16.gmra.mxu1 %v1870_v61 }
  0xf1   : > { %1239 = vmatprep.mubr.bf16.mxu0 %v1871_v62  ;;  %1367 = vmatprep.mubr.bf16.mxu1 %v1873_v63 }
  0xf8   : > { %1240 = vmatmul.mubr.bf16.gmra.mxu0 %v1875_v0  ;;  %1368 = vmatmul.mubr.bf16.gmra.mxu1 %v1876_v1 }
  0xf9   : > { %1247 = vmatprep.mubr.bf16.mxu0 %v1877_v2  ;;  %1375 = vmatprep.mubr.bf16.mxu1 %v1879_v3  ;;  %v549_v2 = vld [vmem:[%s2914_s2 + $0x30] sm:$0xff] }
  0xfa   : > { %v581_v3 = vld [vmem:[%s2914_s2 + $0x130] sm:$0xff] }
 0x100   : > { %1248 = vmatmul.mubr.bf16.gmra.mxu0 %v1881_v4  ;;  %1376 = vmatmul.mubr.bf16.gmra.mxu1 %v1882_v5 }
 0x101   : > { %1255 = vmatprep.mubr.bf16.mxu0 %v1883_v6  ;;  %1383 = vmatprep.mubr.bf16.mxu1 %v1885_v7 }
 0x108   : > { %1256 = vmatmul.mubr.bf16.gmra.mxu0 %v1887_v8  ;;  %1384 = vmatmul.mubr.bf16.gmra.mxu1 %v1888_v9 }
 0x109   : > { %1263 = vmatprep.mubr.bf16.mxu0 %v1889_v10  ;;  %1391 = vmatprep.mubr.bf16.mxu1 %v1891_v11  ;;  %v550_v10 = vld [vmem:[%s2914_s2 + $0x38] sm:$0xff] }
 0x10a   : > { %v582_v11 = vld [vmem:[%s2914_s2 + $0x138] sm:$0xff] }
 0x110   : > { %1264 = vmatmul.mubr.bf16.gmra.mxu0 %v1893_v12  ;;  %1392 = vmatmul.mubr.bf16.gmra.mxu1 %v1894_v13 }
 0x111   : > { %1271 = vmatprep.mubr.bf16.mxu0 %v1895_v14  ;;  %1399 = vmatprep.mubr.bf16.mxu1 %v1897_v15 }
 0x118   : > { %1272 = vmatmul.mubr.bf16.gmra.mxu0 %v1899_v16  ;;  %1400 = vmatmul.mubr.bf16.gmra.mxu1 %v1900_v17 }
 0x160   : > { %v1153_v20 = vpop.f32.mrf.mxu0  ;;  %v1281_v21 = vpop.f32.mrf.mxu1 }
 0x161   : > { %v1408_v22 = vadd.f32 %v1153_v20, %v543_v18  ;;  %v1440_v23 = vadd.f32 %v1281_v21, %v575_v19  ;;  %v551_v18 = vld [vmem:[%s2914_s2 + $0x40] sm:$0xff] }
 0x162   : > { %v1155_v24 = vpop.f32.mrf.mxu0  ;;  %v1283_v25 = vpop.f32.mrf.mxu1  ;;  %v583_v19 = vld [vmem:[%s2914_s2 + $0x140] sm:$0xff] }
 0x163   : > { %1472 = vst [vmem:[%s2914_s2] sm:$0xff] %v1408_v22  ;;  %1504 = vst [vmem:[%s2914_s2 + $0x100] sm:$0xff] %v1440_v23 }
 0x164   : > { %v1156_v28 = vpop.f32.mrf.mxu0  ;;  %v1284_v29 = vpop.f32.mrf.mxu1 }
 0x165   : > { %v1409_v30 = vadd.f32 %v1156_v28, %v544_v26  ;;  %v1441_v31 = vadd.f32 %v1284_v29, %v576_v27  ;;  %v552_v26 = vld [vmem:[%s2914_s2 + $0x48] sm:$0xff] }
 0x166   : > { %v1158_v32 = vpop.f32.mrf.mxu0  ;;  %v1286_v33 = vpop.f32.mrf.mxu1  ;;  %v584_v27 = vld [vmem:[%s2914_s2 + $0x148] sm:$0xff] }
 0x167   : > { %1473 = vst [vmem:[%s2914_s2 + $0x8] sm:$0xff] %v1409_v30  ;;  %1505 = vst [vmem:[%s2914_s2 + $0x108] sm:$0xff] %v1441_v31 }
 0x168   : > { %v1161_v36 = vpop.f32.mrf.mxu0  ;;  %v1289_v37 = vpop.f32.mrf.mxu1 }
 0x169   : > { %v1410_v38 = vadd.f32 %v1161_v36, %v545_v34  ;;  %v1442_v39 = vadd.f32 %v1289_v37, %v577_v35  ;;  %v553_v34 = vld [vmem:[%s2914_s2 + $0x50] sm:$0xff] }
 0x16a   : > { %v1163_v40 = vpop.f32.mrf.mxu0  ;;  %v1291_v41 = vpop.f32.mrf.mxu1  ;;  %v585_v35 = vld [vmem:[%s2914_s2 + $0x150] sm:$0xff] }
 0x16b   : > { %1474 = vst [vmem:[%s2914_s2 + $0x10] sm:$0xff] %v1410_v38  ;;  %1506 = vst [vmem:[%s2914_s2 + $0x110] sm:$0xff] %v1442_v39 }
 0x16c   : > { %v1164_v44 = vpop.f32.mrf.mxu0  ;;  %v1292_v45 = vpop.f32.mrf.mxu1 }
 0x16d   : > { %v1411_v46 = vadd.f32 %v1164_v44, %v546_v42  ;;  %v1443_v47 = vadd.f32 %v1292_v45, %v578_v43  ;;  %v554_v42 = vld [vmem:[%s2914_s2 + $0x58] sm:$0xff] }
 0x16e   : > { %v1166_v48 = vpop.f32.mrf.mxu0  ;;  %v1294_v49 = vpop.f32.mrf.mxu1  ;;  %v586_v43 = vld [vmem:[%s2914_s2 + $0x158] sm:$0xff] }
 0x16f   : > { %1475 = vst [vmem:[%s2914_s2 + $0x18] sm:$0xff] %v1411_v46  ;;  %1507 = vst [vmem:[%s2914_s2 + $0x118] sm:$0xff] %v1443_v47 }
 0x170   : > { %v1169_v52 = vpop.f32.mrf.mxu0  ;;  %v1297_v53 = vpop.f32.mrf.mxu1 }
 0x171   : > { %v1412_v54 = vadd.f32 %v1169_v52, %v547_v50  ;;  %v1444_v55 = vadd.f32 %v1297_v53, %v579_v51  ;;  %v555_v50 = vld [vmem:[%s2914_s2 + $0x60] sm:$0xff] }
 0x172   : > { %v1171_v56 = vpop.f32.mrf.mxu0  ;;  %v1299_v57 = vpop.f32.mrf.mxu1  ;;  %v587_v51 = vld [vmem:[%s2914_s2 + $0x160] sm:$0xff] }
 0x173   : > { %1476 = vst [vmem:[%s2914_s2 + $0x20] sm:$0xff] %v1412_v54  ;;  %1508 = vst [vmem:[%s2914_s2 + $0x120] sm:$0xff] %v1444_v55 }
 0x174   : > { %v1172_v60 = vpop.f32.mrf.mxu0  ;;  %v1300_v61 = vpop.f32.mrf.mxu1 }
 0x175   : > { %v1413_v62 = vadd.f32 %v1172_v60, %v548_v58  ;;  %v1445_v63 = vadd.f32 %v1300_v61, %v580_v59  ;;  %v556_v58 = vld [vmem:[%s2914_s2 + $0x68] sm:$0xff] }
 0x176   : > { %v1174_v0 = vpop.f32.mrf.mxu0  ;;  %v1302_v1 = vpop.f32.mrf.mxu1  ;;  %v588_v59 = vld [vmem:[%s2914_s2 + $0x168] sm:$0xff] }
 0x177   : > { %1477 = vst [vmem:[%s2914_s2 + $0x28] sm:$0xff] %v1413_v62  ;;  %1509 = vst [vmem:[%s2914_s2 + $0x128] sm:$0xff] %v1445_v63 }
 0x178   : > { %v1177_v4 = vpop.f32.mrf.mxu0  ;;  %v1305_v5 = vpop.f32.mrf.mxu1 }
 0x179   : > { %v1414_v6 = vadd.f32 %v1177_v4, %v549_v2  ;;  %v1446_v7 = vadd.f32 %v1305_v5, %v581_v3  ;;  %v557_v2 = vld [vmem:[%s2914_s2 + $0x70] sm:$0xff] }
 0x17a   : > { %v1179_v8 = vpop.f32.mrf.mxu0  ;;  %v1307_v9 = vpop.f32.mrf.mxu1  ;;  %v589_v3 = vld [vmem:[%s2914_s2 + $0x170] sm:$0xff] }
 0x17b   : > { %1478 = vst [vmem:[%s2914_s2 + $0x30] sm:$0xff] %v1414_v6  ;;  %1510 = vst [vmem:[%s2914_s2 + $0x130] sm:$0xff] %v1446_v7 }
 0x17c   : > { %v1180_v12 = vpop.f32.mrf.mxu0  ;;  %v1308_v13 = vpop.f32.mrf.mxu1 }
 0x17d   : > { %v1415_v14 = vadd.f32 %v1180_v12, %v550_v10  ;;  %v1447_v15 = vadd.f32 %v1308_v13, %v582_v11  ;;  %v558_v10 = vld [vmem:[%s2914_s2 + $0x78] sm:$0xff] }
 0x17e   : > { %v1182_v16 = vpop.f32.mrf.mxu0  ;;  %v1310_v17 = vpop.f32.mrf.mxu1  ;;  %v590_v11 = vld [vmem:[%s2914_s2 + $0x178] sm:$0xff] }
 0x17f   : > { %1479 = vst [vmem:[%s2914_s2 + $0x38] sm:$0xff] %v1415_v14  ;;  %1511 = vst [vmem:[%s2914_s2 + $0x138] sm:$0xff] %v1447_v15 }
 0x180   : > { %v1185_v20 = vpop.f32.mrf.mxu0  ;;  %v1313_v21 = vpop.f32.mrf.mxu1 }
 0x181   : > { %v1416_v22 = vadd.f32 %v1185_v20, %v551_v18  ;;  %v1448_v23 = vadd.f32 %v1313_v21, %v583_v19  ;;  %v559_v18 = vld [vmem:[%s2914_s2 + $0x80] sm:$0xff] }
 0x182   : > { %v1187_v24 = vpop.f32.mrf.mxu0  ;;  %v1315_v25 = vpop.f32.mrf.mxu1  ;;  %v591_v19 = vld [vmem:[%s2914_s2 + $0x180] sm:$0xff] }
 0x183   : > { %1480 = vst [vmem:[%s2914_s2 + $0x40] sm:$0xff] %v1416_v22  ;;  %1512 = vst [vmem:[%s2914_s2 + $0x140] sm:$0xff] %v1448_v23 }
 0x184   : > { %v1188_v28 = vpop.f32.mrf.mxu0  ;;  %v1316_v29 = vpop.f32.mrf.mxu1 }
 0x185   : > { %v1417_v30 = vadd.f32 %v1188_v28, %v552_v26  ;;  %v1449_v31 = vadd.f32 %v1316_v29, %v584_v27  ;;  %v560_v26 = vld [vmem:[%s2914_s2 + $0x88] sm:$0xff] }
 0x186   : > { %v1190_v32 = vpop.f32.mrf.mxu0  ;;  %v1318_v33 = vpop.f32.mrf.mxu1  ;;  %v592_v27 = vld [vmem:[%s2914_s2 + $0x188] sm:$0xff] }
 0x187   : > { %1481 = vst [vmem:[%s2914_s2 + $0x48] sm:$0xff] %v1417_v30  ;;  %1513 = vst [vmem:[%s2914_s2 + $0x148] sm:$0xff] %v1449_v31 }
 0x188   : > { %v1193_v36 = vpop.f32.mrf.mxu0  ;;  %v1321_v37 = vpop.f32.mrf.mxu1 }
 0x189   : > { %v1418_v38 = vadd.f32 %v1193_v36, %v553_v34  ;;  %v1450_v39 = vadd.f32 %v1321_v37, %v585_v35  ;;  %v561_v34 = vld [vmem:[%s2914_s2 + $0x90] sm:$0xff] }
 0x18a   : > { %v1195_v40 = vpop.f32.mrf.mxu0  ;;  %v1323_v41 = vpop.f32.mrf.mxu1  ;;  %v593_v35 = vld [vmem:[%s2914_s2 + $0x190] sm:$0xff] }
 0x18b   : > { %1482 = vst [vmem:[%s2914_s2 + $0x50] sm:$0xff] %v1418_v38  ;;  %1514 = vst [vmem:[%s2914_s2 + $0x150] sm:$0xff] %v1450_v39 }
 0x18c   : > { %v1196_v44 = vpop.f32.mrf.mxu0  ;;  %v1324_v45 = vpop.f32.mrf.mxu1 }
 0x18d   : > { %v1419_v46 = vadd.f32 %v1196_v44, %v554_v42  ;;  %v1451_v47 = vadd.f32 %v1324_v45, %v586_v43  ;;  %v562_v42 = vld [vmem:[%s2914_s2 + $0x98] sm:$0xff] }
 0x18e   : > { %v1198_v48 = vpop.f32.mrf.mxu0  ;;  %v1326_v49 = vpop.f32.mrf.mxu1  ;;  %v594_v43 = vld [vmem:[%s2914_s2 + $0x198] sm:$0xff] }
 0x18f   : > { %1483 = vst [vmem:[%s2914_s2 + $0x58] sm:$0xff] %v1419_v46  ;;  %1515 = vst [vmem:[%s2914_s2 + $0x158] sm:$0xff] %v1451_v47 }
 0x190   : > { %v1201_v52 = vpop.f32.mrf.mxu0  ;;  %v1329_v53 = vpop.f32.mrf.mxu1 }
 0x191   : > { %v1420_v54 = vadd.f32 %v1201_v52, %v555_v50  ;;  %v1452_v55 = vadd.f32 %v1329_v53, %v587_v51  ;;  %v563_v50 = vld [vmem:[%s2914_s2 + $0xa0] sm:$0xff] }
 0x192   : > { %v1203_v56 = vpop.f32.mrf.mxu0  ;;  %v1331_v57 = vpop.f32.mrf.mxu1  ;;  %v595_v51 = vld [vmem:[%s2914_s2 + $0x1a0] sm:$0xff] }
 0x193   : > { %1484 = vst [vmem:[%s2914_s2 + $0x60] sm:$0xff] %v1420_v54  ;;  %1516 = vst [vmem:[%s2914_s2 + $0x160] sm:$0xff] %v1452_v55 }
 0x194   : > { %v1204_v60 = vpop.f32.mrf.mxu0  ;;  %v1332_v61 = vpop.f32.mrf.mxu1 }
 0x195   : > { %v1421_v62 = vadd.f32 %v1204_v60, %v556_v58  ;;  %v1453_v63 = vadd.f32 %v1332_v61, %v588_v59  ;;  %v564_v58 = vld [vmem:[%s2914_s2 + $0xa8] sm:$0xff] }
 0x196   : > { %v1206_v0 = vpop.f32.mrf.mxu0  ;;  %v1334_v1 = vpop.f32.mrf.mxu1  ;;  %v596_v59 = vld [vmem:[%s2914_s2 + $0x1a8] sm:$0xff] }
 0x197   : > { %1485 = vst [vmem:[%s2914_s2 + $0x68] sm:$0xff] %v1421_v62  ;;  %1517 = vst [vmem:[%s2914_s2 + $0x168] sm:$0xff] %v1453_v63 }
 0x198   : > { %v1209_v4 = vpop.f32.mrf.mxu0  ;;  %v1337_v5 = vpop.f32.mrf.mxu1 }
 0x199   : > { %v1422_v6 = vadd.f32 %v1209_v4, %v557_v2  ;;  %v1454_v7 = vadd.f32 %v1337_v5, %v589_v3  ;;  %v565_v2 = vld [vmem:[%s2914_s2 + $0xb0] sm:$0xff] }
 0x19a   : > { %v1211_v8 = vpop.f32.mrf.mxu0  ;;  %v1339_v9 = vpop.f32.mrf.mxu1  ;;  %v597_v3 = vld [vmem:[%s2914_s2 + $0x1b0] sm:$0xff] }
 0x19b   : > { %1486 = vst [vmem:[%s2914_s2 + $0x70] sm:$0xff] %v1422_v6  ;;  %1518 = vst [vmem:[%s2914_s2 + $0x170] sm:$0xff] %v1454_v7 }
 0x19c   : > { %v1212_v12 = vpop.f32.mrf.mxu0  ;;  %v1340_v13 = vpop.f32.mrf.mxu1 }
 0x19d   : > { %v1423_v14 = vadd.f32 %v1212_v12, %v558_v10  ;;  %v1455_v15 = vadd.f32 %v1340_v13, %v590_v11  ;;  %v566_v10 = vld [vmem:[%s2914_s2 + $0xb8] sm:$0xff] }
 0x19e   : > { %v1214_v16 = vpop.f32.mrf.mxu0  ;;  %v1342_v17 = vpop.f32.mrf.mxu1  ;;  %v598_v11 = vld [vmem:[%s2914_s2 + $0x1b8] sm:$0xff] }
 0x19f   : > { %1487 = vst [vmem:[%s2914_s2 + $0x78] sm:$0xff] %v1423_v14  ;;  %1519 = vst [vmem:[%s2914_s2 + $0x178] sm:$0xff] %v1455_v15 }
 0x1a0   : > { %v1217_v20 = vpop.f32.mrf.mxu0  ;;  %v1345_v21 = vpop.f32.mrf.mxu1 }
 0x1a1   : > { %v1424_v22 = vadd.f32 %v1217_v20, %v559_v18  ;;  %v1456_v23 = vadd.f32 %v1345_v21, %v591_v19  ;;  %v567_v18 = vld [vmem:[%s2914_s2 + $0xc0] sm:$0xff] }
 0x1a2   : > { %v1219_v24 = vpop.f32.mrf.mxu0  ;;  %v1347_v25 = vpop.f32.mrf.mxu1  ;;  %v599_v19 = vld [vmem:[%s2914_s2 + $0x1c0] sm:$0xff] }
 0x1a3   : > { %1488 = vst [vmem:[%s2914_s2 + $0x80] sm:$0xff] %v1424_v22  ;;  %1520 = vst [vmem:[%s2914_s2 + $0x180] sm:$0xff] %v1456_v23 }
 0x1a4   : > { %v1220_v28 = vpop.f32.mrf.mxu0  ;;  %v1348_v29 = vpop.f32.mrf.mxu1 }
 0x1a5   : > { %v1425_v30 = vadd.f32 %v1220_v28, %v560_v26  ;;  %v1457_v31 = vadd.f32 %v1348_v29, %v592_v27  ;;  %v568_v26 = vld [vmem:[%s2914_s2 + $0xc8] sm:$0xff] }
 0x1a6   : > { %v1222_v32 = vpop.f32.mrf.mxu0  ;;  %v1350_v33 = vpop.f32.mrf.mxu1  ;;  %v600_v27 = vld [vmem:[%s2914_s2 + $0x1c8] sm:$0xff] }
 0x1a7   : > { %1489 = vst [vmem:[%s2914_s2 + $0x88] sm:$0xff] %v1425_v30  ;;  %1521 = vst [vmem:[%s2914_s2 + $0x188] sm:$0xff] %v1457_v31 }
 0x1a8   : > { %v1225_v36 = vpop.f32.mrf.mxu0  ;;  %v1353_v37 = vpop.f32.mrf.mxu1 }
 0x1a9   : > { %v1426_v38 = vadd.f32 %v1225_v36, %v561_v34  ;;  %v1458_v39 = vadd.f32 %v1353_v37, %v593_v35  ;;  %v569_v34 = vld [vmem:[%s2914_s2 + $0xd0] sm:$0xff] }
 0x1aa   : > { %v1227_v40 = vpop.f32.mrf.mxu0  ;;  %v1355_v41 = vpop.f32.mrf.mxu1  ;;  %v601_v35 = vld [vmem:[%s2914_s2 + $0x1d0] sm:$0xff] }
 0x1ab   : > { %1490 = vst [vmem:[%s2914_s2 + $0x90] sm:$0xff] %v1426_v38  ;;  %1522 = vst [vmem:[%s2914_s2 + $0x190] sm:$0xff] %v1458_v39 }
 0x1ac   : > { %v1228_v44 = vpop.f32.mrf.mxu0  ;;  %v1356_v45 = vpop.f32.mrf.mxu1 }
 0x1ad   : > { %v1427_v46 = vadd.f32 %v1228_v44, %v562_v42  ;;  %v1459_v47 = vadd.f32 %v1356_v45, %v594_v43  ;;  %v570_v42 = vld [vmem:[%s2914_s2 + $0xd8] sm:$0xff] }
 0x1ae   : > { %v1230_v48 = vpop.f32.mrf.mxu0  ;;  %v1358_v49 = vpop.f32.mrf.mxu1  ;;  %v602_v43 = vld [vmem:[%s2914_s2 + $0x1d8] sm:$0xff] }
 0x1af   : > { %1491 = vst [vmem:[%s2914_s2 + $0x98] sm:$0xff] %v1427_v46  ;;  %1523 = vst [vmem:[%s2914_s2 + $0x198] sm:$0xff] %v1459_v47 }
 0x1b0   : > { %v1233_v52 = vpop.f32.mrf.mxu0  ;;  %v1361_v53 = vpop.f32.mrf.mxu1 }
 0x1b1   : > { %v1428_v54 = vadd.f32 %v1233_v52, %v563_v50  ;;  %v1460_v55 = vadd.f32 %v1361_v53, %v595_v51  ;;  %v571_v50 = vld [vmem:[%s2914_s2 + $0xe0] sm:$0xff] }
 0x1b2   : > { %v1235_v56 = vpop.f32.mrf.mxu0  ;;  %v1363_v57 = vpop.f32.mrf.mxu1  ;;  %v603_v51 = vld [vmem:[%s2914_s2 + $0x1e0] sm:$0xff] }
 0x1b3   : > { %1492 = vst [vmem:[%s2914_s2 + $0xa0] sm:$0xff] %v1428_v54  ;;  %1524 = vst [vmem:[%s2914_s2 + $0x1a0] sm:$0xff] %v1460_v55 }
 0x1b4   : > { %v1236_v60 = vpop.f32.mrf.mxu0  ;;  %v1364_v61 = vpop.f32.mrf.mxu1 }
 0x1b5   : > { %v1429_v62 = vadd.f32 %v1236_v60, %v564_v58  ;;  %v1461_v63 = vadd.f32 %v1364_v61, %v596_v59  ;;  %v572_v58 = vld [vmem:[%s2914_s2 + $0xe8] sm:$0xff] }
 0x1b6   : > { %v1238_v0 = vpop.f32.mrf.mxu0  ;;  %v1366_v1 = vpop.f32.mrf.mxu1  ;;  %v604_v59 = vld [vmem:[%s2914_s2 + $0x1e8] sm:$0xff] }
 0x1b7   : > { %1493 = vst [vmem:[%s2914_s2 + $0xa8] sm:$0xff] %v1429_v62  ;;  %1525 = vst [vmem:[%s2914_s2 + $0x1a8] sm:$0xff] %v1461_v63 }
 0x1b8   : > { %v1241_v4 = vpop.f32.mrf.mxu0  ;;  %v1369_v5 = vpop.f32.mrf.mxu1 }
 0x1b9   : > { %v1430_v6 = vadd.f32 %v1241_v4, %v565_v2  ;;  %v1462_v7 = vadd.f32 %v1369_v5, %v597_v3  ;;  %v573_v2 = vld [vmem:[%s2914_s2 + $0xf0] sm:$0xff] }
 0x1ba   : > { %v1243_v8 = vpop.f32.mrf.mxu0  ;;  %v1371_v9 = vpop.f32.mrf.mxu1  ;;  %v605_v3 = vld [vmem:[%s2914_s2 + $0x1f0] sm:$0xff] }
 0x1bb   : > { %1494 = vst [vmem:[%s2914_s2 + $0xb0] sm:$0xff] %v1430_v6  ;;  %1526 = vst [vmem:[%s2914_s2 + $0x1b0] sm:$0xff] %v1462_v7 }
 0x1bc   : > { %v1244_v12 = vpop.f32.mrf.mxu0  ;;  %v1372_v13 = vpop.f32.mrf.mxu1 }
 0x1bd   : > { %v1431_v14 = vadd.f32 %v1244_v12, %v566_v10  ;;  %v1463_v15 = vadd.f32 %v1372_v13, %v598_v11  ;;  %v574_v10 = vld [vmem:[%s2914_s2 + $0xf8] sm:$0xff] }
 0x1be   : > { %v1246_v16 = vpop.f32.mrf.mxu0  ;;  %v1374_v17 = vpop.f32.mrf.mxu1  ;;  %v606_v11 = vld [vmem:[%s2914_s2 + $0x1f8] sm:$0xff] }
 0x1bf   : > { %1495 = vst [vmem:[%s2914_s2 + $0xb8] sm:$0xff] %v1431_v14  ;;  %1527 = vst [vmem:[%s2914_s2 + $0x1b8] sm:$0xff] %v1463_v15 }
 0x1c0   : > { %v1249_v20 = vpop.f32.mrf.mxu0  ;;  %v1377_v21 = vpop.f32.mrf.mxu1 }
 0x1c1   : > { %v1432_v22 = vadd.f32 %v1249_v20, %v567_v18  ;;  %v1464_v23 = vadd.f32 %v1377_v21, %v599_v19 }
 0x1c2   : > { %v1251_v24 = vpop.f32.mrf.mxu0  ;;  %v1379_v25 = vpop.f32.mrf.mxu1 }
 0x1c3   : > { %1496 = vst [vmem:[%s2914_s2 + $0xc0] sm:$0xff] %v1432_v22  ;;  %1528 = vst [vmem:[%s2914_s2 + $0x1c0] sm:$0xff] %v1464_v23 }
 0x1c4   : > { %v1252_v28 = vpop.f32.mrf.mxu0  ;;  %v1380_v29 = vpop.f32.mrf.mxu1 }
 0x1c5   : > { %v1433_v30 = vadd.f32 %v1252_v28, %v568_v26  ;;  %v1465_v31 = vadd.f32 %v1380_v29, %v600_v27 }
 0x1c6   : > { %v1254_v32 = vpop.f32.mrf.mxu0  ;;  %v1382_v33 = vpop.f32.mrf.mxu1 }
 0x1c7   : > { %1497 = vst [vmem:[%s2914_s2 + $0xc8] sm:$0xff] %v1433_v30  ;;  %1529 = vst [vmem:[%s2914_s2 + $0x1c8] sm:$0xff] %v1465_v31 }
 0x1c8   : > { %v1257_v36 = vpop.f32.mrf.mxu0  ;;  %v1385_v37 = vpop.f32.mrf.mxu1 }
 0x1c9   : > { %v1434_v38 = vadd.f32 %v1257_v36, %v569_v34  ;;  %v1466_v39 = vadd.f32 %v1385_v37, %v601_v35 }
 0x1ca   : > { %v1259_v40 = vpop.f32.mrf.mxu0  ;;  %v1387_v41 = vpop.f32.mrf.mxu1 }
 0x1cb   : > { %1498 = vst [vmem:[%s2914_s2 + $0xd0] sm:$0xff] %v1434_v38  ;;  %1530 = vst [vmem:[%s2914_s2 + $0x1d0] sm:$0xff] %v1466_v39 }
 0x1cc   : > { %v1260_v44 = vpop.f32.mrf.mxu0  ;;  %v1388_v45 = vpop.f32.mrf.mxu1 }
 0x1cd   : > { %v1435_v46 = vadd.f32 %v1260_v44, %v570_v42  ;;  %v1467_v47 = vadd.f32 %v1388_v45, %v602_v43 }
 0x1ce   : > { %v1262_v48 = vpop.f32.mrf.mxu0  ;;  %v1390_v49 = vpop.f32.mrf.mxu1 }
 0x1cf   : > { %1499 = vst [vmem:[%s2914_s2 + $0xd8] sm:$0xff] %v1435_v46  ;;  %1531 = vst [vmem:[%s2914_s2 + $0x1d8] sm:$0xff] %v1467_v47 }
 0x1d0   : > { %v1265_v52 = vpop.f32.mrf.mxu0  ;;  %v1393_v53 = vpop.f32.mrf.mxu1 }
 0x1d1   : > { %v1436_v54 = vadd.f32 %v1265_v52, %v571_v50  ;;  %v1468_v55 = vadd.f32 %v1393_v53, %v603_v51 }
 0x1d2   : > { %v1267_v56 = vpop.f32.mrf.mxu0  ;;  %v1395_v57 = vpop.f32.mrf.mxu1 }
 0x1d3   : > { %1500 = vst [vmem:[%s2914_s2 + $0xe0] sm:$0xff] %v1436_v54  ;;  %1532 = vst [vmem:[%s2914_s2 + $0x1e0] sm:$0xff] %v1468_v55 }
 0x1d4   : > { %v1268_v60 = vpop.f32.mrf.mxu0  ;;  %v1396_v61 = vpop.f32.mrf.mxu1 }
 0x1d5   : > { %v1437_v62 = vadd.f32 %v1268_v60, %v572_v58  ;;  %v1469_v63 = vadd.f32 %v1396_v61, %v604_v59 }
 0x1d6   : > { %v1270_v0 = vpop.f32.mrf.mxu0  ;;  %v1398_v1 = vpop.f32.mrf.mxu1 }
 0x1d7   : > { %1501 = vst [vmem:[%s2914_s2 + $0xe8] sm:$0xff] %v1437_v62  ;;  %1533 = vst [vmem:[%s2914_s2 + $0x1e8] sm:$0xff] %v1469_v63 }
 0x1d8   : > { %v1273_v4 = vpop.f32.mrf.mxu0  ;;  %v1401_v5 = vpop.f32.mrf.mxu1 }
 0x1d9   : > { %v1438_v6 = vadd.f32 %v1273_v4, %v573_v2  ;;  %v1470_v7 = vadd.f32 %v1401_v5, %v605_v3 }
 0x1da   : > { %v1275_v8 = vpop.f32.mrf.mxu0  ;;  %v1403_v9 = vpop.f32.mrf.mxu1 }
 0x1db   : > { %1502 = vst [vmem:[%s2914_s2 + $0xf0] sm:$0xff] %v1438_v6  ;;  %1534 = vst [vmem:[%s2914_s2 + $0x1f0] sm:$0xff] %v1470_v7 }
 0x1dc   : > { %v1276_v12 = vpop.f32.mrf.mxu0  ;;  %v1404_v13 = vpop.f32.mrf.mxu1 }
 0x1dd   : > { %v1439_v14 = vadd.f32 %v1276_v12, %v574_v10  ;;  %v1471_v15 = vadd.f32 %v1404_v13, %v606_v11 }
 0x1de   : > { %v1278_v16 = vpop.f32.mrf.mxu0  ;;  %v1406_v17 = vpop.f32.mrf.mxu1 }
 0x1df   : > { %1503 = vst [vmem:[%s2914_s2 + $0xf8] sm:$0xff] %v1439_v14  ;;  %1535 = vst [vmem:[%s2914_s2 + $0x1f8] sm:$0xff] %v1471_v15 }
 0x1e0 PF: > { %s12_s13 = sadd.s32 1, %s1939_s13   ;;  %s2915_s9 = smov %s1927_s10 }
 0x1e1   : > { %p9_p11 = scmp.ge.s32.totalorder %s12_s13, 41   ;;  %s2916_s10 = smov %s1993_s17 }
 0x1e2   : > { %s2917_s11 = smov %s1935_s12  ;;  %s2918_s12 = smov %s2920_s14 }
 0x1e3   :  { %11 = sbr.rel (!%p9_p11) target bundleno = 3 (0x3), region = 108 }

// kernel: densenet_forward.57
= control target key start
LH: loop header
LB: loop body
LE: loop exit
PB: predicated region body
PF: predicated region fallthrough
CT: control target
= control target key end

     0   :  { %vm284_vm0 = vcmask 261120   ;;  %s961_s0 = inlined_call_operand.vmem [shape: f32[512,32], index: 0, kind: input, shape index: {}]   ;;  %s962_s1 = inlined_call_operand.vmem [shape: f32[1,32], index: 1, kind: input, shape index: {}]   ;;  %s963_s2 = inlined_call_operand.vmem [shape: f32[1,32], index: 2, kind: input, shape index: {}]   ;;  %s964_s3 = inlined_call_operand.vmem [shape: f32[512,32], index: 3, kind: output, shape index: {}]  }
   0x1   :  { %v14_v0 = vld [vmem:[%s961_s0] sm:$0xff]  ;;  %v15_v4 = vld [vmem:[%s961_s0 + $0x8] sm:$0xff]  ;;  %v16_v5 = vld [vmem:[%s961_s0 + $0x10] sm:$0xff] }
   0x2   :  { %v381_v1 = vld [vmem:[%s962_s1] ss:$0 sm:$0xff]  ;;  %v17_v6 = vld [vmem:[%s961_s0 + $0x18] sm:$0xff]  ;;  %v19_v11 = vld [vmem:[%s961_s0 + $0x28] sm:$0xff] }
   0x3   :  { %v386_v2 = vld [vmem:[%s963_s2] ss:$0 sm:$0xff]  ;;  %v85_v3 = vmul.f32 %v381_v1, %v14_v0  ;;  %v86_v7 = vmul.f32 %v381_v1, %v15_v4  ;;  %v87_v8 = vmul.f32 %v381_v1, %v16_v5  ;;  %v88_v9 = vmul.f32 %v381_v1, %v17_v6  ;;  %v20_v12 = vld [vmem:[%s961_s0 + $0x30] sm:$0xff]  ;;  %v21_v17 = vld [vmem:[%s961_s0 + $0x38] sm:$0xff] }
   0x4   :  { %v18_v10 = vld [vmem:[%s961_s0 + $0x20] sm:$0xff]  ;;  %v90_v15 = vmul.f32 %v381_v1, %v19_v11  ;;  %v91_v16 = vmul.f32 %v381_v1, %v20_v12  ;;  %v92_v21 = vmul.f32 %v381_v1, %v21_v17  ;;  %v23_v27 = vld [vmem:[%s961_s0 + $0x48] sm:$0xff]  ;;  %v24_v28 = vld [vmem:[%s961_s0 + $0x50] sm:$0xff] }
   0x5   :  { %v156_v13 = vadd.f32 %v386_v2, %v85_v3  ;;  %v89_v14 = vmul.f32 %v381_v1, %v18_v10  ;;  %v157_v18 = vadd.f32 %v386_v2, %v86_v7  ;;  %v158_v19 = vadd.f32 %v386_v2, %v87_v8  ;;  %v22_v22 = vld [vmem:[%s961_s0 + $0x40] sm:$0xff]  ;;  %v25_v29 = vld [vmem:[%s961_s0 + $0x58] sm:$0xff]  ;;  %v27_v35 = vld [vmem:[%s961_s0 + $0x68] sm:$0xff] }
   0x6   :  { %v159_v20 = vadd.f32 %v386_v2, %v88_v9  ;;  %v161_v25 = vadd.f32 %v386_v2, %v90_v15  ;;  %v162_v26 = vadd.f32 %v386_v2, %v91_v16  ;;  %v163_v33 = vadd.f32 %v386_v2, %v92_v21  ;;  %v26_v34 = vld [vmem:[%s961_s0 + $0x60] sm:$0xff]  ;;  %v28_v36 = vld [vmem:[%s961_s0 + $0x70] sm:$0xff]  ;;  %v29_v41 = vld [vmem:[%s961_s0 + $0x78] sm:$0xff] }
   0x7   :  { %v220_v23 = vmax.f32 %v156_v13, 0.0  ;;  %v160_v24 = vadd.f32 %v386_v2, %v89_v14  ;;  %v221_v30 = vmax.f32 %v157_v18, 0.0  ;;  %v222_v31 = vmax.f32 %v158_v19, 0.0  ;;  %v30_v54 = vld [vmem:[%s961_s0 + $0x80] sm:$0xff]  ;;  %v31_v59 = vld [vmem:[%s961_s0 + $0x88] sm:$0xff]  ;;  %v32_v60 = vld [vmem:[%s961_s0 + $0x90] sm:$0xff] }
   0x8   :  { %v223_v32 = vmax.f32 %v159_v20, 0.0  ;;  %v225_v38 = vmax.f32 %v161_v25, 0.0  ;;  %v226_v39 = vmax.f32 %v162_v26, 0.0  ;;  %v93_v40 = vmul.f32 %v381_v1, %v22_v22  ;;  %v33_v61 = vld [vmem:[%s961_s0 + $0x98] sm:$0xff]  ;;  %v34_v4 = vld [vmem:[%s961_s0 + $0xa0] sm:$0xff]  ;;  %v35_v5 = vld [vmem:[%s961_s0 + $0xa8] sm:$0xff] }
   0x9   :  { %285 = vst.msk [vmem:[%s964_s3] sm:$0xff] %vm284_vm0, %v220_v23  ;;  %v224_v37 = vmax.f32 %v160_v24, 0.0  ;;  %286 = vst.msk [vmem:[%s964_s3 + $0x8] sm:$0xff] %vm284_vm0, %v221_v30  ;;  %v227_v42 = vmax.f32 %v163_v33, 0.0  ;;  %v94_v43 = vmul.f32 %v381_v1, %v23_v27  ;;  %v95_v44 = vmul.f32 %v381_v1, %v24_v28  ;;  %v36_v6 = vld [vmem:[%s961_s0 + $0xb0] sm:$0xff]  ;;  %v37_v11 = vld [vmem:[%s961_s0 + $0xb8] sm:$0xff] }
   0xa   :  { %287 = vst.msk [vmem:[%s964_s3 + $0x10] sm:$0xff] %vm284_vm0, %v222_v31  ;;  %288 = vst.msk [vmem:[%s964_s3 + $0x18] sm:$0xff] %vm284_vm0, %v223_v32  ;;  %v96_v45 = vmul.f32 %v381_v1, %v25_v29  ;;  %v164_v46 = vadd.f32 %v386_v2, %v93_v40  ;;  %v97_v47 = vmul.f32 %v381_v1, %v26_v34  ;;  %v38_v24 = vld [vmem:[%s961_s0 + $0xc0] sm:$0xff]  ;;  %v39_v29 = vld [vmem:[%s961_s0 + $0xc8] sm:$0xff] }
   0xb   :  { %289 = vst.msk [vmem:[%s964_s3 + $0x20] sm:$0xff] %vm284_vm0, %v224_v37  ;;  %290 = vst.msk [vmem:[%s964_s3 + $0x28] sm:$0xff] %vm284_vm0, %v225_v38  ;;  %v98_v48 = vmul.f32 %v381_v1, %v27_v35  ;;  %v99_v49 = vmul.f32 %v381_v1, %v28_v36  ;;  %v165_v50 = vadd.f32 %v386_v2, %v94_v43  ;;  %v40_v30 = vld [vmem:[%s961_s0 + $0xd0] sm:$0xff]  ;;  %v41_v31 = vld [vmem:[%s961_s0 + $0xd8] sm:$0xff] }
   0xc   :  { %291 = vst.msk [vmem:[%s964_s3 + $0x30] sm:$0xff] %vm284_vm0, %v226_v39  ;;  %292 = vst.msk [vmem:[%s964_s3 + $0x38] sm:$0xff] %vm284_vm0, %v227_v42  ;;  %v166_v51 = vadd.f32 %v386_v2, %v95_v44  ;;  %v167_v52 = vadd.f32 %v386_v2, %v96_v45  ;;  %v100_v53 = vmul.f32 %v381_v1, %v29_v41  ;;  %v228_v55 = vmax.f32 %v164_v46, 0.0  ;;  %v42_v36 = vld [vmem:[%s961_s0 + $0xe0] sm:$0xff]  ;;  %v43_v37 = vld [vmem:[%s961_s0 + $0xe8] sm:$0xff] }
   0xd   :  { %v168_v56 = vadd.f32 %v386_v2, %v97_v47  ;;  %v169_v57 = vadd.f32 %v386_v2, %v98_v48  ;;  %v170_v58 = vadd.f32 %v386_v2, %v99_v49  ;;  %v229_v62 = vmax.f32 %v165_v50, 0.0  ;;  %v44_v38 = vld [vmem:[%s961_s0 + $0xf0] sm:$0xff]  ;;  %v45_v43 = vld [vmem:[%s961_s0 + $0xf8] sm:$0xff] }
   0xe   :  { %v230_v63 = vmax.f32 %v166_v51, 0.0  ;;  %v231_v0 = vmax.f32 %v167_v52, 0.0  ;;  %v171_v3 = vadd.f32 %v386_v2, %v100_v53  ;;  %293 = vst.msk [vmem:[%s964_s3 + $0x40] sm:$0xff] %vm284_vm0, %v228_v55  ;;  %v101_v10 = vmul.f32 %v381_v1, %v30_v54 }
   0xf   :  { %v232_v7 = vmax.f32 %v168_v56, 0.0  ;;  %v233_v8 = vmax.f32 %v169_v57, 0.0  ;;  %v234_v9 = vmax.f32 %v170_v58, 0.0  ;;  %294 = vst.msk [vmem:[%s964_s3 + $0x48] sm:$0xff] %vm284_vm0, %v229_v62  ;;  %v102_v13 = vmul.f32 %v381_v1, %v31_v59  ;;  %v46_v56 = vld [vmem:[%s961_s0 + $0x100] sm:$0xff]  ;;  %v48_v62 = vld [vmem:[%s961_s0 + $0x110] sm:$0xff] }
  0x10   :  { %295 = vst.msk [vmem:[%s964_s3 + $0x50] sm:$0xff] %vm284_vm0, %v230_v63  ;;  %296 = vst.msk [vmem:[%s964_s3 + $0x58] sm:$0xff] %vm284_vm0, %v231_v0  ;;  %v235_v12 = vmax.f32 %v171_v3, 0.0  ;;  %v103_v14 = vmul.f32 %v381_v1, %v32_v60  ;;  %v104_v15 = vmul.f32 %v381_v1, %v33_v61  ;;  %v172_v16 = vadd.f32 %v386_v2, %v101_v10  ;;  %v47_v61 = vld [vmem:[%s961_s0 + $0x108] sm:$0xff]  ;;  %v49_v63 = vld [vmem:[%s961_s0 + $0x118] sm:$0xff] }
  0x11   :  { %297 = vst.msk [vmem:[%s964_s3 + $0x60] sm:$0xff] %vm284_vm0, %v232_v7  ;;  %298 = vst.msk [vmem:[%s964_s3 + $0x68] sm:$0xff] %vm284_vm0, %v233_v8  ;;  %v105_v17 = vmul.f32 %v381_v1, %v34_v4  ;;  %v106_v18 = vmul.f32 %v381_v1, %v35_v5  ;;  %v107_v19 = vmul.f32 %v381_v1, %v36_v6  ;;  %v50_v6 = vld [vmem:[%s961_s0 + $0x120] sm:$0xff]  ;;  %v51_v7 = vld [vmem:[%s961_s0 + $0x128] sm:$0xff] }
  0x12   :  { %299 = vst.msk [vmem:[%s964_s3 + $0x70] sm:$0xff] %vm284_vm0, %v234_v9  ;;  %300 = vst.msk [vmem:[%s964_s3 + $0x78] sm:$0xff] %vm284_vm0, %v235_v12  ;;  %v173_v20 = vadd.f32 %v386_v2, %v102_v13  ;;  %v174_v21 = vadd.f32 %v386_v2, %v103_v14  ;;  %v175_v22 = vadd.f32 %v386_v2, %v104_v15  ;;  %v236_v25 = vmax.f32 %v172_v16, 0.0  ;;  %v52_v8 = vld [vmem:[%s961_s0 + $0x130] sm:$0xff]  ;;  %v53_v13 = vld [vmem:[%s961_s0 + $0x138] sm:$0xff] }
  0x13   :  { %v108_v23 = vmul.f32 %v381_v1, %v37_v11  ;;  %v176_v26 = vadd.f32 %v386_v2, %v105_v17  ;;  %v177_v27 = vadd.f32 %v386_v2, %v106_v18  ;;  %v178_v28 = vadd.f32 %v386_v2, %v107_v19 }
  0x14   :  { %v237_v32 = vmax.f32 %v173_v20, 0.0  ;;  %v238_v33 = vmax.f32 %v174_v21, 0.0  ;;  %v239_v34 = vmax.f32 %v175_v22, 0.0  ;;  %301 = vst.msk [vmem:[%s964_s3 + $0x80] sm:$0xff] %vm284_vm0, %v236_v25  ;;  %v109_v42 = vmul.f32 %v381_v1, %v38_v24 }
  0x15   :  { %v179_v35 = vadd.f32 %v386_v2, %v108_v23  ;;  %v240_v39 = vmax.f32 %v176_v26, 0.0  ;;  %v241_v40 = vmax.f32 %v177_v27, 0.0  ;;  %v242_v41 = vmax.f32 %v178_v28, 0.0  ;;  %v54_v26 = vld [vmem:[%s961_s0 + $0x140] sm:$0xff] }
  0x16   :  { %302 = vst.msk [vmem:[%s964_s3 + $0x88] sm:$0xff] %vm284_vm0, %v237_v32  ;;  %303 = vst.msk [vmem:[%s964_s3 + $0x90] sm:$0xff] %vm284_vm0, %v238_v33  ;;  %v110_v45 = vmul.f32 %v381_v1, %v39_v29  ;;  %v111_v46 = vmul.f32 %v381_v1, %v40_v30  ;;  %v112_v47 = vmul.f32 %v381_v1, %v41_v31  ;;  %v55_v31 = vld [vmem:[%s961_s0 + $0x148] sm:$0xff]  ;;  %v56_v32 = vld [vmem:[%s961_s0 + $0x150] sm:$0xff] }
  0x17   :  { %304 = vst.msk [vmem:[%s964_s3 + $0x98] sm:$0xff] %vm284_vm0, %v239_v34  ;;  %v243_v44 = vmax.f32 %v179_v35, 0.0  ;;  %305 = vst.msk [vmem:[%s964_s3 + $0xa0] sm:$0xff] %vm284_vm0, %v240_v39  ;;  %v180_v48 = vadd.f32 %v386_v2, %v109_v42  ;;  %v113_v49 = vmul.f32 %v381_v1, %v42_v36  ;;  %v114_v50 = vmul.f32 %v381_v1, %v43_v37  ;;  %v57_v33 = vld [vmem:[%s961_s0 + $0x158] sm:$0xff]  ;;  %v59_v39 = vld [vmem:[%s961_s0 + $0x168] sm:$0xff] }
  0x18   :  { %306 = vst.msk [vmem:[%s964_s3 + $0xa8] sm:$0xff] %vm284_vm0, %v241_v40  ;;  %307 = vst.msk [vmem:[%s964_s3 + $0xb0] sm:$0xff] %vm284_vm0, %v242_v41  ;;  %v115_v51 = vmul.f32 %v381_v1, %v44_v38  ;;  %v181_v52 = vadd.f32 %v386_v2, %v110_v45  ;;  %v182_v53 = vadd.f32 %v386_v2, %v111_v46  ;;  %v58_v38 = vld [vmem:[%s961_s0 + $0x160] sm:$0xff]  ;;  %v60_v40 = vld [vmem:[%s961_s0 + $0x170] sm:$0xff] }
  0x19   :  { %308 = vst.msk [vmem:[%s964_s3 + $0xb8] sm:$0xff] %vm284_vm0, %v243_v44  ;;  %v183_v54 = vadd.f32 %v386_v2, %v112_v47  ;;  %v116_v55 = vmul.f32 %v381_v1, %v45_v43  ;;  %v244_v57 = vmax.f32 %v180_v48, 0.0  ;;  %v184_v58 = vadd.f32 %v386_v2, %v113_v49  ;;  %v61_v45 = vld [vmem:[%s961_s0 + $0x178] sm:$0xff] }
  0x1a   :  { %v185_v59 = vadd.f32 %v386_v2, %v114_v50  ;;  %v186_v60 = vadd.f32 %v386_v2, %v115_v51  ;;  %v245_v0 = vmax.f32 %v181_v52, 0.0  ;;  %v246_v3 = vmax.f32 %v182_v53, 0.0 }
  0x1b   :  { %v247_v4 = vmax.f32 %v183_v54, 0.0  ;;  %v187_v5 = vadd.f32 %v386_v2, %v116_v55  ;;  %309 = vst.msk [vmem:[%s964_s3 + $0xc0] sm:$0xff] %vm284_vm0, %v244_v57  ;;  %v248_v9 = vmax.f32 %v184_v58, 0.0  ;;  %v117_v12 = vmul.f32 %v381_v1, %v46_v56  ;;  %v62_v58 = vld [vmem:[%s961_s0 + $0x180] sm:$0xff] }
  0x1c   :  { %v249_v10 = vmax.f32 %v185_v59, 0.0  ;;  %v250_v11 = vmax.f32 %v186_v60, 0.0  ;;  %310 = vst.msk [vmem:[%s964_s3 + $0xc8] sm:$0xff] %vm284_vm0, %v245_v0  ;;  %311 = vst.msk [vmem:[%s964_s3 + $0xd0] sm:$0xff] %vm284_vm0, %v246_v3  ;;  %v118_v15 = vmul.f32 %v381_v1, %v47_v61  ;;  %v119_v16 = vmul.f32 %v381_v1, %v48_v62  ;;  %v64_v0 = vld [vmem:[%s961_s0 + $0x190] sm:$0xff]  ;;  %v65_v3 = vld [vmem:[%s961_s0 + $0x198] sm:$0xff] }
  0x1d   :  { %312 = vst.msk [vmem:[%s964_s3 + $0xd8] sm:$0xff] %vm284_vm0, %v247_v4  ;;  %v251_v14 = vmax.f32 %v187_v5, 0.0  ;;  %v120_v17 = vmul.f32 %v381_v1, %v49_v63  ;;  %313 = vst.msk [vmem:[%s964_s3 + $0xe0] sm:$0xff] %vm284_vm0, %v248_v9  ;;  %v188_v18 = vadd.f32 %v386_v2, %v117_v12  ;;  %v121_v19 = vmul.f32 %v381_v1, %v50_v6  ;;  %v63_v63 = vld [vmem:[%s961_s0 + $0x188] sm:$0xff] }
  0x1e   :  { %314 = vst.msk [vmem:[%s964_s3 + $0xe8] sm:$0xff] %vm284_vm0, %v249_v10  ;;  %315 = vst.msk [vmem:[%s964_s3 + $0xf0] sm:$0xff] %vm284_vm0, %v250_v11  ;;  %v122_v20 = vmul.f32 %v381_v1, %v51_v7  ;;  %v123_v21 = vmul.f32 %v381_v1, %v52_v8  ;;  %v189_v22 = vadd.f32 %v386_v2, %v118_v15  ;;  %v66_v8 = vld [vmem:[%s961_s0 + $0x1a0] sm:$0xff]  ;;  %v67_v9 = vld [vmem:[%s961_s0 + $0x1a8] sm:$0xff] }
  0x1f   :  { %316 = vst.msk [vmem:[%s964_s3 + $0xf8] sm:$0xff] %vm284_vm0, %v251_v14  ;;  %v190_v23 = vadd.f32 %v386_v2, %v119_v16  ;;  %v191_v24 = vadd.f32 %v386_v2, %v120_v17  ;;  %v124_v25 = vmul.f32 %v381_v1, %v53_v13  ;;  %v252_v27 = vmax.f32 %v188_v18, 0.0  ;;  %v68_v10 = vld [vmem:[%s961_s0 + $0x1b0] sm:$0xff]  ;;  %v69_v15 = vld [vmem:[%s961_s0 + $0x1b8] sm:$0xff] }
  0x20   :  { %v192_v28 = vadd.f32 %v386_v2, %v121_v19  ;;  %v193_v29 = vadd.f32 %v386_v2, %v122_v20  ;;  %v194_v30 = vadd.f32 %v386_v2, %v123_v21  ;;  %v253_v34 = vmax.f32 %v189_v22, 0.0 }
  0x21   :  { %v254_v35 = vmax.f32 %v190_v23, 0.0  ;;  %v255_v36 = vmax.f32 %v191_v24, 0.0  ;;  %v195_v37 = vadd.f32 %v386_v2, %v124_v25  ;;  %317 = vst.msk [vmem:[%s964_s3 + $0x100] sm:$0xff] %vm284_vm0, %v252_v27  ;;  %v125_v44 = vmul.f32 %v381_v1, %v54_v26 }
  0x22   :  { %v256_v41 = vmax.f32 %v192_v28, 0.0  ;;  %v257_v42 = vmax.f32 %v193_v29, 0.0  ;;  %v258_v43 = vmax.f32 %v194_v30, 0.0  ;;  %318 = vst.msk [vmem:[%s964_s3 + $0x108] sm:$0xff] %vm284_vm0, %v253_v34  ;;  %v126_v47 = vmul.f32 %v381_v1, %v55_v31  ;;  %v70_v28 = vld [vmem:[%s961_s0 + $0x1c0] sm:$0xff]  ;;  %v72_v34 = vld [vmem:[%s961_s0 + $0x1d0] sm:$0xff] }
  0x23   :  { %319 = vst.msk [vmem:[%s964_s3 + $0x110] sm:$0xff] %vm284_vm0, %v254_v35  ;;  %320 = vst.msk [vmem:[%s964_s3 + $0x118] sm:$0xff] %vm284_vm0, %v255_v36  ;;  %v259_v46 = vmax.f32 %v195_v37, 0.0  ;;  %v127_v48 = vmul.f32 %v381_v1, %v56_v32  ;;  %v128_v49 = vmul.f32 %v381_v1, %v57_v33  ;;  %v196_v50 = vadd.f32 %v386_v2, %v125_v44  ;;  %v71_v33 = vld [vmem:[%s961_s0 + $0x1c8] sm:$0xff]  ;;  %v73_v35 = vld [vmem:[%s961_s0 + $0x1d8] sm:$0xff] }
  0x24   :  { %321 = vst.msk [vmem:[%s964_s3 + $0x120] sm:$0xff] %vm284_vm0, %v256_v41  ;;  %322 = vst.msk [vmem:[%s964_s3 + $0x128] sm:$0xff] %vm284_vm0, %v257_v42  ;;  %v129_v51 = vmul.f32 %v381_v1, %v58_v38  ;;  %v130_v52 = vmul.f32 %v381_v1, %v59_v39  ;;  %v131_v53 = vmul.f32 %v381_v1, %v60_v40  ;;  %v74_v40 = vld [vmem:[%s961_s0 + $0x1e0] sm:$0xff]  ;;  %v75_v41 = vld [vmem:[%s961_s0 + $0x1e8] sm:$0xff] }
  0x25   :  { %323 = vst.msk [vmem:[%s964_s3 + $0x130] sm:$0xff] %vm284_vm0, %v258_v43  ;;  %324 = vst.msk [vmem:[%s964_s3 + $0x138] sm:$0xff] %vm284_vm0, %v259_v46  ;;  %v197_v54 = vadd.f32 %v386_v2, %v126_v47  ;;  %v198_v55 = vadd.f32 %v386_v2, %v127_v48  ;;  %v199_v56 = vadd.f32 %v386_v2, %v128_v49  ;;  %v260_v59 = vmax.f32 %v196_v50, 0.0  ;;  %v76_v42 = vld [vmem:[%s961_s0 + $0x1f0] sm:$0xff]  ;;  %v77_v47 = vld [vmem:[%s961_s0 + $0x1f8] sm:$0xff] }
  0x26   :  { %v132_v57 = vmul.f32 %v381_v1, %v61_v45  ;;  %v200_v60 = vadd.f32 %v386_v2, %v129_v51  ;;  %v201_v61 = vadd.f32 %v386_v2, %v130_v52  ;;  %v202_v62 = vadd.f32 %v386_v2, %v131_v53 }
  0x27   :  { %v261_v4 = vmax.f32 %v197_v54, 0.0  ;;  %v262_v5 = vmax.f32 %v198_v55, 0.0  ;;  %v263_v6 = vmax.f32 %v199_v56, 0.0  ;;  %325 = vst.msk [vmem:[%s964_s3 + $0x140] sm:$0xff] %vm284_vm0, %v260_v59  ;;  %v133_v14 = vmul.f32 %v381_v1, %v62_v58 }
  0x28   :  { %v203_v7 = vadd.f32 %v386_v2, %v132_v57  ;;  %v264_v11 = vmax.f32 %v200_v60, 0.0  ;;  %v265_v12 = vmax.f32 %v201_v61, 0.0  ;;  %v266_v13 = vmax.f32 %v202_v62, 0.0 }
  0x29   :  { %326 = vst.msk [vmem:[%s964_s3 + $0x148] sm:$0xff] %vm284_vm0, %v261_v4  ;;  %327 = vst.msk [vmem:[%s964_s3 + $0x150] sm:$0xff] %vm284_vm0, %v262_v5  ;;  %v134_v17 = vmul.f32 %v381_v1, %v63_v63  ;;  %v135_v18 = vmul.f32 %v381_v1, %v64_v0  ;;  %v136_v19 = vmul.f32 %v381_v1, %v65_v3 }
  0x2a   :  { %328 = vst.msk [vmem:[%s964_s3 + $0x158] sm:$0xff] %vm284_vm0, %v263_v6  ;;  %v267_v16 = vmax.f32 %v203_v7, 0.0  ;;  %329 = vst.msk [vmem:[%s964_s3 + $0x160] sm:$0xff] %vm284_vm0, %v264_v11  ;;  %v204_v20 = vadd.f32 %v386_v2, %v133_v14  ;;  %v137_v21 = vmul.f32 %v381_v1, %v66_v8  ;;  %v138_v22 = vmul.f32 %v381_v1, %v67_v9 }
  0x2b   :  { %330 = vst.msk [vmem:[%s964_s3 + $0x168] sm:$0xff] %vm284_vm0, %v265_v12  ;;  %331 = vst.msk [vmem:[%s964_s3 + $0x170] sm:$0xff] %vm284_vm0, %v266_v13  ;;  %v139_v23 = vmul.f32 %v381_v1, %v68_v10  ;;  %v205_v24 = vadd.f32 %v386_v2, %v134_v17  ;;  %v206_v25 = vadd.f32 %v386_v2, %v135_v18 }
  0x2c   :  { %332 = vst.msk [vmem:[%s964_s3 + $0x178] sm:$0xff] %vm284_vm0, %v267_v16  ;;  %v207_v26 = vadd.f32 %v386_v2, %v136_v19  ;;  %v140_v27 = vmul.f32 %v381_v1, %v69_v15  ;;  %v268_v29 = vmax.f32 %v204_v20, 0.0  ;;  %v208_v30 = vadd.f32 %v386_v2, %v137_v21 }
  0x2d   :  { %v209_v31 = vadd.f32 %v386_v2, %v138_v22  ;;  %v210_v32 = vadd.f32 %v386_v2, %v139_v23  ;;  %v269_v36 = vmax.f32 %v205_v24, 0.0  ;;  %v270_v37 = vmax.f32 %v206_v25, 0.0 }
  0x2e   :  { %v271_v38 = vmax.f32 %v207_v26, 0.0  ;;  %v211_v39 = vadd.f32 %v386_v2, %v140_v27  ;;  %333 = vst.msk [vmem:[%s964_s3 + $0x180] sm:$0xff] %vm284_vm0, %v268_v29  ;;  %v272_v43 = vmax.f32 %v208_v30, 0.0  ;;  %v141_v46 = vmul.f32 %v381_v1, %v70_v28 }
  0x2f   :  { %v273_v44 = vmax.f32 %v209_v31, 0.0  ;;  %v274_v45 = vmax.f32 %v210_v32, 0.0  ;;  %334 = vst.msk [vmem:[%s964_s3 + $0x188] sm:$0xff] %vm284_vm0, %v269_v36  ;;  %335 = vst.msk [vmem:[%s964_s3 + $0x190] sm:$0xff] %vm284_vm0, %v270_v37  ;;  %v142_v49 = vmul.f32 %v381_v1, %v71_v33  ;;  %v143_v50 = vmul.f32 %v381_v1, %v72_v34 }
  0x30   :  { %336 = vst.msk [vmem:[%s964_s3 + $0x198] sm:$0xff] %vm284_vm0, %v271_v38  ;;  %v275_v48 = vmax.f32 %v211_v39, 0.0  ;;  %v144_v51 = vmul.f32 %v381_v1, %v73_v35  ;;  %337 = vst.msk [vmem:[%s964_s3 + $0x1a0] sm:$0xff] %vm284_vm0, %v272_v43  ;;  %v212_v52 = vadd.f32 %v386_v2, %v141_v46  ;;  %v145_v53 = vmul.f32 %v381_v1, %v74_v40 }
  0x31   :  { %338 = vst.msk [vmem:[%s964_s3 + $0x1a8] sm:$0xff] %vm284_vm0, %v273_v44  ;;  %339 = vst.msk [vmem:[%s964_s3 + $0x1b0] sm:$0xff] %vm284_vm0, %v274_v45  ;;  %v146_v54 = vmul.f32 %v381_v1, %v75_v41  ;;  %v147_v55 = vmul.f32 %v381_v1, %v76_v42  ;;  %v213_v56 = vadd.f32 %v386_v2, %v142_v49 }
  0x32   :  { %340 = vst.msk [vmem:[%s964_s3 + $0x1b8] sm:$0xff] %vm284_vm0, %v275_v48  ;;  %v214_v57 = vadd.f32 %v386_v2, %v143_v50  ;;  %v215_v58 = vadd.f32 %v386_v2, %v144_v51  ;;  %v148_v59 = vmul.f32 %v381_v1, %v77_v47  ;;  %v276_v60 = vmax.f32 %v212_v52, 0.0 }
  0x33   :  { %v216_v61 = vadd.f32 %v386_v2, %v145_v53  ;;  %v217_v62 = vadd.f32 %v386_v2, %v146_v54  ;;  %v218_v63 = vadd.f32 %v386_v2, %v147_v55  ;;  %v277_v0 = vmax.f32 %v213_v56, 0.0 }
  0x34   :  { %v278_v3 = vmax.f32 %v214_v57, 0.0  ;;  %v279_v4 = vmax.f32 %v215_v58, 0.0  ;;  %v219_v5 = vadd.f32 %v386_v2, %v148_v59  ;;  %341 = vst.msk [vmem:[%s964_s3 + $0x1c0] sm:$0xff] %vm284_vm0, %v276_v60 }
  0x35   :  { %v280_v6 = vmax.f32 %v216_v61, 0.0  ;;  %v281_v7 = vmax.f32 %v217_v62, 0.0  ;;  %v282_v1 = vmax.f32 %v218_v63, 0.0  ;;  %342 = vst.msk [vmem:[%s964_s3 + $0x1c8] sm:$0xff] %vm284_vm0, %v277_v0 }
  0x36   :  { %343 = vst.msk [vmem:[%s964_s3 + $0x1d0] sm:$0xff] %vm284_vm0, %v278_v3  ;;  %344 = vst.msk [vmem:[%s964_s3 + $0x1d8] sm:$0xff] %vm284_vm0, %v279_v4  ;;  %v283_v2 = vmax.f32 %v219_v5, 0.0 }
  0x37   :  { %345 = vst.msk [vmem:[%s964_s3 + $0x1e0] sm:$0xff] %vm284_vm0, %v280_v6  ;;  %346 = vst.msk [vmem:[%s964_s3 + $0x1e8] sm:$0xff] %vm284_vm0, %v281_v7 }
  0x38   :  { %347 = vst.msk [vmem:[%s964_s3 + $0x1f0] sm:$0xff] %vm284_vm0, %v282_v1  ;;  %348 = vst.msk [vmem:[%s964_s3 + $0x1f8] sm:$0xff] %vm284_vm0, %v283_v2 }

// kernel: densenet_forward.59
= control target key start
LH: loop header
LB: loop body
LE: loop exit
PB: predicated region body
PF: predicated region fallthrough
CT: control target
= control target key end

     0   :  { %vm14_vm0 = vcmask 253952   ;;  %vm34_vm1 = vcmask 261120   ;;  %v140_v0 = vmov 0.0   ;;  %s258_s0 = inlined_call_operand.vmem [shape: f32[128,32], index: 0, kind: input, shape index: {}]   ;;  %s259_s1 = inlined_call_operand.vmem [shape: f32[1,32], index: 1, kind: output, shape index: {0}]   ;;  %s260_s2 = inlined_call_operand.vmem [shape: f32[1,32], index: 2, kind: output, shape index: {1}]  }
   0x1   :  { %15 = vst.msk [vmem:[%s259_s1] sm:$0x1] %vm14_vm0, %v140_v0  ;;  %v17_v1 = vld [vmem:[%s258_s0] sm:$0xff]  ;;  %v18_v2 = vld [vmem:[%s258_s0 + $0x8] sm:$0xff]  ;;  %v19_v3 = vld [vmem:[%s258_s0 + $0x10] sm:$0xff] }
   0x2   :  { %16 = vst.msk [vmem:[%s260_s2] sm:$0x1] %vm14_vm0, %v140_v0  ;;  %v35_v4 = vsel %vm34_vm1, %v17_v1, 0.0  ;;  %v36_v5 = vsel %vm34_vm1, %v18_v2, 0.0  ;;  %v38_v6 = vsel %vm34_vm1, %v19_v3, 0.0  ;;  %v20_v7 = vld [vmem:[%s258_s0 + $0x18] sm:$0xff]  ;;  %v76_v15 = vmul.f32 %v17_v1, %v17_v1 }
   0x3   :  { %v37_v8 = vadd.f32 %v36_v5, %v35_v4  ;;  %v40_v9 = vsel %vm34_vm1, %v20_v7, 0.0  ;;  %v21_v10 = vld [vmem:[%s258_s0 + $0x20] sm:$0xff]  ;;  %v22_v13 = vld [vmem:[%s258_s0 + $0x28] sm:$0xff]  ;;  %v77_v16 = vmul.f32 %v18_v2, %v18_v2  ;;  %v78_v17 = vmul.f32 %v19_v3, %v19_v3  ;;  %v23_v19 = vld [vmem:[%s258_s0 + $0x30] sm:$0xff] }
   0x4   :  { %v42_v12 = vsel %vm34_vm1, %v21_v10, 0.0  ;;  %v44_v18 = vsel %vm34_vm1, %v22_v13, 0.0  ;;  %v79_v21 = vmul.f32 %v20_v7, %v20_v7  ;;  %v46_v22 = vsel %vm34_vm1, %v23_v19, 0.0  ;;  %v24_v24 = vld [vmem:[%s258_s0 + $0x38] sm:$0xff]  ;;  %v25_v31 = vld [vmem:[%s258_s0 + $0x40] sm:$0xff]  ;;  %v26_v37 = vld [vmem:[%s258_s0 + $0x48] sm:$0xff] }
   0x5   :  { %v39_v11 = vadd.f32 %v38_v6, %v37_v8  ;;  %v80_v23 = vmul.f32 %v21_v10, %v21_v10  ;;  %v92_v26 = vsel %vm34_vm1, %v76_v15, 0.0  ;;  %v93_v27 = vsel %vm34_vm1, %v77_v16, 0.0  ;;  %v27_v43 = vld [vmem:[%s258_s0 + $0x50] sm:$0xff]  ;;  %v28_v49 = vld [vmem:[%s258_s0 + $0x58] sm:$0xff]  ;;  %v29_v55 = vld [vmem:[%s258_s0 + $0x60] sm:$0xff] }
   0x6   :  { %v95_v28 = vsel %vm34_vm1, %v78_v17, 0.0  ;;  %v48_v29 = vsel %vm34_vm1, %v24_v24, 0.0  ;;  %v94_v30 = vadd.f32 %v93_v27, %v92_v26  ;;  %v81_v33 = vmul.f32 %v22_v13, %v22_v13  ;;  %v30_v61 = vld [vmem:[%s258_s0 + $0x68] sm:$0xff]  ;;  %v31_v3 = vld [vmem:[%s258_s0 + $0x70] sm:$0xff] }
   0x7   :  { %v41_v14 = vadd.f32 %v40_v9, %v39_v11  ;;  %v97_v34 = vsel %vm34_vm1, %v79_v21, 0.0  ;;  %v50_v35 = vsel %vm34_vm1, %v25_v31, 0.0  ;;  %v82_v39 = vmul.f32 %v23_v19, %v23_v19  ;;  %v32_v9 = vld [vmem:[%s258_s0 + $0x78] sm:$0xff] }
   0x8   :  { %v96_v36 = vadd.f32 %v95_v28, %v94_v30  ;;  %v99_v40 = vsel %vm34_vm1, %v80_v23, 0.0  ;;  %v52_v41 = vsel %vm34_vm1, %v26_v37, 0.0  ;;  %v83_v45 = vmul.f32 %v24_v24, %v24_v24 }
   0x9   :  { %v43_v20 = vadd.f32 %v42_v12, %v41_v14  ;;  %v101_v46 = vsel %vm34_vm1, %v81_v33, 0.0  ;;  %v54_v47 = vsel %vm34_vm1, %v27_v43, 0.0  ;;  %v84_v51 = vmul.f32 %v25_v31, %v25_v31 }
   0xa   :  { %v98_v42 = vadd.f32 %v97_v34, %v96_v36  ;;  %v103_v52 = vsel %vm34_vm1, %v82_v39, 0.0  ;;  %v56_v53 = vsel %vm34_vm1, %v28_v49, 0.0  ;;  %v85_v57 = vmul.f32 %v26_v37, %v26_v37  ;;  %v33_v36 = vld [vmem:[%s259_s1] sm:$0x1] }
   0xb   :  { %v45_v25 = vadd.f32 %v44_v18, %v43_v20  ;;  %v105_v58 = vsel %vm34_vm1, %v83_v45, 0.0  ;;  %v58_v59 = vsel %vm34_vm1, %v29_v55, 0.0  ;;  %v86_v63 = vmul.f32 %v27_v43, %v27_v43 }
   0xc   :  { %v100_v48 = vadd.f32 %v99_v40, %v98_v42  ;;  %v107_v0 = vsel %vm34_vm1, %v84_v51, 0.0  ;;  %v60_v1 = vsel %vm34_vm1, %v30_v61, 0.0  ;;  %v87_v5 = vmul.f32 %v28_v49, %v28_v49 }
   0xd   :  { %v47_v32 = vadd.f32 %v46_v22, %v45_v25  ;;  %v109_v6 = vsel %vm34_vm1, %v85_v57, 0.0  ;;  %v62_v7 = vsel %vm34_vm1, %v31_v3, 0.0  ;;  %v88_v11 = vmul.f32 %v29_v55, %v29_v55 }
   0xe   :  { %v102_v54 = vadd.f32 %v101_v46, %v100_v48  ;;  %v111_v12 = vsel %vm34_vm1, %v86_v63, 0.0  ;;  %v64_v13 = vsel %vm34_vm1, %v32_v9, 0.0  ;;  %v89_v16 = vmul.f32 %v30_v61, %v30_v61 }
   0xf   :  { %v49_v38 = vadd.f32 %v48_v29, %v47_v32  ;;  %v113_v17 = vsel %vm34_vm1, %v87_v5, 0.0  ;;  %v90_v20 = vmul.f32 %v31_v3, %v31_v3  ;;  %v115_v21 = vsel %vm34_vm1, %v88_v11, 0.0 }
  0x10   :  { %v104_v60 = vadd.f32 %v103_v52, %v102_v54  ;;  %v91_v24 = vmul.f32 %v32_v9, %v32_v9  ;;  %v117_v25 = vsel %vm34_vm1, %v89_v16, 0.0 }
  0x11   :  { %v51_v44 = vadd.f32 %v50_v35, %v49_v38  ;;  %v119_v28 = vsel %vm34_vm1, %v90_v20, 0.0 }
  0x12   :  { %v106_v2 = vadd.f32 %v105_v58, %v104_v60  ;;  %v121_v31 = vsel %vm34_vm1, %v91_v24, 0.0 }
  0x13   :  { %v53_v50 = vadd.f32 %v52_v41, %v51_v44  ;;  %v75_v44 = vld [vmem:[%s260_s2] sm:$0x1] }
  0x14   :  { %v108_v8 = vadd.f32 %v107_v0, %v106_v2 }
  0x15   :  { %v55_v56 = vadd.f32 %v54_v47, %v53_v50 }
  0x16   :  { %v110_v14 = vadd.f32 %v109_v6, %v108_v8 }
  0x17   :  { %v57_v62 = vadd.f32 %v56_v53, %v55_v56 }
  0x18   :  { %v112_v18 = vadd.f32 %v111_v12, %v110_v14 }
  0x19   :  { %v59_v4 = vadd.f32 %v58_v59, %v57_v62 }
  0x1a   :  { %v114_v22 = vadd.f32 %v113_v17, %v112_v18 }
  0x1b   :  { %v61_v10 = vadd.f32 %v60_v1, %v59_v4 }
  0x1c   :  { %v116_v26 = vadd.f32 %v115_v21, %v114_v22 }
  0x1d   :  { %v63_v15 = vadd.f32 %v62_v7, %v61_v10 }
  0x1e   :  { %v118_v29 = vadd.f32 %v117_v25, %v116_v26 }
  0x1f   :  { %v65_v19 = vadd.f32 %v64_v13, %v63_v15 }
  0x20   :  { %v120_v32 = vadd.f32 %v119_v28, %v118_v29 }
  0x21   :  { %v66_v23 = vrot.slane %v65_v19, 4 }
  0x22   :  { %v122_v34 = vadd.f32 %v121_v31, %v120_v32 }
  0x23   :  { %v67_v27 = vadd.f32 %v66_v23, %v65_v19 }
  0x24   :  { %v123_v37 = vrot.slane %v122_v34, 4 }
  0x25   :  { %v68_v30 = vrot.slane %v67_v27, 2 }
  0x26   :  { %v124_v39 = vadd.f32 %v123_v37, %v122_v34 }
  0x27   :  { %v69_v33 = vadd.f32 %v68_v30, %v67_v27 }
  0x28   :  { %v125_v41 = vrot.slane %v124_v39, 2 }
  0x29   :  { %v70_v35 = vrot.slane %v69_v33, 1 }
  0x2a   :  { %v126_v42 = vadd.f32 %v125_v41, %v124_v39 }
  0x2b   :  { %v71_v38 = vadd.f32 %v70_v35, %v69_v33 }
  0x2c   :  { %v127_v43 = vrot.slane %v126_v42, 1 }
  0x2d   :  { %v72_v40 = vadd.f32 %v71_v38, %v33_v36 }
  0x2e   :  { %v128_v45 = vadd.f32 %v127_v43, %v126_v42 }
  0x2f   :  { %74 = vst.msk [vmem:[%s259_s1] sm:$0x1] %vm14_vm0, %v72_v40 }
  0x30   :  { %v129_v46 = vadd.f32 %v128_v45, %v75_v44 }
  0x32   :  { %130 = vst.msk [vmem:[%s260_s2] sm:$0x1] %vm14_vm0, %v129_v46 }

// kernel: densenet_forward.58
= control target key start
LH: loop header
LB: loop body
LE: loop exit
PB: predicated region body
PF: predicated region fallthrough
CT: control target
= control target key end

     0   :  { %vm152_vm0 = vcmask 261120   ;;  %s1095_s0 = inlined_call_operand.vmem [shape: f32[9,128,32], index: 0, kind: input, shape index: {}]   ;;  %s1096_s1 = inlined_call_operand.vmem [shape: f32[128,32], index: 1, kind: output, shape index: {}]  }
   0x1   :  { %v8_v0 = vld [vmem:[%s1095_s0] sm:$0xff]  ;;  %v9_v13 = vld [vmem:[%s1095_s0 + $0x8] sm:$0xff]  ;;  %v10_v32 = vld [vmem:[%s1095_s0 + $0x10] sm:$0xff] }
   0x2   :  { %v24_v1 = vld [vmem:[%s1095_s0 + $0x80] sm:$0xff]  ;;  %v153_v5 = vsel %vm152_vm0, %v8_v0, -inf  ;;  %v25_v14 = vld [vmem:[%s1095_s0 + $0x88] sm:$0xff]  ;;  %v170_v19 = vsel %vm152_vm0, %v9_v13, -inf  ;;  %v26_v33 = vld [vmem:[%s1095_s0 + $0x90] sm:$0xff]  ;;  %v187_v38 = vsel %vm152_vm0, %v10_v32, -inf }
   0x3   :  { %v40_v2 = vld [vmem:[%s1095_s0 + $0x100] sm:$0xff]  ;;  %v154_v6 = vsel %vm152_vm0, %v24_v1, -inf  ;;  %v41_v15 = vld [vmem:[%s1095_s0 + $0x108] sm:$0xff]  ;;  %v171_v20 = vsel %vm152_vm0, %v25_v14, -inf  ;;  %v42_v34 = vld [vmem:[%s1095_s0 + $0x110] sm:$0xff]  ;;  %v188_v39 = vsel %vm152_vm0, %v26_v33, -inf }
   0x4   :  { %v56_v3 = vld [vmem:[%s1095_s0 + $0x180] sm:$0xff]  ;;  %v156_v7 = vsel %vm152_vm0, %v40_v2, -inf  ;;  %v155_v11 = vmax.f32 %v153_v5, %v154_v6  ;;  %v57_v18 = vld [vmem:[%s1095_s0 + $0x188] sm:$0xff]  ;;  %v173_v21 = vsel %vm152_vm0, %v41_v15, -inf  ;;  %v172_v27 = vmax.f32 %v170_v19, %v171_v20  ;;  %v58_v37 = vld [vmem:[%s1095_s0 + $0x190] sm:$0xff] }
   0x5   :  { %v72_v4 = vld [vmem:[%s1095_s0 + $0x200] sm:$0xff]  ;;  %v158_v12 = vsel %vm152_vm0, %v56_v3, -inf  ;;  %v73_v24 = vld [vmem:[%s1095_s0 + $0x208] sm:$0xff]  ;;  %v175_v31 = vsel %vm152_vm0, %v57_v18, -inf  ;;  %v190_v40 = vsel %vm152_vm0, %v42_v34, -inf  ;;  %v74_v45 = vld [vmem:[%s1095_s0 + $0x210] sm:$0xff]  ;;  %v189_v46 = vmax.f32 %v187_v38, %v188_v39 }
   0x6   :  { %v88_v8 = vld [vmem:[%s1095_s0 + $0x280] sm:$0xff]  ;;  %v157_v17 = vmax.f32 %v155_v11, %v156_v7  ;;  %v160_v22 = vsel %vm152_vm0, %v72_v4, -inf  ;;  %v89_v25 = vld [vmem:[%s1095_s0 + $0x288] sm:$0xff]  ;;  %v174_v36 = vmax.f32 %v172_v27, %v173_v21  ;;  %v177_v44 = vsel %vm152_vm0, %v73_v24, -inf  ;;  %v11_v51 = vld [vmem:[%s1095_s0 + $0x18] sm:$0xff] }
   0x7   :  { %v104_v9 = vld [vmem:[%s1095_s0 + $0x300] sm:$0xff]  ;;  %v162_v23 = vsel %vm152_vm0, %v88_v8, -inf  ;;  %v105_v26 = vld [vmem:[%s1095_s0 + $0x308] sm:$0xff]  ;;  %v179_v48 = vsel %vm152_vm0, %v89_v25, -inf  ;;  %v192_v50 = vsel %vm152_vm0, %v58_v37, -inf  ;;  %v27_v52 = vld [vmem:[%s1095_s0 + $0x98] sm:$0xff]  ;;  %v191_v58 = vmax.f32 %v189_v46, %v190_v40 }
   0x8   :  { %v120_v10 = vld [vmem:[%s1095_s0 + $0x380] sm:$0xff]  ;;  %v159_v28 = vmax.f32 %v157_v17, %v158_v12  ;;  %v164_v29 = vsel %vm152_vm0, %v104_v9, -inf  ;;  %v121_v35 = vld [vmem:[%s1095_s0 + $0x388] sm:$0xff]  ;;  %v176_v47 = vmax.f32 %v174_v36, %v175_v31  ;;  %v181_v49 = vsel %vm152_vm0, %v105_v26, -inf  ;;  %v43_v53 = vld [vmem:[%s1095_s0 + $0x118] sm:$0xff] }
   0x9   :  { %v136_v16 = vld [vmem:[%s1095_s0 + $0x400] sm:$0xff]  ;;  %v166_v30 = vsel %vm152_vm0, %v120_v10, -inf  ;;  %v137_v43 = vld [vmem:[%s1095_s0 + $0x408] sm:$0xff]  ;;  %v183_v55 = vsel %vm152_vm0, %v121_v35, -inf  ;;  %v90_v56 = vld [vmem:[%s1095_s0 + $0x290] sm:$0xff]  ;;  %v204_v60 = vsel %vm152_vm0, %v11_v51, -inf  ;;  %v193_v4 = vmax.f32 %v191_v58, %v192_v50 }
   0xa   :  { %v161_v41 = vmax.f32 %v159_v28, %v160_v22  ;;  %v168_v42 = vsel %vm152_vm0, %v136_v16, -inf  ;;  %v106_v57 = vld [vmem:[%s1095_s0 + $0x310] sm:$0xff]  ;;  %v59_v59 = vld [vmem:[%s1095_s0 + $0x198] sm:$0xff]  ;;  %v178_v61 = vmax.f32 %v176_v47, %v177_v44  ;;  %v194_v62 = vsel %vm152_vm0, %v74_v45, -inf  ;;  %v12_v6 = vld [vmem:[%s1095_s0 + $0x20] sm:$0xff] }
   0xb   :  { %v75_v63 = vld [vmem:[%s1095_s0 + $0x218] sm:$0xff]  ;;  %v205_v0 = vsel %vm152_vm0, %v27_v52, -inf  ;;  %v207_v1 = vsel %vm152_vm0, %v43_v53, -inf  ;;  %v185_v3 = vsel %vm152_vm0, %v137_v43, -inf  ;;  %v28_v7 = vld [vmem:[%s1095_s0 + $0xa0] sm:$0xff]  ;;  %v196_v10 = vsel %vm152_vm0, %v90_v56, -inf }
   0xc   :  { %v163_v54 = vmax.f32 %v161_v41, %v162_v23  ;;  %v206_v5 = vmax.f32 %v204_v60, %v205_v0  ;;  %v44_v8 = vld [vmem:[%s1095_s0 + $0x120] sm:$0xff]  ;;  %v180_v9 = vmax.f32 %v178_v61, %v179_v48  ;;  %v198_v11 = vsel %vm152_vm0, %v106_v57, -inf  ;;  %v122_v14 = vld [vmem:[%s1095_s0 + $0x390] sm:$0xff]  ;;  %v91_v16 = vld [vmem:[%s1095_s0 + $0x298] sm:$0xff] }
   0xd   :  { %v209_v12 = vsel %vm152_vm0, %v59_v59, -inf  ;;  %v195_v15 = vmax.f32 %v193_v4, %v194_v62  ;;  %v211_v18 = vsel %vm152_vm0, %v75_v63, -inf  ;;  %v60_v19 = vld [vmem:[%s1095_s0 + $0x1a0] sm:$0xff]  ;;  %v138_v21 = vld [vmem:[%s1095_s0 + $0x410] sm:$0xff]  ;;  %v221_v22 = vsel %vm152_vm0, %v12_v6, -inf  ;;  %v107_v27 = vld [vmem:[%s1095_s0 + $0x318] sm:$0xff] }
   0xe   :  { %v165_v2 = vmax.f32 %v163_v54, %v164_v29  ;;  %v208_v17 = vmax.f32 %v206_v5, %v207_v1  ;;  %v182_v20 = vmax.f32 %v180_v9, %v181_v49  ;;  %v222_v23 = vsel %vm152_vm0, %v28_v7, -inf  ;;  %v76_v29 = vld [vmem:[%s1095_s0 + $0x220] sm:$0xff]  ;;  %v13_v31 = vld [vmem:[%s1095_s0 + $0x28] sm:$0xff]  ;;  %v123_v39 = vld [vmem:[%s1095_s0 + $0x398] sm:$0xff] }
   0xf   :  { %v224_v24 = vsel %vm152_vm0, %v44_v8, -inf  ;;  %v197_v26 = vmax.f32 %v195_v15, %v196_v10  ;;  %v200_v33 = vsel %vm152_vm0, %v122_v14, -inf  ;;  %v213_v34 = vsel %vm152_vm0, %v91_v16, -inf  ;;  %v29_v36 = vld [vmem:[%s1095_s0 + $0xa8] sm:$0xff]  ;;  %v92_v41 = vld [vmem:[%s1095_s0 + $0x2a0] sm:$0xff]  ;;  %v139_v50 = vld [vmem:[%s1095_s0 + $0x418] sm:$0xff] }
  0x10   :  { %v167_v13 = vmax.f32 %v165_v2, %v166_v30  ;;  %v210_v28 = vmax.f32 %v208_v17, %v209_v12  ;;  %v223_v30 = vmax.f32 %v221_v22, %v222_v23  ;;  %v184_v32 = vmax.f32 %v182_v20, %v183_v55  ;;  %v45_v43 = vld [vmem:[%s1095_s0 + $0x128] sm:$0xff]  ;;  %v108_v52 = vld [vmem:[%s1095_s0 + $0x320] sm:$0xff]  ;;  %v14_v60 = vld [vmem:[%s1095_s0 + $0x30] sm:$0xff] }
  0x11   :  { %v226_v35 = vsel %vm152_vm0, %v60_v19, -inf  ;;  %v199_v37 = vmax.f32 %v197_v26, %v198_v11  ;;  %v202_v38 = vsel %vm152_vm0, %v138_v21, -inf  ;;  %v215_v45 = vsel %vm152_vm0, %v107_v27, -inf  ;;  %v61_v47 = vld [vmem:[%s1095_s0 + $0x1a8] sm:$0xff]  ;;  %v30_v61 = vld [vmem:[%s1095_s0 + $0xb0] sm:$0xff]  ;;  %v124_v0 = vld [vmem:[%s1095_s0 + $0x3a0] sm:$0xff] }
  0x12   :  { %v169_v25 = vmax.f32 %v167_v13, %v168_v42  ;;  %v212_v40 = vmax.f32 %v210_v28, %v211_v18  ;;  %v225_v42 = vmax.f32 %v223_v30, %v224_v24  ;;  %v186_v44 = vmax.f32 %v184_v32, %v185_v3  ;;  %v77_v54 = vld [vmem:[%s1095_s0 + $0x228] sm:$0xff]  ;;  %v46_v3 = vld [vmem:[%s1095_s0 + $0x130] sm:$0xff]  ;;  %v140_v11 = vld [vmem:[%s1095_s0 + $0x420] sm:$0xff] }
  0x13   :  { %v228_v46 = vsel %vm152_vm0, %v76_v29, -inf  ;;  %v238_v48 = vsel %vm152_vm0, %v13_v31, -inf  ;;  %v201_v49 = vmax.f32 %v199_v37, %v200_v33  ;;  %v239_v55 = vsel %vm152_vm0, %v29_v36, -inf  ;;  %v93_v6 = vld [vmem:[%s1095_s0 + $0x2a8] sm:$0xff]  ;;  %v62_v9 = vld [vmem:[%s1095_s0 + $0x1b0] sm:$0xff]  ;;  %v15_v21 = vld [vmem:[%s1095_s0 + $0x38] sm:$0xff] }
  0x14   :  { %425 = vst.msk [vmem:[%s1096_s1] sm:$0xff] %vm152_vm0, %v169_v25  ;;  %v214_v51 = vmax.f32 %v212_v40, %v213_v34  ;;  %v227_v53 = vmax.f32 %v225_v42, %v226_v35  ;;  %426 = vst.msk [vmem:[%s1096_s1 + $0x8] sm:$0xff] %vm152_vm0, %v186_v44  ;;  %v217_v56 = vsel %vm152_vm0, %v123_v39, -inf  ;;  %v230_v57 = vsel %vm152_vm0, %v92_v41, -inf  ;;  %v109_v13 = vld [vmem:[%s1095_s0 + $0x328] sm:$0xff]  ;;  %v78_v18 = vld [vmem:[%s1095_s0 + $0x230] sm:$0xff] }
  0x15   :  { %v240_v58 = vmax.f32 %v238_v48, %v239_v55  ;;  %v241_v59 = vsel %vm152_vm0, %v45_v43, -inf  ;;  %v203_v62 = vmax.f32 %v201_v49, %v202_v38  ;;  %v243_v2 = vsel %vm152_vm0, %v61_v47, -inf  ;;  %v31_v22 = vld [vmem:[%s1095_s0 + $0xb8] sm:$0xff]  ;;  %v125_v29 = vld [vmem:[%s1095_s0 + $0x3a8] sm:$0xff]  ;;  %v94_v32 = vld [vmem:[%s1095_s0 + $0x2b0] sm:$0xff] }
  0x16   :  { %v216_v63 = vmax.f32 %v214_v51, %v215_v45  ;;  %v229_v1 = vmax.f32 %v227_v53, %v228_v46  ;;  %v219_v4 = vsel %vm152_vm0, %v139_v50, -inf  ;;  %v232_v5 = vsel %vm152_vm0, %v108_v52, -inf  ;;  %v47_v27 = vld [vmem:[%s1095_s0 + $0x138] sm:$0xff]  ;;  %v141_v36 = vld [vmem:[%s1095_s0 + $0x428] sm:$0xff]  ;;  %v110_v37 = vld [vmem:[%s1095_s0 + $0x330] sm:$0xff] }
  0x17   :  { %v242_v7 = vmax.f32 %v240_v58, %v241_v59  ;;  %v245_v8 = vsel %vm152_vm0, %v77_v54, -inf  ;;  %427 = vst.msk [vmem:[%s1096_s1 + $0x10] sm:$0xff] %vm152_vm0, %v203_v62  ;;  %v255_v14 = vsel %vm152_vm0, %v14_v60, -inf  ;;  %v256_v15 = vsel %vm152_vm0, %v30_v61, -inf  ;;  %v63_v34 = vld [vmem:[%s1095_s0 + $0x1b8] sm:$0xff]  ;;  %v16_v46 = vld [vmem:[%s1095_s0 + $0x40] sm:$0xff] }
  0x18   :  { %v218_v10 = vmax.f32 %v216_v63, %v217_v56  ;;  %v231_v12 = vmax.f32 %v229_v1, %v230_v57  ;;  %v234_v16 = vsel %vm152_vm0, %v124_v0, -inf  ;;  %v257_v19 = vmax.f32 %v255_v14, %v256_v15  ;;  %v79_v43 = vld [vmem:[%s1095_s0 + $0x238] sm:$0xff]  ;;  %v32_v47 = vld [vmem:[%s1095_s0 + $0xc0] sm:$0xff]  ;;  %v126_v50 = vld [vmem:[%s1095_s0 + $0x3b0] sm:$0xff] }
  0x19   :  { %v244_v17 = vmax.f32 %v242_v7, %v243_v2  ;;  %v258_v20 = vsel %vm152_vm0, %v46_v3, -inf  ;;  %v247_v25 = vsel %vm152_vm0, %v93_v6, -inf  ;;  %v260_v26 = vsel %vm152_vm0, %v62_v9, -inf  ;;  %v95_v56 = vld [vmem:[%s1095_s0 + $0x2b8] sm:$0xff]  ;;  %v48_v58 = vld [vmem:[%s1095_s0 + $0x140] sm:$0xff]  ;;  %v142_v60 = vld [vmem:[%s1095_s0 + $0x430] sm:$0xff] }
  0x1a   :  { %v220_v23 = vmax.f32 %v218_v10, %v219_v4  ;;  %v233_v24 = vmax.f32 %v231_v12, %v232_v5  ;;  %v236_v28 = vsel %vm152_vm0, %v140_v11, -inf  ;;  %v249_v31 = vsel %vm152_vm0, %v109_v13, -inf  ;;  %v64_v59 = vld [vmem:[%s1095_s0 + $0x1c0] sm:$0xff]  ;;  %v111_v3 = vld [vmem:[%s1095_s0 + $0x338] sm:$0xff]  ;;  %v17_v7 = vld [vmem:[%s1095_s0 + $0x48] sm:$0xff] }
  0x1b   :  { %v246_v30 = vmax.f32 %v244_v17, %v245_v8  ;;  %v259_v33 = vmax.f32 %v257_v19, %v258_v20  ;;  %v262_v38 = vsel %vm152_vm0, %v78_v18, -inf  ;;  %v272_v39 = vsel %vm152_vm0, %v15_v21, -inf  ;;  %v80_v5 = vld [vmem:[%s1095_s0 + $0x240] sm:$0xff]  ;;  %v33_v12 = vld [vmem:[%s1095_s0 + $0xc8] sm:$0xff]  ;;  %v127_v15 = vld [vmem:[%s1095_s0 + $0x3b8] sm:$0xff] }
  0x1c   :  { %428 = vst.msk [vmem:[%s1096_s1 + $0x18] sm:$0xff] %vm152_vm0, %v220_v23  ;;  %v235_v35 = vmax.f32 %v233_v24, %v234_v16  ;;  %v273_v40 = vsel %vm152_vm0, %v31_v22, -inf  ;;  %v275_v45 = vsel %vm152_vm0, %v47_v27, -inf  ;;  %v251_v49 = vsel %vm152_vm0, %v125_v29, -inf  ;;  %v96_v17 = vld [vmem:[%s1095_s0 + $0x2c0] sm:$0xff]  ;;  %v49_v19 = vld [vmem:[%s1095_s0 + $0x148] sm:$0xff] }
  0x1d   :  { %v248_v41 = vmax.f32 %v246_v30, %v247_v25  ;;  %v261_v42 = vmax.f32 %v259_v33, %v260_v26  ;;  %v274_v44 = vmax.f32 %v272_v39, %v273_v40  ;;  %v264_v51 = vsel %vm152_vm0, %v94_v32, -inf  ;;  %v65_v23 = vld [vmem:[%s1095_s0 + $0x1c8] sm:$0xff]  ;;  %v143_v26 = vld [vmem:[%s1095_s0 + $0x438] sm:$0xff]  ;;  %v128_v40 = vld [vmem:[%s1095_s0 + $0x3c0] sm:$0xff] }
  0x1e   :  { %v237_v48 = vmax.f32 %v235_v35, %v236_v28  ;;  %v277_v52 = vsel %vm152_vm0, %v63_v34, -inf  ;;  %v253_v54 = vsel %vm152_vm0, %v141_v36, -inf  ;;  %v266_v61 = vsel %vm152_vm0, %v110_v37, -inf  ;;  %v112_v28 = vld [vmem:[%s1095_s0 + $0x340] sm:$0xff]  ;;  %v81_v30 = vld [vmem:[%s1095_s0 + $0x248] sm:$0xff]  ;;  %v18_v36 = vld [vmem:[%s1095_s0 + $0x50] sm:$0xff] }
  0x1f   :  { %v250_v53 = vmax.f32 %v248_v41, %v249_v31  ;;  %v263_v55 = vmax.f32 %v261_v42, %v262_v38  ;;  %v276_v57 = vmax.f32 %v274_v44, %v275_v45  ;;  %v279_v62 = vsel %vm152_vm0, %v79_v43, -inf  ;;  %v34_v37 = vld [vmem:[%s1095_s0 + $0xd0] sm:$0xff] }
  0x20   :  { %429 = vst.msk [vmem:[%s1096_s1 + $0x20] sm:$0xff] %vm152_vm0, %v237_v48  ;;  %v289_v63 = vsel %vm152_vm0, %v16_v46, -inf  ;;  %v290_v0 = vsel %vm152_vm0, %v32_v47, -inf  ;;  %v268_v8 = vsel %vm152_vm0, %v126_v50, -inf  ;;  %v281_v9 = vsel %vm152_vm0, %v95_v56, -inf  ;;  %v50_v43 = vld [vmem:[%s1095_s0 + $0x150] sm:$0xff] }
  0x21   :  { %v252_v1 = vmax.f32 %v250_v53, %v251_v49  ;;  %v265_v2 = vmax.f32 %v263_v55, %v264_v51  ;;  %v278_v4 = vmax.f32 %v276_v57, %v277_v52  ;;  %v291_v6 = vmax.f32 %v289_v63, %v290_v0  ;;  %v97_v46 = vld [vmem:[%s1095_s0 + $0x2c8] sm:$0xff]  ;;  %v66_v49 = vld [vmem:[%s1095_s0 + $0x1d0] sm:$0xff]  ;;  %v144_v51 = vld [vmem:[%s1095_s0 + $0x440] sm:$0xff] }
  0x22   :  { %v292_v10 = vsel %vm152_vm0, %v48_v58, -inf  ;;  %v294_v11 = vsel %vm152_vm0, %v64_v59, -inf  ;;  %v270_v20 = vsel %vm152_vm0, %v142_v60, -inf  ;;  %v283_v21 = vsel %vm152_vm0, %v111_v3, -inf  ;;  %v113_v53 = vld [vmem:[%s1095_s0 + $0x348] sm:$0xff]  ;;  %v82_v58 = vld [vmem:[%s1095_s0 + $0x250] sm:$0xff] }
  0x23   :  { %v254_v13 = vmax.f32 %v252_v1, %v253_v54  ;;  %v267_v14 = vmax.f32 %v265_v2, %v266_v61  ;;  %v280_v16 = vmax.f32 %v278_v4, %v279_v62  ;;  %v293_v18 = vmax.f32 %v291_v6, %v292_v10  ;;  %v19_v61 = vld [vmem:[%s1095_s0 + $0x58] sm:$0xff] }
  0x24   :  { %v296_v22 = vsel %vm152_vm0, %v80_v5, -inf  ;;  %v306_v24 = vsel %vm152_vm0, %v17_v7, -inf  ;;  %v307_v31 = vsel %vm152_vm0, %v33_v12, -inf  ;;  %v285_v32 = vsel %vm152_vm0, %v127_v15, -inf  ;;  %v35_v62 = vld [vmem:[%s1095_s0 + $0xd8] sm:$0xff]  ;;  %v129_v5 = vld [vmem:[%s1095_s0 + $0x3c8] sm:$0xff] }
  0x25   :  { %430 = vst.msk [vmem:[%s1096_s1 + $0x28] sm:$0xff] %vm152_vm0, %v254_v13  ;;  %v269_v25 = vmax.f32 %v267_v14, %v268_v8  ;;  %v282_v27 = vmax.f32 %v280_v16, %v281_v9  ;;  %v295_v29 = vmax.f32 %v293_v18, %v294_v11  ;;  %v298_v33 = vsel %vm152_vm0, %v96_v17, -inf  ;;  %v51_v3 = vld [vmem:[%s1095_s0 + $0x158] sm:$0xff]  ;;  %v98_v8 = vld [vmem:[%s1095_s0 + $0x2d0] sm:$0xff]  ;;  %v145_v12 = vld [vmem:[%s1095_s0 + $0x448] sm:$0xff] }
  0x26   :  { %v308_v34 = vmax.f32 %v306_v24, %v307_v31  ;;  %v309_v35 = vsel %vm152_vm0, %v49_v19, -inf  ;;  %v311_v42 = vsel %vm152_vm0, %v65_v23, -inf  ;;  %v287_v44 = vsel %vm152_vm0, %v143_v26, -inf  ;;  %v67_v10 = vld [vmem:[%s1095_s0 + $0x1d8] sm:$0xff]  ;;  %v114_v13 = vld [vmem:[%s1095_s0 + $0x350] sm:$0xff]  ;;  %v36_v23 = vld [vmem:[%s1095_s0 + $0xe0] sm:$0xff] }
  0x27   :  { %v271_v38 = vmax.f32 %v269_v25, %v270_v20  ;;  %v284_v39 = vmax.f32 %v282_v27, %v283_v21  ;;  %v297_v41 = vmax.f32 %v295_v29, %v296_v22  ;;  %v300_v45 = vsel %vm152_vm0, %v112_v28, -inf  ;;  %v83_v19 = vld [vmem:[%s1095_s0 + $0x258] sm:$0xff]  ;;  %v20_v22 = vld [vmem:[%s1095_s0 + $0x60] sm:$0xff]  ;;  %v130_v26 = vld [vmem:[%s1095_s0 + $0x3d0] sm:$0xff] }
  0x28   :  { %v310_v47 = vmax.f32 %v308_v34, %v309_v35  ;;  %v313_v48 = vsel %vm152_vm0, %v81_v30, -inf  ;;  %v323_v54 = vsel %vm152_vm0, %v18_v36, -inf  ;;  %v324_v55 = vsel %vm152_vm0, %v34_v37, -inf  ;;  %v52_v34 = vld [vmem:[%s1095_s0 + $0x160] sm:$0xff]  ;;  %v146_v36 = vld [vmem:[%s1095_s0 + $0x450] sm:$0xff] }
  0x29   :  { %431 = vst.msk [vmem:[%s1096_s1 + $0x30] sm:$0xff] %vm152_vm0, %v271_v38  ;;  %v286_v50 = vmax.f32 %v284_v39, %v285_v32  ;;  %v299_v52 = vmax.f32 %v297_v41, %v298_v33  ;;  %v302_v56 = vsel %vm152_vm0, %v128_v40, -inf  ;;  %v325_v59 = vmax.f32 %v323_v54, %v324_v55  ;;  %v99_v32 = vld [vmem:[%s1095_s0 + $0x2d8] sm:$0xff]  ;;  %v68_v35 = vld [vmem:[%s1095_s0 + $0x1e0] sm:$0xff] }
  0x2a   :  { %v312_v57 = vmax.f32 %v310_v47, %v311_v42  ;;  %v326_v60 = vsel %vm152_vm0, %v50_v43, -inf  ;;  %v315_v1 = vsel %vm152_vm0, %v97_v46, -inf  ;;  %v328_v2 = vsel %vm152_vm0, %v66_v49, -inf  ;;  %v115_v43 = vld [vmem:[%s1095_s0 + $0x358] sm:$0xff]  ;;  %v21_v47 = vld [vmem:[%s1095_s0 + $0x68] sm:$0xff] }
  0x2b   :  { %v288_v63 = vmax.f32 %v286_v50, %v287_v44  ;;  %v301_v0 = vmax.f32 %v299_v52, %v300_v45  ;;  %v304_v4 = vsel %vm152_vm0, %v144_v51, -inf  ;;  %v317_v7 = vsel %vm152_vm0, %v113_v53, -inf  ;;  %v84_v45 = vld [vmem:[%s1095_s0 + $0x260] sm:$0xff]  ;;  %v37_v52 = vld [vmem:[%s1095_s0 + $0xe8] sm:$0xff]  ;;  %v131_v55 = vld [vmem:[%s1095_s0 + $0x3d8] sm:$0xff] }
  0x2c   :  { %v314_v6 = vmax.f32 %v312_v57, %v313_v48  ;;  %v327_v9 = vmax.f32 %v325_v59, %v326_v60  ;;  %v330_v14 = vsel %vm152_vm0, %v82_v58, -inf  ;;  %v340_v15 = vsel %vm152_vm0, %v19_v61, -inf  ;;  %v100_v57 = vld [vmem:[%s1095_s0 + $0x2e0] sm:$0xff]  ;;  %v53_v59 = vld [vmem:[%s1095_s0 + $0x168] sm:$0xff] }
  0x2d   :  { %432 = vst.msk [vmem:[%s1096_s1 + $0x38] sm:$0xff] %vm152_vm0, %v288_v63  ;;  %v303_v11 = vmax.f32 %v301_v0, %v302_v56  ;;  %v341_v16 = vsel %vm152_vm0, %v35_v62, -inf  ;;  %v343_v21 = vsel %vm152_vm0, %v51_v3, -inf  ;;  %v319_v25 = vsel %vm152_vm0, %v129_v5, -inf  ;;  %v69_v63 = vld [vmem:[%s1095_s0 + $0x1e8] sm:$0xff] }
  0x2e   :  { %v316_v17 = vmax.f32 %v314_v6, %v315_v1  ;;  %v329_v18 = vmax.f32 %v327_v9, %v328_v2  ;;  %v342_v20 = vmax.f32 %v340_v15, %v341_v16  ;;  %v332_v27 = vsel %vm152_vm0, %v98_v8, -inf  ;;  %v147_v2 = vld [vmem:[%s1095_s0 + $0x458] sm:$0xff]  ;;  %v85_v6 = vld [vmem:[%s1095_s0 + $0x268] sm:$0xff]  ;;  %v132_v16 = vld [vmem:[%s1095_s0 + $0x3e0] sm:$0xff] }
  0x2f   :  { %v305_v24 = vmax.f32 %v303_v11, %v304_v4  ;;  %v345_v28 = vsel %vm152_vm0, %v67_v10, -inf  ;;  %v321_v30 = vsel %vm152_vm0, %v145_v12, -inf  ;;  %v334_v37 = vsel %vm152_vm0, %v114_v13, -inf  ;;  %v116_v4 = vld [vmem:[%s1095_s0 + $0x360] sm:$0xff]  ;;  %v22_v12 = vld [vmem:[%s1095_s0 + $0x70] sm:$0xff] }
  0x30   :  { %v318_v29 = vmax.f32 %v316_v17, %v317_v7  ;;  %v331_v31 = vmax.f32 %v329_v18, %v330_v14  ;;  %v344_v33 = vmax.f32 %v342_v20, %v343_v21  ;;  %v347_v38 = vsel %vm152_vm0, %v83_v19, -inf  ;;  %v38_v13 = vld [vmem:[%s1095_s0 + $0xf0] sm:$0xff] }
  0x31   :  { %433 = vst.msk [vmem:[%s1096_s1 + $0x40] sm:$0xff] %vm152_vm0, %v305_v24  ;;  %v357_v39 = vsel %vm152_vm0, %v20_v22, -inf  ;;  %v358_v40 = vsel %vm152_vm0, %v36_v23, -inf  ;;  %v336_v48 = vsel %vm152_vm0, %v130_v26, -inf  ;;  %v349_v49 = vsel %vm152_vm0, %v99_v32, -inf  ;;  %v54_v19 = vld [vmem:[%s1095_s0 + $0x170] sm:$0xff] }
  0x32   :  { %v320_v41 = vmax.f32 %v318_v29, %v319_v25  ;;  %v333_v42 = vmax.f32 %v331_v31, %v332_v27  ;;  %v346_v44 = vmax.f32 %v344_v33, %v345_v28  ;;  %v359_v46 = vmax.f32 %v357_v39, %v358_v40  ;;  %v101_v22 = vld [vmem:[%s1095_s0 + $0x2e8] sm:$0xff]  ;;  %v70_v25 = vld [vmem:[%s1095_s0 + $0x1f0] sm:$0xff]  ;;  %v148_v27 = vld [vmem:[%s1095_s0 + $0x460] sm:$0xff] }
  0x33   :  { %v360_v50 = vsel %vm152_vm0, %v52_v34, -inf  ;;  %v362_v51 = vsel %vm152_vm0, %v68_v35, -inf  ;;  %v338_v60 = vsel %vm152_vm0, %v146_v36, -inf  ;;  %v351_v61 = vsel %vm152_vm0, %v115_v43, -inf  ;;  %v117_v29 = vld [vmem:[%s1095_s0 + $0x368] sm:$0xff]  ;;  %v86_v34 = vld [vmem:[%s1095_s0 + $0x270] sm:$0xff] }
  0x34   :  { %v322_v53 = vmax.f32 %v320_v41, %v321_v30  ;;  %v335_v54 = vmax.f32 %v333_v42, %v334_v37  ;;  %v348_v56 = vmax.f32 %v346_v44, %v347_v38  ;;  %v361_v58 = vmax.f32 %v359_v46, %v360_v50  ;;  %v23_v37 = vld [vmem:[%s1095_s0 + $0x78] sm:$0xff] }
  0x35   :  { %v364_v62 = vsel %vm152_vm0, %v84_v45, -inf  ;;  %v374_v0 = vsel %vm152_vm0, %v21_v47, -inf  ;;  %v375_v7 = vsel %vm152_vm0, %v37_v52, -inf  ;;  %v353_v8 = vsel %vm152_vm0, %v131_v55, -inf  ;;  %v39_v38 = vld [vmem:[%s1095_s0 + $0xf8] sm:$0xff]  ;;  %v133_v45 = vld [vmem:[%s1095_s0 + $0x3e8] sm:$0xff] }
  0x36   :  { %434 = vst.msk [vmem:[%s1096_s1 + $0x48] sm:$0xff] %vm152_vm0, %v322_v53  ;;  %v337_v1 = vmax.f32 %v335_v54, %v336_v48  ;;  %v350_v3 = vmax.f32 %v348_v56, %v349_v49  ;;  %v363_v5 = vmax.f32 %v361_v58, %v362_v51  ;;  %v366_v9 = vsel %vm152_vm0, %v100_v57, -inf  ;;  %v55_v43 = vld [vmem:[%s1095_s0 + $0x178] sm:$0xff]  ;;  %v102_v48 = vld [vmem:[%s1095_s0 + $0x2f0] sm:$0xff]  ;;  %v149_v55 = vld [vmem:[%s1095_s0 + $0x468] sm:$0xff] }
  0x37   :  { %v376_v10 = vmax.f32 %v374_v0, %v375_v7  ;;  %v377_v11 = vsel %vm152_vm0, %v53_v59, -inf  ;;  %v379_v18 = vsel %vm152_vm0, %v69_v63, -inf  ;;  %v355_v20 = vsel %vm152_vm0, %v147_v2, -inf  ;;  %v71_v50 = vld [vmem:[%s1095_s0 + $0x1f8] sm:$0xff]  ;;  %v118_v57 = vld [vmem:[%s1095_s0 + $0x370] sm:$0xff] }
  0x38   :  { %v339_v14 = vmax.f32 %v337_v1, %v338_v60  ;;  %v352_v15 = vmax.f32 %v350_v3, %v351_v61  ;;  %v365_v17 = vmax.f32 %v363_v5, %v364_v62  ;;  %v368_v21 = vsel %vm152_vm0, %v116_v4, -inf  ;;  %v87_v59 = vld [vmem:[%s1095_s0 + $0x278] sm:$0xff]  ;;  %v134_v3 = vld [vmem:[%s1095_s0 + $0x3f0] sm:$0xff] }
  0x39   :  { %v378_v23 = vmax.f32 %v376_v10, %v377_v11  ;;  %v381_v24 = vsel %vm152_vm0, %v85_v6, -inf  ;;  %v391_v30 = vsel %vm152_vm0, %v22_v12, -inf  ;;  %v392_v31 = vsel %vm152_vm0, %v38_v13, -inf  ;;  %v103_v5 = vld [vmem:[%s1095_s0 + $0x2f8] sm:$0xff]  ;;  %v150_v11 = vld [vmem:[%s1095_s0 + $0x470] sm:$0xff] }
  0x3a   :  { %435 = vst.msk [vmem:[%s1096_s1 + $0x50] sm:$0xff] %vm152_vm0, %v339_v14  ;;  %v354_v26 = vmax.f32 %v352_v15, %v353_v8  ;;  %v367_v28 = vmax.f32 %v365_v17, %v366_v9  ;;  %v370_v32 = vsel %vm152_vm0, %v132_v16, -inf  ;;  %v393_v35 = vmax.f32 %v391_v30, %v392_v31  ;;  %v119_v13 = vld [vmem:[%s1095_s0 + $0x378] sm:$0xff] }
  0x3b   :  { %v380_v33 = vmax.f32 %v378_v23, %v379_v18  ;;  %v394_v36 = vsel %vm152_vm0, %v54_v19, -inf  ;;  %v383_v41 = vsel %vm152_vm0, %v101_v22, -inf  ;;  %v396_v42 = vsel %vm152_vm0, %v70_v25, -inf  ;;  %v135_v19 = vld [vmem:[%s1095_s0 + $0x3f8] sm:$0xff] }
  0x3c   :  { %v356_v39 = vmax.f32 %v354_v26, %v355_v20  ;;  %v369_v40 = vmax.f32 %v367_v28, %v368_v21  ;;  %v372_v44 = vsel %vm152_vm0, %v148_v27, -inf  ;;  %v385_v47 = vsel %vm152_vm0, %v117_v29, -inf }
  0x3d   :  { %v382_v46 = vmax.f32 %v380_v33, %v381_v24  ;;  %v395_v49 = vmax.f32 %v393_v35, %v394_v36  ;;  %v398_v52 = vsel %vm152_vm0, %v86_v34, -inf  ;;  %v408_v53 = vsel %vm152_vm0, %v23_v37, -inf  ;;  %v151_v24 = vld [vmem:[%s1095_s0 + $0x478] sm:$0xff] }
  0x3e   :  { %436 = vst.msk [vmem:[%s1096_s1 + $0x58] sm:$0xff] %vm152_vm0, %v356_v39  ;;  %v371_v51 = vmax.f32 %v369_v40, %v370_v32  ;;  %v409_v54 = vsel %vm152_vm0, %v39_v38, -inf  ;;  %v411_v61 = vsel %vm152_vm0, %v55_v43, -inf  ;;  %v387_v63 = vsel %vm152_vm0, %v133_v45, -inf }
  0x3f   :  { %v384_v56 = vmax.f32 %v382_v46, %v383_v41  ;;  %v397_v58 = vmax.f32 %v395_v49, %v396_v42  ;;  %v410_v60 = vmax.f32 %v408_v53, %v409_v54  ;;  %v400_v0 = vsel %vm152_vm0, %v102_v48, -inf }
  0x40   :  { %v373_v62 = vmax.f32 %v371_v51, %v372_v44  ;;  %v413_v1 = vsel %vm152_vm0, %v71_v50, -inf  ;;  %v389_v7 = vsel %vm152_vm0, %v149_v55, -inf  ;;  %v402_v8 = vsel %vm152_vm0, %v118_v57, -inf }
  0x41   :  { %v386_v2 = vmax.f32 %v384_v56, %v385_v47  ;;  %v399_v4 = vmax.f32 %v397_v58, %v398_v52  ;;  %v412_v6 = vmax.f32 %v410_v60, %v411_v61  ;;  %v415_v9 = vsel %vm152_vm0, %v87_v59, -inf }
  0x42   :  { %437 = vst.msk [vmem:[%s1096_s1 + $0x60] sm:$0xff] %vm152_vm0, %v373_v62  ;;  %v404_v15 = vsel %vm152_vm0, %v134_v3, -inf  ;;  %v417_v16 = vsel %vm152_vm0, %v103_v5, -inf  ;;  %v406_v21 = vsel %vm152_vm0, %v150_v11, -inf  ;;  %v419_v22 = vsel %vm152_vm0, %v119_v13, -inf }
  0x43   :  { %v388_v10 = vmax.f32 %v386_v2, %v387_v63  ;;  %v401_v12 = vmax.f32 %v399_v4, %v400_v0  ;;  %v414_v14 = vmax.f32 %v412_v6, %v413_v1  ;;  %v421_v26 = vsel %vm152_vm0, %v135_v19, -inf }
  0x44   :  { %v423_v29 = vsel %vm152_vm0, %v151_v24, -inf }
  0x45   :  { %v390_v17 = vmax.f32 %v388_v10, %v389_v7  ;;  %v403_v18 = vmax.f32 %v401_v12, %v402_v8  ;;  %v416_v20 = vmax.f32 %v414_v14, %v415_v9 }
  0x47   :  { %438 = vst.msk [vmem:[%s1096_s1 + $0x68] sm:$0xff] %vm152_vm0, %v390_v17  ;;  %v405_v23 = vmax.f32 %v403_v18, %v404_v15  ;;  %v418_v25 = vmax.f32 %v416_v20, %v417_v16 }
  0x49   :  { %v407_v27 = vmax.f32 %v405_v23, %v406_v21  ;;  %v420_v28 = vmax.f32 %v418_v25, %v419_v22 }
  0x4b   :  { %439 = vst.msk [vmem:[%s1096_s1 + $0x70] sm:$0xff] %vm152_vm0, %v407_v27  ;;  %v422_v30 = vmax.f32 %v420_v28, %v421_v26 }
  0x4d   :  { %v424_v31 = vmax.f32 %v422_v30, %v423_v29 }
  0x4f   :  { %440 = vst.msk [vmem:[%s1096_s1 + $0x78] sm:$0xff] %vm152_vm0, %v424_v31 }

// kernel: densenet_forward.60
= control target key start
LH: loop header
LB: loop body
LE: loop exit
PB: predicated region body
PF: predicated region fallthrough
CT: control target
= control target key end

     0   :  { %vm120_vm0 = vcmask 261120   ;;  %s487_s3 = inlined_call_operand.vmem [shape: bf16[32,128], index: 3, kind: input, shape index: {}]   ;;  %s488_s0 = inlined_call_operand.vmem [shape: f32[128,32], index: 0, kind: input, shape index: {}]   ;;  %s489_s1 = inlined_call_operand.vmem [shape: f32[1,32], index: 1, kind: input, shape index: {}]   ;;  %s490_s2 = inlined_call_operand.vmem [shape: f32[1,32], index: 2, kind: input, shape index: {}]   ;;  %s491_s4 = inlined_call_operand.vmem [shape: f32[128,128], index: 4, kind: output, shape index: {}]  }
   0x1   :  { %v308_v0 = vld [vmem:[%s487_s3 + $0x8] sm:$0xff]   ;;  %v309_v1 = vld [vmem:[%s487_s3] sm:$0xff]   ;;  %v20_v12 = vld [vmem:[%s488_s0 + $0x10] sm:$0xff] }
   0x2   :  { %284 = vmatprep.subr.bf16.mxu0 %v308_v0  ;;  %304 = vmatprep.subr.bf16.mxu1 %v308_v0  ;;  %v18_v2 = vld [vmem:[%s488_s0] sm:$0xff]  ;;  %v19_v3 = vld [vmem:[%s488_s0 + $0x8] sm:$0xff]  ;;  %v21_v13 = vld [vmem:[%s488_s0 + $0x18] sm:$0xff] }
   0x3   :  { %v350_v4 = vld [vmem:[%s489_s1] ss:$0 sm:$0xff]  ;;  %285 = vmatpush3.bf16.msra.mxu0 %v308_v0  ;;  %306 = vmatpush3.bf16.msra.mxu1 %v308_v0  ;;  %v27_v9 = vld [vmem:[%s488_s0 + $0x48] sm:$0xff]  ;;  %v28_v14 = vld [vmem:[%s488_s0 + $0x50] sm:$0xff] }
   0x4   :  { %v41_v5 = vmul.f32 %v350_v4, %v18_v2  ;;  %v42_v6 = vmul.f32 %v350_v4, %v19_v3  ;;  %v357_v7 = vld [vmem:[%s490_s2] ss:$0 sm:$0xff]  ;;  %286 = vmatprep.subr.bf16.mxu0 %v309_v1  ;;  %305 = vmatprep.subr.bf16.mxu1 %v309_v1  ;;  %v50_v11 = vmul.f32 %v350_v4, %v27_v9  ;;  %v29_v19 = vld [vmem:[%s488_s0 + $0x58] sm:$0xff]  ;;  %v23_v29 = vld [vmem:[%s488_s0 + $0x28] sm:$0xff] }
   0x5   :  { %v26_v8 = vld [vmem:[%s488_s0 + $0x40] sm:$0xff]  ;;  %v43_v17 = vmul.f32 %v350_v4, %v20_v12  ;;  %v44_v18 = vmul.f32 %v350_v4, %v21_v13  ;;  %v51_v22 = vmul.f32 %v350_v4, %v28_v14  ;;  %v52_v23 = vmul.f32 %v350_v4, %v29_v19  ;;  %v31_v35 = vld [vmem:[%s488_s0 + $0x68] sm:$0xff]  ;;  %v24_v40 = vld [vmem:[%s488_s0 + $0x30] sm:$0xff] }
   0x6   :  { %v49_v10 = vmul.f32 %v350_v4, %v26_v8  ;;  %v64_v15 = vadd.f32 %v357_v7, %v41_v5  ;;  %v65_v16 = vadd.f32 %v357_v7, %v42_v6  ;;  %v73_v21 = vadd.f32 %v357_v7, %v50_v11  ;;  %v22_v24 = vld [vmem:[%s488_s0 + $0x20] sm:$0xff]  ;;  %v25_v41 = vld [vmem:[%s488_s0 + $0x38] sm:$0xff]  ;;  %v32_v46 = vld [vmem:[%s488_s0 + $0x70] sm:$0xff] }
   0x7   :  { %287 = vmatpush3.bf16.msra.mxu0 %v309_v1  ;;  %307 = vmatpush3.bf16.msra.mxu1 %v309_v1  ;;  %v66_v27 = vadd.f32 %v357_v7, %v43_v17  ;;  %v67_v28 = vadd.f32 %v357_v7, %v44_v18  ;;  %v74_v32 = vadd.f32 %v357_v7, %v51_v22  ;;  %v30_v34 = vld [vmem:[%s488_s0 + $0x60] sm:$0xff]  ;;  %v33_v51 = vld [vmem:[%s488_s0 + $0x78] sm:$0xff] }
   0x8   :  { %v72_v20 = vadd.f32 %v357_v7, %v49_v10  ;;  %v80_v25 = vmax.f32 %v64_v15, 0.0  ;;  %v81_v26 = vmax.f32 %v65_v16, 0.0  ;;  %v89_v31 = vmax.f32 %v73_v21, 0.0 }
   0x9   :  { %v75_v33 = vadd.f32 %v357_v7, %v52_v23  ;;  %v82_v37 = vmax.f32 %v66_v27, 0.0  ;;  %v83_v38 = vmax.f32 %v67_v28, 0.0  ;;  %v45_v39 = vmul.f32 %v350_v4, %v22_v24 }
   0xa   :  { %v88_v30 = vmax.f32 %v72_v20, 0.0  ;;  %v96_v36 = vpack.c.bf16 %v81_v26, %v80_v25  ;;  %v90_v43 = vmax.f32 %v74_v32, 0.0  ;;  %v46_v45 = vmul.f32 %v350_v4, %v23_v29 }
   0xb   :  { %v91_v44 = vmax.f32 %v75_v33, 0.0  ;;  %v97_v47 = vpack.c.bf16 %v83_v38, %v82_v37  ;;  %v68_v48 = vadd.f32 %v357_v7, %v45_v39  ;;  %v53_v49 = vmul.f32 %v350_v4, %v30_v34 }
   0xc   :  { %v100_v42 = vpack.c.bf16 %v89_v31, %v88_v30  ;;  %288 = vmatprep.mubr.msk.bf16.mxu0 %vm120_vm0, %v96_v36  ;;  %v54_v50 = vmul.f32 %v350_v4, %v31_v35  ;;  %v69_v53 = vadd.f32 %v357_v7, %v46_v45  ;;  %v47_v54 = vmul.f32 %v350_v4, %v24_v40 }
   0xd   :  { %v101_v52 = vpack.c.bf16 %v91_v44, %v90_v43  ;;  %v48_v55 = vmul.f32 %v350_v4, %v25_v41  ;;  %289 = vmatmul.mubr.msk.bf16.vlgmr.msra.gmra.mxu0 %vm120_vm0, %v97_v47  ;;  %v84_v56 = vmax.f32 %v68_v48, 0.0  ;;  %v76_v57 = vadd.f32 %v357_v7, %v53_v49 }
   0xe   :  { %296 = vmatprep.mubr.msk.bf16.mxu1 %vm120_vm0, %v100_v42  ;;  %v77_v58 = vadd.f32 %v357_v7, %v54_v50  ;;  %v55_v59 = vmul.f32 %v350_v4, %v32_v46  ;;  %v85_v60 = vmax.f32 %v69_v53, 0.0  ;;  %v70_v61 = vadd.f32 %v357_v7, %v47_v54 }
   0xf   :  { %297 = vmatmul.mubr.msk.bf16.vlgmr.msra.gmra.mxu1 %vm120_vm0, %v101_v52  ;;  %v71_v62 = vadd.f32 %v357_v7, %v48_v55  ;;  %v56_v63 = vmul.f32 %v350_v4, %v33_v51  ;;  %v92_v0 = vmax.f32 %v76_v57, 0.0 }
  0x10   :  { %v93_v1 = vmax.f32 %v77_v58, 0.0  ;;  %v78_v2 = vadd.f32 %v357_v7, %v55_v59  ;;  %v98_v3 = vpack.c.bf16 %v85_v60, %v84_v56  ;;  %v86_v5 = vmax.f32 %v70_v61, 0.0 }
  0x11   :  { %v87_v6 = vmax.f32 %v71_v62, 0.0  ;;  %v79_v8 = vadd.f32 %v357_v7, %v56_v63 }
  0x12   :  { %v102_v9 = vpack.c.bf16 %v93_v1, %v92_v0  ;;  %v94_v10 = vmax.f32 %v78_v2, 0.0  ;;  %292 = vmatprep.mubr.msk.bf16.mxu0 %vm120_vm0, %v98_v3 }
  0x13   :  { %v99_v11 = vpack.c.bf16 %v87_v6, %v86_v5  ;;  %v95_v12 = vmax.f32 %v79_v8, 0.0 }
  0x14   :  { %300 = vmatprep.mubr.msk.bf16.mxu1 %vm120_vm0, %v102_v9 }
  0x15   :  { %v103_v13 = vpack.c.bf16 %v95_v12, %v94_v10  ;;  %293 = vmatmul.mubr.msk.bf16.gmra.mxu0 %vm120_vm0, %v99_v11 }
  0x17   :  { %301 = vmatmul.mubr.msk.bf16.gmra.mxu1 %vm120_vm0, %v103_v13 }
  0xcd   :  { %v290_v4 = vpop.f32.mrf.mxu0 }
  0xce   :  { %244 = vst [vmem:[%s491_s4 + $0x10] sm:$0xff] %v290_v4 }
  0xcf   :  { %v298_v14 = vpop.f32.mrf.mxu1  ;;  %v179_v7 = vpop.f32.mrf.mxu0 }
  0xd0   :  { %252 = vst [vmem:[%s491_s4 + $0x50] sm:$0xff] %v298_v14  ;;  %242 = vst [vmem:[%s491_s4] sm:$0xff] %v179_v7 }
  0xd1   :  { %v211_v15 = vpop.f32.mrf.mxu1  ;;  %v291_v16 = vpop.f32.mrf.mxu0 }
  0xd2   :  { %250 = vst [vmem:[%s491_s4 + $0x40] sm:$0xff] %v211_v15  ;;  %245 = vst [vmem:[%s491_s4 + $0x18] sm:$0xff] %v291_v16 }
  0xd3   :  { %v299_v17 = vpop.f32.mrf.mxu1  ;;  %v182_v18 = vpop.f32.mrf.mxu0 }
  0xd4   :  { %253 = vst [vmem:[%s491_s4 + $0x58] sm:$0xff] %v299_v17  ;;  %243 = vst [vmem:[%s491_s4 + $0x8] sm:$0xff] %v182_v18 }
  0xd5   :  { %v214_v19 = vpop.f32.mrf.mxu1  ;;  %v294_v20 = vpop.f32.mrf.mxu0 }
  0xd6   :  { %251 = vst [vmem:[%s491_s4 + $0x48] sm:$0xff] %v214_v19  ;;  %248 = vst [vmem:[%s491_s4 + $0x30] sm:$0xff] %v294_v20 }
  0xd7   :  { %v302_v21 = vpop.f32.mrf.mxu1  ;;  %v195_v22 = vpop.f32.mrf.mxu0 }
  0xd8   :  { %256 = vst [vmem:[%s491_s4 + $0x70] sm:$0xff] %v302_v21  ;;  %246 = vst [vmem:[%s491_s4 + $0x20] sm:$0xff] %v195_v22 }
  0xd9   :  { %v227_v23 = vpop.f32.mrf.mxu1  ;;  %v295_v24 = vpop.f32.mrf.mxu0 }
  0xda   :  { %254 = vst [vmem:[%s491_s4 + $0x60] sm:$0xff] %v227_v23  ;;  %249 = vst [vmem:[%s491_s4 + $0x38] sm:$0xff] %v295_v24 }
  0xdb   :  { %v303_v25 = vpop.f32.mrf.mxu1  ;;  %v198_v26 = vpop.f32.mrf.mxu0 }
  0xdc   :  { %257 = vst [vmem:[%s491_s4 + $0x78] sm:$0xff] %v303_v25  ;;  %247 = vst [vmem:[%s491_s4 + $0x28] sm:$0xff] %v198_v26 }
  0xdd   :  { %v230_v27 = vpop.f32.mrf.mxu1 }
  0xde   :  { %255 = vst [vmem:[%s491_s4 + $0x68] sm:$0xff] %v230_v27 }

// kernel: densenet_forward.61
= control target key start
LH: loop header
LB: loop body
LE: loop exit
PB: predicated region body
PF: predicated region fallthrough
CT: control target
= control target key end

     0   :  { %vm14_vm0 = vcmask 516096   ;;  %vm34_vm1 = vcmask 523264   ;;  %v140_v0 = vmov 0.0   ;;  %s258_s0 = inlined_call_operand.vmem [shape: f32[128,64], index: 0, kind: input, shape index: {}]   ;;  %s259_s1 = inlined_call_operand.vmem [shape: f32[1,64], index: 1, kind: output, shape index: {0}]   ;;  %s260_s2 = inlined_call_operand.vmem [shape: f32[1,64], index: 2, kind: output, shape index: {1}]  }
   0x1   :  { %15 = vst.msk [vmem:[%s259_s1] sm:$0x1] %vm14_vm0, %v140_v0  ;;  %v17_v1 = vld [vmem:[%s258_s0] sm:$0xff]  ;;  %v18_v2 = vld [vmem:[%s258_s0 + $0x8] sm:$0xff]  ;;  %v19_v3 = vld [vmem:[%s258_s0 + $0x10] sm:$0xff] }
   0x2   :  { %16 = vst.msk [vmem:[%s260_s2] sm:$0x1] %vm14_vm0, %v140_v0  ;;  %v35_v4 = vsel %vm34_vm1, %v17_v1, 0.0  ;;  %v36_v5 = vsel %vm34_vm1, %v18_v2, 0.0  ;;  %v38_v6 = vsel %vm34_vm1, %v19_v3, 0.0  ;;  %v20_v7 = vld [vmem:[%s258_s0 + $0x18] sm:$0xff]  ;;  %v76_v15 = vmul.f32 %v17_v1, %v17_v1 }
   0x3   :  { %v37_v8 = vadd.f32 %v36_v5, %v35_v4  ;;  %v40_v9 = vsel %vm34_vm1, %v20_v7, 0.0  ;;  %v21_v10 = vld [vmem:[%s258_s0 + $0x20] sm:$0xff]  ;;  %v22_v13 = vld [vmem:[%s258_s0 + $0x28] sm:$0xff]  ;;  %v77_v16 = vmul.f32 %v18_v2, %v18_v2  ;;  %v78_v17 = vmul.f32 %v19_v3, %v19_v3  ;;  %v23_v19 = vld [vmem:[%s258_s0 + $0x30] sm:$0xff] }
   0x4   :  { %v42_v12 = vsel %vm34_vm1, %v21_v10, 0.0  ;;  %v44_v18 = vsel %vm34_vm1, %v22_v13, 0.0  ;;  %v79_v21 = vmul.f32 %v20_v7, %v20_v7  ;;  %v46_v22 = vsel %vm34_vm1, %v23_v19, 0.0  ;;  %v24_v24 = vld [vmem:[%s258_s0 + $0x38] sm:$0xff]  ;;  %v25_v31 = vld [vmem:[%s258_s0 + $0x40] sm:$0xff]  ;;  %v26_v37 = vld [vmem:[%s258_s0 + $0x48] sm:$0xff] }
   0x5   :  { %v39_v11 = vadd.f32 %v38_v6, %v37_v8  ;;  %v80_v23 = vmul.f32 %v21_v10, %v21_v10  ;;  %v92_v26 = vsel %vm34_vm1, %v76_v15, 0.0  ;;  %v93_v27 = vsel %vm34_vm1, %v77_v16, 0.0  ;;  %v27_v43 = vld [vmem:[%s258_s0 + $0x50] sm:$0xff]  ;;  %v28_v49 = vld [vmem:[%s258_s0 + $0x58] sm:$0xff]  ;;  %v29_v55 = vld [vmem:[%s258_s0 + $0x60] sm:$0xff] }
   0x6   :  { %v95_v28 = vsel %vm34_vm1, %v78_v17, 0.0  ;;  %v48_v29 = vsel %vm34_vm1, %v24_v24, 0.0  ;;  %v94_v30 = vadd.f32 %v93_v27, %v92_v26  ;;  %v81_v33 = vmul.f32 %v22_v13, %v22_v13  ;;  %v30_v61 = vld [vmem:[%s258_s0 + $0x68] sm:$0xff]  ;;  %v31_v3 = vld [vmem:[%s258_s0 + $0x70] sm:$0xff] }
   0x7   :  { %v41_v14 = vadd.f32 %v40_v9, %v39_v11  ;;  %v97_v34 = vsel %vm34_vm1, %v79_v21, 0.0  ;;  %v50_v35 = vsel %vm34_vm1, %v25_v31, 0.0  ;;  %v82_v39 = vmul.f32 %v23_v19, %v23_v19  ;;  %v32_v9 = vld [vmem:[%s258_s0 + $0x78] sm:$0xff] }
   0x8   :  { %v96_v36 = vadd.f32 %v95_v28, %v94_v30  ;;  %v99_v40 = vsel %vm34_vm1, %v80_v23, 0.0  ;;  %v52_v41 = vsel %vm34_vm1, %v26_v37, 0.0  ;;  %v83_v45 = vmul.f32 %v24_v24, %v24_v24 }
   0x9   :  { %v43_v20 = vadd.f32 %v42_v12, %v41_v14  ;;  %v101_v46 = vsel %vm34_vm1, %v81_v33, 0.0  ;;  %v54_v47 = vsel %vm34_vm1, %v27_v43, 0.0  ;;  %v84_v51 = vmul.f32 %v25_v31, %v25_v31 }
   0xa   :  { %v98_v42 = vadd.f32 %v97_v34, %v96_v36  ;;  %v103_v52 = vsel %vm34_vm1, %v82_v39, 0.0  ;;  %v56_v53 = vsel %vm34_vm1, %v28_v49, 0.0  ;;  %v85_v57 = vmul.f32 %v26_v37, %v26_v37  ;;  %v33_v36 = vld [vmem:[%s259_s1] sm:$0x1] }
   0xb   :  { %v45_v25 = vadd.f32 %v44_v18, %v43_v20  ;;  %v105_v58 = vsel %vm34_vm1, %v83_v45, 0.0  ;;  %v58_v59 = vsel %vm34_vm1, %v29_v55, 0.0  ;;  %v86_v63 = vmul.f32 %v27_v43, %v27_v43 }
   0xc   :  { %v100_v48 = vadd.f32 %v99_v40, %v98_v42  ;;  %v107_v0 = vsel %vm34_vm1, %v84_v51, 0.0  ;;  %v60_v1 = vsel %vm34_vm1, %v30_v61, 0.0  ;;  %v87_v5 = vmul.f32 %v28_v49, %v28_v49 }
   0xd   :  { %v47_v32 = vadd.f32 %v46_v22, %v45_v25  ;;  %v109_v6 = vsel %vm34_vm1, %v85_v57, 0.0  ;;  %v62_v7 = vsel %vm34_vm1, %v31_v3, 0.0  ;;  %v88_v11 = vmul.f32 %v29_v55, %v29_v55 }
   0xe   :  { %v102_v54 = vadd.f32 %v101_v46, %v100_v48  ;;  %v111_v12 = vsel %vm34_vm1, %v86_v63, 0.0  ;;  %v64_v13 = vsel %vm34_vm1, %v32_v9, 0.0  ;;  %v89_v16 = vmul.f32 %v30_v61, %v30_v61 }
   0xf   :  { %v49_v38 = vadd.f32 %v48_v29, %v47_v32  ;;  %v113_v17 = vsel %vm34_vm1, %v87_v5, 0.0  ;;  %v90_v20 = vmul.f32 %v31_v3, %v31_v3  ;;  %v115_v21 = vsel %vm34_vm1, %v88_v11, 0.0 }
  0x10   :  { %v104_v60 = vadd.f32 %v103_v52, %v102_v54  ;;  %v91_v24 = vmul.f32 %v32_v9, %v32_v9  ;;  %v117_v25 = vsel %vm34_vm1, %v89_v16, 0.0 }
  0x11   :  { %v51_v44 = vadd.f32 %v50_v35, %v49_v38  ;;  %v119_v28 = vsel %vm34_vm1, %v90_v20, 0.0 }
  0x12   :  { %v106_v2 = vadd.f32 %v105_v58, %v104_v60  ;;  %v121_v31 = vsel %vm34_vm1, %v91_v24, 0.0 }
  0x13   :  { %v53_v50 = vadd.f32 %v52_v41, %v51_v44  ;;  %v75_v44 = vld [vmem:[%s260_s2] sm:$0x1] }
  0x14   :  { %v108_v8 = vadd.f32 %v107_v0, %v106_v2 }
  0x15   :  { %v55_v56 = vadd.f32 %v54_v47, %v53_v50 }
  0x16   :  { %v110_v14 = vadd.f32 %v109_v6, %v108_v8 }
  0x17   :  { %v57_v62 = vadd.f32 %v56_v53, %v55_v56 }
  0x18   :  { %v112_v18 = vadd.f32 %v111_v12, %v110_v14 }
  0x19   :  { %v59_v4 = vadd.f32 %v58_v59, %v57_v62 }
  0x1a   :  { %v114_v22 = vadd.f32 %v113_v17, %v112_v18 }
  0x1b   :  { %v61_v10 = vadd.f32 %v60_v1, %v59_v4 }
  0x1c   :  { %v116_v26 = vadd.f32 %v115_v21, %v114_v22 }
  0x1d   :  { %v63_v15 = vadd.f32 %v62_v7, %v61_v10 }
  0x1e   :  { %v118_v29 = vadd.f32 %v117_v25, %v116_v26 }
  0x1f   :  { %v65_v19 = vadd.f32 %v64_v13, %v63_v15 }
  0x20   :  { %v120_v32 = vadd.f32 %v119_v28, %v118_v29 }
  0x21   :  { %v66_v23 = vrot.slane %v65_v19, 4 }
  0x22   :  { %v122_v34 = vadd.f32 %v121_v31, %v120_v32 }
  0x23   :  { %v67_v27 = vadd.f32 %v66_v23, %v65_v19 }
  0x24   :  { %v123_v37 = vrot.slane %v122_v34, 4 }
  0x25   :  { %v68_v30 = vrot.slane %v67_v27, 2 }
  0x26   :  { %v124_v39 = vadd.f32 %v123_v37, %v122_v34 }
  0x27   :  { %v69_v33 = vadd.f32 %v68_v30, %v67_v27 }
  0x28   :  { %v125_v41 = vrot.slane %v124_v39, 2 }
  0x29   :  { %v70_v35 = vrot.slane %v69_v33, 1 }
  0x2a   :  { %v126_v42 = vadd.f32 %v125_v41, %v124_v39 }
  0x2b   :  { %v71_v38 = vadd.f32 %v70_v35, %v69_v33 }
  0x2c   :  { %v127_v43 = vrot.slane %v126_v42, 1 }
  0x2d   :  { %v72_v40 = vadd.f32 %v71_v38, %v33_v36 }
  0x2e   :  { %v128_v45 = vadd.f32 %v127_v43, %v126_v42 }
  0x2f   :  { %74 = vst.msk [vmem:[%s259_s1] sm:$0x1] %vm14_vm0, %v72_v40 }
  0x30   :  { %v129_v46 = vadd.f32 %v128_v45, %v75_v44 }
  0x32   :  { %130 = vst.msk [vmem:[%s260_s2] sm:$0x1] %vm14_vm0, %v129_v46 }

// kernel: densenet_forward.62
= control target key start
LH: loop header
LB: loop body
LE: loop exit
PB: predicated region body
PF: predicated region fallthrough
CT: control target
= control target key end

     0   :  { %vm156_vm0 = vcmask 519168   ;;  %s385_s0 = inlined_call_operand.vmem [shape: f32[128,64], index: 0, kind: input, shape index: {}]   ;;  %s386_s1 = inlined_call_operand.vmem [shape: f32[1,64], index: 1, kind: input, shape index: {}]   ;;  %s387_s2 = inlined_call_operand.vmem [shape: f32[1,64], index: 2, kind: input, shape index: {}]   ;;  %s388_s3 = inlined_call_operand.vmem [shape: bf16[128,64], index: 3, kind: output, shape index: {}]  }
   0x1   :  { %v14_v0 = vld [vmem:[%s385_s0] sm:$0xff]  ;;  %v15_v4 = vld [vmem:[%s385_s0 + $0x8] sm:$0xff]  ;;  %v16_v5 = vld [vmem:[%s385_s0 + $0x10] sm:$0xff] }
   0x2   :  { %v237_v1 = vld [vmem:[%s386_s1] ss:$0 sm:$0xff]  ;;  %v17_v6 = vld [vmem:[%s385_s0 + $0x18] sm:$0xff]  ;;  %v19_v11 = vld [vmem:[%s385_s0 + $0x28] sm:$0xff] }
   0x3   :  { %v242_v2 = vld [vmem:[%s387_s2] ss:$0 sm:$0xff]  ;;  %v37_v3 = vmul.f32 %v237_v1, %v14_v0  ;;  %v38_v7 = vmul.f32 %v237_v1, %v15_v4  ;;  %v39_v8 = vmul.f32 %v237_v1, %v16_v5  ;;  %v40_v9 = vmul.f32 %v237_v1, %v17_v6  ;;  %v20_v12 = vld [vmem:[%s385_s0 + $0x30] sm:$0xff]  ;;  %v21_v17 = vld [vmem:[%s385_s0 + $0x38] sm:$0xff] }
   0x4   :  { %v18_v10 = vld [vmem:[%s385_s0 + $0x20] sm:$0xff]  ;;  %v42_v15 = vmul.f32 %v237_v1, %v19_v11  ;;  %v43_v16 = vmul.f32 %v237_v1, %v20_v12  ;;  %v44_v21 = vmul.f32 %v237_v1, %v21_v17  ;;  %v23_v35 = vld [vmem:[%s385_s0 + $0x48] sm:$0xff]  ;;  %v24_v36 = vld [vmem:[%s385_s0 + $0x50] sm:$0xff] }
   0x5   :  { %v60_v13 = vadd.f32 %v242_v2, %v37_v3  ;;  %v41_v14 = vmul.f32 %v237_v1, %v18_v10  ;;  %v61_v18 = vadd.f32 %v242_v2, %v38_v7  ;;  %v62_v19 = vadd.f32 %v242_v2, %v39_v8  ;;  %v22_v30 = vld [vmem:[%s385_s0 + $0x40] sm:$0xff]  ;;  %v25_v37 = vld [vmem:[%s385_s0 + $0x58] sm:$0xff]  ;;  %v27_v43 = vld [vmem:[%s385_s0 + $0x68] sm:$0xff] }
   0x6   :  { %v63_v20 = vadd.f32 %v242_v2, %v40_v9  ;;  %v65_v24 = vadd.f32 %v242_v2, %v42_v15  ;;  %v66_v25 = vadd.f32 %v242_v2, %v43_v16  ;;  %v67_v29 = vadd.f32 %v242_v2, %v44_v21  ;;  %v26_v42 = vld [vmem:[%s385_s0 + $0x60] sm:$0xff]  ;;  %v28_v44 = vld [vmem:[%s385_s0 + $0x70] sm:$0xff]  ;;  %v29_v49 = vld [vmem:[%s385_s0 + $0x78] sm:$0xff] }
   0x7   :  { %v76_v22 = vmax.f32 %v60_v13, 0.0  ;;  %v64_v23 = vadd.f32 %v242_v2, %v41_v14  ;;  %v77_v26 = vmax.f32 %v61_v18, 0.0  ;;  %v78_v27 = vmax.f32 %v62_v19, 0.0 }
   0x8   :  { %v79_v28 = vmax.f32 %v63_v20, 0.0  ;;  %v81_v33 = vmax.f32 %v65_v24, 0.0  ;;  %v82_v34 = vmax.f32 %v66_v25, 0.0  ;;  %v83_v41 = vmax.f32 %v67_v29, 0.0 }
   0x9   :  { %v195_v31 = vpack.c.bf16 %v76_v22, %v76_v22  ;;  %v80_v32 = vmax.f32 %v64_v23, 0.0  ;;  %v196_v38 = vpack.c.bf16 %v77_v26, %v77_v26  ;;  %v197_v39 = vpack.c.bf16 %v78_v27, %v78_v27 }
   0xa   :  { %v198_v40 = vpack.c.bf16 %v79_v28, %v79_v28  ;;  %v200_v46 = vpack.c.bf16 %v81_v33, %v81_v33  ;;  %v201_v47 = vpack.c.bf16 %v82_v34, %v82_v34  ;;  %v45_v48 = vmul.f32 %v237_v1, %v22_v30 }
   0xb   :  { %157 = vst.msk [vmem:[%s388_s3] sm:$0xf] %vm156_vm0, %v195_v31  ;;  %v199_v45 = vpack.c.bf16 %v80_v32, %v80_v32  ;;  %158 = vst.msk [vmem:[%s388_s3 + $0x4] sm:$0xf] %vm156_vm0, %v196_v38  ;;  %v202_v50 = vpack.c.bf16 %v83_v41, %v83_v41  ;;  %v46_v51 = vmul.f32 %v237_v1, %v23_v35 }
   0xc   :  { %159 = vst.msk [vmem:[%s388_s3 + $0x8] sm:$0xf] %vm156_vm0, %v197_v39  ;;  %160 = vst.msk [vmem:[%s388_s3 + $0xc] sm:$0xf] %vm156_vm0, %v198_v40  ;;  %v47_v52 = vmul.f32 %v237_v1, %v24_v36  ;;  %v48_v53 = vmul.f32 %v237_v1, %v25_v37  ;;  %v68_v54 = vadd.f32 %v242_v2, %v45_v48 }
   0xd   :  { %161 = vst.msk [vmem:[%s388_s3 + $0x10] sm:$0xf] %vm156_vm0, %v199_v45  ;;  %162 = vst.msk [vmem:[%s388_s3 + $0x14] sm:$0xf] %vm156_vm0, %v200_v46  ;;  %v49_v55 = vmul.f32 %v237_v1, %v26_v42  ;;  %v50_v56 = vmul.f32 %v237_v1, %v27_v43  ;;  %v51_v57 = vmul.f32 %v237_v1, %v28_v44 }
   0xe   :  { %163 = vst.msk [vmem:[%s388_s3 + $0x18] sm:$0xf] %vm156_vm0, %v201_v47  ;;  %164 = vst.msk [vmem:[%s388_s3 + $0x1c] sm:$0xf] %vm156_vm0, %v202_v50  ;;  %v69_v58 = vadd.f32 %v242_v2, %v46_v51  ;;  %v70_v59 = vadd.f32 %v242_v2, %v47_v52  ;;  %v71_v60 = vadd.f32 %v242_v2, %v48_v53  ;;  %v84_v62 = vmax.f32 %v68_v54, 0.0 }
   0xf   :  { %v52_v61 = vmul.f32 %v237_v1, %v29_v49  ;;  %v72_v63 = vadd.f32 %v242_v2, %v49_v55  ;;  %v73_v0 = vadd.f32 %v242_v2, %v50_v56  ;;  %v74_v3 = vadd.f32 %v242_v2, %v51_v57 }
  0x10   :  { %v85_v4 = vmax.f32 %v69_v58, 0.0  ;;  %v86_v5 = vmax.f32 %v70_v59, 0.0  ;;  %v87_v6 = vmax.f32 %v71_v60, 0.0  ;;  %v203_v8 = vpack.c.bf16 %v84_v62, %v84_v62 }
  0x11   :  { %v75_v7 = vadd.f32 %v242_v2, %v52_v61  ;;  %v88_v9 = vmax.f32 %v72_v63, 0.0  ;;  %v89_v10 = vmax.f32 %v73_v0, 0.0  ;;  %v90_v11 = vmax.f32 %v74_v3, 0.0 }
  0x12   :  { %v204_v12 = vpack.c.bf16 %v85_v4, %v85_v4  ;;  %v205_v13 = vpack.c.bf16 %v86_v5, %v86_v5  ;;  %v206_v14 = vpack.c.bf16 %v87_v6, %v87_v6  ;;  %165 = vst.msk [vmem:[%s388_s3 + $0x20] sm:$0xf] %vm156_vm0, %v203_v8 }
  0x13   :  { %v91_v1 = vmax.f32 %v75_v7, 0.0  ;;  %v207_v15 = vpack.c.bf16 %v88_v9, %v88_v9  ;;  %v208_v16 = vpack.c.bf16 %v89_v10, %v89_v10  ;;  %v209_v17 = vpack.c.bf16 %v90_v11, %v90_v11 }
  0x14   :  { %166 = vst.msk [vmem:[%s388_s3 + $0x24] sm:$0xf] %vm156_vm0, %v204_v12  ;;  %167 = vst.msk [vmem:[%s388_s3 + $0x28] sm:$0xf] %vm156_vm0, %v205_v13 }
  0x15   :  { %168 = vst.msk [vmem:[%s388_s3 + $0x2c] sm:$0xf] %vm156_vm0, %v206_v14  ;;  %v210_v2 = vpack.c.bf16 %v91_v1, %v91_v1  ;;  %169 = vst.msk [vmem:[%s388_s3 + $0x30] sm:$0xf] %vm156_vm0, %v207_v15 }
  0x16   :  { %170 = vst.msk [vmem:[%s388_s3 + $0x34] sm:$0xf] %vm156_vm0, %v208_v16  ;;  %171 = vst.msk [vmem:[%s388_s3 + $0x38] sm:$0xf] %vm156_vm0, %v209_v17 }
  0x17   :  { %172 = vst.msk [vmem:[%s388_s3 + $0x3c] sm:$0xf] %vm156_vm0, %v210_v2 }

// kernel: densenet_forward.63
= control target key start
LH: loop header
LB: loop body
LE: loop exit
PB: predicated region body
PF: predicated region fallthrough
CT: control target
= control target key end

     0   :  { %vm548_vm0 = vcmask 523264   ;;  %s1615_s1 = inlined_call_operand.vmem [shape: bf16[576,128], index: 1, kind: input, shape index: {}]   ;;  %s1616_s0 = inlined_call_operand.vmem [shape: bf16[128,576], index: 0, kind: input, shape index: {}]   ;;  %s1617_s2 = inlined_call_operand.vmem [shape: f32[128,128], index: 2, kind: output, shape index: {}]  }
   0x1   :  { %v1140_v0 = vld [vmem:[%s1615_s1 + $0x78] sm:$0xff]   ;;  %v1144_v4 = vld [vmem:[%s1615_s1 + $0x70] sm:$0xff]   ;;  %v1148_v8 = vld [vmem:[%s1615_s1 + $0x68] sm:$0xff]  }
   0x2   :  { %v1141_v1 = vld [vmem:[%s1615_s1 + $0xf8] sm:$0xff]   ;;  %968 = vmatprep.subr.bf16.mxu0 %v1140_v0  ;;  %v1145_v5 = vld [vmem:[%s1615_s1 + $0xf0] sm:$0xff]   ;;  %v1149_v9 = vld [vmem:[%s1615_s1 + $0xe8] sm:$0xff]  }
   0x3   :  { %v1142_v2 = vld [vmem:[%s1615_s1 + $0x38] sm:$0xff]   ;;  %1032 = vmatprep.subr.bf16.mxu1 %v1141_v1  ;;  %v1146_v6 = vld [vmem:[%s1615_s1 + $0x30] sm:$0xff]   ;;  %v1150_v10 = vld [vmem:[%s1615_s1 + $0x28] sm:$0xff]  }
   0x4   :  { %v1143_v3 = vld [vmem:[%s1615_s1 + $0xb8] sm:$0xff]   ;;  %969 = vmatpush3.bf16.msra.mxu0 %v1142_v2  ;;  %v1147_v7 = vld [vmem:[%s1615_s1 + $0xb0] sm:$0xff]   ;;  %v1151_v11 = vld [vmem:[%s1615_s1 + $0xa8] sm:$0xff]  }
   0x5   :  { %1033 = vmatpush3.bf16.msra.mxu1 %v1143_v3  ;;  %970 = vmatprep.subr.bf16.mxu0 %v1144_v4  ;;  %v1152_v12 = vld [vmem:[%s1615_s1 + $0x60] sm:$0xff]   ;;  %v1156_v16 = vld [vmem:[%s1615_s1 + $0x58] sm:$0xff]   ;;  %v1160_v20 = vld [vmem:[%s1615_s1 + $0x50] sm:$0xff]  }
   0x6   :  { %1034 = vmatprep.subr.bf16.mxu1 %v1145_v5  ;;  %v1153_v13 = vld [vmem:[%s1615_s1 + $0xe0] sm:$0xff]   ;;  %v1157_v17 = vld [vmem:[%s1615_s1 + $0xd8] sm:$0xff]   ;;  %v1161_v21 = vld [vmem:[%s1615_s1 + $0xd0] sm:$0xff]  }
   0x7   :  { %v1154_v14 = vld [vmem:[%s1615_s1 + $0x20] sm:$0xff]   ;;  %v1158_v18 = vld [vmem:[%s1615_s1 + $0x18] sm:$0xff]   ;;  %v1162_v22 = vld [vmem:[%s1615_s1 + $0x10] sm:$0xff]  }
   0x8   :  { %971 = vmatpush3.bf16.msra.mxu0 %v1146_v6  ;;  %v1155_v15 = vld [vmem:[%s1615_s1 + $0xa0] sm:$0xff]   ;;  %v1159_v19 = vld [vmem:[%s1615_s1 + $0x98] sm:$0xff]   ;;  %v1163_v23 = vld [vmem:[%s1615_s1 + $0x90] sm:$0xff]  }
   0x9   :  { %1035 = vmatpush3.bf16.msra.mxu1 %v1147_v7  ;;  %972 = vmatprep.subr.bf16.mxu0 %v1148_v8  ;;  %v1164_v24 = vld [vmem:[%s1615_s1 + $0x48] sm:$0xff]   ;;  %v1168_v28 = vld [vmem:[%s1615_s1 + $0x40] sm:$0xff]   ;;  %v1178_v36 = vld [vmem:[%s1615_s1 + $0x118] sm:$0xff]  }
   0xa   :  { %1036 = vmatprep.subr.bf16.mxu1 %v1149_v9  ;;  %v1165_v25 = vld [vmem:[%s1615_s1 + $0xc8] sm:$0xff]   ;;  %v1169_v29 = vld [vmem:[%s1615_s1 + $0xc0] sm:$0xff]   ;;  %v1191_v42 = vld [vmem:[%s1615_s1 + $0x110] sm:$0xff]  }
   0xb   :  { %v1166_v26 = vld [vmem:[%s1615_s1 + $0x8] sm:$0xff]   ;;  %v1170_v30 = vld [vmem:[%s1615_s1] sm:$0xff]   ;;  %v1187_v43 = vld [vmem:[%s1616_s0 + $0x5c] ss:$20 sps:$4 sm:$0xff]  }
   0xc   :  { %973 = vmatpush3.bf16.msra.mxu0 %v1150_v10  ;;  %v1167_v27 = vld [vmem:[%s1615_s1 + $0x88] sm:$0xff]   ;;  %v1171_v31 = vld [vmem:[%s1615_s1 + $0x80] sm:$0xff]   ;;  %v1192_v47 = vld [vmem:[%s1616_s0 + $0x7c] ss:$20 sps:$4 sm:$0xff]  }
   0xd   :  { %1037 = vmatpush3.bf16.msra.mxu1 %v1151_v11  ;;  %974 = vmatprep.subr.bf16.mxu0 %v1152_v12  ;;  %v1172_v32 = vld [vmem:[%s1616_s0] ss:$20 sps:$4 sm:$0xff]   ;;  %v1174_v33 = vld [vmem:[%s1616_s0 + $0x4] ss:$20 sps:$4 sm:$0xff]   ;;  %v1175_v34 = vld [vmem:[%s1616_s0 + $0x8] ss:$20 sps:$4 sm:$0xff]  }
   0xe   :  { %1038 = vmatprep.subr.bf16.mxu1 %v1153_v13  ;;  %v1177_v35 = vld [vmem:[%s1616_s0 + $0xc] ss:$20 sps:$4 sm:$0xff]   ;;  %605 = vmatprep.mubr.bf16.mxu0 %v1174_v33  ;;  %v1181_v38 = vld [vmem:[%s1616_s0 + $0x34] ss:$20 sps:$4 sm:$0xff]   ;;  %v1184_v40 = vld [vmem:[%s1616_s0 + $0x30] ss:$20 sps:$4 sm:$0xff]  }
   0xf   :  { %702 = vmatprep.mubr.bf16.mxu1 %v1177_v35  ;;  %v1179_v37 = vld [vmem:[%s1616_s0 + $0x2c] ss:$20 sps:$4 sm:$0xff]   ;;  %v1183_v39 = vld [vmem:[%s1616_s0 + $0x28] ss:$20 sps:$4 sm:$0xff]   ;;  %v1189_v44 = vld [vmem:[%s1616_s0 + $0x50] ss:$20 sps:$4 sm:$0xff]  }
  0x10   :  { %975 = vmatpush3.bf16.msra.mxu0 %v1154_v14  ;;  %v1185_v41 = vld [vmem:[%s1616_s0 + $0x54] ss:$20 sps:$4 sm:$0xff]   ;;  %v1190_v45 = vld [vmem:[%s1616_s0 + $0x58] ss:$20 sps:$4 sm:$0xff]   ;;  %v1217_v49 = vld [vmem:[%s1615_s1 + $0x100] sm:$0xff]  }
  0x11   :  { %1039 = vmatpush3.bf16.msra.mxu1 %v1155_v15  ;;  %976 = vmatprep.subr.bf16.mxu0 %v1156_v16  ;;  %v1204_v46 = vld [vmem:[%s1615_s1 + $0x108] sm:$0xff]   ;;  %v1194_v48 = vld [vmem:[%s1616_s0 + $0x84] ss:$20 sps:$4 sm:$0xff]   ;;  %v1197_v51 = vld [vmem:[%s1616_s0 + $0x80] ss:$20 sps:$4 sm:$0xff]  }
  0x12   :  { %1040 = vmatprep.subr.bf16.mxu1 %v1157_v17  ;;  %v1196_v50 = vld [vmem:[%s1616_s0 + $0x78] ss:$20 sps:$4 sm:$0xff]   ;;  %v1202_v54 = vld [vmem:[%s1616_s0 + $0xa0] ss:$20 sps:$4 sm:$0xff]   ;;  %v1203_v55 = vld [vmem:[%s1616_s0 + $0xa8] ss:$20 sps:$4 sm:$0xff]  }
  0x13   :  { %v1198_v52 = vld [vmem:[%s1616_s0 + $0xa4] ss:$20 sps:$4 sm:$0xff]   ;;  %v1200_v53 = vld [vmem:[%s1616_s0 + $0xac] ss:$20 sps:$4 sm:$0xff]   ;;  %v1207_v57 = vld [vmem:[%s1616_s0 + $0xd4] ss:$20 sps:$4 sm:$0xff]  }
  0x14   :  { %977 = vmatpush3.bf16.msra.mxu0 %v1158_v18  ;;  %v1205_v56 = vld [vmem:[%s1616_s0 + $0xcc] ss:$20 sps:$4 sm:$0xff]   ;;  %v1209_v58 = vld [vmem:[%s1616_s0 + $0xc8] ss:$20 sps:$4 sm:$0xff]   ;;  %v1210_v59 = vld [vmem:[%s1616_s0 + $0xd0] ss:$20 sps:$4 sm:$0xff]  }
  0x15   :  { %1041 = vmatpush3.bf16.msra.mxu1 %v1159_v19  ;;  %978 = vmatprep.subr.bf16.mxu0 %v1160_v20  ;;  %v1211_v60 = vld [vmem:[%s1616_s0 + $0xf4] ss:$20 sps:$4 sm:$0xff]   ;;  %v1213_v61 = vld [vmem:[%s1616_s0 + $0xfc] ss:$20 sps:$4 sm:$0xff]   ;;  %v1216_v63 = vld [vmem:[%s1616_s0 + $0xf8] ss:$20 sps:$4 sm:$0xff]  }
  0x16   :  { %1042 = vmatprep.subr.bf16.mxu1 %v1161_v21  ;;  %v1215_v62 = vld [vmem:[%s1616_s0 + $0xf0] ss:$20 sps:$4 sm:$0xff]   ;;  %v1222_v2 = vld [vmem:[%s1616_s0 + $0x118] ss:$20 sps:$4 sm:$0xff]   ;;  %v1223_v3 = vld [vmem:[%s1616_s0 + $0x120] ss:$20 sps:$4 sm:$0xff]  }
  0x17   :  { %v1218_v0 = vld [vmem:[%s1616_s0 + $0x11c] ss:$20 sps:$4 sm:$0xff]   ;;  %v1220_v1 = vld [vmem:[%s1616_s0 + $0x124] ss:$20 sps:$4 sm:$0xff]   ;;  %v1228_v8 = vld [vmem:[%s1616_s0 + $0x60] ss:$20 sps:$4 sm:$0xff]  }
  0x18   :  { %979 = vmatpush3.bf16.msra.mxu0 %v1162_v22  ;;  %v1224_v4 = vld [vmem:[%s1616_s0 + $0x10] ss:$20 sps:$4 sm:$0xff]   ;;  %v1226_v6 = vld [vmem:[%s1616_s0 + $0x38] ss:$20 sps:$4 sm:$0xff]   ;;  %v1229_v9 = vld [vmem:[%s1616_s0 + $0x100] ss:$20 sps:$4 sm:$0xff]  }
  0x19   :  { %1043 = vmatpush3.bf16.msra.mxu1 %v1163_v23  ;;  %980 = vmatprep.subr.bf16.mxu0 %v1164_v24  ;;  %v1225_v5 = vld [vmem:[%s1616_s0 + $0xb0] ss:$20 sps:$4 sm:$0xff]   ;;  %v1227_v7 = vld [vmem:[%s1616_s0 + $0xd8] ss:$20 sps:$4 sm:$0xff]   ;;  %v1230_v10 = vld [vmem:[%s1616_s0 + $0x88] ss:$20 sps:$4 sm:$0xff]  }
  0x1a   :  { %1044 = vmatprep.subr.bf16.mxu1 %v1165_v25  ;;  %v1231_v11 = vld [vmem:[%s1616_s0 + $0x128] ss:$20 sps:$4 sm:$0xff]  }
  0x1c   :  { %981 = vmatpush3.bf16.msra.mxu0 %v1166_v26 }
  0x1d   :  { %1045 = vmatpush3.bf16.msra.mxu1 %v1167_v27  ;;  %982 = vmatprep.subr.bf16.mxu0 %v1168_v28 }
  0x1e   :  { %1046 = vmatprep.subr.bf16.mxu1 %v1169_v29 }
  0x20   :  { %983 = vmatpush3.bf16.msra.mxu0 %v1170_v30 }
  0x21   :  { %1047 = vmatpush3.bf16.msra.mxu1 %v1171_v31  ;;  %1108 = vmatprep.subr.bf16.mxu0 %v1178_v36 }
  0x22   :  { %1132 = vmatprep.subr.bf16.mxu1 %v1178_v36 }
  0x23   :  { %606 = vmatmul.mubr.bf16.vlgmr.msra.gmra.mxu0 %v1172_v32 }
  0x24   :  { %703 = vmatmul.mubr.bf16.vlgmr.msra.gmra.mxu1 %v1175_v34  ;;  %1109 = vmatpush3.bf16.msra.mxu0 %v1178_v36 }
  0x25   :  { %1136 = vmatpush3.bf16.msra.mxu1 %v1178_v36  ;;  %613 = vmatprep.mubr.bf16.mxu0 %v1179_v37 }
  0x26   :  { %710 = vmatprep.mubr.bf16.mxu1 %v1181_v38  ;;  %1110 = vmatprep.subr.bf16.mxu0 %v1191_v42 }
  0x27   :  { %1133 = vmatprep.subr.bf16.mxu1 %v1191_v42 }
  0x28   :  { %1111 = vmatpush3.bf16.msra.mxu0 %v1191_v42 }
  0x29   :  { %1137 = vmatpush3.bf16.msra.mxu1 %v1191_v42  ;;  %1112 = vmatprep.subr.bf16.mxu0 %v1204_v46 }
  0x2a   :  { %1134 = vmatprep.subr.bf16.mxu1 %v1204_v46 }
  0x2b   :  { %614 = vmatmul.mubr.bf16.gmra.mxu0 %v1183_v39 }
  0x2c   :  { %711 = vmatmul.mubr.bf16.gmra.mxu1 %v1184_v40  ;;  %621 = vmatprep.mubr.bf16.mxu0 %v1185_v41 }
  0x2d   :  { %718 = vmatprep.mubr.bf16.mxu1 %v1187_v43  ;;  %1113 = vmatpush3.bf16.msra.mxu0 %v1204_v46 }
  0x2e   :  { %1138 = vmatpush3.bf16.msra.mxu1 %v1204_v46  ;;  %1114 = vmatprep.subr.bf16.mxu0 %v1217_v49 }
  0x2f   :  { %1135 = vmatprep.subr.bf16.mxu1 %v1217_v49 }
  0x31   :  { %1115 = vmatpush3.bf16.msra.mxu0 %v1217_v49 }
  0x32   :  { %1139 = vmatpush3.bf16.msra.mxu1 %v1217_v49 }
  0x33   :  { %622 = vmatmul.mubr.bf16.gmra.mxu0 %v1189_v44 }
  0x34   :  { %719 = vmatmul.mubr.bf16.gmra.mxu1 %v1190_v45  ;;  %629 = vmatprep.mubr.bf16.mxu0 %v1192_v47 }
  0x35   :  { %726 = vmatprep.mubr.bf16.mxu1 %v1194_v48 }
  0x3b   :  { %630 = vmatmul.mubr.bf16.gmra.mxu0 %v1196_v50 }
  0x3c   :  { %727 = vmatmul.mubr.bf16.gmra.mxu1 %v1197_v51  ;;  %637 = vmatprep.mubr.bf16.mxu0 %v1198_v52 }
  0x3d   :  { %734 = vmatprep.mubr.bf16.mxu1 %v1200_v53 }
  0x43   :  { %638 = vmatmul.mubr.bf16.gmra.mxu0 %v1202_v54 }
  0x44   :  { %735 = vmatmul.mubr.bf16.gmra.mxu1 %v1203_v55  ;;  %645 = vmatprep.mubr.bf16.mxu0 %v1205_v56 }
  0x45   :  { %742 = vmatprep.mubr.bf16.mxu1 %v1207_v57 }
  0x4b   :  { %646 = vmatmul.mubr.bf16.gmra.mxu0 %v1209_v58 }
  0x4c   :  { %743 = vmatmul.mubr.bf16.gmra.mxu1 %v1210_v59  ;;  %653 = vmatprep.mubr.bf16.mxu0 %v1211_v60 }
  0x4d   :  { %750 = vmatprep.mubr.bf16.mxu1 %v1213_v61 }
  0x53   :  { %654 = vmatmul.mubr.bf16.gmra.mxu0 %v1215_v62 }
  0x54   :  { %751 = vmatmul.mubr.bf16.gmra.mxu1 %v1216_v63  ;;  %661 = vmatprep.mubr.bf16.mxu0 %v1218_v0 }
  0x55   :  { %758 = vmatprep.mubr.bf16.mxu1 %v1220_v1 }
  0x5b   :  { %662 = vmatmul.mubr.bf16.gmra.mxu0 %v1222_v2 }
  0x5c   :  { %759 = vmatmul.mubr.bf16.gmra.mxu1 %v1223_v3  ;;  %1116 = vmatprep.mubr.msk.bf16.mxu0 %vm548_vm0, %v1224_v4 }
  0x5d   :  { %1124 = vmatprep.mubr.msk.bf16.mxu1 %vm548_vm0, %v1225_v5 }
  0x63   :  { %1117 = vmatmul.mubr.msk.bf16.vlgmr.msra.gmra.mxu0 %vm548_vm0, %v1226_v6 }
  0x64   :  { %1125 = vmatmul.mubr.msk.bf16.vlgmr.msra.gmra.mxu1 %vm548_vm0, %v1227_v7  ;;  %1120 = vmatprep.mubr.msk.bf16.mxu0 %vm548_vm0, %v1228_v8 }
  0x65   :  { %1128 = vmatprep.mubr.msk.bf16.mxu1 %vm548_vm0, %v1229_v9 }
  0x6b   :  { %1121 = vmatmul.mubr.msk.bf16.gmra.mxu0 %vm548_vm0, %v1230_v10 }
  0x6c   :  { %1129 = vmatmul.mubr.msk.bf16.gmra.mxu1 %vm548_vm0, %v1231_v11 }
  0xe3   :  { %v1483_v12 = vpop.f32.mrf.mxu0 }
  0xe4   :  { %v1485_v13 = vpop.f32.mrf.mxu1 }
  0xe5   :  { %v1487_v14 = vpop.f32.mrf.mxu0 }
  0xe6   :  { %v1489_v15 = vpop.f32.mrf.mxu1 }
  0xe7   :  { %v1491_v16 = vpop.f32.mrf.mxu0 }
  0xe8   :  { %v1493_v17 = vpop.f32.mrf.mxu1 }
  0xe9   :  { %v1495_v18 = vpop.f32.mrf.mxu0 }
  0xea   :  { %v1497_v19 = vpop.f32.mrf.mxu1 }
  0xeb   :  { %v990_v20 = vpop.f32.mrf.mxu0 }
  0xec   :  { %v1054_v21 = vpop.f32.mrf.mxu1 }
  0xed   :  { %v991_v22 = vpop.f32.mrf.mxu0 }
  0xee   :  { %v1055_v23 = vpop.f32.mrf.mxu1  ;;  %v992_v7 = vadd.f32 %v991_v22, %v990_v20 }
  0xef   :  { %v993_v24 = vpop.f32.mrf.mxu0  ;;  %v1056_v8 = vadd.f32 %v1055_v23, %v1054_v21 }
  0xf0   :  { %v1057_v25 = vpop.f32.mrf.mxu1 }
  0xf1   :  { %v994_v26 = vpop.f32.mrf.mxu0 }
  0xf2   :  { %v1058_v27 = vpop.f32.mrf.mxu1 }
  0xf3   :  { %v1499_v28 = vpop.f32.mrf.mxu0 }
  0xf4   :  { %v1501_v29 = vpop.f32.mrf.mxu1 }
  0xf5   :  { %v1503_v30 = vpop.f32.mrf.mxu0 }
  0xf6   :  { %v1505_v31 = vpop.f32.mrf.mxu1 }
  0xf7   :  { %v1507_v32 = vpop.f32.mrf.mxu0 }
  0xf8   :  { %1618 = vst [vmem:[#allocation2_spill] sm:$0xff] %v1507_v32  ;;  %v1509_v33 = vpop.f32.mrf.mxu1 }
  0xf9   :  { %1619 = vst [vmem:[#allocation3_spill] sm:$0xff] %v1509_v33  ;;  %v1511_v34 = vpop.f32.mrf.mxu0  ;;  %v986_v33 = vadd.f32 %v1487_v14, %v1483_v12  ;;  %v1053_v12 = vadd.f32 %v1497_v19, %v1493_v17 }
  0xfa   :  { %1620 = vst [vmem:[#allocation4_spill] sm:$0xff] %v1511_v34  ;;  %v1513_v35 = vpop.f32.mrf.mxu1 }
  0xfb   :  { %1621 = vst [vmem:[#allocation5_spill] sm:$0xff] %v1513_v35  ;;  %v1515_v36 = vpop.f32.mrf.mxu0 }
  0xfc   :  { %v1517_v37 = vpop.f32.mrf.mxu1 }
  0xfd   :  { %v1519_v38 = vpop.f32.mrf.mxu0 }
  0xfe   :  { %v1521_v39 = vpop.f32.mrf.mxu1 }
  0xff   :  { %v1523_v40 = vpop.f32.mrf.mxu0 }
 0x100   :  { %v1525_v41 = vpop.f32.mrf.mxu1 }
 0x101   :  { %1622 = vst [vmem:[#allocation6_spill] sm:$0xff] %v1525_v41  ;;  %v1527_v42 = vpop.f32.mrf.mxu0 }
 0x102   :  { %1623 = vst [vmem:[#allocation7_spill] sm:$0xff] %v1527_v42  ;;  %v1529_v43 = vpop.f32.mrf.mxu1  ;;  %v713_v42 = vadd.f32 %v1056_v8, %v992_v7 }
 0x103   :  { %1624 = vst [vmem:[#allocation8_spill] sm:$0xff] %v1529_v43  ;;  %v1008_v44 = vpop.f32.mrf.mxu0  ;;  %v1059_v43 = vadd.f32 %v1058_v27, %v1057_v25  ;;  %v1068_v27 = vadd.f32 %v1521_v39, %v1517_v37  ;;  %v1062_v37 = vadd.f32 %v1505_v31, %v1501_v29 }
 0x104   :  { %v1072_v45 = vpop.f32.mrf.mxu1 }
 0x105   :  { %v1009_v46 = vpop.f32.mrf.mxu0 }
 0x106   :  { %v1073_v47 = vpop.f32.mrf.mxu1  ;;  %v1010_v34 = vadd.f32 %v1009_v46, %v1008_v44 }
 0x107   :  { %v1011_v48 = vpop.f32.mrf.mxu0 }
 0x108   :  { %v1075_v49 = vpop.f32.mrf.mxu1  ;;  %v1630_v29 = vld [vmem:[#allocation6_spill] sm:$0xff] }
 0x109   :  { %v1012_v50 = vpop.f32.mrf.mxu0 }
 0x10a   :  { %v1076_v51 = vpop.f32.mrf.mxu1  ;;  %v1013_v44 = vadd.f32 %v1012_v50, %v1011_v48  ;;  %v1631_v31 = vld [vmem:[#allocation8_spill] sm:$0xff] }
 0x10b   :  { %v1014_v52 = vpop.f32.mrf.mxu0 }
 0x10c   :  { %v1078_v53 = vpop.f32.mrf.mxu1 }
 0x10d   :  { %v1015_v54 = vpop.f32.mrf.mxu0 }
 0x10e   :  { %v1079_v55 = vpop.f32.mrf.mxu1  ;;  %v1016_v10 = vadd.f32 %v1015_v54, %v1014_v52  ;;  %v989_v52 = vadd.f32 %v1495_v18, %v1491_v16  ;;  %v1071_v54 = vadd.f32 %v1631_v31, %v1630_v29 }
 0x10f   :  { %v1017_v56 = vpop.f32.mrf.mxu0  ;;  %v1080_v11 = vadd.f32 %v1079_v55, %v1078_v53 }
 0x110   :  { %v1081_v57 = vpop.f32.mrf.mxu1 }
 0x111   :  { %v1018_v58 = vpop.f32.mrf.mxu0  ;;  %v745_v23 = vadd.f32 %v1080_v11, %v1016_v10 }
 0x112   :  { %v1082_v59 = vpop.f32.mrf.mxu1  ;;  %v1019_v20 = vadd.f32 %v1018_v58, %v1017_v56 }
 0x113   :  { %v1020_v60 = vpop.f32.mrf.mxu0  ;;  %v1083_v21 = vadd.f32 %v1082_v59, %v1081_v57 }
 0x114   :  { %v1084_v61 = vpop.f32.mrf.mxu1 }
 0x115   :  { %v1021_v62 = vpop.f32.mrf.mxu0 }
 0x116   :  { %v1085_v63 = vpop.f32.mrf.mxu1  ;;  %v1022_v48 = vadd.f32 %v1021_v62, %v1020_v60 }
 0x117   :  { %v1531_v0 = vpop.f32.mrf.mxu0 }
 0x118   :  { %1625 = vst [vmem:[#allocation9_spill] sm:$0xff] %v1531_v0  ;;  %v1533_v1 = vpop.f32.mrf.mxu1  ;;  %v1050_v0 = vadd.f32 %v1489_v15, %v1485_v13 }
 0x119   :  { %1626 = vst [vmem:[#allocation10_spill] sm:$0xff] %v1533_v1  ;;  %v1535_v2 = vpop.f32.mrf.mxu0 }
 0x11a   :  { %1627 = vst [vmem:[#allocation11_spill] sm:$0xff] %v1535_v2  ;;  %v1537_v3 = vpop.f32.mrf.mxu1  ;;  %v1074_v2 = vadd.f32 %v1073_v47, %v1072_v45  ;;  %v705_v15 = vadd.f32 %v1050_v0, %v986_v33  ;;  %v1077_v45 = vadd.f32 %v1076_v51, %v1075_v49  ;;  %v748_v47 = vadd.f32 %v1083_v21, %v1019_v20 }
 0x11b   :  { %1628 = vst [vmem:[#allocation12_spill] sm:$0xff] %v1537_v3  ;;  %v1026_v4 = vpop.f32.mrf.mxu0  ;;  %v995_v3 = vadd.f32 %v994_v26, %v993_v24  ;;  %v1004_v26 = vadd.f32 %v1519_v38, %v1515_v36  ;;  %v998_v36 = vadd.f32 %v1503_v30, %v1499_v28  ;;  %v1086_v49 = vadd.f32 %v1085_v63, %v1084_v61  ;;  %v1629_v28 = vld [vmem:[#allocation7_spill] sm:$0xff]  ;;  %v1633_v63 = vld [vmem:[#allocation4_spill] sm:$0xff] }
 0x11c   :  { %v1090_v5 = vpop.f32.mrf.mxu1  ;;  %v737_v25 = vadd.f32 %v1074_v2, %v1010_v34  ;;  %v740_v53 = vadd.f32 %v1077_v45, %v1013_v44  ;;  %v1007_v30 = vadd.f32 %v1629_v28, %v1523_v40  ;;  %v1632_v40 = vld [vmem:[#allocation2_spill] sm:$0xff]  ;;  %v1634_v2 = vld [vmem:[#allocation3_spill] sm:$0xff] }
 0x11d   :  { %v1027_v6 = vpop.f32.mrf.mxu0  ;;  %v716_v18 = vadd.f32 %v1059_v43, %v995_v3  ;;  %v708_v43 = vadd.f32 %v1053_v12, %v989_v52  ;;  %v729_v57 = vadd.f32 %v1068_v27, %v1004_v26  ;;  %v1001_v0 = vadd.f32 %v1633_v63, %v1632_v40  ;;  %v1635_v3 = vld [vmem:[#allocation5_spill] sm:$0xff] }
 0x11e   :  { %v1091_v9 = vpop.f32.mrf.mxu1  ;;  %v1028_v19 = vadd.f32 %v1027_v6, %v1026_v4  ;;  %v1065_v4 = vadd.f32 %v1635_v3, %v1634_v2  ;;  %v753_v20 = vadd.f32 %v1086_v49, %v1022_v48 }
 0x11f   :  { %v1029_v35 = vpop.f32.mrf.mxu0  ;;  %v1092_v33 = vadd.f32 %v1091_v9, %v1090_v5 }
 0x120   :  { %v1093_v1 = vpop.f32.mrf.mxu1  ;;  %v1638_v7 = vld [vmem:[#allocation10_spill] sm:$0xff]  ;;  %v724_v44 = vadd.f32 %v1065_v4, %v1001_v0 }
 0x121   :  { %v1030_v32 = vpop.f32.mrf.mxu0  ;;  %v761_v62 = vadd.f32 %v1092_v33, %v1028_v19 }
 0x122   :  { %v1094_v41 = vpop.f32.mrf.mxu1  ;;  %v1031_v58 = vadd.f32 %v1030_v32, %v1029_v35  ;;  %v721_v35 = vadd.f32 %v1062_v37, %v998_v36  ;;  %v1639_v8 = vld [vmem:[#allocation12_spill] sm:$0xff] }
 0x123   :  { %v1118_v22 = vpop.f32.mrf.mxu0  ;;  %v1095_v59 = vadd.f32 %v1094_v41, %v1093_v1  ;;  %v1636_v41 = vld [vmem:[#allocation9_spill] sm:$0xff]  ;;  %v1637_v1 = vld [vmem:[#allocation11_spill] sm:$0xff]  ;;  %v1089_v9 = vadd.f32 %v1639_v8, %v1638_v7 }
 0x124   :  { %v810_v14 = vadd.f32 %v1118_v22, %v713_v42  ;;  %v1126_v13 = vpop.f32.mrf.mxu1  ;;  %v1025_v6 = vadd.f32 %v1637_v1, %v1636_v41 }
 0x125   :  { %v842_v46 = vadd.f32 %v1126_v13, %v745_v23  ;;  %v801_v24 = vpop.f32.mrf.mxu0  ;;  %v732_v23 = vadd.f32 %v1071_v54, %v1007_v30 }
 0x126   :  { %866 = vst [vmem:[%s1617_s2 + $0x10] sm:$0xff] %v810_v14  ;;  %v802_v16 = vadd.f32 %v801_v24, %v705_v15  ;;  %v833_v17 = vpop.f32.mrf.mxu1  ;;  %v764_v14 = vadd.f32 %v1095_v59, %v1031_v58  ;;  %v756_v24 = vadd.f32 %v1089_v9, %v1025_v6 }
 0x127   :  { %874 = vst [vmem:[%s1617_s2 + $0x50] sm:$0xff] %v842_v46  ;;  %v834_v34 = vadd.f32 %v833_v17, %v737_v25  ;;  %v1119_v42 = vpop.f32.mrf.mxu0 }
 0x128   :  { %864 = vst [vmem:[%s1617_s2] sm:$0xff] %v802_v16  ;;  %v813_v38 = vadd.f32 %v1119_v42, %v716_v18  ;;  %v1127_v39 = vpop.f32.mrf.mxu1 }
 0x129   :  { %872 = vst [vmem:[%s1617_s2 + $0x40] sm:$0xff] %v834_v34  ;;  %v845_v50 = vadd.f32 %v1127_v39, %v748_v47  ;;  %v804_v51 = vpop.f32.mrf.mxu0 }
 0x12a   :  { %867 = vst [vmem:[%s1617_s2 + $0x18] sm:$0xff] %v813_v38  ;;  %v805_v55 = vadd.f32 %v804_v51, %v708_v43  ;;  %v836_v56 = vpop.f32.mrf.mxu1 }
 0x12b   :  { %875 = vst [vmem:[%s1617_s2 + $0x58] sm:$0xff] %v845_v50  ;;  %v837_v60 = vadd.f32 %v836_v56, %v740_v53  ;;  %v1122_v61 = vpop.f32.mrf.mxu0 }
 0x12c   :  { %865 = vst [vmem:[%s1617_s2 + $0x8] sm:$0xff] %v805_v55  ;;  %v826_v5 = vadd.f32 %v1122_v61, %v729_v57  ;;  %v1130_v32 = vpop.f32.mrf.mxu1 }
 0x12d   :  { %873 = vst [vmem:[%s1617_s2 + $0x48] sm:$0xff] %v837_v60  ;;  %v858_v10 = vadd.f32 %v1130_v32, %v761_v62  ;;  %v817_v11 = vpop.f32.mrf.mxu0 }
 0x12e   :  { %870 = vst [vmem:[%s1617_s2 + $0x30] sm:$0xff] %v826_v5  ;;  %v818_v21 = vadd.f32 %v817_v11, %v721_v35  ;;  %v849_v22 = vpop.f32.mrf.mxu1 }
 0x12f   :  { %878 = vst [vmem:[%s1617_s2 + $0x70] sm:$0xff] %v858_v10  ;;  %v850_v52 = vadd.f32 %v849_v22, %v753_v20  ;;  %v1123_v12 = vpop.f32.mrf.mxu0 }
 0x130   :  { %868 = vst [vmem:[%s1617_s2 + $0x20] sm:$0xff] %v818_v21  ;;  %v829_v13 = vadd.f32 %v1123_v12, %v732_v23  ;;  %v1131_v15 = vpop.f32.mrf.mxu1 }
 0x131   :  { %876 = vst [vmem:[%s1617_s2 + $0x60] sm:$0xff] %v850_v52  ;;  %v861_v45 = vadd.f32 %v1131_v15, %v764_v14  ;;  %v820_v46 = vpop.f32.mrf.mxu0 }
 0x132   :  { %871 = vst [vmem:[%s1617_s2 + $0x38] sm:$0xff] %v829_v13  ;;  %v821_v25 = vadd.f32 %v820_v46, %v724_v44  ;;  %v852_v26 = vpop.f32.mrf.mxu1 }
 0x133   :  { %879 = vst [vmem:[%s1617_s2 + $0x78] sm:$0xff] %v861_v45  ;;  %v853_v27 = vadd.f32 %v852_v26, %v756_v24 }
 0x134   :  { %869 = vst [vmem:[%s1617_s2 + $0x28] sm:$0xff] %v821_v25 }
 0x135   :  { %877 = vst [vmem:[%s1617_s2 + $0x68] sm:$0xff] %v853_v27 }

// kernel: densenet_forward.64
= control target key start
LH: loop header
LB: loop body
LE: loop exit
PB: predicated region body
PF: predicated region fallthrough
CT: control target
= control target key end

     0   :  { %vm14_vm0 = vcmask 385024   ;;  %vm34_vm1 = vcmask 392192   ;;  %v140_v0 = vmov 0.0   ;;  %s258_s0 = inlined_call_operand.vmem [shape: f32[128,48], index: 0, kind: input, shape index: {}]   ;;  %s259_s1 = inlined_call_operand.vmem [shape: f32[1,48], index: 1, kind: output, shape index: {0}]   ;;  %s260_s2 = inlined_call_operand.vmem [shape: f32[1,48], index: 2, kind: output, shape index: {1}]  }
   0x1   :  { %15 = vst.msk [vmem:[%s259_s1] sm:$0x1] %vm14_vm0, %v140_v0  ;;  %v17_v1 = vld [vmem:[%s258_s0] sm:$0xff]  ;;  %v18_v2 = vld [vmem:[%s258_s0 + $0x8] sm:$0xff]  ;;  %v19_v3 = vld [vmem:[%s258_s0 + $0x10] sm:$0xff] }
   0x2   :  { %16 = vst.msk [vmem:[%s260_s2] sm:$0x1] %vm14_vm0, %v140_v0  ;;  %v35_v4 = vsel %vm34_vm1, %v17_v1, 0.0  ;;  %v36_v5 = vsel %vm34_vm1, %v18_v2, 0.0  ;;  %v38_v6 = vsel %vm34_vm1, %v19_v3, 0.0  ;;  %v20_v7 = vld [vmem:[%s258_s0 + $0x18] sm:$0xff]  ;;  %v76_v15 = vmul.f32 %v17_v1, %v17_v1 }
   0x3   :  { %v37_v8 = vadd.f32 %v36_v5, %v35_v4  ;;  %v40_v9 = vsel %vm34_vm1, %v20_v7, 0.0  ;;  %v21_v10 = vld [vmem:[%s258_s0 + $0x20] sm:$0xff]  ;;  %v22_v13 = vld [vmem:[%s258_s0 + $0x28] sm:$0xff]  ;;  %v77_v16 = vmul.f32 %v18_v2, %v18_v2  ;;  %v78_v17 = vmul.f32 %v19_v3, %v19_v3  ;;  %v23_v19 = vld [vmem:[%s258_s0 + $0x30] sm:$0xff] }
   0x4   :  { %v42_v12 = vsel %vm34_vm1, %v21_v10, 0.0  ;;  %v44_v18 = vsel %vm34_vm1, %v22_v13, 0.0  ;;  %v79_v21 = vmul.f32 %v20_v7, %v20_v7  ;;  %v46_v22 = vsel %vm34_vm1, %v23_v19, 0.0  ;;  %v24_v24 = vld [vmem:[%s258_s0 + $0x38] sm:$0xff]  ;;  %v25_v31 = vld [vmem:[%s258_s0 + $0x40] sm:$0xff]  ;;  %v26_v37 = vld [vmem:[%s258_s0 + $0x48] sm:$0xff] }
   0x5   :  { %v39_v11 = vadd.f32 %v38_v6, %v37_v8  ;;  %v80_v23 = vmul.f32 %v21_v10, %v21_v10  ;;  %v92_v26 = vsel %vm34_vm1, %v76_v15, 0.0  ;;  %v93_v27 = vsel %vm34_vm1, %v77_v16, 0.0  ;;  %v27_v43 = vld [vmem:[%s258_s0 + $0x50] sm:$0xff]  ;;  %v28_v49 = vld [vmem:[%s258_s0 + $0x58] sm:$0xff]  ;;  %v29_v55 = vld [vmem:[%s258_s0 + $0x60] sm:$0xff] }
   0x6   :  { %v95_v28 = vsel %vm34_vm1, %v78_v17, 0.0  ;;  %v48_v29 = vsel %vm34_vm1, %v24_v24, 0.0  ;;  %v94_v30 = vadd.f32 %v93_v27, %v92_v26  ;;  %v81_v33 = vmul.f32 %v22_v13, %v22_v13  ;;  %v30_v61 = vld [vmem:[%s258_s0 + $0x68] sm:$0xff]  ;;  %v31_v3 = vld [vmem:[%s258_s0 + $0x70] sm:$0xff] }
   0x7   :  { %v41_v14 = vadd.f32 %v40_v9, %v39_v11  ;;  %v97_v34 = vsel %vm34_vm1, %v79_v21, 0.0  ;;  %v50_v35 = vsel %vm34_vm1, %v25_v31, 0.0  ;;  %v82_v39 = vmul.f32 %v23_v19, %v23_v19  ;;  %v32_v9 = vld [vmem:[%s258_s0 + $0x78] sm:$0xff] }
   0x8   :  { %v96_v36 = vadd.f32 %v95_v28, %v94_v30  ;;  %v99_v40 = vsel %vm34_vm1, %v80_v23, 0.0  ;;  %v52_v41 = vsel %vm34_vm1, %v26_v37, 0.0  ;;  %v83_v45 = vmul.f32 %v24_v24, %v24_v24 }
   0x9   :  { %v43_v20 = vadd.f32 %v42_v12, %v41_v14  ;;  %v101_v46 = vsel %vm34_vm1, %v81_v33, 0.0  ;;  %v54_v47 = vsel %vm34_vm1, %v27_v43, 0.0  ;;  %v84_v51 = vmul.f32 %v25_v31, %v25_v31 }
   0xa   :  { %v98_v42 = vadd.f32 %v97_v34, %v96_v36  ;;  %v103_v52 = vsel %vm34_vm1, %v82_v39, 0.0  ;;  %v56_v53 = vsel %vm34_vm1, %v28_v49, 0.0  ;;  %v85_v57 = vmul.f32 %v26_v37, %v26_v37  ;;  %v33_v36 = vld [vmem:[%s259_s1] sm:$0x1] }
   0xb   :  { %v45_v25 = vadd.f32 %v44_v18, %v43_v20  ;;  %v105_v58 = vsel %vm34_vm1, %v83_v45, 0.0  ;;  %v58_v59 = vsel %vm34_vm1, %v29_v55, 0.0  ;;  %v86_v63 = vmul.f32 %v27_v43, %v27_v43 }
   0xc   :  { %v100_v48 = vadd.f32 %v99_v40, %v98_v42  ;;  %v107_v0 = vsel %vm34_vm1, %v84_v51, 0.0  ;;  %v60_v1 = vsel %vm34_vm1, %v30_v61, 0.0  ;;  %v87_v5 = vmul.f32 %v28_v49, %v28_v49 }
   0xd   :  { %v47_v32 = vadd.f32 %v46_v22, %v45_v25  ;;  %v109_v6 = vsel %vm34_vm1, %v85_v57, 0.0  ;;  %v62_v7 = vsel %vm34_vm1, %v31_v3, 0.0  ;;  %v88_v11 = vmul.f32 %v29_v55, %v29_v55 }
   0xe   :  { %v102_v54 = vadd.f32 %v101_v46, %v100_v48  ;;  %v111_v12 = vsel %vm34_vm1, %v86_v63, 0.0  ;;  %v64_v13 = vsel %vm34_vm1, %v32_v9, 0.0  ;;  %v89_v16 = vmul.f32 %v30_v61, %v30_v61 }
   0xf   :  { %v49_v38 = vadd.f32 %v48_v29, %v47_v32  ;;  %v113_v17 = vsel %vm34_vm1, %v87_v5, 0.0  ;;  %v90_v20 = vmul.f32 %v31_v3, %v31_v3  ;;  %v115_v21 = vsel %vm34_vm1, %v88_v11, 0.0 }
  0x10   :  { %v104_v60 = vadd.f32 %v103_v52, %v102_v54  ;;  %v91_v24 = vmul.f32 %v32_v9, %v32_v9  ;;  %v117_v25 = vsel %vm34_vm1, %v89_v16, 0.0 }
  0x11   :  { %v51_v44 = vadd.f32 %v50_v35, %v49_v38  ;;  %v119_v28 = vsel %vm34_vm1, %v90_v20, 0.0 }
  0x12   :  { %v106_v2 = vadd.f32 %v105_v58, %v104_v60  ;;  %v121_v31 = vsel %vm34_vm1, %v91_v24, 0.0 }
  0x13   :  { %v53_v50 = vadd.f32 %v52_v41, %v51_v44  ;;  %v75_v44 = vld [vmem:[%s260_s2] sm:$0x1] }
  0x14   :  { %v108_v8 = vadd.f32 %v107_v0, %v106_v2 }
  0x15   :  { %v55_v56 = vadd.f32 %v54_v47, %v53_v50 }
  0x16   :  { %v110_v14 = vadd.f32 %v109_v6, %v108_v8 }
  0x17   :  { %v57_v62 = vadd.f32 %v56_v53, %v55_v56 }
  0x18   :  { %v112_v18 = vadd.f32 %v111_v12, %v110_v14 }
  0x19   :  { %v59_v4 = vadd.f32 %v58_v59, %v57_v62 }
  0x1a   :  { %v114_v22 = vadd.f32 %v113_v17, %v112_v18 }
  0x1b   :  { %v61_v10 = vadd.f32 %v60_v1, %v59_v4 }
  0x1c   :  { %v116_v26 = vadd.f32 %v115_v21, %v114_v22 }
  0x1d   :  { %v63_v15 = vadd.f32 %v62_v7, %v61_v10 }
  0x1e   :  { %v118_v29 = vadd.f32 %v117_v25, %v116_v26 }
  0x1f   :  { %v65_v19 = vadd.f32 %v64_v13, %v63_v15 }
  0x20   :  { %v120_v32 = vadd.f32 %v119_v28, %v118_v29 }
  0x21   :  { %v66_v23 = vrot.slane %v65_v19, 4 }
  0x22   :  { %v122_v34 = vadd.f32 %v121_v31, %v120_v32 }
  0x23   :  { %v67_v27 = vadd.f32 %v66_v23, %v65_v19 }
  0x24   :  { %v123_v37 = vrot.slane %v122_v34, 4 }
  0x25   :  { %v68_v30 = vrot.slane %v67_v27, 2 }
  0x26   :  { %v124_v39 = vadd.f32 %v123_v37, %v122_v34 }
  0x27   :  { %v69_v33 = vadd.f32 %v68_v30, %v67_v27 }
  0x28   :  { %v125_v41 = vrot.slane %v124_v39, 2 }
  0x29   :  { %v70_v35 = vrot.slane %v69_v33, 1 }
  0x2a   :  { %v126_v42 = vadd.f32 %v125_v41, %v124_v39 }
  0x2b   :  { %v71_v38 = vadd.f32 %v70_v35, %v69_v33 }
  0x2c   :  { %v127_v43 = vrot.slane %v126_v42, 1 }
  0x2d   :  { %v72_v40 = vadd.f32 %v71_v38, %v33_v36 }
  0x2e   :  { %v128_v45 = vadd.f32 %v127_v43, %v126_v42 }
  0x2f   :  { %74 = vst.msk [vmem:[%s259_s1] sm:$0x1] %vm14_vm0, %v72_v40 }
  0x30   :  { %v129_v46 = vadd.f32 %v128_v45, %v75_v44 }
  0x32   :  { %130 = vst.msk [vmem:[%s260_s2] sm:$0x1] %vm14_vm0, %v129_v46 }

// kernel: densenet_forward.65
= control target key start
LH: loop header
LB: loop body
LE: loop exit
PB: predicated region body
PF: predicated region fallthrough
CT: control target
= control target key end

     0   :  { %vm128_vm0 = vcmask 392192   ;;  %s505_s3 = inlined_call_operand.vmem [shape: bf16[48,128], index: 3, kind: input, shape index: {}]   ;;  %s506_s0 = inlined_call_operand.vmem [shape: f32[128,48], index: 0, kind: input, shape index: {}]   ;;  %s507_s1 = inlined_call_operand.vmem [shape: f32[1,48], index: 1, kind: input, shape index: {}]   ;;  %s508_s2 = inlined_call_operand.vmem [shape: f32[1,48], index: 2, kind: input, shape index: {}]   ;;  %s509_s4 = inlined_call_operand.vmem [shape: f32[128,128], index: 4, kind: output, shape index: {}]  }
   0x1   :  { %v322_v0 = vld [vmem:[%s505_s3 + $0x10] sm:$0xff]   ;;  %v323_v1 = vld [vmem:[%s505_s3 + $0x8] sm:$0xff]   ;;  %v324_v2 = vld [vmem:[%s505_s3] sm:$0xff]  }
   0x2   :  { %294 = vmatprep.subr.bf16.mxu0 %v322_v0  ;;  %316 = vmatprep.subr.bf16.mxu1 %v322_v0  ;;  %v18_v3 = vld [vmem:[%s506_s0] sm:$0xff]  ;;  %v19_v4 = vld [vmem:[%s506_s0 + $0x8] sm:$0xff]  ;;  %v20_v13 = vld [vmem:[%s506_s0 + $0x10] sm:$0xff] }
   0x3   :  { %295 = vmatpush3.bf16.msra.mxu0 %v322_v0  ;;  %319 = vmatpush3.bf16.msra.mxu1 %v322_v0  ;;  %v368_v5 = vld [vmem:[%s507_s1] ss:$0 sm:$0xff]  ;;  %v27_v10 = vld [vmem:[%s506_s0 + $0x48] sm:$0xff]  ;;  %v21_v14 = vld [vmem:[%s506_s0 + $0x18] sm:$0xff] }
   0x4   :  { %296 = vmatprep.subr.bf16.mxu0 %v323_v1  ;;  %317 = vmatprep.subr.bf16.mxu1 %v323_v1  ;;  %v41_v6 = vmul.f32 %v368_v5, %v18_v3  ;;  %v42_v7 = vmul.f32 %v368_v5, %v19_v4  ;;  %v375_v8 = vld [vmem:[%s508_s2] ss:$0 sm:$0xff]  ;;  %v50_v12 = vmul.f32 %v368_v5, %v27_v10  ;;  %v28_v15 = vld [vmem:[%s506_s0 + $0x50] sm:$0xff]  ;;  %v29_v20 = vld [vmem:[%s506_s0 + $0x58] sm:$0xff] }
   0x5   :  { %v26_v9 = vld [vmem:[%s506_s0 + $0x40] sm:$0xff]  ;;  %v43_v18 = vmul.f32 %v368_v5, %v20_v13  ;;  %v44_v19 = vmul.f32 %v368_v5, %v21_v14  ;;  %v51_v23 = vmul.f32 %v368_v5, %v28_v15  ;;  %v23_v29 = vld [vmem:[%s506_s0 + $0x28] sm:$0xff]  ;;  %v52_v32 = vmul.f32 %v368_v5, %v29_v20  ;;  %v24_v40 = vld [vmem:[%s506_s0 + $0x30] sm:$0xff] }
   0x6   :  { %v49_v11 = vmul.f32 %v368_v5, %v26_v9  ;;  %v64_v16 = vadd.f32 %v375_v8, %v41_v6  ;;  %v65_v17 = vadd.f32 %v375_v8, %v42_v7  ;;  %v73_v22 = vadd.f32 %v375_v8, %v50_v12  ;;  %v22_v24 = vld [vmem:[%s506_s0 + $0x20] sm:$0xff]  ;;  %v31_v35 = vld [vmem:[%s506_s0 + $0x68] sm:$0xff]  ;;  %v25_v41 = vld [vmem:[%s506_s0 + $0x38] sm:$0xff] }
   0x7   :  { %297 = vmatpush3.bf16.msra.mxu0 %v323_v1  ;;  %320 = vmatpush3.bf16.msra.mxu1 %v323_v1  ;;  %v66_v27 = vadd.f32 %v375_v8, %v43_v18  ;;  %v67_v28 = vadd.f32 %v375_v8, %v44_v19  ;;  %v74_v33 = vadd.f32 %v375_v8, %v51_v23  ;;  %v30_v34 = vld [vmem:[%s506_s0 + $0x60] sm:$0xff]  ;;  %v32_v46 = vld [vmem:[%s506_s0 + $0x70] sm:$0xff]  ;;  %v33_v55 = vld [vmem:[%s506_s0 + $0x78] sm:$0xff] }
   0x8   :  { %v72_v21 = vadd.f32 %v375_v8, %v49_v11  ;;  %298 = vmatprep.subr.bf16.mxu0 %v324_v2  ;;  %318 = vmatprep.subr.bf16.mxu1 %v324_v2  ;;  %v80_v25 = vmax.f32 %v64_v16, 0.0  ;;  %v81_v26 = vmax.f32 %v65_v17, 0.0  ;;  %v89_v31 = vmax.f32 %v73_v22, 0.0 }
   0x9   :  { %v82_v37 = vmax.f32 %v66_v27, 0.0  ;;  %v83_v38 = vmax.f32 %v67_v28, 0.0  ;;  %v45_v39 = vmul.f32 %v368_v5, %v22_v24  ;;  %v75_v43 = vadd.f32 %v375_v8, %v52_v32 }
   0xa   :  { %v88_v30 = vmax.f32 %v72_v21, 0.0  ;;  %v96_v36 = vpack.c.bf16 %v81_v26, %v80_v25  ;;  %v90_v44 = vmax.f32 %v74_v33, 0.0  ;;  %v46_v45 = vmul.f32 %v368_v5, %v23_v29 }
   0xb   :  { %299 = vmatpush3.bf16.msra.mxu0 %v324_v2  ;;  %321 = vmatpush3.bf16.msra.mxu1 %v324_v2  ;;  %v97_v47 = vpack.c.bf16 %v83_v38, %v82_v37  ;;  %v68_v48 = vadd.f32 %v375_v8, %v45_v39  ;;  %v53_v49 = vmul.f32 %v368_v5, %v30_v34  ;;  %v91_v51 = vmax.f32 %v75_v43, 0.0 }
   0xc   :  { %v100_v42 = vpack.c.bf16 %v89_v31, %v88_v30  ;;  %300 = vmatprep.mubr.msk.bf16.mxu0 %vm128_vm0, %v96_v36  ;;  %v54_v50 = vmul.f32 %v368_v5, %v31_v35  ;;  %v69_v52 = vadd.f32 %v375_v8, %v46_v45  ;;  %v47_v53 = vmul.f32 %v368_v5, %v24_v40 }
   0xd   :  { %v48_v54 = vmul.f32 %v368_v5, %v25_v41  ;;  %v84_v56 = vmax.f32 %v68_v48, 0.0  ;;  %v76_v57 = vadd.f32 %v375_v8, %v53_v49  ;;  %v55_v59 = vmul.f32 %v368_v5, %v32_v46 }
   0xe   :  { %308 = vmatprep.mubr.msk.bf16.mxu1 %vm128_vm0, %v100_v42  ;;  %301 = vmatmul.mubr.msk.bf16.vlgmr.msra.gmra.mxu0 %vm128_vm0, %v97_v47  ;;  %v77_v58 = vadd.f32 %v375_v8, %v54_v50  ;;  %v101_v60 = vpack.c.bf16 %v91_v51, %v90_v44  ;;  %v85_v61 = vmax.f32 %v69_v52, 0.0  ;;  %v70_v62 = vadd.f32 %v375_v8, %v47_v53 }
   0xf   :  { %v71_v63 = vadd.f32 %v375_v8, %v48_v54  ;;  %v92_v0 = vmax.f32 %v76_v57, 0.0  ;;  %v56_v2 = vmul.f32 %v368_v5, %v33_v55  ;;  %v78_v3 = vadd.f32 %v375_v8, %v55_v59 }
  0x10   :  { %v93_v1 = vmax.f32 %v77_v58, 0.0  ;;  %309 = vmatmul.mubr.msk.bf16.vlgmr.msra.gmra.mxu1 %vm128_vm0, %v101_v60  ;;  %v98_v4 = vpack.c.bf16 %v85_v61, %v84_v56  ;;  %v86_v6 = vmax.f32 %v70_v62, 0.0 }
  0x11   :  { %v87_v7 = vmax.f32 %v71_v63, 0.0  ;;  %v79_v10 = vadd.f32 %v375_v8, %v56_v2  ;;  %v94_v11 = vmax.f32 %v78_v3, 0.0 }
  0x12   :  { %v102_v9 = vpack.c.bf16 %v93_v1, %v92_v0  ;;  %304 = vmatprep.mubr.msk.bf16.mxu0 %vm128_vm0, %v98_v4 }
  0x13   :  { %v99_v12 = vpack.c.bf16 %v87_v7, %v86_v6  ;;  %v95_v13 = vmax.f32 %v79_v10, 0.0 }
  0x14   :  { %312 = vmatprep.mubr.msk.bf16.mxu1 %vm128_vm0, %v102_v9 }
  0x15   :  { %v103_v5 = vpack.c.bf16 %v95_v13, %v94_v11 }
  0x16   :  { %305 = vmatmul.mubr.msk.bf16.gmra.mxu0 %vm128_vm0, %v99_v12 }
  0x18   :  { %313 = vmatmul.mubr.msk.bf16.gmra.mxu1 %vm128_vm0, %v103_v5 }
  0xce   :  { %v302_v14 = vpop.f32.mrf.mxu0 }
  0xcf   :  { %252 = vst [vmem:[%s509_s4 + $0x10] sm:$0xff] %v302_v14 }
  0xd0   :  { %v187_v15 = vpop.f32.mrf.mxu0  ;;  %v310_v16 = vpop.f32.mrf.mxu1 }
  0xd1   :  { %250 = vst [vmem:[%s509_s4] sm:$0xff] %v187_v15  ;;  %260 = vst [vmem:[%s509_s4 + $0x50] sm:$0xff] %v310_v16 }
  0xd2   :  { %v303_v8 = vpop.f32.mrf.mxu0  ;;  %v219_v17 = vpop.f32.mrf.mxu1 }
  0xd3   :  { %253 = vst [vmem:[%s509_s4 + $0x18] sm:$0xff] %v303_v8  ;;  %258 = vst [vmem:[%s509_s4 + $0x40] sm:$0xff] %v219_v17 }
  0xd4   :  { %v190_v18 = vpop.f32.mrf.mxu0  ;;  %v311_v19 = vpop.f32.mrf.mxu1 }
  0xd5   :  { %251 = vst [vmem:[%s509_s4 + $0x8] sm:$0xff] %v190_v18  ;;  %261 = vst [vmem:[%s509_s4 + $0x58] sm:$0xff] %v311_v19 }
  0xd6   :  { %v306_v20 = vpop.f32.mrf.mxu0  ;;  %v222_v21 = vpop.f32.mrf.mxu1 }
  0xd7   :  { %256 = vst [vmem:[%s509_s4 + $0x30] sm:$0xff] %v306_v20  ;;  %259 = vst [vmem:[%s509_s4 + $0x48] sm:$0xff] %v222_v21 }
  0xd8   :  { %v203_v22 = vpop.f32.mrf.mxu0  ;;  %v314_v23 = vpop.f32.mrf.mxu1 }
  0xd9   :  { %254 = vst [vmem:[%s509_s4 + $0x20] sm:$0xff] %v203_v22  ;;  %264 = vst [vmem:[%s509_s4 + $0x70] sm:$0xff] %v314_v23 }
  0xda   :  { %v307_v24 = vpop.f32.mrf.mxu0  ;;  %v235_v25 = vpop.f32.mrf.mxu1 }
  0xdb   :  { %257 = vst [vmem:[%s509_s4 + $0x38] sm:$0xff] %v307_v24  ;;  %262 = vst [vmem:[%s509_s4 + $0x60] sm:$0xff] %v235_v25 }
  0xdc   :  { %v206_v26 = vpop.f32.mrf.mxu0  ;;  %v315_v27 = vpop.f32.mrf.mxu1 }
  0xdd   :  { %255 = vst [vmem:[%s509_s4 + $0x28] sm:$0xff] %v206_v26  ;;  %265 = vst [vmem:[%s509_s4 + $0x78] sm:$0xff] %v315_v27 }
  0xde   :  { %v238_v28 = vpop.f32.mrf.mxu1 }
  0xdf   :  { %263 = vst [vmem:[%s509_s4 + $0x68] sm:$0xff] %v238_v28 }

// kernel: densenet_forward.70
= control target key start
LH: loop header
LB: loop body
LE: loop exit
PB: predicated region body
PF: predicated region fallthrough
CT: control target
= control target key end

     0   :  { %vm92_vm0 = vcmask 523264   ;;  %vm142_vm1 = vcmask 519168   ;;  %s303_s0 = inlined_call_operand.vmem [shape: f32[4,32,64], index: 0, kind: input, shape index: {}]   ;;  %s304_s1 = inlined_call_operand.vmem [shape: f32[1,64], index: 1, kind: input, shape index: {}]   ;;  %s305_s2 = inlined_call_operand.vmem [shape: f32[1,64], index: 2, kind: input, shape index: {}]   ;;  %s306_s3 = inlined_call_operand.vmem [shape: bf16[32,64], index: 3, kind: output, shape index: {}]  }
   0x1   :  { %v14_v0 = vld [vmem:[%s303_s0] sm:$0xff]  ;;  %v15_v10 = vld [vmem:[%s303_s0 + $0x8] sm:$0xff]  ;;  %v16_v33 = vld [vmem:[%s303_s0 + $0x10] sm:$0xff] }
   0x2   :  { %v18_v1 = vld [vmem:[%s303_s0 + $0x20] sm:$0xff]  ;;  %v19_v11 = vld [vmem:[%s303_s0 + $0x28] sm:$0xff]  ;;  %v20_v34 = vld [vmem:[%s303_s0 + $0x30] sm:$0xff] }
   0x3   :  { %v22_v2 = vld [vmem:[%s303_s0 + $0x40] sm:$0xff]  ;;  %v23_v12 = vld [vmem:[%s303_s0 + $0x48] sm:$0xff]  ;;  %v24_v39 = vld [vmem:[%s303_s0 + $0x50] sm:$0xff] }
   0x4   :  { %v26_v3 = vld [vmem:[%s303_s0 + $0x60] sm:$0xff]  ;;  %v27_v13 = vld [vmem:[%s303_s0 + $0x68] sm:$0xff]  ;;  %v28_v40 = vld [vmem:[%s303_s0 + $0x70] sm:$0xff] }
   0x5   :  { %v196_v4 = vld [vmem:[%s304_s1] ss:$0 sm:$0xff]  ;;  %v17_v45 = vld [vmem:[%s303_s0 + $0x18] sm:$0xff] }
   0x6   :  { %v201_v5 = vld [vmem:[%s305_s2] ss:$0 sm:$0xff]  ;;  %v37_v6 = vmul.f32 %v196_v4, %v14_v0  ;;  %v41_v7 = vmul.f32 %v196_v4, %v18_v1  ;;  %v45_v8 = vmul.f32 %v196_v4, %v22_v2  ;;  %v49_v9 = vmul.f32 %v196_v4, %v26_v3  ;;  %v21_v50 = vld [vmem:[%s303_s0 + $0x38] sm:$0xff] }
   0x7   :  { %v38_v14 = vmul.f32 %v196_v4, %v15_v10  ;;  %v42_v15 = vmul.f32 %v196_v4, %v19_v11  ;;  %v46_v16 = vmul.f32 %v196_v4, %v23_v12  ;;  %v50_v21 = vmul.f32 %v196_v4, %v27_v13  ;;  %v25_v55 = vld [vmem:[%s303_s0 + $0x58] sm:$0xff] }
   0x8   :  { %v60_v17 = vadd.f32 %v201_v5, %v37_v6  ;;  %v64_v18 = vadd.f32 %v201_v5, %v41_v7  ;;  %v68_v19 = vadd.f32 %v201_v5, %v45_v8  ;;  %v72_v20 = vadd.f32 %v201_v5, %v49_v9  ;;  %v29_v59 = vld [vmem:[%s303_s0 + $0x78] sm:$0xff] }
   0x9   :  { %v61_v22 = vadd.f32 %v201_v5, %v38_v14  ;;  %v65_v23 = vadd.f32 %v201_v5, %v42_v15  ;;  %v69_v24 = vadd.f32 %v201_v5, %v46_v16  ;;  %v73_v29 = vadd.f32 %v201_v5, %v50_v21 }
   0xa   :  { %v76_v25 = vmax.f32 %v60_v17, 0.0  ;;  %v80_v26 = vmax.f32 %v64_v18, 0.0  ;;  %v84_v27 = vmax.f32 %v68_v19, 0.0  ;;  %v88_v28 = vmax.f32 %v72_v20, 0.0 }
   0xb   :  { %v77_v30 = vmax.f32 %v61_v22, 0.0  ;;  %v81_v31 = vmax.f32 %v65_v23, 0.0  ;;  %v85_v32 = vmax.f32 %v69_v24, 0.0  ;;  %v89_v42 = vmax.f32 %v73_v29, 0.0 }
   0xc   :  { %v93_v35 = vsel %vm92_vm0, %v76_v25, 0.0  ;;  %v94_v36 = vsel %vm92_vm0, %v80_v26, 0.0  ;;  %v96_v37 = vsel %vm92_vm0, %v84_v27, 0.0  ;;  %v98_v38 = vsel %vm92_vm0, %v88_v28, 0.0 }
   0xd   :  { %v95_v41 = vadd.f32 %v94_v36, %v93_v35  ;;  %v100_v43 = vsel %vm92_vm0, %v77_v30, 0.0  ;;  %v101_v44 = vsel %vm92_vm0, %v81_v31, 0.0  ;;  %v103_v47 = vsel %vm92_vm0, %v85_v32, 0.0 }
   0xe   :  { %v102_v46 = vadd.f32 %v101_v44, %v100_v43  ;;  %v39_v48 = vmul.f32 %v196_v4, %v16_v33  ;;  %v43_v49 = vmul.f32 %v196_v4, %v20_v34  ;;  %v105_v52 = vsel %vm92_vm0, %v89_v42, 0.0 }
   0xf   :  { %v97_v51 = vadd.f32 %v96_v37, %v95_v41  ;;  %v47_v53 = vmul.f32 %v196_v4, %v24_v39  ;;  %v51_v54 = vmul.f32 %v196_v4, %v28_v40  ;;  %v40_v60 = vmul.f32 %v196_v4, %v17_v45 }
  0x10   :  { %v104_v56 = vadd.f32 %v103_v47, %v102_v46  ;;  %v62_v57 = vadd.f32 %v201_v5, %v39_v48  ;;  %v66_v58 = vadd.f32 %v201_v5, %v43_v49  ;;  %v44_v0 = vmul.f32 %v196_v4, %v21_v50 }
  0x11   :  { %v99_v61 = vadd.f32 %v98_v38, %v97_v51  ;;  %v70_v62 = vadd.f32 %v201_v5, %v47_v53  ;;  %v74_v63 = vadd.f32 %v201_v5, %v51_v54  ;;  %v48_v6 = vmul.f32 %v196_v4, %v25_v55 }
  0x12   :  { %v106_v1 = vadd.f32 %v105_v52, %v104_v56  ;;  %v78_v2 = vmax.f32 %v62_v57, 0.0  ;;  %v82_v3 = vmax.f32 %v66_v58, 0.0  ;;  %v52_v10 = vmul.f32 %v196_v4, %v29_v59 }
  0x13   :  { %v122_v7 = vmul.f32 0.25, %v99_v61  ;;  %v86_v8 = vmax.f32 %v70_v62, 0.0  ;;  %v90_v9 = vmax.f32 %v74_v63, 0.0  ;;  %v63_v14 = vadd.f32 %v201_v5, %v40_v60 }
  0x14   :  { %v123_v11 = vmul.f32 0.25, %v106_v1  ;;  %v107_v12 = vsel %vm92_vm0, %v78_v2, 0.0  ;;  %v108_v13 = vsel %vm92_vm0, %v82_v3, 0.0  ;;  %v67_v20 = vadd.f32 %v201_v5, %v44_v0 }
  0x15   :  { %v157_v15 = vpack.c.bf16 %v122_v7, %v122_v7  ;;  %v109_v16 = vadd.f32 %v108_v13, %v107_v12  ;;  %v110_v17 = vsel %vm92_vm0, %v86_v8, 0.0  ;;  %v112_v18 = vsel %vm92_vm0, %v90_v9, 0.0 }
  0x16   :  { %v158_v19 = vpack.c.bf16 %v123_v11, %v123_v11  ;;  %v71_v21 = vadd.f32 %v201_v5, %v48_v6  ;;  %v75_v4 = vadd.f32 %v201_v5, %v52_v10  ;;  %v79_v23 = vmax.f32 %v63_v14, 0.0 }
  0x17   :  { %143 = vst.msk [vmem:[%s306_s3] sm:$0xf] %vm142_vm1, %v157_v15  ;;  %v111_v22 = vadd.f32 %v110_v17, %v109_v16  ;;  %v83_v24 = vmax.f32 %v67_v20, 0.0 }
  0x18   :  { %144 = vst.msk [vmem:[%s306_s3 + $0x4] sm:$0xf] %vm142_vm1, %v158_v19  ;;  %v87_v25 = vmax.f32 %v71_v21, 0.0  ;;  %v91_v26 = vmax.f32 %v75_v4, 0.0  ;;  %v114_v28 = vsel %vm92_vm0, %v79_v23, 0.0 }
  0x19   :  { %v113_v27 = vadd.f32 %v112_v18, %v111_v22  ;;  %v115_v5 = vsel %vm92_vm0, %v83_v24, 0.0 }
  0x1a   :  { %v117_v29 = vsel %vm92_vm0, %v87_v25, 0.0  ;;  %v116_v31 = vadd.f32 %v115_v5, %v114_v28  ;;  %v119_v32 = vsel %vm92_vm0, %v91_v26, 0.0 }
  0x1b   :  { %v124_v30 = vmul.f32 0.25, %v113_v27 }
  0x1c   :  { %v118_v34 = vadd.f32 %v117_v29, %v116_v31 }
  0x1d   :  { %v159_v33 = vpack.c.bf16 %v124_v30, %v124_v30 }
  0x1e   :  { %v120_v35 = vadd.f32 %v119_v32, %v118_v34 }
  0x1f   :  { %145 = vst.msk [vmem:[%s306_s3 + $0x8] sm:$0xf] %vm142_vm1, %v159_v33 }
  0x20   :  { %v125_v36 = vmul.f32 0.25, %v120_v35 }
  0x22   :  { %v160_v37 = vpack.c.bf16 %v125_v36, %v125_v36 }
  0x24   :  { %146 = vst.msk [vmem:[%s306_s3 + $0xc] sm:$0xf] %vm142_vm1, %v160_v37 }

// kernel: densenet_forward.71
= control target key start
LH: loop header
LB: loop body
LE: loop exit
PB: predicated region body
PF: predicated region fallthrough
CT: control target
= control target key end

     0   :  { %vm58_vm0 = vcmask 523264   ;;  %s199_s1 = inlined_call_operand.vmem [shape: bf16[64,128], index: 1, kind: input, shape index: {}]   ;;  %s200_s0 = inlined_call_operand.vmem [shape: bf16[32,64], index: 0, kind: input, shape index: {}]   ;;  %s201_s2 = inlined_call_operand.vmem [shape: f32[32,128], index: 2, kind: output, shape index: {}]  }
   0x1   :  { %v148_v0 = vld [vmem:[%s199_s1 + $0x18] sm:$0xff]   ;;  %v149_v1 = vld [vmem:[%s199_s1 + $0x10] sm:$0xff]   ;;  %v150_v2 = vld [vmem:[%s199_s1 + $0x8] sm:$0xff]  }
   0x2   :  { %136 = vmatprep.subr.bf16.mxu0 %v148_v0  ;;  %v152_v3 = vld [vmem:[%s200_s0] sm:$0xff]   ;;  %v153_v5 = vld [vmem:[%s200_s0 + $0x8] sm:$0xff]  }
   0x3   :  { %137 = vmatpush3.bf16.msra.mxu0 %v148_v0  ;;  %144 = vmatprep.mubr.msk.bf16.mxu0 %vm58_vm0, %v152_v3  ;;  %v151_v4 = vld [vmem:[%s199_s1] sm:$0xff]  }
   0x4   :  { %138 = vmatprep.subr.bf16.mxu0 %v149_v1 }
   0x7   :  { %139 = vmatpush3.bf16.msra.mxu0 %v149_v1 }
   0x8   :  { %140 = vmatprep.subr.bf16.mxu0 %v150_v2 }
   0xb   :  { %141 = vmatpush3.bf16.msra.mxu0 %v150_v2 }
   0xc   :  { %142 = vmatprep.subr.bf16.mxu0 %v151_v4 }
   0xf   :  { %143 = vmatpush3.bf16.msra.mxu0 %v151_v4 }
  0x12   :  { %145 = vmatmul.mubr.msk.bf16.vlgmr.msra.gmra.mxu0 %vm58_vm0, %v153_v5 }
  0xd2   :  { %v146_v6 = vpop.f32.mrf.mxu0 }
  0xd3   :  { %116 = vst [vmem:[%s201_s2 + $0x10] sm:$0xff] %v146_v6 }
  0xd4   :  { %v99_v7 = vpop.f32.mrf.mxu0 }
  0xd5   :  { %114 = vst [vmem:[%s201_s2] sm:$0xff] %v99_v7 }
  0xd6   :  { %v147_v8 = vpop.f32.mrf.mxu0 }
  0xd7   :  { %117 = vst [vmem:[%s201_s2 + $0x18] sm:$0xff] %v147_v8 }
  0xd8   :  { %v102_v9 = vpop.f32.mrf.mxu0 }
  0xd9   :  { %115 = vst [vmem:[%s201_s2 + $0x8] sm:$0xff] %v102_v9 }

// kernel: densenet_forward.72
= control target key start
LH: loop header
LB: loop body
LE: loop exit
PB: predicated region body
PF: predicated region fallthrough
CT: control target
= control target key end

     0   :  { %vm14_vm0 = vcmask 253952   ;;  %vm22_vm1 = vcmask 261120   ;;  %v68_v0 = vmov 0.0   ;;  %s126_s0 = inlined_call_operand.vmem [shape: f32[32,32], index: 0, kind: input, shape index: {}]   ;;  %s127_s1 = inlined_call_operand.vmem [shape: f32[1,32], index: 1, kind: output, shape index: {0}]   ;;  %s128_s2 = inlined_call_operand.vmem [shape: f32[1,32], index: 2, kind: output, shape index: {1}]  }
   0x1   :  { %15 = vst.msk [vmem:[%s127_s1] sm:$0x1] %vm14_vm0, %v68_v0  ;;  %v17_v1 = vld [vmem:[%s126_s0] sm:$0xff]  ;;  %v18_v2 = vld [vmem:[%s126_s0 + $0x8] sm:$0xff]  ;;  %v19_v3 = vld [vmem:[%s126_s0 + $0x10] sm:$0xff] }
   0x2   :  { %16 = vst.msk [vmem:[%s128_s2] sm:$0x1] %vm14_vm0, %v68_v0  ;;  %v20_v4 = vld [vmem:[%s126_s0 + $0x18] sm:$0xff]  ;;  %v23_v5 = vsel %vm22_vm1, %v17_v1, 0.0  ;;  %v24_v6 = vsel %vm22_vm1, %v18_v2, 0.0  ;;  %v26_v7 = vsel %vm22_vm1, %v19_v3, 0.0  ;;  %v40_v8 = vmul.f32 %v17_v1, %v17_v1 }
   0x3   :  { %v25_v9 = vadd.f32 %v24_v6, %v23_v5  ;;  %v41_v10 = vmul.f32 %v18_v2, %v18_v2  ;;  %v42_v11 = vmul.f32 %v19_v3, %v19_v3  ;;  %v28_v12 = vsel %vm22_vm1, %v20_v4, 0.0 }
   0x4   :  { %v43_v13 = vmul.f32 %v20_v4, %v20_v4  ;;  %v44_v14 = vsel %vm22_vm1, %v40_v8, 0.0 }
   0x5   :  { %v27_v15 = vadd.f32 %v26_v7, %v25_v9  ;;  %v45_v16 = vsel %vm22_vm1, %v41_v10, 0.0  ;;  %v47_v17 = vsel %vm22_vm1, %v42_v11, 0.0 }
   0x6   :  { %v46_v18 = vadd.f32 %v45_v16, %v44_v14  ;;  %v49_v20 = vsel %vm22_vm1, %v43_v13, 0.0 }
   0x7   :  { %v29_v19 = vadd.f32 %v28_v12, %v27_v15 }
   0x8   :  { %v48_v21 = vadd.f32 %v47_v17, %v46_v18  ;;  %v21_v31 = vld [vmem:[%s127_s1] sm:$0x1] }
   0x9   :  { %v30_v22 = vrot.slane %v29_v19, 4  ;;  %v39_v36 = vld [vmem:[%s128_s2] sm:$0x1] }
   0xa   :  { %v50_v23 = vadd.f32 %v49_v20, %v48_v21 }
   0xb   :  { %v31_v24 = vadd.f32 %v30_v22, %v29_v19 }
   0xc   :  { %v51_v25 = vrot.slane %v50_v23, 4 }
   0xd   :  { %v32_v26 = vrot.slane %v31_v24, 2 }
   0xe   :  { %v52_v27 = vadd.f32 %v51_v25, %v50_v23 }
   0xf   :  { %v33_v28 = vadd.f32 %v32_v26, %v31_v24 }
  0x10   :  { %v53_v29 = vrot.slane %v52_v27, 2 }
  0x11   :  { %v34_v30 = vrot.slane %v33_v28, 1 }
  0x12   :  { %v54_v32 = vadd.f32 %v53_v29, %v52_v27 }
  0x13   :  { %v35_v33 = vadd.f32 %v34_v30, %v33_v28 }
  0x14   :  { %v55_v34 = vrot.slane %v54_v32, 1 }
  0x15   :  { %v36_v35 = vadd.f32 %v35_v33, %v21_v31 }
  0x16   :  { %v56_v37 = vadd.f32 %v55_v34, %v54_v32 }
  0x17   :  { %38 = vst.msk [vmem:[%s127_s1] sm:$0x1] %vm14_vm0, %v36_v35 }
  0x18   :  { %v57_v38 = vadd.f32 %v56_v37, %v39_v36 }
  0x1a   :  { %58 = vst.msk [vmem:[%s128_s2] sm:$0x1] %vm14_vm0, %v57_v38 }

// kernel: densenet_forward.73
= control target key start
LH: loop header
LB: loop body
LE: loop exit
PB: predicated region body
PF: predicated region fallthrough
CT: control target
= control target key end

     0   :  { %vm66_vm0 = vcmask 261120   ;;  %s211_s3 = inlined_call_operand.vmem [shape: bf16[32,128], index: 3, kind: input, shape index: {}]   ;;  %s212_s0 = inlined_call_operand.vmem [shape: f32[32,32], index: 0, kind: input, shape index: {}]   ;;  %s213_s1 = inlined_call_operand.vmem [shape: f32[1,32], index: 1, kind: input, shape index: {}]   ;;  %s214_s2 = inlined_call_operand.vmem [shape: f32[1,32], index: 2, kind: input, shape index: {}]   ;;  %s215_s4 = inlined_call_operand.vmem [shape: f32[32,128], index: 4, kind: output, shape index: {}]  }
   0x1   :  { %v148_v0 = vld [vmem:[%s211_s3 + $0x8] sm:$0xff]   ;;  %v149_v1 = vld [vmem:[%s211_s3] sm:$0xff]   ;;  %v20_v8 = vld [vmem:[%s212_s0 + $0x10] sm:$0xff] }
   0x2   :  { %140 = vmatprep.subr.bf16.mxu0 %v148_v0  ;;  %v18_v2 = vld [vmem:[%s212_s0] sm:$0xff]  ;;  %v19_v3 = vld [vmem:[%s212_s0 + $0x8] sm:$0xff]  ;;  %v21_v9 = vld [vmem:[%s212_s0 + $0x18] sm:$0xff] }
   0x3   :  { %v130_v4 = vld [vmem:[%s213_s1] ss:$0 sm:$0xff]  ;;  %141 = vmatpush3.bf16.msra.mxu0 %v148_v0 }
   0x4   :  { %v29_v5 = vmul.f32 %v130_v4, %v18_v2  ;;  %v30_v6 = vmul.f32 %v130_v4, %v19_v3  ;;  %v131_v7 = vld [vmem:[%s214_s2] ss:$0 sm:$0xff]  ;;  %142 = vmatprep.subr.bf16.mxu0 %v149_v1  ;;  %v31_v10 = vmul.f32 %v130_v4, %v20_v8  ;;  %v32_v11 = vmul.f32 %v130_v4, %v21_v9 }
   0x6   :  { %v40_v12 = vadd.f32 %v131_v7, %v29_v5  ;;  %v41_v13 = vadd.f32 %v131_v7, %v30_v6  ;;  %v42_v14 = vadd.f32 %v131_v7, %v31_v10  ;;  %v43_v15 = vadd.f32 %v131_v7, %v32_v11 }
   0x7   :  { %143 = vmatpush3.bf16.msra.mxu0 %v149_v1 }
   0x8   :  { %v44_v16 = vmax.f32 %v40_v12, 0.0  ;;  %v45_v17 = vmax.f32 %v41_v13, 0.0  ;;  %v46_v18 = vmax.f32 %v42_v14, 0.0  ;;  %v47_v19 = vmax.f32 %v43_v15, 0.0 }
   0xa   :  { %v48_v20 = vpack.c.bf16 %v45_v17, %v44_v16  ;;  %v49_v21 = vpack.c.bf16 %v47_v19, %v46_v18 }
   0xc   :  { %144 = vmatprep.mubr.msk.bf16.mxu0 %vm66_vm0, %v48_v20 }
   0xd   :  { %145 = vmatmul.mubr.msk.bf16.vlgmr.msra.gmra.mxu0 %vm66_vm0, %v49_v21 }
  0xcd   :  { %v146_v22 = vpop.f32.mrf.mxu0 }
  0xce   :  { %124 = vst [vmem:[%s215_s4 + $0x10] sm:$0xff] %v146_v22 }
  0xcf   :  { %v107_v23 = vpop.f32.mrf.mxu0 }
  0xd0   :  { %122 = vst [vmem:[%s215_s4] sm:$0xff] %v107_v23 }
  0xd1   :  { %v147_v24 = vpop.f32.mrf.mxu0 }
  0xd2   :  { %125 = vst [vmem:[%s215_s4 + $0x18] sm:$0xff] %v147_v24 }
  0xd3   :  { %v110_v25 = vpop.f32.mrf.mxu0 }
  0xd4   :  { %123 = vst [vmem:[%s215_s4 + $0x8] sm:$0xff] %v110_v25 }

// kernel: densenet_forward.74
= control target key start
LH: loop header
LB: loop body
LE: loop exit
PB: predicated region body
PF: predicated region fallthrough
CT: control target
= control target key end

     0   :  { %vm14_vm0 = vcmask 516096   ;;  %vm22_vm1 = vcmask 523264   ;;  %v68_v0 = vmov 0.0   ;;  %s126_s0 = inlined_call_operand.vmem [shape: f32[32,64], index: 0, kind: input, shape index: {}]   ;;  %s127_s1 = inlined_call_operand.vmem [shape: f32[1,64], index: 1, kind: output, shape index: {0}]   ;;  %s128_s2 = inlined_call_operand.vmem [shape: f32[1,64], index: 2, kind: output, shape index: {1}]  }
   0x1   :  { %15 = vst.msk [vmem:[%s127_s1] sm:$0x1] %vm14_vm0, %v68_v0  ;;  %v17_v1 = vld [vmem:[%s126_s0] sm:$0xff]  ;;  %v18_v2 = vld [vmem:[%s126_s0 + $0x8] sm:$0xff]  ;;  %v19_v3 = vld [vmem:[%s126_s0 + $0x10] sm:$0xff] }
   0x2   :  { %16 = vst.msk [vmem:[%s128_s2] sm:$0x1] %vm14_vm0, %v68_v0  ;;  %v20_v4 = vld [vmem:[%s126_s0 + $0x18] sm:$0xff]  ;;  %v23_v5 = vsel %vm22_vm1, %v17_v1, 0.0  ;;  %v24_v6 = vsel %vm22_vm1, %v18_v2, 0.0  ;;  %v26_v7 = vsel %vm22_vm1, %v19_v3, 0.0  ;;  %v40_v8 = vmul.f32 %v17_v1, %v17_v1 }
   0x3   :  { %v25_v9 = vadd.f32 %v24_v6, %v23_v5  ;;  %v41_v10 = vmul.f32 %v18_v2, %v18_v2  ;;  %v42_v11 = vmul.f32 %v19_v3, %v19_v3  ;;  %v28_v12 = vsel %vm22_vm1, %v20_v4, 0.0 }
   0x4   :  { %v43_v13 = vmul.f32 %v20_v4, %v20_v4  ;;  %v44_v14 = vsel %vm22_vm1, %v40_v8, 0.0 }
   0x5   :  { %v27_v15 = vadd.f32 %v26_v7, %v25_v9  ;;  %v45_v16 = vsel %vm22_vm1, %v41_v10, 0.0  ;;  %v47_v17 = vsel %vm22_vm1, %v42_v11, 0.0 }
   0x6   :  { %v46_v18 = vadd.f32 %v45_v16, %v44_v14  ;;  %v49_v20 = vsel %vm22_vm1, %v43_v13, 0.0 }
   0x7   :  { %v29_v19 = vadd.f32 %v28_v12, %v27_v15 }
   0x8   :  { %v48_v21 = vadd.f32 %v47_v17, %v46_v18  ;;  %v21_v31 = vld [vmem:[%s127_s1] sm:$0x1] }
   0x9   :  { %v30_v22 = vrot.slane %v29_v19, 4  ;;  %v39_v36 = vld [vmem:[%s128_s2] sm:$0x1] }
   0xa   :  { %v50_v23 = vadd.f32 %v49_v20, %v48_v21 }
   0xb   :  { %v31_v24 = vadd.f32 %v30_v22, %v29_v19 }
   0xc   :  { %v51_v25 = vrot.slane %v50_v23, 4 }
   0xd   :  { %v32_v26 = vrot.slane %v31_v24, 2 }
   0xe   :  { %v52_v27 = vadd.f32 %v51_v25, %v50_v23 }
   0xf   :  { %v33_v28 = vadd.f32 %v32_v26, %v31_v24 }
  0x10   :  { %v53_v29 = vrot.slane %v52_v27, 2 }
  0x11   :  { %v34_v30 = vrot.slane %v33_v28, 1 }
  0x12   :  { %v54_v32 = vadd.f32 %v53_v29, %v52_v27 }
  0x13   :  { %v35_v33 = vadd.f32 %v34_v30, %v33_v28 }
  0x14   :  { %v55_v34 = vrot.slane %v54_v32, 1 }
  0x15   :  { %v36_v35 = vadd.f32 %v35_v33, %v21_v31 }
  0x16   :  { %v56_v37 = vadd.f32 %v55_v34, %v54_v32 }
  0x17   :  { %38 = vst.msk [vmem:[%s127_s1] sm:$0x1] %vm14_vm0, %v36_v35 }
  0x18   :  { %v57_v38 = vadd.f32 %v56_v37, %v39_v36 }
  0x1a   :  { %58 = vst.msk [vmem:[%s128_s2] sm:$0x1] %vm14_vm0, %v57_v38 }

// kernel: densenet_forward.75
= control target key start
LH: loop header
LB: loop body
LE: loop exit
PB: predicated region body
PF: predicated region fallthrough
CT: control target
= control target key end

     0   :  { %vm60_vm0 = vcmask 519168   ;;  %s129_s0 = inlined_call_operand.vmem [shape: f32[32,64], index: 0, kind: input, shape index: {}]   ;;  %s130_s1 = inlined_call_operand.vmem [shape: f32[1,64], index: 1, kind: input, shape index: {}]   ;;  %s131_s2 = inlined_call_operand.vmem [shape: f32[1,64], index: 2, kind: input, shape index: {}]   ;;  %s132_s3 = inlined_call_operand.vmem [shape: bf16[32,64], index: 3, kind: output, shape index: {}]  }
   0x1   :  { %v14_v0 = vld [vmem:[%s129_s0] sm:$0xff]  ;;  %v15_v4 = vld [vmem:[%s129_s0 + $0x8] sm:$0xff]  ;;  %v16_v5 = vld [vmem:[%s129_s0 + $0x10] sm:$0xff] }
   0x2   :  { %v69_v1 = vld [vmem:[%s130_s1] ss:$0 sm:$0xff]  ;;  %v17_v6 = vld [vmem:[%s129_s0 + $0x18] sm:$0xff] }
   0x3   :  { %v70_v2 = vld [vmem:[%s131_s2] ss:$0 sm:$0xff]  ;;  %v25_v3 = vmul.f32 %v69_v1, %v14_v0  ;;  %v26_v7 = vmul.f32 %v69_v1, %v15_v4  ;;  %v27_v8 = vmul.f32 %v69_v1, %v16_v5  ;;  %v28_v9 = vmul.f32 %v69_v1, %v17_v6 }
   0x5   :  { %v36_v10 = vadd.f32 %v70_v2, %v25_v3  ;;  %v37_v11 = vadd.f32 %v70_v2, %v26_v7  ;;  %v38_v12 = vadd.f32 %v70_v2, %v27_v8  ;;  %v39_v13 = vadd.f32 %v70_v2, %v28_v9 }
   0x7   :  { %v40_v14 = vmax.f32 %v36_v10, 0.0  ;;  %v41_v15 = vmax.f32 %v37_v11, 0.0  ;;  %v42_v16 = vmax.f32 %v38_v12, 0.0  ;;  %v43_v17 = vmax.f32 %v39_v13, 0.0 }
   0x9   :  { %v75_v18 = vpack.c.bf16 %v40_v14, %v40_v14  ;;  %v76_v19 = vpack.c.bf16 %v41_v15, %v41_v15  ;;  %v77_v20 = vpack.c.bf16 %v42_v16, %v42_v16  ;;  %v78_v21 = vpack.c.bf16 %v43_v17, %v43_v17 }
   0xb   :  { %61 = vst.msk [vmem:[%s132_s3] sm:$0xf] %vm60_vm0, %v75_v18  ;;  %62 = vst.msk [vmem:[%s132_s3 + $0x4] sm:$0xf] %vm60_vm0, %v76_v19 }
   0xc   :  { %63 = vst.msk [vmem:[%s132_s3 + $0x8] sm:$0xf] %vm60_vm0, %v77_v20  ;;  %64 = vst.msk [vmem:[%s132_s3 + $0xc] sm:$0xf] %vm60_vm0, %v78_v21 }

// kernel: densenet_forward.76
= control target key start
LH: loop header
LB: loop body
LE: loop exit
PB: predicated region body
PF: predicated region fallthrough
CT: control target
= control target key end

     0   :  { %vm362_vm0 = vcmask 523264   ;;  %s861_s1 = inlined_call_operand.vmem [shape: bf16[576,128], index: 1, kind: input, shape index: {}]   ;;  %s862_s0 = inlined_call_operand.vmem [shape: bf16[32,576], index: 0, kind: input, shape index: {}]   ;;  %s863_s2 = inlined_call_operand.vmem [shape: f32[32,128], index: 2, kind: output, shape index: {}]  }
   0x1   :  { %v646_v0 = vld [vmem:[%s861_s1 + $0x78] sm:$0xff]   ;;  %v650_v4 = vld [vmem:[%s861_s1 + $0x70] sm:$0xff]   ;;  %v654_v8 = vld [vmem:[%s861_s1 + $0x68] sm:$0xff]  }
   0x2   :  { %v647_v1 = vld [vmem:[%s861_s1 + $0xf8] sm:$0xff]   ;;  %572 = vmatprep.subr.bf16.mxu0 %v646_v0  ;;  %v651_v5 = vld [vmem:[%s861_s1 + $0xf0] sm:$0xff]   ;;  %v655_v9 = vld [vmem:[%s861_s1 + $0xe8] sm:$0xff]  }
   0x3   :  { %v648_v2 = vld [vmem:[%s861_s1 + $0x38] sm:$0xff]   ;;  %600 = vmatprep.subr.bf16.mxu1 %v647_v1  ;;  %v652_v6 = vld [vmem:[%s861_s1 + $0x30] sm:$0xff]   ;;  %v656_v10 = vld [vmem:[%s861_s1 + $0x28] sm:$0xff]  }
   0x4   :  { %v649_v3 = vld [vmem:[%s861_s1 + $0xb8] sm:$0xff]   ;;  %573 = vmatpush3.bf16.msra.mxu0 %v648_v2  ;;  %v653_v7 = vld [vmem:[%s861_s1 + $0xb0] sm:$0xff]   ;;  %v657_v11 = vld [vmem:[%s861_s1 + $0xa8] sm:$0xff]  }
   0x5   :  { %601 = vmatpush3.bf16.msra.mxu1 %v649_v3  ;;  %574 = vmatprep.subr.bf16.mxu0 %v650_v4  ;;  %v658_v12 = vld [vmem:[%s861_s1 + $0x60] sm:$0xff]   ;;  %v662_v16 = vld [vmem:[%s861_s1 + $0x58] sm:$0xff]   ;;  %v666_v20 = vld [vmem:[%s861_s1 + $0x50] sm:$0xff]  }
   0x6   :  { %602 = vmatprep.subr.bf16.mxu1 %v651_v5  ;;  %v659_v13 = vld [vmem:[%s861_s1 + $0xe0] sm:$0xff]   ;;  %v663_v17 = vld [vmem:[%s861_s1 + $0xd8] sm:$0xff]   ;;  %v667_v21 = vld [vmem:[%s861_s1 + $0xd0] sm:$0xff]  }
   0x7   :  { %v660_v14 = vld [vmem:[%s861_s1 + $0x20] sm:$0xff]   ;;  %v664_v18 = vld [vmem:[%s861_s1 + $0x18] sm:$0xff]   ;;  %v668_v22 = vld [vmem:[%s861_s1 + $0x10] sm:$0xff]  }
   0x8   :  { %575 = vmatpush3.bf16.msra.mxu0 %v652_v6  ;;  %v661_v15 = vld [vmem:[%s861_s1 + $0xa0] sm:$0xff]   ;;  %v665_v19 = vld [vmem:[%s861_s1 + $0x98] sm:$0xff]   ;;  %v669_v23 = vld [vmem:[%s861_s1 + $0x90] sm:$0xff]  }
   0x9   :  { %603 = vmatpush3.bf16.msra.mxu1 %v653_v7  ;;  %576 = vmatprep.subr.bf16.mxu0 %v654_v8  ;;  %v670_v24 = vld [vmem:[%s861_s1 + $0x48] sm:$0xff]   ;;  %v674_v28 = vld [vmem:[%s861_s1 + $0x40] sm:$0xff]   ;;  %v684_v36 = vld [vmem:[%s861_s1 + $0x118] sm:$0xff]  }
   0xa   :  { %604 = vmatprep.subr.bf16.mxu1 %v655_v9  ;;  %v671_v25 = vld [vmem:[%s861_s1 + $0xc8] sm:$0xff]   ;;  %v675_v29 = vld [vmem:[%s861_s1 + $0xc0] sm:$0xff]   ;;  %v685_v37 = vld [vmem:[%s861_s1 + $0x110] sm:$0xff]  }
   0xb   :  { %v672_v26 = vld [vmem:[%s861_s1 + $0x8] sm:$0xff]   ;;  %v676_v30 = vld [vmem:[%s861_s1] sm:$0xff]  }
   0xc   :  { %577 = vmatpush3.bf16.msra.mxu0 %v656_v10  ;;  %v673_v27 = vld [vmem:[%s861_s1 + $0x88] sm:$0xff]   ;;  %v677_v31 = vld [vmem:[%s861_s1 + $0x80] sm:$0xff]  }
   0xd   :  { %605 = vmatpush3.bf16.msra.mxu1 %v657_v11  ;;  %578 = vmatprep.subr.bf16.mxu0 %v658_v12  ;;  %v678_v32 = vld [vmem:[%s862_s0] ss:$20 sps:$4 sm:$0xff]   ;;  %v680_v33 = vld [vmem:[%s862_s0 + $0x4] ss:$20 sps:$4 sm:$0xff]   ;;  %v681_v34 = vld [vmem:[%s862_s0 + $0x8] ss:$20 sps:$4 sm:$0xff]  }
   0xe   :  { %606 = vmatprep.subr.bf16.mxu1 %v659_v13  ;;  %v683_v35 = vld [vmem:[%s862_s0 + $0xc] ss:$20 sps:$4 sm:$0xff]   ;;  %401 = vmatprep.mubr.bf16.mxu0 %v680_v33  ;;  %v688_v39 = vld [vmem:[%s862_s0 + $0x34] ss:$20 sps:$4 sm:$0xff]   ;;  %v691_v42 = vld [vmem:[%s862_s0 + $0x30] ss:$20 sps:$4 sm:$0xff]  }
   0xf   :  { %450 = vmatprep.mubr.bf16.mxu1 %v683_v35  ;;  %v686_v38 = vld [vmem:[%s862_s0 + $0x2c] ss:$20 sps:$4 sm:$0xff]   ;;  %v690_v40 = vld [vmem:[%s862_s0 + $0x28] ss:$20 sps:$4 sm:$0xff]   ;;  %v694_v43 = vld [vmem:[%s862_s0 + $0x10] ss:$20 sps:$4 sm:$0xff]  }
  0x10   :  { %579 = vmatpush3.bf16.msra.mxu0 %v660_v14  ;;  %v692_v41 = vld [vmem:[%s861_s1 + $0x108] sm:$0xff]   ;;  %v693_v44 = vld [vmem:[%s861_s1 + $0x100] sm:$0xff]  }
  0x11   :  { %607 = vmatpush3.bf16.msra.mxu1 %v661_v15  ;;  %580 = vmatprep.subr.bf16.mxu0 %v662_v16  ;;  %v695_v45 = vld [vmem:[%s862_s0 + $0x38] ss:$20 sps:$4 sm:$0xff]  }
  0x12   :  { %608 = vmatprep.subr.bf16.mxu1 %v663_v17 }
  0x14   :  { %581 = vmatpush3.bf16.msra.mxu0 %v664_v18 }
  0x15   :  { %609 = vmatpush3.bf16.msra.mxu1 %v665_v19  ;;  %582 = vmatprep.subr.bf16.mxu0 %v666_v20 }
  0x16   :  { %610 = vmatprep.subr.bf16.mxu1 %v667_v21 }
  0x18   :  { %583 = vmatpush3.bf16.msra.mxu0 %v668_v22 }
  0x19   :  { %611 = vmatpush3.bf16.msra.mxu1 %v669_v23  ;;  %584 = vmatprep.subr.bf16.mxu0 %v670_v24 }
  0x1a   :  { %612 = vmatprep.subr.bf16.mxu1 %v671_v25 }
  0x1c   :  { %585 = vmatpush3.bf16.msra.mxu0 %v672_v26 }
  0x1d   :  { %613 = vmatpush3.bf16.msra.mxu1 %v673_v27  ;;  %586 = vmatprep.subr.bf16.mxu0 %v674_v28 }
  0x1e   :  { %614 = vmatprep.subr.bf16.mxu1 %v675_v29 }
  0x20   :  { %587 = vmatpush3.bf16.msra.mxu0 %v676_v30 }
  0x21   :  { %615 = vmatpush3.bf16.msra.mxu1 %v677_v31  ;;  %634 = vmatprep.subr.bf16.mxu0 %v684_v36 }
  0x23   :  { %402 = vmatmul.mubr.bf16.vlgmr.msra.gmra.mxu0 %v678_v32 }
  0x24   :  { %451 = vmatmul.mubr.bf16.vlgmr.msra.gmra.mxu1 %v681_v34  ;;  %635 = vmatpush3.bf16.msra.mxu0 %v684_v36 }
  0x25   :  { %636 = vmatprep.subr.bf16.mxu0 %v685_v37  ;;  %409 = vmatprep.mubr.bf16.mxu0 %v686_v38 }
  0x26   :  { %458 = vmatprep.mubr.bf16.mxu1 %v688_v39 }
  0x28   :  { %637 = vmatpush3.bf16.msra.mxu0 %v685_v37 }
  0x29   :  { %638 = vmatprep.subr.bf16.mxu0 %v692_v41 }
  0x2b   :  { %410 = vmatmul.mubr.bf16.gmra.mxu0 %v690_v40 }
  0x2c   :  { %459 = vmatmul.mubr.bf16.gmra.mxu1 %v691_v42  ;;  %642 = vmatprep.mubr.msk.bf16.mxu0 %vm362_vm0, %v694_v43 }
  0x2d   :  { %639 = vmatpush3.bf16.msra.mxu0 %v692_v41 }
  0x2e   :  { %640 = vmatprep.subr.bf16.mxu0 %v693_v44 }
  0x31   :  { %641 = vmatpush3.bf16.msra.mxu0 %v693_v44 }
  0x34   :  { %643 = vmatmul.mubr.msk.bf16.vlgmr.msra.gmra.mxu0 %vm362_vm0, %v695_v45 }
  0xe3   :  { %v588_v46 = vpop.f32.mrf.mxu0 }
  0xe4   :  { %v616_v47 = vpop.f32.mrf.mxu1 }
  0xe5   :  { %v589_v48 = vpop.f32.mrf.mxu0 }
  0xe6   :  { %v617_v49 = vpop.f32.mrf.mxu1  ;;  %v590_v62 = vadd.f32 %v589_v48, %v588_v46 }
  0xe7   :  { %v591_v50 = vpop.f32.mrf.mxu0  ;;  %v618_v63 = vadd.f32 %v617_v49, %v616_v47 }
  0xe8   :  { %v619_v51 = vpop.f32.mrf.mxu1 }
  0xe9   :  { %v592_v52 = vpop.f32.mrf.mxu0  ;;  %v453_v9 = vadd.f32 %v618_v63, %v590_v62 }
  0xea   :  { %v620_v53 = vpop.f32.mrf.mxu1  ;;  %v593_v6 = vadd.f32 %v592_v52, %v591_v50 }
  0xeb   :  { %v594_v54 = vpop.f32.mrf.mxu0  ;;  %v621_v7 = vadd.f32 %v620_v53, %v619_v51 }
  0xec   :  { %v622_v55 = vpop.f32.mrf.mxu1 }
  0xed   :  { %v595_v56 = vpop.f32.mrf.mxu0  ;;  %v456_v15 = vadd.f32 %v621_v7, %v593_v6 }
  0xee   :  { %v623_v57 = vpop.f32.mrf.mxu1  ;;  %v596_v58 = vadd.f32 %v595_v56, %v594_v54 }
  0xef   :  { %v624_v59 = vadd.f32 %v623_v57, %v622_v55  ;;  %v597_v60 = vpop.f32.mrf.mxu0 }
  0xf0   :  { %v625_v61 = vpop.f32.mrf.mxu1 }
  0xf1   :  { %v598_v0 = vpop.f32.mrf.mxu0  ;;  %v461_v4 = vadd.f32 %v624_v59, %v596_v58 }
  0xf2   :  { %v626_v1 = vpop.f32.mrf.mxu1  ;;  %v599_v2 = vadd.f32 %v598_v0, %v597_v60 }
  0xf3   :  { %v627_v3 = vadd.f32 %v626_v1, %v625_v61 }
  0xf4   :  { %v644_v5 = vpop.f32.mrf.mxu0 }
  0xf5   :  { %v510_v8 = vadd.f32 %v644_v5, %v461_v4  ;;  %v464_v12 = vadd.f32 %v627_v3, %v599_v2 }
  0xf6   :  { %v501_v10 = vpop.f32.mrf.mxu0 }
  0xf7   :  { %518 = vst [vmem:[%s863_s2 + $0x10] sm:$0xff] %v510_v8  ;;  %v502_v11 = vadd.f32 %v501_v10, %v453_v9 }
  0xf8   :  { %v645_v13 = vpop.f32.mrf.mxu0 }
  0xf9   :  { %516 = vst [vmem:[%s863_s2] sm:$0xff] %v502_v11  ;;  %v513_v14 = vadd.f32 %v645_v13, %v464_v12 }
  0xfa   :  { %v504_v16 = vpop.f32.mrf.mxu0 }
  0xfb   :  { %519 = vst [vmem:[%s863_s2 + $0x18] sm:$0xff] %v513_v14  ;;  %v505_v17 = vadd.f32 %v504_v16, %v456_v15 }
  0xfd   :  { %517 = vst [vmem:[%s863_s2 + $0x8] sm:$0xff] %v505_v17 }

// kernel: densenet_forward.77
= control target key start
LH: loop header
LB: loop body
LE: loop exit
PB: predicated region body
PF: predicated region fallthrough
CT: control target
= control target key end

     0   :  { %vm14_vm0 = vcmask 385024   ;;  %vm22_vm1 = vcmask 392192   ;;  %v68_v0 = vmov 0.0   ;;  %s126_s0 = inlined_call_operand.vmem [shape: f32[32,48], index: 0, kind: input, shape index: {}]   ;;  %s127_s1 = inlined_call_operand.vmem [shape: f32[1,48], index: 1, kind: output, shape index: {0}]   ;;  %s128_s2 = inlined_call_operand.vmem [shape: f32[1,48], index: 2, kind: output, shape index: {1}]  }
   0x1   :  { %15 = vst.msk [vmem:[%s127_s1] sm:$0x1] %vm14_vm0, %v68_v0  ;;  %v17_v1 = vld [vmem:[%s126_s0] sm:$0xff]  ;;  %v18_v2 = vld [vmem:[%s126_s0 + $0x8] sm:$0xff]  ;;  %v19_v3 = vld [vmem:[%s126_s0 + $0x10] sm:$0xff] }
   0x2   :  { %16 = vst.msk [vmem:[%s128_s2] sm:$0x1] %vm14_vm0, %v68_v0  ;;  %v20_v4 = vld [vmem:[%s126_s0 + $0x18] sm:$0xff]  ;;  %v23_v5 = vsel %vm22_vm1, %v17_v1, 0.0  ;;  %v24_v6 = vsel %vm22_vm1, %v18_v2, 0.0  ;;  %v26_v7 = vsel %vm22_vm1, %v19_v3, 0.0  ;;  %v40_v8 = vmul.f32 %v17_v1, %v17_v1 }
   0x3   :  { %v25_v9 = vadd.f32 %v24_v6, %v23_v5  ;;  %v41_v10 = vmul.f32 %v18_v2, %v18_v2  ;;  %v42_v11 = vmul.f32 %v19_v3, %v19_v3  ;;  %v28_v12 = vsel %vm22_vm1, %v20_v4, 0.0 }
   0x4   :  { %v43_v13 = vmul.f32 %v20_v4, %v20_v4  ;;  %v44_v14 = vsel %vm22_vm1, %v40_v8, 0.0 }
   0x5   :  { %v27_v15 = vadd.f32 %v26_v7, %v25_v9  ;;  %v45_v16 = vsel %vm22_vm1, %v41_v10, 0.0  ;;  %v47_v17 = vsel %vm22_vm1, %v42_v11, 0.0 }
   0x6   :  { %v46_v18 = vadd.f32 %v45_v16, %v44_v14  ;;  %v49_v20 = vsel %vm22_vm1, %v43_v13, 0.0 }
   0x7   :  { %v29_v19 = vadd.f32 %v28_v12, %v27_v15 }
   0x8   :  { %v48_v21 = vadd.f32 %v47_v17, %v46_v18  ;;  %v21_v31 = vld [vmem:[%s127_s1] sm:$0x1] }
   0x9   :  { %v30_v22 = vrot.slane %v29_v19, 4  ;;  %v39_v36 = vld [vmem:[%s128_s2] sm:$0x1] }
   0xa   :  { %v50_v23 = vadd.f32 %v49_v20, %v48_v21 }
   0xb   :  { %v31_v24 = vadd.f32 %v30_v22, %v29_v19 }
   0xc   :  { %v51_v25 = vrot.slane %v50_v23, 4 }
   0xd   :  { %v32_v26 = vrot.slane %v31_v24, 2 }
   0xe   :  { %v52_v27 = vadd.f32 %v51_v25, %v50_v23 }
   0xf   :  { %v33_v28 = vadd.f32 %v32_v26, %v31_v24 }
  0x10   :  { %v53_v29 = vrot.slane %v52_v27, 2 }
  0x11   :  { %v34_v30 = vrot.slane %v33_v28, 1 }
  0x12   :  { %v54_v32 = vadd.f32 %v53_v29, %v52_v27 }
  0x13   :  { %v35_v33 = vadd.f32 %v34_v30, %v33_v28 }
  0x14   :  { %v55_v34 = vrot.slane %v54_v32, 1 }
  0x15   :  { %v36_v35 = vadd.f32 %v35_v33, %v21_v31 }
  0x16   :  { %v56_v37 = vadd.f32 %v55_v34, %v54_v32 }
  0x17   :  { %38 = vst.msk [vmem:[%s127_s1] sm:$0x1] %vm14_vm0, %v36_v35 }
  0x18   :  { %v57_v38 = vadd.f32 %v56_v37, %v39_v36 }
  0x1a   :  { %58 = vst.msk [vmem:[%s128_s2] sm:$0x1] %vm14_vm0, %v57_v38 }

// kernel: densenet_forward.78
= control target key start
LH: loop header
LB: loop body
LE: loop exit
PB: predicated region body
PF: predicated region fallthrough
CT: control target
= control target key end

     0   :  { %vm74_vm0 = vcmask 392192   ;;  %s227_s3 = inlined_call_operand.vmem [shape: bf16[48,128], index: 3, kind: input, shape index: {}]   ;;  %s228_s0 = inlined_call_operand.vmem [shape: f32[32,48], index: 0, kind: input, shape index: {}]   ;;  %s229_s1 = inlined_call_operand.vmem [shape: f32[1,48], index: 1, kind: input, shape index: {}]   ;;  %s230_s2 = inlined_call_operand.vmem [shape: f32[1,48], index: 2, kind: input, shape index: {}]   ;;  %s231_s4 = inlined_call_operand.vmem [shape: f32[32,128], index: 4, kind: output, shape index: {}]  }
   0x1   :  { %v160_v0 = vld [vmem:[%s227_s3 + $0x10] sm:$0xff]   ;;  %v161_v1 = vld [vmem:[%s227_s3 + $0x8] sm:$0xff]   ;;  %v162_v2 = vld [vmem:[%s227_s3] sm:$0xff]  }
   0x2   :  { %150 = vmatprep.subr.bf16.mxu0 %v160_v0  ;;  %v18_v3 = vld [vmem:[%s228_s0] sm:$0xff]  ;;  %v19_v4 = vld [vmem:[%s228_s0 + $0x8] sm:$0xff]  ;;  %v20_v9 = vld [vmem:[%s228_s0 + $0x10] sm:$0xff] }
   0x3   :  { %151 = vmatpush3.bf16.msra.mxu0 %v160_v0  ;;  %v138_v5 = vld [vmem:[%s229_s1] ss:$0 sm:$0xff]  ;;  %v21_v10 = vld [vmem:[%s228_s0 + $0x18] sm:$0xff] }
   0x4   :  { %152 = vmatprep.subr.bf16.mxu0 %v161_v1  ;;  %v29_v6 = vmul.f32 %v138_v5, %v18_v3  ;;  %v30_v7 = vmul.f32 %v138_v5, %v19_v4  ;;  %v139_v8 = vld [vmem:[%s230_s2] ss:$0 sm:$0xff]  ;;  %v31_v11 = vmul.f32 %v138_v5, %v20_v9  ;;  %v32_v12 = vmul.f32 %v138_v5, %v21_v10 }
   0x6   :  { %v40_v13 = vadd.f32 %v139_v8, %v29_v6  ;;  %v41_v14 = vadd.f32 %v139_v8, %v30_v7  ;;  %v42_v15 = vadd.f32 %v139_v8, %v31_v11  ;;  %v43_v16 = vadd.f32 %v139_v8, %v32_v12 }
   0x7   :  { %153 = vmatpush3.bf16.msra.mxu0 %v161_v1 }
   0x8   :  { %154 = vmatprep.subr.bf16.mxu0 %v162_v2  ;;  %v44_v17 = vmax.f32 %v40_v13, 0.0  ;;  %v45_v18 = vmax.f32 %v41_v14, 0.0  ;;  %v46_v19 = vmax.f32 %v42_v15, 0.0  ;;  %v47_v20 = vmax.f32 %v43_v16, 0.0 }
   0xa   :  { %v48_v21 = vpack.c.bf16 %v45_v18, %v44_v17  ;;  %v49_v22 = vpack.c.bf16 %v47_v20, %v46_v19 }
   0xb   :  { %155 = vmatpush3.bf16.msra.mxu0 %v162_v2 }
   0xc   :  { %156 = vmatprep.mubr.msk.bf16.mxu0 %vm74_vm0, %v48_v21 }
   0xe   :  { %157 = vmatmul.mubr.msk.bf16.vlgmr.msra.gmra.mxu0 %vm74_vm0, %v49_v22 }
  0xce   :  { %v158_v23 = vpop.f32.mrf.mxu0 }
  0xcf   :  { %132 = vst [vmem:[%s231_s4 + $0x10] sm:$0xff] %v158_v23 }
  0xd0   :  { %v115_v24 = vpop.f32.mrf.mxu0 }
  0xd1   :  { %130 = vst [vmem:[%s231_s4] sm:$0xff] %v115_v24 }
  0xd2   :  { %v159_v25 = vpop.f32.mrf.mxu0 }
  0xd3   :  { %133 = vst [vmem:[%s231_s4 + $0x18] sm:$0xff] %v159_v25 }
  0xd4   :  { %v118_v26 = vpop.f32.mrf.mxu0 }
  0xd5   :  { %131 = vst [vmem:[%s231_s4 + $0x8] sm:$0xff] %v118_v26 }

// kernel: densenet_forward.85
= control target key start
LH: loop header
LB: loop body
LE: loop exit
PB: predicated region body
PF: predicated region fallthrough
CT: control target
= control target key end

     0   :  { %vm14_vm0 = vcmask 253952   ;;  %vm19_vm1 = vcmask 261120   ;;  %v50_v0 = vmov 0.0   ;;  %s91_s0 = inlined_call_operand.vmem [shape: f32[8,32], index: 0, kind: input, shape index: {}]   ;;  %s92_s1 = inlined_call_operand.vmem [shape: f32[1,32], index: 1, kind: output, shape index: {0}]   ;;  %s93_s2 = inlined_call_operand.vmem [shape: f32[1,32], index: 2, kind: output, shape index: {1}]  }
   0x1   :  { %15 = vst.msk [vmem:[%s92_s1] sm:$0x1] %vm14_vm0, %v50_v0  ;;  %v17_v1 = vld [vmem:[%s91_s0] sm:$0xff]  ;;  %16 = vst.msk [vmem:[%s93_s2] sm:$0x1] %vm14_vm0, %v50_v0 }
   0x2   :  { %v20_v2 = vsel %vm19_vm1, %v17_v1, 0.0  ;;  %v31_v3 = vmul.f32 %v17_v1, %v17_v1 }
   0x3   :  { %v21_v4 = vrot.slane %v20_v2, 4 }
   0x4   :  { %v32_v5 = vsel %vm19_vm1, %v31_v3, 0.0 }
   0x5   :  { %v22_v6 = vadd.f32 %v21_v4, %v20_v2  ;;  %v33_v7 = vrot.slane %v32_v5, 4 }
   0x7   :  { %v23_v8 = vrot.slane %v22_v6, 2  ;;  %v34_v9 = vadd.f32 %v33_v7, %v32_v5 }
   0x8   :  { %v18_v14 = vld [vmem:[%s92_s1] sm:$0x1] }
   0x9   :  { %v24_v10 = vadd.f32 %v23_v8, %v22_v6  ;;  %v35_v11 = vrot.slane %v34_v9, 2  ;;  %v30_v17 = vld [vmem:[%s93_s2] sm:$0x1] }
   0xb   :  { %v25_v12 = vrot.slane %v24_v10, 1  ;;  %v36_v13 = vadd.f32 %v35_v11, %v34_v9 }
   0xd   :  { %v26_v15 = vadd.f32 %v25_v12, %v24_v10  ;;  %v37_v16 = vrot.slane %v36_v13, 1 }
   0xf   :  { %v27_v18 = vadd.f32 %v26_v15, %v18_v14  ;;  %v38_v19 = vadd.f32 %v37_v16, %v36_v13 }
  0x11   :  { %29 = vst.msk [vmem:[%s92_s1] sm:$0x1] %vm14_vm0, %v27_v18  ;;  %v39_v20 = vadd.f32 %v38_v19, %v30_v17 }
  0x13   :  { %40 = vst.msk [vmem:[%s93_s2] sm:$0x1] %vm14_vm0, %v39_v20 }

// kernel: densenet_forward.83
= control target key start
LH: loop header
LB: loop body
LE: loop exit
PB: predicated region body
PF: predicated region fallthrough
CT: control target
= control target key end

     0   :  { %vm44_vm0 = vcmask 523264   ;;  %vm55_vm1 = vcmask 519168   ;;  %s104_s0 = inlined_call_operand.vmem [shape: f32[4,8,64], index: 0, kind: input, shape index: {}]   ;;  %s105_s1 = inlined_call_operand.vmem [shape: f32[1,64], index: 1, kind: input, shape index: {}]   ;;  %s106_s2 = inlined_call_operand.vmem [shape: f32[1,64], index: 2, kind: input, shape index: {}]   ;;  %s107_s3 = inlined_call_operand.vmem [shape: bf16[8,64], index: 3, kind: output, shape index: {}]  }
   0x1   :  { %v14_v0 = vld [vmem:[%s104_s0] sm:$0xff]  ;;  %v15_v1 = vld [vmem:[%s104_s0 + $0x8] sm:$0xff]  ;;  %v16_v2 = vld [vmem:[%s104_s0 + $0x10] sm:$0xff] }
   0x2   :  { %v17_v3 = vld [vmem:[%s104_s0 + $0x18] sm:$0xff]  ;;  %v61_v4 = vld [vmem:[%s105_s1] ss:$0 sm:$0xff] }
   0x3   :  { %v62_v5 = vld [vmem:[%s106_s2] ss:$0 sm:$0xff]  ;;  %v25_v6 = vmul.f32 %v61_v4, %v14_v0  ;;  %v26_v7 = vmul.f32 %v61_v4, %v15_v1  ;;  %v27_v8 = vmul.f32 %v61_v4, %v16_v2  ;;  %v28_v9 = vmul.f32 %v61_v4, %v17_v3 }
   0x5   :  { %v36_v10 = vadd.f32 %v62_v5, %v25_v6  ;;  %v37_v11 = vadd.f32 %v62_v5, %v26_v7  ;;  %v38_v12 = vadd.f32 %v62_v5, %v27_v8  ;;  %v39_v13 = vadd.f32 %v62_v5, %v28_v9 }
   0x7   :  { %v40_v14 = vmax.f32 %v36_v10, 0.0  ;;  %v41_v15 = vmax.f32 %v37_v11, 0.0  ;;  %v42_v16 = vmax.f32 %v38_v12, 0.0  ;;  %v43_v17 = vmax.f32 %v39_v13, 0.0 }
   0x9   :  { %v45_v18 = vsel %vm44_vm0, %v40_v14, 0.0  ;;  %v46_v19 = vsel %vm44_vm0, %v41_v15, 0.0  ;;  %v48_v20 = vsel %vm44_vm0, %v42_v16, 0.0  ;;  %v50_v22 = vsel %vm44_vm0, %v43_v17, 0.0 }
   0xa   :  { %v47_v21 = vadd.f32 %v46_v19, %v45_v18 }
   0xc   :  { %v49_v23 = vadd.f32 %v48_v20, %v47_v21 }
   0xe   :  { %v51_v24 = vadd.f32 %v50_v22, %v49_v23 }
  0x10   :  { %v53_v25 = vmul.f32 0.25, %v51_v24 }
  0x12   :  { %v54_v26 = vpack.c.bf16 %v53_v25, %v53_v25 }
  0x14   :  { %56 = vst.msk [vmem:[%s107_s3] sm:$0xf] %vm55_vm1, %v54_v26 }

// kernel: densenet_forward.84
= control target key start
LH: loop header
LB: loop body
LE: loop exit
PB: predicated region body
PF: predicated region fallthrough
CT: control target
= control target key end

     0   :  { %v122_v0 = vmov 0.0   ;;  %vm123_vm0 = vmmov 0   ;;  %vm45_vm1 = vcmask 523264   ;;  %s157_s1 = inlined_call_operand.vmem [shape: bf16[64,128], index: 1, kind: input, shape index: {}]   ;;  %s158_s0 = inlined_call_operand.vmem [shape: bf16[8,64], index: 0, kind: input, shape index: {}]   ;;  %s159_s2 = inlined_call_operand.vmem [shape: f32[8,128], index: 2, kind: output, shape index: {}]  }
   0x1   :  { %104 = vmatprep.subr.bf16.mxu0 %v122_v0  ;;  %v118_v1 = vld [vmem:[%s157_s1 + $0x18] sm:$0xff]   ;;  %112 = vmatprep.mubr.msk.bf16.mxu0 %vm123_vm0, %v122_v0  ;;  %v119_v2 = vld [vmem:[%s157_s1 + $0x10] sm:$0xff]   ;;  %v120_v3 = vld [vmem:[%s157_s1 + $0x8] sm:$0xff]  }
   0x2   :  { %105 = vmatpush3.bf16.msra.mxu0 %v118_v1  ;;  %v121_v4 = vld [vmem:[%s157_s1] sm:$0xff]  }
   0x3   :  { %106 = vmatprep.subr.bf16.mxu0 %v122_v0  ;;  %v12_v5 = vld [vmem:[%s158_s0] sm:$0xf] }
   0x6   :  { %107 = vmatpush3.bf16.msra.mxu0 %v119_v2 }
   0x7   :  { %108 = vmatprep.subr.bf16.mxu0 %v122_v0 }
   0xa   :  { %109 = vmatpush3.bf16.msra.mxu0 %v120_v3 }
   0xb   :  { %110 = vmatprep.subr.bf16.mxu0 %v122_v0 }
   0xe   :  { %111 = vmatpush3.bf16.msra.mxu0 %v121_v4 }
  0x11   :  { %113 = vmatmul.mubr.msk.bf16.vlgmr.msra.gmra.mxu0 %vm45_vm1, %v12_v5 }
  0xd1   :  { %v83_v6 = vpop.f32.mrf.mxu0 }
  0xd2   :  { %89 = vst [vmem:[%s159_s2] sm:$0xff] %v83_v6 }
  0xd3   :  { %v114_v7 = vpop.f32.mrf.mxu0 }
  0xd5   :  { %v86_v8 = vpop.f32.mrf.mxu0 }
  0xd7   :  { %v115_v9 = vpop.f32.mrf.mxu0 }

// kernel: densenet_forward.86
= control target key start
LH: loop header
LB: loop body
LE: loop exit
PB: predicated region body
PF: predicated region fallthrough
CT: control target
= control target key end

     0   :  { %v122_v0 = vmov 0.0   ;;  %vm123_vm0 = vmmov 0   ;;  %vm53_vm1 = vcmask 261120   ;;  %s167_s3 = inlined_call_operand.vmem [shape: bf16[32,128], index: 3, kind: input, shape index: {}]   ;;  %s168_s0 = inlined_call_operand.vmem [shape: f32[8,32], index: 0, kind: input, shape index: {}]   ;;  %s169_s1 = inlined_call_operand.vmem [shape: f32[1,32], index: 1, kind: input, shape index: {}]   ;;  %s170_s2 = inlined_call_operand.vmem [shape: f32[1,32], index: 2, kind: input, shape index: {}]   ;;  %s171_s4 = inlined_call_operand.vmem [shape: f32[8,128], index: 4, kind: output, shape index: {}]  }
   0x1   :  { %110 = vmatprep.subr.bf16.mxu0 %v122_v0  ;;  %v120_v1 = vld [vmem:[%s167_s3 + $0x8] sm:$0xff]   ;;  %114 = vmatprep.mubr.msk.bf16.mxu0 %vm123_vm0, %v122_v0  ;;  %v121_v2 = vld [vmem:[%s167_s3] sm:$0xff]  }
   0x2   :  { %111 = vmatpush3.bf16.msra.mxu0 %v120_v1  ;;  %v18_v3 = vld [vmem:[%s168_s0] sm:$0xff] }
   0x3   :  { %v102_v4 = vld [vmem:[%s169_s1] ss:$0 sm:$0xff]  ;;  %112 = vmatprep.subr.bf16.mxu0 %v122_v0 }
   0x4   :  { %v103_v5 = vld [vmem:[%s170_s2] ss:$0 sm:$0xff]  ;;  %v26_v6 = vmul.f32 %v102_v4, %v18_v3 }
   0x6   :  { %v34_v7 = vadd.f32 %v103_v5, %v26_v6  ;;  %113 = vmatpush3.bf16.msra.mxu0 %v121_v2 }
   0x8   :  { %v35_v8 = vmax.f32 %v34_v7, 0.0 }
   0xa   :  { %v36_v9 = vpack.c.bf16 %v35_v8, %v35_v8 }
   0xc   :  { %115 = vmatmul.mubr.msk.bf16.vlgmr.msra.gmra.mxu0 %vm53_vm1, %v36_v9 }
  0xcc   :  { %v91_v10 = vpop.f32.mrf.mxu0 }
  0xcd   :  { %97 = vst [vmem:[%s171_s4] sm:$0xff] %v91_v10 }
  0xce   :  { %v116_v11 = vpop.f32.mrf.mxu0 }
  0xd0   :  { %v94_v12 = vpop.f32.mrf.mxu0 }
  0xd2   :  { %v117_v13 = vpop.f32.mrf.mxu0 }

// kernel: densenet_forward.88
= control target key start
LH: loop header
LB: loop body
LE: loop exit
PB: predicated region body
PF: predicated region fallthrough
CT: control target
= control target key end

     0   :  { %vm33_vm0 = vcmask 519168   ;;  %s73_s0 = inlined_call_operand.vmem [shape: f32[8,64], index: 0, kind: input, shape index: {}]   ;;  %s74_s1 = inlined_call_operand.vmem [shape: f32[1,64], index: 1, kind: input, shape index: {}]   ;;  %s75_s2 = inlined_call_operand.vmem [shape: f32[1,64], index: 2, kind: input, shape index: {}]   ;;  %s76_s3 = inlined_call_operand.vmem [shape: bf16[8,64], index: 3, kind: output, shape index: {}]  }
   0x1   :  { %v14_v0 = vld [vmem:[%s73_s0] sm:$0xff] }
   0x2   :  { %v39_v1 = vld [vmem:[%s74_s1] ss:$0 sm:$0xff] }
   0x3   :  { %v40_v2 = vld [vmem:[%s75_s2] ss:$0 sm:$0xff]  ;;  %v22_v3 = vmul.f32 %v39_v1, %v14_v0 }
   0x5   :  { %v30_v4 = vadd.f32 %v40_v2, %v22_v3 }
   0x7   :  { %v31_v5 = vmax.f32 %v30_v4, 0.0 }
   0x9   :  { %v32_v6 = vpack.c.bf16 %v31_v5, %v31_v5 }
   0xb   :  { %34 = vst.msk [vmem:[%s76_s3] sm:$0xf] %vm33_vm0, %v32_v6 }

// kernel: densenet_forward.87
= control target key start
LH: loop header
LB: loop body
LE: loop exit
PB: predicated region body
PF: predicated region fallthrough
CT: control target
= control target key end

     0   :  { %vm14_vm0 = vcmask 516096   ;;  %vm19_vm1 = vcmask 523264   ;;  %v50_v0 = vmov 0.0   ;;  %s91_s0 = inlined_call_operand.vmem [shape: f32[8,64], index: 0, kind: input, shape index: {}]   ;;  %s92_s1 = inlined_call_operand.vmem [shape: f32[1,64], index: 1, kind: output, shape index: {0}]   ;;  %s93_s2 = inlined_call_operand.vmem [shape: f32[1,64], index: 2, kind: output, shape index: {1}]  }
   0x1   :  { %15 = vst.msk [vmem:[%s92_s1] sm:$0x1] %vm14_vm0, %v50_v0  ;;  %v17_v1 = vld [vmem:[%s91_s0] sm:$0xff]  ;;  %16 = vst.msk [vmem:[%s93_s2] sm:$0x1] %vm14_vm0, %v50_v0 }
   0x2   :  { %v20_v2 = vsel %vm19_vm1, %v17_v1, 0.0  ;;  %v31_v3 = vmul.f32 %v17_v1, %v17_v1 }
   0x3   :  { %v21_v4 = vrot.slane %v20_v2, 4 }
   0x4   :  { %v32_v5 = vsel %vm19_vm1, %v31_v3, 0.0 }
   0x5   :  { %v22_v6 = vadd.f32 %v21_v4, %v20_v2  ;;  %v33_v7 = vrot.slane %v32_v5, 4 }
   0x7   :  { %v23_v8 = vrot.slane %v22_v6, 2  ;;  %v34_v9 = vadd.f32 %v33_v7, %v32_v5 }
   0x8   :  { %v18_v14 = vld [vmem:[%s92_s1] sm:$0x1] }
   0x9   :  { %v24_v10 = vadd.f32 %v23_v8, %v22_v6  ;;  %v35_v11 = vrot.slane %v34_v9, 2  ;;  %v30_v17 = vld [vmem:[%s93_s2] sm:$0x1] }
   0xb   :  { %v25_v12 = vrot.slane %v24_v10, 1  ;;  %v36_v13 = vadd.f32 %v35_v11, %v34_v9 }
   0xd   :  { %v26_v15 = vadd.f32 %v25_v12, %v24_v10  ;;  %v37_v16 = vrot.slane %v36_v13, 1 }
   0xf   :  { %v27_v18 = vadd.f32 %v26_v15, %v18_v14  ;;  %v38_v19 = vadd.f32 %v37_v16, %v36_v13 }
  0x11   :  { %29 = vst.msk [vmem:[%s92_s1] sm:$0x1] %vm14_vm0, %v27_v18  ;;  %v39_v20 = vadd.f32 %v38_v19, %v30_v17 }
  0x13   :  { %40 = vst.msk [vmem:[%s93_s2] sm:$0x1] %vm14_vm0, %v39_v20 }

// kernel: densenet_forward.90
= control target key start
LH: loop header
LB: loop body
LE: loop exit
PB: predicated region body
PF: predicated region fallthrough
CT: control target
= control target key end

     0   :  { %vm14_vm0 = vcmask 385024   ;;  %vm19_vm1 = vcmask 392192   ;;  %v50_v0 = vmov 0.0   ;;  %s91_s0 = inlined_call_operand.vmem [shape: f32[8,48], index: 0, kind: input, shape index: {}]   ;;  %s92_s1 = inlined_call_operand.vmem [shape: f32[1,48], index: 1, kind: output, shape index: {0}]   ;;  %s93_s2 = inlined_call_operand.vmem [shape: f32[1,48], index: 2, kind: output, shape index: {1}]  }
   0x1   :  { %15 = vst.msk [vmem:[%s92_s1] sm:$0x1] %vm14_vm0, %v50_v0  ;;  %v17_v1 = vld [vmem:[%s91_s0] sm:$0xff]  ;;  %16 = vst.msk [vmem:[%s93_s2] sm:$0x1] %vm14_vm0, %v50_v0 }
   0x2   :  { %v20_v2 = vsel %vm19_vm1, %v17_v1, 0.0  ;;  %v31_v3 = vmul.f32 %v17_v1, %v17_v1 }
   0x3   :  { %v21_v4 = vrot.slane %v20_v2, 4 }
   0x4   :  { %v32_v5 = vsel %vm19_vm1, %v31_v3, 0.0 }
   0x5   :  { %v22_v6 = vadd.f32 %v21_v4, %v20_v2  ;;  %v33_v7 = vrot.slane %v32_v5, 4 }
   0x7   :  { %v23_v8 = vrot.slane %v22_v6, 2  ;;  %v34_v9 = vadd.f32 %v33_v7, %v32_v5 }
   0x8   :  { %v18_v14 = vld [vmem:[%s92_s1] sm:$0x1] }
   0x9   :  { %v24_v10 = vadd.f32 %v23_v8, %v22_v6  ;;  %v35_v11 = vrot.slane %v34_v9, 2  ;;  %v30_v17 = vld [vmem:[%s93_s2] sm:$0x1] }
   0xb   :  { %v25_v12 = vrot.slane %v24_v10, 1  ;;  %v36_v13 = vadd.f32 %v35_v11, %v34_v9 }
   0xd   :  { %v26_v15 = vadd.f32 %v25_v12, %v24_v10  ;;  %v37_v16 = vrot.slane %v36_v13, 1 }
   0xf   :  { %v27_v18 = vadd.f32 %v26_v15, %v18_v14  ;;  %v38_v19 = vadd.f32 %v37_v16, %v36_v13 }
  0x11   :  { %29 = vst.msk [vmem:[%s92_s1] sm:$0x1] %vm14_vm0, %v27_v18  ;;  %v39_v20 = vadd.f32 %v38_v19, %v30_v17 }
  0x13   :  { %40 = vst.msk [vmem:[%s93_s2] sm:$0x1] %vm14_vm0, %v39_v20 }

// kernel: densenet_forward.91
= control target key start
LH: loop header
LB: loop body
LE: loop exit
PB: predicated region body
PF: predicated region fallthrough
CT: control target
= control target key end

     0   :  { %v135_v0 = vmov 0.0   ;;  %vm136_vm0 = vmmov 0   ;;  %vm61_vm1 = vcmask 392192   ;;  %s183_s3 = inlined_call_operand.vmem [shape: bf16[48,128], index: 3, kind: input, shape index: {}]   ;;  %s184_s0 = inlined_call_operand.vmem [shape: f32[8,48], index: 0, kind: input, shape index: {}]   ;;  %s185_s1 = inlined_call_operand.vmem [shape: f32[1,48], index: 1, kind: input, shape index: {}]   ;;  %s186_s2 = inlined_call_operand.vmem [shape: f32[1,48], index: 2, kind: input, shape index: {}]   ;;  %s187_s4 = inlined_call_operand.vmem [shape: f32[8,128], index: 4, kind: output, shape index: {}]  }
   0x1   :  { %120 = vmatprep.subr.bf16.mxu0 %v135_v0  ;;  %v132_v1 = vld [vmem:[%s183_s3 + $0x10] sm:$0xff]   ;;  %126 = vmatprep.mubr.msk.bf16.mxu0 %vm136_vm0, %v135_v0  ;;  %v133_v2 = vld [vmem:[%s183_s3 + $0x8] sm:$0xff]   ;;  %v18_v3 = vld [vmem:[%s184_s0] sm:$0xff] }
   0x2   :  { %121 = vmatpush3.bf16.msra.mxu0 %v132_v1  ;;  %v110_v4 = vld [vmem:[%s185_s1] ss:$0 sm:$0xff] }
   0x3   :  { %122 = vmatprep.subr.bf16.mxu0 %v135_v0  ;;  %v111_v5 = vld [vmem:[%s186_s2] ss:$0 sm:$0xff]  ;;  %v26_v6 = vmul.f32 %v110_v4, %v18_v3 }
   0x4   :  { %v134_v7 = vld [vmem:[%s183_s3] sm:$0xff]  }
   0x5   :  { %v34_v8 = vadd.f32 %v111_v5, %v26_v6 }
   0x6   :  { %123 = vmatpush3.bf16.msra.mxu0 %v133_v2 }
   0x7   :  { %124 = vmatprep.subr.bf16.mxu0 %v135_v0  ;;  %v35_v9 = vmax.f32 %v34_v8, 0.0 }
   0x9   :  { %v36_v10 = vpack.c.bf16 %v35_v9, %v35_v9 }
   0xa   :  { %125 = vmatpush3.bf16.msra.mxu0 %v134_v7 }
   0xd   :  { %127 = vmatmul.mubr.msk.bf16.vlgmr.msra.gmra.mxu0 %vm61_vm1, %v36_v10 }
  0xcd   :  { %v99_v11 = vpop.f32.mrf.mxu0 }
  0xce   :  { %105 = vst [vmem:[%s187_s4] sm:$0xff] %v99_v11 }
  0xcf   :  { %v128_v12 = vpop.f32.mrf.mxu0 }
  0xd1   :  { %v102_v13 = vpop.f32.mrf.mxu0 }
  0xd3   :  { %v129_v14 = vpop.f32.mrf.mxu0 }

// kernel: densenet_forward.89
= control target key start
LH: loop header
LB: loop body
LE: loop exit
PB: predicated region body
PF: predicated region fallthrough
CT: control target
= control target key end

     0   :  { %v595_v36 = vmov 0.0   ;;  %vm596_vm0 = vmmov 0   ;;  %vm320_vm1 = vcmask 523264   ;;  %s732_s1 = inlined_call_operand.vmem [shape: bf16[576,128], index: 1, kind: input, shape index: {}]   ;;  %s733_s0 = inlined_call_operand.vmem [shape: bf16[8,576], index: 0, kind: input, shape index: {}]   ;;  %s734_s2 = inlined_call_operand.vmem [shape: f32[8,128], index: 2, kind: output, shape index: {}]  }
   0x1   :  { %v554_v0 = vld [vmem:[%s732_s1 + $0x78] sm:$0xff]   ;;  %v558_v4 = vld [vmem:[%s732_s1 + $0x70] sm:$0xff]   ;;  %v562_v8 = vld [vmem:[%s732_s1 + $0x68] sm:$0xff]  }
   0x2   :  { %v555_v1 = vld [vmem:[%s732_s1 + $0xf8] sm:$0xff]   ;;  %491 = vmatprep.subr.bf16.mxu0 %v554_v0  ;;  %v559_v5 = vld [vmem:[%s732_s1 + $0xf0] sm:$0xff]   ;;  %v563_v9 = vld [vmem:[%s732_s1 + $0xe8] sm:$0xff]  }
   0x3   :  { %v556_v2 = vld [vmem:[%s732_s1 + $0x38] sm:$0xff]   ;;  %513 = vmatprep.subr.bf16.mxu1 %v555_v1  ;;  %v560_v6 = vld [vmem:[%s732_s1 + $0x30] sm:$0xff]   ;;  %v564_v10 = vld [vmem:[%s732_s1 + $0x28] sm:$0xff]  }
   0x4   :  { %v557_v3 = vld [vmem:[%s732_s1 + $0xb8] sm:$0xff]   ;;  %492 = vmatpush3.bf16.msra.mxu0 %v556_v2  ;;  %v561_v7 = vld [vmem:[%s732_s1 + $0xb0] sm:$0xff]   ;;  %v565_v11 = vld [vmem:[%s732_s1 + $0xa8] sm:$0xff]  }
   0x5   :  { %514 = vmatpush3.bf16.msra.mxu1 %v557_v3  ;;  %493 = vmatprep.subr.bf16.mxu0 %v558_v4  ;;  %v566_v12 = vld [vmem:[%s732_s1 + $0x60] sm:$0xff]   ;;  %v570_v16 = vld [vmem:[%s732_s1 + $0x58] sm:$0xff]   ;;  %v574_v20 = vld [vmem:[%s732_s1 + $0x50] sm:$0xff]  }
   0x6   :  { %515 = vmatprep.subr.bf16.mxu1 %v559_v5  ;;  %v567_v13 = vld [vmem:[%s732_s1 + $0xe0] sm:$0xff]   ;;  %v571_v17 = vld [vmem:[%s732_s1 + $0xd8] sm:$0xff]   ;;  %v575_v21 = vld [vmem:[%s732_s1 + $0xd0] sm:$0xff]  }
   0x7   :  { %v568_v14 = vld [vmem:[%s732_s1 + $0x20] sm:$0xff]   ;;  %v572_v18 = vld [vmem:[%s732_s1 + $0x18] sm:$0xff]   ;;  %v576_v22 = vld [vmem:[%s732_s1 + $0x10] sm:$0xff]  }
   0x8   :  { %494 = vmatpush3.bf16.msra.mxu0 %v560_v6  ;;  %v569_v15 = vld [vmem:[%s732_s1 + $0xa0] sm:$0xff]   ;;  %v573_v19 = vld [vmem:[%s732_s1 + $0x98] sm:$0xff]   ;;  %v577_v23 = vld [vmem:[%s732_s1 + $0x90] sm:$0xff]  }
   0x9   :  { %516 = vmatpush3.bf16.msra.mxu1 %v561_v7  ;;  %495 = vmatprep.subr.bf16.mxu0 %v562_v8  ;;  %v578_v24 = vld [vmem:[%s732_s1 + $0x48] sm:$0xff]   ;;  %v582_v28 = vld [vmem:[%s732_s1 + $0x40] sm:$0xff]   ;;  %v591_v39 = vld [vmem:[%s732_s1 + $0x118] sm:$0xff]  }
   0xa   :  { %517 = vmatprep.subr.bf16.mxu1 %v563_v9  ;;  %v579_v25 = vld [vmem:[%s732_s1 + $0xc8] sm:$0xff]   ;;  %v583_v29 = vld [vmem:[%s732_s1 + $0xc0] sm:$0xff]   ;;  %v592_v40 = vld [vmem:[%s732_s1 + $0x110] sm:$0xff]  }
   0xb   :  { %v580_v26 = vld [vmem:[%s732_s1 + $0x8] sm:$0xff]   ;;  %v584_v30 = vld [vmem:[%s732_s1] sm:$0xff]   ;;  %v588_v43 = vld [vmem:[%s733_s0 + $0x10] ss:$0 sps:$4 sm:$0xff]  }
   0xc   :  { %496 = vmatpush3.bf16.msra.mxu0 %v564_v10  ;;  %v581_v27 = vld [vmem:[%s732_s1 + $0x88] sm:$0xff]   ;;  %v585_v31 = vld [vmem:[%s732_s1 + $0x80] sm:$0xff]  }
   0xd   :  { %518 = vmatpush3.bf16.msra.mxu1 %v565_v11  ;;  %497 = vmatprep.subr.bf16.mxu0 %v566_v12  ;;  %v12_v32 = vld [vmem:[%s733_s0] sm:$0xff]  ;;  %v13_v35 = vld [vmem:[%s733_s0 + $0x8] sm:$0xff] }
   0xe   :  { %519 = vmatprep.subr.bf16.mxu1 %v567_v13  ;;  %v449_v33 = vcombine.low %v12_v32, %v12_v32  ;;  %v450_v34 = vcombine.high %v12_v32, %v12_v32  ;;  %v451_v37 = vcombine.low %v13_v35, %v13_v35  ;;  %v452_v38 = vcombine.high %v13_v35, %v13_v35  ;;  %v593_v41 = vld [vmem:[%s732_s1 + $0x108] sm:$0xff]   ;;  %v594_v42 = vld [vmem:[%s732_s1 + $0x100] sm:$0xff]  }
  0x10   :  { %498 = vmatpush3.bf16.msra.mxu0 %v568_v14  ;;  %356 = vmatprep.mubr.bf16.mxu0 %v450_v34 }
  0x11   :  { %520 = vmatpush3.bf16.msra.mxu1 %v569_v15  ;;  %499 = vmatprep.subr.bf16.mxu0 %v570_v16 }
  0x12   :  { %521 = vmatprep.subr.bf16.mxu1 %v571_v17  ;;  %396 = vmatprep.mubr.bf16.mxu1 %v452_v38 }
  0x14   :  { %500 = vmatpush3.bf16.msra.mxu0 %v572_v18 }
  0x15   :  { %522 = vmatpush3.bf16.msra.mxu1 %v573_v19  ;;  %501 = vmatprep.subr.bf16.mxu0 %v574_v20 }
  0x16   :  { %523 = vmatprep.subr.bf16.mxu1 %v575_v21 }
  0x18   :  { %502 = vmatpush3.bf16.msra.mxu0 %v576_v22 }
  0x19   :  { %524 = vmatpush3.bf16.msra.mxu1 %v577_v23  ;;  %503 = vmatprep.subr.bf16.mxu0 %v578_v24 }
  0x1a   :  { %525 = vmatprep.subr.bf16.mxu1 %v579_v25 }
  0x1c   :  { %504 = vmatpush3.bf16.msra.mxu0 %v580_v26 }
  0x1d   :  { %526 = vmatpush3.bf16.msra.mxu1 %v581_v27  ;;  %505 = vmatprep.subr.bf16.mxu0 %v582_v28 }
  0x1e   :  { %527 = vmatprep.subr.bf16.mxu1 %v583_v29 }
  0x20   :  { %506 = vmatpush3.bf16.msra.mxu0 %v584_v30 }
  0x21   :  { %528 = vmatpush3.bf16.msra.mxu1 %v585_v31  ;;  %540 = vmatprep.subr.bf16.mxu0 %v595_v36 }
  0x23   :  { %357 = vmatmul.mubr.bf16.vlgmr.msra.gmra.mxu0 %v449_v33 }
  0x24   :  { %397 = vmatmul.mubr.bf16.vlgmr.msra.gmra.mxu1 %v451_v37  ;;  %541 = vmatpush3.bf16.msra.mxu0 %v591_v39 }
  0x25   :  { %542 = vmatprep.subr.bf16.mxu0 %v595_v36  ;;  %548 = vmatprep.mubr.msk.bf16.mxu0 %vm596_vm0, %v595_v36 }
  0x28   :  { %543 = vmatpush3.bf16.msra.mxu0 %v592_v40 }
  0x29   :  { %544 = vmatprep.subr.bf16.mxu0 %v595_v36 }
  0x2c   :  { %545 = vmatpush3.bf16.msra.mxu0 %v593_v41 }
  0x2d   :  { %546 = vmatprep.subr.bf16.mxu0 %v595_v36 }
  0x30   :  { %547 = vmatpush3.bf16.msra.mxu0 %v594_v42 }
  0x33   :  { %549 = vmatmul.mubr.msk.bf16.vlgmr.msra.gmra.mxu0 %vm320_vm1, %v588_v43 }
  0xe3   :  { %v507_v44 = vpop.f32.mrf.mxu0 }
  0xe4   :  { %v529_v45 = vpop.f32.mrf.mxu1 }
  0xe5   :  { %v508_v46 = vpop.f32.mrf.mxu0 }
  0xe6   :  { %v530_v47 = vpop.f32.mrf.mxu1  ;;  %v509_v52 = vadd.f32 %v508_v46, %v507_v44 }
  0xe7   :  { %v510_v48 = vpop.f32.mrf.mxu0  ;;  %v531_v53 = vadd.f32 %v530_v47, %v529_v45 }
  0xe8   :  { %v532_v49 = vpop.f32.mrf.mxu1 }
  0xe9   :  { %v511_v50 = vpop.f32.mrf.mxu0  ;;  %v399_v54 = vadd.f32 %v531_v53, %v509_v52 }
  0xea   :  { %v533_v51 = vpop.f32.mrf.mxu1 }
  0xf3   :  { %v438_v55 = vpop.f32.mrf.mxu0 }
  0xf4   :  { %v439_v56 = vadd.f32 %v438_v55, %v399_v54 }
  0xf5   :  { %v550_v57 = vpop.f32.mrf.mxu0 }
  0xf6   :  { %444 = vst [vmem:[%s734_s2] sm:$0xff] %v439_v56 }
  0xf7   :  { %v441_v58 = vpop.f32.mrf.mxu0 }
  0xf9   :  { %v551_v59 = vpop.f32.mrf.mxu0 }

// kernel: densenet_forward.109
= control target key start
LH: loop header
LB: loop body
LE: loop exit
PB: predicated region body
PF: predicated region fallthrough
CT: control target
= control target key end

     0   :  { %vm32_vm0 = vcmask 523264   ;;  %s72_s0 = inlined_call_operand.vmem [shape: f32[8,64], index: 0, kind: input, shape index: {}]   ;;  %s73_s1 = inlined_call_operand.vmem [shape: f32[1,64], index: 1, kind: input, shape index: {}]   ;;  %s74_s2 = inlined_call_operand.vmem [shape: f32[1,64], index: 2, kind: input, shape index: {}]   ;;  %s75_s3 = inlined_call_operand.vmem [shape: f32[8,64], index: 3, kind: output, shape index: {}]  }
   0x1   :  { %v14_v0 = vld [vmem:[%s72_s0] sm:$0xff] }
   0x2   :  { %v38_v1 = vld [vmem:[%s73_s1] ss:$0 sm:$0xff] }
   0x3   :  { %v39_v2 = vld [vmem:[%s74_s2] ss:$0 sm:$0xff]  ;;  %v22_v3 = vmul.f32 %v38_v1, %v14_v0 }
   0x5   :  { %v30_v4 = vadd.f32 %v39_v2, %v22_v3 }
   0x7   :  { %v31_v5 = vmax.f32 %v30_v4, 0.0 }
   0x9   :  { %33 = vst.msk [vmem:[%s75_s3] sm:$0xff] %vm32_vm0, %v31_v5 }

</bundles_post_ra>
